<compile_context>
chip_gen: v5e
topology: v5e:2x2
jax: 0.10.0
libtpu: 0.0.40
codegen_flags: <defaults>
</compile_context>

<pallas_src>
import functools

import jax
import jax.numpy as jnp
import numpy as np
from jax import lax
from jax.experimental import pallas as pl
from jax.experimental.pallas import tpu as pltpu

NUM_FEATURES = 4      # dataset.num_features
NUM_CLASSES = 10      # dataset.num_classes
HIDDEN = 30           # hidden width of the edge MLPs
HIDDEN_PAD = 32       # padded hidden width (sublane aligned)
CONV1_OUT = 48
CONV2_OUT = 96
F_PAD = 128           # padded (lane-dense) feature width for conv outputs
FC1_OUT = 128
CLASSES_PAD = 128     # lane-dense output store; sliced to NUM_CLASSES in wrapper
BF16 = jnp.bfloat16


# ------------------------------ in-kernel ops -------------------------------

def _elu(v):
    # clamp arg so exp() is not evaluated on large positives of the dead branch
    return jnp.where(v > 0, v, jnp.exp(jnp.minimum(v, 0.0)) - 1.0)


def _onehot(eq):
    # exact 0/1 selection matrix, bf16 so the MXU runs at native rate
    return jnp.where(eq, 1.0, 0.0).astype(BF16)


def _gather_rows(idx_col, num_rows, table):
    """table[idx] via one-hot MXU matmul.  idx_col:[E,1] int32, table:[N,F]."""
    e = idx_col.shape[0]
    oh = _onehot(idx_col == lax.broadcasted_iota(jnp.int32, (e, num_rows), 1))
    return jnp.dot(oh, table.astype(BF16), preferred_element_type=jnp.float32)


def _scatter_mean(dst_row, num_rows, msgs):
    """mean-aggregate msgs rows by destination.  dst_row:[1,E] int32."""
    e = dst_row.shape[1]
    oh = _onehot(dst_row == lax.broadcasted_iota(jnp.int32, (num_rows, e), 0))
    # scatter-sum on MXU, then EUP approx reciprocal row scale (divide off VALU)
    deg = jnp.sum(oh.astype(jnp.float32), axis=1, keepdims=True)
    inv = pl.reciprocal(jnp.maximum(deg, 1.0), approx=True)
    s = jnp.dot(oh, msgs.astype(BF16), preferred_element_type=jnp.float32)
    return s * inv


def _pair_max(x):
    """max over consecutive node pairs via even/odd selection matmuls."""
    n = x.shape[0]
    rows = lax.broadcasted_iota(jnp.int32, (n // 2, n), 0)
    cols = lax.broadcasted_iota(jnp.int32, (n // 2, n), 1)
    xb = x.astype(BF16)
    a = jnp.dot(_onehot(cols == 2 * rows), xb, preferred_element_type=jnp.float32)
    b = jnp.dot(_onehot(cols == 2 * rows + 1), xb, preferred_element_type=jnp.float32)
    return jnp.maximum(a, b)


def _nnconv(x, x_src, ea, dst_row, w1, b1, w2p, b2p, wr, br, expand, tile):
    """NNConv(aggr='mean') + ELU, output feature axis zero-padded to F_PAD.

    Per-edge message m_e = x_src[e] @ We[e], We[e] = reshape(h[e] @ w2 + b2),
    refactored into one deep MXU matmul:
        msg = (x_src @ expand) * (h @ tile) @ w2p  +  x_src @ b2p
    with w2p host-repacked to [fin*HIDDEN_PAD, F_PAD].
    """
    # edge MLP hidden: Linear(1, 32) -> ReLU    (f32 elementwise)
    h = jnp.maximum(ea * w1 + b1, 0.0)                                   # [E, 32]
    x_src_b = x_src.astype(BF16)
    # build the scaled hidden block [E, fin*32] via two small constant matmuls
    x_exp = jnp.dot(x_src_b, expand, preferred_element_type=jnp.float32)
    h_til = jnp.dot(h.astype(BF16), tile, preferred_element_type=jnp.float32)
    scaled_h = (x_exp * h_til).astype(BF16)                              # [E, fin*32]
    # single MXU matmul replaces the fin-long broadcast-FMA loop
    msg = (jnp.dot(scaled_h, w2p, preferred_element_type=jnp.float32)
           + jnp.dot(x_src_b, b2p, preferred_element_type=jnp.float32))  # [E, 128]
    agg = _scatter_mean(dst_row, x.shape[0], msg)                        # [N, 128]
    root = jnp.dot(x.astype(BF16), wr, preferred_element_type=jnp.float32)
    return _elu(root + agg + br)


# ------------------------------- fused kernel -------------------------------

def _fused_kernel(x_ref, src_ref, dst_ref, ea_ref, batch4_ref,
                  w1a_ref, b1a_ref, w2a_ref, b2a_ref, wra_ref, bra_ref,
                  xpa_ref, tla_ref,
                  w1b_ref, b1b_ref, w2b_ref, b2b_ref, wrb_ref, brb_ref,
                  xpb_ref, tlb_ref,
                  wf1_ref, bf1_ref, wf2_ref, bf2_ref,
                  o_ref):
    x0 = x_ref[...]                                   # [N, F_in]
    src = src_ref[...]                                # [E, 1] int32
    dst = dst_ref[...]                                # [1, E] int32
    ea = ea_ref[...]                                  # [E, 1]
    n0 = x0.shape[0]

    # ---- conv1 + ELU ----
    xs1 = _gather_rows(src, n0, x0)                   # [E, F_in]
    x1 = _nnconv(x0, xs1, ea, dst,
                 w1a_ref[...], b1a_ref[...], w2a_ref[...], b2a_ref[...],
                 wra_ref[...], bra_ref[...], xpa_ref[...], tla_ref[...])  # [N, 128]

    # ---- graclus stand-in (consecutive pairs) + max_pool ----
    x1p = _pair_max(x1)                               # [N/2, 128]
    src2 = jnp.right_shift(src, 1)                    # cluster remap // 2
    dst2 = jnp.right_shift(dst, 1)
    n1 = n0 // 2

    # ---- conv2 + ELU ----
    xs2 = _gather_rows(src2, n1, x1p)                 # [E, 128]
    x2 = _nnconv(x1p, xs2, ea, dst2,
                 w1b_ref[...], b1b_ref[...], w2b_ref[...], b2b_ref[...],
                 wrb_ref[...], brb_ref[...], xpb_ref[...], tlb_ref[...])  # [N/2, 128]

    # ---- second pooling (max_pool_x) ----
    x2p = _pair_max(x2)                               # [N/4, 128]

    # ---- global_mean_pool ----
    batch4 = batch4_ref[...]                          # [1, N/4] int32
    b = o_ref.shape[0]
    n2 = batch4.shape[1]
    ohp = _onehot(batch4 == lax.broadcasted_iota(jnp.int32, (b, n2), 0))
    cnt = jnp.sum(ohp.astype(jnp.float32), axis=1, keepdims=True)
    invc = pl.reciprocal(jnp.maximum(cnt, 1.0), approx=True)
    pooled = jnp.dot(ohp, x2p.astype(BF16),
                     preferred_element_type=jnp.float32) * invc          # [B, 128]

    # ---- fc1 + ELU, (dropout = identity in eval), fc2, log_softmax ----
    h = _elu(jnp.dot(pooled.astype(BF16), wf1_ref[...],
                     preferred_element_type=jnp.float32) + bf1_ref[...])
    # padded class lanes carry bias -1e30 -> exp underflows to 0, real classes exact
    logits = (jnp.dot(h.astype(BF16), wf2_ref[...],
                      preferred_element_type=jnp.float32) + bf2_ref[...])
    z = logits - jnp.max(logits, axis=-1, keepdims=True)
    o_ref[...] = z - jnp.log(jnp.sum(jnp.exp(z), axis=-1, keepdims=True))


def _full_specs(shapes):
    return [pl.BlockSpec(s, lambda i, n=len(s): (0,) * n) for s in shapes]


def _fused_call(x, src, dst, edge_attr, batch4, flat_params, num_graphs):
    ins = (x, src, dst, edge_attr, batch4) + tuple(flat_params)
    out = pl.pallas_call(
        _fused_kernel,
        out_shape=jax.ShapeDtypeStruct((num_graphs, CLASSES_PAD), jnp.float32),
        grid=(1,),
        in_specs=_full_specs([a.shape for a in ins]),
        out_specs=pl.BlockSpec((num_graphs, CLASSES_PAD), lambda i: (0, 0)),
        compiler_params=pltpu.CompilerParams(
            dimension_semantics=("arbitrary",),
            vmem_limit_bytes=32 * 1024 * 1024),
    )(*ins)
    return out[:, :NUM_CLASSES]


@functools.partial(jax.jit, static_argnames=("num_graphs",))
def net_forward(x, edge_index, edge_attr, batch, padded_params, num_graphs):
    e = edge_index.shape[1]
    src = edge_index[0].astype(jnp.int32).reshape(e, 1)
    dst = edge_index[1].astype(jnp.int32).reshape(1, e)
    batch4 = batch[0::4].astype(jnp.int32).reshape(1, -1)   # batch after 2 poolings
    flat = padded_params["conv1"] + padded_params["conv2"] + padded_params["fc"]
    return _fused_call(x, src, dst, edge_attr, batch4, flat, num_graphs)


# ----------------------- parameter init + host repacking ---------------------

def init_params(key):
    """Unpadded parameters (PyTorch-equivalent shapes)."""
    def lin(k, fan_in, fan_out, scale=0.1):
        kw, kb = jax.random.split(k)
        w = scale * jax.random.normal(kw, (fan_in, fan_out), jnp.float32)
        b = scale * jax.random.normal(kb, (1, fan_out), jnp.float32)
        return w, b

    ks = jax.random.split(key, 8)
    w1a, b1a = lin(ks[0], 1, HIDDEN)
    w2a, b2a = lin(ks[1], HIDDEN, NUM_FEATURES * CONV1_OUT)
    wra, bra = lin(ks[2], NUM_FEATURES, CONV1_OUT)
    w1b, b1b = lin(ks[3], 1, HIDDEN)
    w2b, b2b = lin(ks[4], HIDDEN, CONV1_OUT * CONV2_OUT)
    wrb, brb = lin(ks[5], CONV1_OUT, CONV2_OUT)
    wf1, bf1 = lin(ks[6], CONV2_OUT, FC1_OUT)
    wf2, bf2 = lin(ks[7], FC1_OUT, NUM_CLASSES)
    return {
        "conv1": (w1a, b1a, w2a, b2a, wra, bra),
        "conv2": (w1b, b1b, w2b, b2b, wrb, brb),
        "fc": (wf1, bf1, wf2, bf2),
    }


def _pad_cols(a, cols):
    return jnp.pad(a, ((0, 0), (0, cols - a.shape[1])))


def _pad_rows(a, rows):
    return jnp.pad(a, ((0, rows - a.shape[0]), (0, 0)))


def _repack_edge_mlp(w2, b2, fin, fout, xsrc_cols):
    """w2:[H, fin*fout] -> W2':[fin*HIDDEN_PAD, F_PAD] so that the per-edge
    message is a single matmul; b2 -> B2':[xsrc_cols, F_PAD]."""
    hcur = w2.shape[0]
    w3 = w2.reshape(hcur, fin, fout).transpose(1, 0, 2)          # [fin, H, fout]
    w3 = jnp.pad(w3, ((0, 0), (0, HIDDEN_PAD - hcur), (0, F_PAD - fout)))
    w2p = w3.reshape(fin * HIDDEN_PAD, F_PAD).astype(BF16)
    b3 = b2.reshape(fin, fout)
    b3 = jnp.pad(b3, ((0, xsrc_cols - fin), (0, F_PAD - fout)))
    return w2p, b3.astype(BF16)


def _expand_tile_mats(xsrc_cols, fin):
    """Constant 0/1 matrices: expand x_src -> [E, fin*32], tile h -> [E, fin*32]."""
    c = np.arange(fin * HIDDEN_PAD)[None, :]
    k = np.arange(xsrc_cols)[:, None]
    j = np.arange(HIDDEN_PAD)[:, None]
    expand = (c // HIDDEN_PAD == k).astype(np.float32)           # [xsrc_cols, fin*32]
    tile = (c % HIDDEN_PAD == j).astype(np.float32)              # [32, fin*32]
    return jnp.asarray(expand, dtype=BF16), jnp.asarray(tile, dtype=BF16)


def pad_params(params):
    w1a, b1a, w2a, b2a, wra, bra = params["conv1"]
    w1b, b1b, w2b, b2b, wrb, brb = params["conv2"]
    wf1, bf1, wf2, bf2 = params["fc"]

    w2ap, b2ap = _repack_edge_mlp(w2a, b2a, NUM_FEATURES, CONV1_OUT, NUM_FEATURES)
    xpa, tla = _expand_tile_mats(NUM_FEATURES, NUM_FEATURES)
    conv1 = (
        _pad_cols(w1a, HIDDEN_PAD), _pad_cols(b1a, HIDDEN_PAD),
        w2ap, b2ap,
        _pad_cols(wra, F_PAD).astype(BF16), _pad_cols(bra, F_PAD),
        xpa, tla,
    )

    w2bp, b2bp = _repack_edge_mlp(w2b, b2b, CONV1_OUT, CONV2_OUT, F_PAD)
    xpb, tlb = _expand_tile_mats(F_PAD, CONV1_OUT)
    conv2 = (
        _pad_cols(w1b, HIDDEN_PAD), _pad_cols(b1b, HIDDEN_PAD),
        w2bp, b2bp,
        _pad_cols(_pad_rows(wrb, F_PAD), F_PAD).astype(BF16), _pad_cols(brb, F_PAD),
        xpb, tlb,
    )

    fc = (
        _pad_rows(wf1, F_PAD).astype(BF16), bf1,
        _pad_cols(wf2, CLASSES_PAD).astype(BF16),
        jnp.pad(bf2, ((0, 0), (0, CLASSES_PAD - NUM_CLASSES)), constant_values=-1e30),
    )
    return {"conv1": conv1, "conv2": conv2, "fc": fc}


# --------------------------- pure-JAX reference ------------------------------

def net_forward_reference(x, edge_index, edge_attr, batch, params, num_graphs):
    def elu(v):
        return jnp.where(v > 0, v, jnp.exp(jnp.minimum(v, 0.0)) - 1.0)

    def nnconv(x, src, dst, ea, p, fin, fout):
        w1, b1, w2, b2, wr, br = p
        h = jnp.maximum(ea @ w1 + b1, 0.0)
        we = (h @ w2 + b2).reshape(-1, fin, fout)
        msg = jnp.einsum("ek,ekf->ef", x[src], we)
        n = x.shape[0]
        num = jax.ops.segment_sum(msg, dst, num_segments=n)
        cnt = jnp.maximum(
            jax.ops.segment_sum(jnp.ones(dst.shape, jnp.float32), dst, num_segments=n), 1.0)
        return elu(x @ wr + num / cnt[:, None] + br)

    src, dst = edge_index[0], edge_index[1]
    x = nnconv(x, src, dst, edge_attr, params["conv1"], NUM_FEATURES, CONV1_OUT)
    x = jnp.maximum(x[0::2], x[1::2])
    src, dst = src // 2, dst // 2
    x = nnconv(x, src, dst, edge_attr, params["conv2"], CONV1_OUT, CONV2_OUT)
    x = jnp.maximum(x[0::2], x[1::2])
    b4 = batch[0::4]
    num = jax.ops.segment_sum(x, b4, num_segments=num_graphs)
    cnt = jnp.maximum(
        jax.ops.segment_sum(jnp.ones(b4.shape, jnp.float32), b4, num_segments=num_graphs), 1.0)
    pooled = num / cnt[:, None]
    wf1, bf1, wf2, bf2 = params["fc"]
    h = elu(pooled @ wf1 + bf1)
    return jax.nn.log_softmax(h @ wf2 + bf2, axis=-1)


# --------------------------------- setup ------------------------------------

if __name__ == "__main__":
    key = jax.random.PRNGKey(0)
    k_x, k_e, k_p = jax.random.split(key, 3)

    num_graphs = 2
    nodes_per_graph = 32
    n_nodes = num_graphs * nodes_per_graph            # 64

    # deterministic ring-ish graph, 2 outgoing edges per node -> E = 128
    srcs, dsts = [], []
    for g in range(num_graphs):
        base = g * nodes_per_graph
        for l in range(nodes_per_graph):
            i = base + l
            srcs += [i, i]
            dsts += [base + (l + 1) % nodes_per_graph,
                     base + (l + 5) % nodes_per_graph]
    edge_index = jnp.asarray(np.array([srcs, dsts], dtype=np.int32))   # [2, 128]

    x = jax.random.normal(k_x, (n_nodes, NUM_FEATURES), jnp.float32)   # [64, 4]
    edge_attr = jax.random.uniform(k_e, (edge_index.shape[1], 1), jnp.float32)  # [128, 1]
    batch = jnp.asarray(
        np.repeat(np.arange(num_graphs, dtype=np.int32), nodes_per_graph))      # [64]

    params = init_params(k_p)
    padded = pad_params(params)

    out = net_forward(x, edge_index, edge_attr, batch, padded, num_graphs)
    out = jax.block_until_ready(out)

    assert out.shape == (num_graphs, NUM_CLASSES)
    assert bool(jnp.all(jnp.isfinite(out)))

    ref = net_forward_reference(x, edge_index, edge_attr, batch, params, num_graphs)
    # bf16 MXU operands + approx reciprocal introduce ~1e-3..1e-2 error (accepted
    # per review); f32 reference comparison with a modest tolerance.
    np.testing.assert_allclose(np.asarray(out), np.asarray(ref), rtol=2e-2, atol=2e-2)

    print("KERNEL_OK")
</pallas_src>

<mosaic_0001>
module attributes {stable_mosaic.version = 11 : i64} {
  func.func @_fused_kernel(%arg0: i32, %arg1: memref<64x4xf32, #tpu.memory_space<vmem>>, %arg2: memref<128x1xi32, #tpu.memory_space<vmem>>, %arg3: memref<1x128xi32, #tpu.memory_space<vmem>>, %arg4: memref<128x1xf32, #tpu.memory_space<vmem>>, %arg5: memref<1x16xi32, #tpu.memory_space<vmem>>, %arg6: memref<1x32xf32, #tpu.memory_space<vmem>>, %arg7: memref<1x32xf32, #tpu.memory_space<vmem>>, %arg8: memref<128x128xbf16, #tpu.memory_space<vmem>>, %arg9: memref<4x128xbf16, #tpu.memory_space<vmem>>, %arg10: memref<4x128xbf16, #tpu.memory_space<vmem>>, %arg11: memref<1x128xf32, #tpu.memory_space<vmem>>, %arg12: memref<4x128xbf16, #tpu.memory_space<vmem>>, %arg13: memref<32x128xbf16, #tpu.memory_space<vmem>>, %arg14: memref<1x32xf32, #tpu.memory_space<vmem>>, %arg15: memref<1x32xf32, #tpu.memory_space<vmem>>, %arg16: memref<1536x128xbf16, #tpu.memory_space<vmem>>, %arg17: memref<128x128xbf16, #tpu.memory_space<vmem>>, %arg18: memref<128x128xbf16, #tpu.memory_space<vmem>>, %arg19: memref<1x128xf32, #tpu.memory_space<vmem>>, %arg20: memref<128x1536xbf16, #tpu.memory_space<vmem>>, %arg21: memref<32x1536xbf16, #tpu.memory_space<vmem>>, %arg22: memref<128x128xbf16, #tpu.memory_space<vmem>>, %arg23: memref<1x128xf32, #tpu.memory_space<vmem>>, %arg24: memref<128x128xbf16, #tpu.memory_space<vmem>>, %arg25: memref<1x128xf32, #tpu.memory_space<vmem>>, %arg26: memref<2x128xf32, #tpu.memory_space<vmem>>) attributes {dimension_semantics = [#tpu.dimension_semantics<arbitrary>], iteration_bounds = array<i64: 1>, scalar_prefetch = 0 : i64, scratch_operands = 0 : i64, tpu.core_type = #tpu.core_type<tc>, window_params = [{pipeline_mode = #tpu.pipeline_mode<synchronous>, transform_indices = @transform_0, window_bounds = array<i64: 64, 4>}, {pipeline_mode = #tpu.pipeline_mode<synchronous>, transform_indices = @transform_1, window_bounds = array<i64: 128, 1>}, {pipeline_mode = #tpu.pipeline_mode<synchronous>, transform_indices = @transform_2, window_bounds = array<i64: 1, 128>}, {pipeline_mode = #tpu.pipeline_mode<synchronous>, transform_indices = @transform_3, window_bounds = array<i64: 128, 1>}, {pipeline_mode = #tpu.pipeline_mode<synchronous>, transform_indices = @transform_4, window_bounds = array<i64: 1, 16>}, {pipeline_mode = #tpu.pipeline_mode<synchronous>, transform_indices = @transform_5, window_bounds = array<i64: 1, 32>}, {pipeline_mode = #tpu.pipeline_mode<synchronous>, transform_indices = @transform_6, window_bounds = array<i64: 1, 32>}, {pipeline_mode = #tpu.pipeline_mode<synchronous>, transform_indices = @transform_7, window_bounds = array<i64: 128, 128>}, {pipeline_mode = #tpu.pipeline_mode<synchronous>, transform_indices = @transform_8, window_bounds = array<i64: 4, 128>}, {pipeline_mode = #tpu.pipeline_mode<synchronous>, transform_indices = @transform_9, window_bounds = array<i64: 4, 128>}, {pipeline_mode = #tpu.pipeline_mode<synchronous>, transform_indices = @transform_10, window_bounds = array<i64: 1, 128>}, {pipeline_mode = #tpu.pipeline_mode<synchronous>, transform_indices = @transform_11, window_bounds = array<i64: 4, 128>}, {pipeline_mode = #tpu.pipeline_mode<synchronous>, transform_indices = @transform_12, window_bounds = array<i64: 32, 128>}, {pipeline_mode = #tpu.pipeline_mode<synchronous>, transform_indices = @transform_13, window_bounds = array<i64: 1, 32>}, {pipeline_mode = #tpu.pipeline_mode<synchronous>, transform_indices = @transform_14, window_bounds = array<i64: 1, 32>}, {pipeline_mode = #tpu.pipeline_mode<synchronous>, transform_indices = @transform_15, window_bounds = array<i64: 1536, 128>}, {pipeline_mode = #tpu.pipeline_mode<synchronous>, transform_indices = @transform_16, window_bounds = array<i64: 128, 128>}, {pipeline_mode = #tpu.pipeline_mode<synchronous>, transform_indices = @transform_17, window_bounds = array<i64: 128, 128>}, {pipeline_mode = #tpu.pipeline_mode<synchronous>, transform_indices = @transform_18, window_bounds = array<i64: 1, 128>}, {pipeline_mode = #tpu.pipeline_mode<synchronous>, transform_indices = @transform_19, window_bounds = array<i64: 128, 1536>}, {pipeline_mode = #tpu.pipeline_mode<synchronous>, transform_indices = @transform_20, window_bounds = array<i64: 32, 1536>}, {pipeline_mode = #tpu.pipeline_mode<synchronous>, transform_indices = @transform_21, window_bounds = array<i64: 128, 128>}, {pipeline_mode = #tpu.pipeline_mode<synchronous>, transform_indices = @transform_22, window_bounds = array<i64: 1, 128>}, {pipeline_mode = #tpu.pipeline_mode<synchronous>, transform_indices = @transform_23, window_bounds = array<i64: 128, 128>}, {pipeline_mode = #tpu.pipeline_mode<synchronous>, transform_indices = @transform_24, window_bounds = array<i64: 1, 128>}, {pipeline_mode = #tpu.pipeline_mode<synchronous>, transform_indices = @transform_25, window_bounds = array<i64: 2, 128>}]} {
    %c0 = arith.constant 0 : index
    %c0_0 = arith.constant 0 : index
    %0 = vector.load %arg1[%c0, %c0_0] : memref<64x4xf32, #tpu.memory_space<vmem>>, vector<64x4xf32>
    %c0_1 = arith.constant 0 : index
    %c0_2 = arith.constant 0 : index
    %1 = vector.load %arg2[%c0_1, %c0_2] : memref<128x1xi32, #tpu.memory_space<vmem>>, vector<128x1xi32>
    %c0_3 = arith.constant 0 : index
    %c0_4 = arith.constant 0 : index
    %2 = vector.load %arg3[%c0_3, %c0_4] : memref<1x128xi32, #tpu.memory_space<vmem>>, vector<1x128xi32>
    %c0_5 = arith.constant 0 : index
    %c0_6 = arith.constant 0 : index
    %3 = vector.load %arg4[%c0_5, %c0_6] : memref<128x1xf32, #tpu.memory_space<vmem>>, vector<128x1xf32>
    %4 = tpu.iota {dimensions = array<i32: 1>} : vector<128x64xi32>
    %5 = vector.broadcast %1 : vector<128x1xi32> to vector<128x64xi32>
    %6 = arith.cmpi eq, %5, %4 : vector<128x64xi32>
    %cst = arith.constant 1.000000e+00 : f32
    %cst_7 = arith.constant 0.000000e+00 : f32
    %7 = vector.broadcast %cst : f32 to vector<128x64xf32>
    %8 = vector.broadcast %cst_7 : f32 to vector<128x64xf32>
    %9 = arith.select %6, %7, %8 : vector<128x64xi1>, vector<128x64xf32>
    %10 = arith.truncf %9 : vector<128x64xf32> to vector<128x64xbf16>
    %11 = arith.truncf %0 : vector<64x4xf32> to vector<64x4xbf16>
    %cst_8 = arith.constant dense<0.000000e+00> : vector<128x4xf32>
    %12 = tpu.matmul %10, %11, %cst_8 {dimension_numbers = #tpu.dot_dimension_numbers<[1], [0], [0], [1], [0, 0, 1, 1], [], []>} : vector<128x64xbf16>, vector<64x4xbf16>, vector<128x4xf32> -> vector<128x4xf32>
    %c0_9 = arith.constant 0 : index
    %c0_10 = arith.constant 0 : index
    %13 = vector.load %arg6[%c0_9, %c0_10] : memref<1x32xf32, #tpu.memory_space<vmem>>, vector<1x32xf32>
    %c0_11 = arith.constant 0 : index
    %c0_12 = arith.constant 0 : index
    %14 = vector.load %arg7[%c0_11, %c0_12] : memref<1x32xf32, #tpu.memory_space<vmem>>, vector<1x32xf32>
    %c0_13 = arith.constant 0 : index
    %c0_14 = arith.constant 0 : index
    %15 = vector.load %arg8[%c0_13, %c0_14] : memref<128x128xbf16, #tpu.memory_space<vmem>>, vector<128x128xbf16>
    %c0_15 = arith.constant 0 : index
    %c0_16 = arith.constant 0 : index
    %16 = vector.load %arg9[%c0_15, %c0_16] : memref<4x128xbf16, #tpu.memory_space<vmem>>, vector<4x128xbf16>
    %c0_17 = arith.constant 0 : index
    %c0_18 = arith.constant 0 : index
    %17 = vector.load %arg10[%c0_17, %c0_18] : memref<4x128xbf16, #tpu.memory_space<vmem>>, vector<4x128xbf16>
    %c0_19 = arith.constant 0 : index
    %c0_20 = arith.constant 0 : index
    %18 = vector.load %arg11[%c0_19, %c0_20] : memref<1x128xf32, #tpu.memory_space<vmem>>, vector<1x128xf32>
    %c0_21 = arith.constant 0 : index
    %c0_22 = arith.constant 0 : index
    %19 = vector.load %arg12[%c0_21, %c0_22] : memref<4x128xbf16, #tpu.memory_space<vmem>>, vector<4x128xbf16>
    %c0_23 = arith.constant 0 : index
    %c0_24 = arith.constant 0 : index
    %20 = vector.load %arg13[%c0_23, %c0_24] : memref<32x128xbf16, #tpu.memory_space<vmem>>, vector<32x128xbf16>
    %21 = vector.broadcast %3 : vector<128x1xf32> to vector<128x32xf32>
    %22 = vector.broadcast %13 : vector<1x32xf32> to vector<128x32xf32>
    %23 = arith.mulf %21, %22 : vector<128x32xf32>
    %24 = vector.broadcast %14 : vector<1x32xf32> to vector<128x32xf32>
    %25 = arith.addf %23, %24 : vector<128x32xf32>
    %cst_25 = arith.constant 0.000000e+00 : f32
    %26 = vector.broadcast %cst_25 : f32 to vector<128x32xf32>
    %27 = arith.maximumf %25, %26 : vector<128x32xf32>
    %28 = arith.truncf %12 : vector<128x4xf32> to vector<128x4xbf16>
    %cst_26 = arith.constant dense<0.000000e+00> : vector<128x128xf32>
    %29 = tpu.matmul %28, %19, %cst_26 {dimension_numbers = #tpu.dot_dimension_numbers<[1], [0], [0], [1], [0, 0, 1, 1], [], []>} : vector<128x4xbf16>, vector<4x128xbf16>, vector<128x128xf32> -> vector<128x128xf32>
    %30 = arith.truncf %27 : vector<128x32xf32> to vector<128x32xbf16>
    %cst_27 = arith.constant dense<0.000000e+00> : vector<128x128xf32>
    %31 = tpu.matmul %30, %20, %cst_27 {dimension_numbers = #tpu.dot_dimension_numbers<[1], [0], [0], [1], [0, 0, 1, 1], [], []>} : vector<128x32xbf16>, vector<32x128xbf16>, vector<128x128xf32> -> vector<128x128xf32>
    %32 = arith.mulf %29, %31 : vector<128x128xf32>
    %33 = arith.truncf %32 : vector<128x128xf32> to vector<128x128xbf16>
    %cst_28 = arith.constant dense<0.000000e+00> : vector<128x128xf32>
    %34 = tpu.matmul %33, %15, %cst_28 {dimension_numbers = #tpu.dot_dimension_numbers<[1], [0], [0], [1], [0, 0, 1, 1], [], []>} : vector<128x128xbf16>, vector<128x128xbf16>, vector<128x128xf32> -> vector<128x128xf32>
    %cst_29 = arith.constant dense<0.000000e+00> : vector<128x128xf32>
    %35 = tpu.matmul %28, %16, %cst_29 {dimension_numbers = #tpu.dot_dimension_numbers<[1], [0], [0], [1], [0, 0, 1, 1], [], []>} : vector<128x4xbf16>, vector<4x128xbf16>, vector<128x128xf32> -> vector<128x128xf32>
    %36 = arith.addf %34, %35 : vector<128x128xf32>
    %37 = tpu.iota {dimensions = array<i32: 0>} : vector<64x128xi32>
    %38 = vector.broadcast %2 : vector<1x128xi32> to vector<64x128xi32>
    %39 = arith.cmpi eq, %38, %37 : vector<64x128xi32>
    %cst_30 = arith.constant 1.000000e+00 : f32
    %cst_31 = arith.constant 0.000000e+00 : f32
    %40 = vector.broadcast %cst_30 : f32 to vector<64x128xf32>
    %41 = vector.broadcast %cst_31 : f32 to vector<64x128xf32>
    %42 = arith.select %39, %40, %41 : vector<64x128xi1>, vector<64x128xf32>
    %43 = arith.truncf %42 : vector<64x128xf32> to vector<64x128xbf16>
    %44 = arith.extf %43 : vector<64x128xbf16> to vector<64x128xf32>
    %cst_32 = arith.constant dense<0.000000e+00> : vector<64xf32>
    %45 = vector.multi_reduction <add>, %44, %cst_32 [1] : vector<64x128xf32> to vector<64xf32>
    %46 = vector.shape_cast %45 : vector<64xf32> to vector<64x1xf32>
    %cst_33 = arith.constant 1.000000e+00 : f32
    %47 = vector.broadcast %cst_33 : f32 to vector<64x1xf32>
    %48 = arith.maximumf %46, %47 : vector<64x1xf32>
    %49 = tpu.reciprocal %48 {approx = true} : vector<64x1xf32> -> vector<64x1xf32>
    %50 = arith.truncf %36 : vector<128x128xf32> to vector<128x128xbf16>
    %cst_34 = arith.constant dense<0.000000e+00> : vector<64x128xf32>
    %51 = tpu.matmul %43, %50, %cst_34 {dimension_numbers = #tpu.dot_dimension_numbers<[1], [0], [0], [1], [0, 0, 1, 1], [], []>} : vector<64x128xbf16>, vector<128x128xbf16>, vector<64x128xf32> -> vector<64x128xf32>
    %52 = vector.broadcast %49 : vector<64x1xf32> to vector<64x128xf32>
    %53 = arith.mulf %51, %52 : vector<64x128xf32>
    %54 = arith.truncf %0 : vector<64x4xf32> to vector<64x4xbf16>
    %cst_35 = arith.constant dense<0.000000e+00> : vector<64x128xf32>
    %55 = tpu.matmul %54, %17, %cst_35 {dimension_numbers = #tpu.dot_dimension_numbers<[1], [0], [0], [1], [0, 0, 1, 1], [], []>} : vector<64x4xbf16>, vector<4x128xbf16>, vector<64x128xf32> -> vector<64x128xf32>
    %56 = arith.addf %55, %53 : vector<64x128xf32>
    %57 = vector.broadcast %18 : vector<1x128xf32> to vector<64x128xf32>
    %58 = arith.addf %56, %57 : vector<64x128xf32>
    %cst_36 = arith.constant 0.000000e+00 : f32
    %59 = vector.broadcast %cst_36 : f32 to vector<64x128xf32>
    %60 = arith.cmpf ogt, %58, %59 : vector<64x128xf32>
    %cst_37 = arith.constant 0.000000e+00 : f32
    %61 = vector.broadcast %cst_37 : f32 to vector<64x128xf32>
    %62 = arith.minimumf %58, %61 : vector<64x128xf32>
    %63 = math.exp %62 : vector<64x128xf32>
    %cst_38 = arith.constant 1.000000e+00 : f32
    %64 = vector.broadcast %cst_38 : f32 to vector<64x128xf32>
    %65 = arith.subf %63, %64 : vector<64x128xf32>
    %66 = arith.select %60, %58, %65 : vector<64x128xi1>, vector<64x128xf32>
    %67 = tpu.iota {dimensions = array<i32: 0>} : vector<32x64xi32>
    %68 = tpu.iota {dimensions = array<i32: 1>} : vector<32x64xi32>
    %69 = arith.truncf %66 : vector<64x128xf32> to vector<64x128xbf16>
    %c2_i32 = arith.constant 2 : i32
    %70 = vector.broadcast %c2_i32 : i32 to vector<32x64xi32>
    %71 = arith.muli %70, %67 : vector<32x64xi32>
    %72 = arith.cmpi eq, %68, %71 : vector<32x64xi32>
    %cst_39 = arith.constant 1.000000e+00 : f32
    %cst_40 = arith.constant 0.000000e+00 : f32
    %73 = vector.broadcast %cst_39 : f32 to vector<32x64xf32>
    %74 = vector.broadcast %cst_40 : f32 to vector<32x64xf32>
    %75 = arith.select %72, %73, %74 : vector<32x64xi1>, vector<32x64xf32>
    %76 = arith.truncf %75 : vector<32x64xf32> to vector<32x64xbf16>
    %cst_41 = arith.constant dense<0.000000e+00> : vector<32x128xf32>
    %77 = tpu.matmul %76, %69, %cst_41 {dimension_numbers = #tpu.dot_dimension_numbers<[1], [0], [0], [1], [0, 0, 1, 1], [], []>} : vector<32x64xbf16>, vector<64x128xbf16>, vector<32x128xf32> -> vector<32x128xf32>
    %c2_i32_42 = arith.constant 2 : i32
    %78 = vector.broadcast %c2_i32_42 : i32 to vector<32x64xi32>
    %79 = arith.muli %78, %67 : vector<32x64xi32>
    %c1_i32 = arith.constant 1 : i32
    %80 = vector.broadcast %c1_i32 : i32 to vector<32x64xi32>
    %81 = arith.addi %79, %80 : vector<32x64xi32>
    %82 = arith.cmpi eq, %68, %81 : vector<32x64xi32>
    %cst_43 = arith.constant 1.000000e+00 : f32
    %cst_44 = arith.constant 0.000000e+00 : f32
    %83 = vector.broadcast %cst_43 : f32 to vector<32x64xf32>
    %84 = vector.broadcast %cst_44 : f32 to vector<32x64xf32>
    %85 = arith.select %82, %83, %84 : vector<32x64xi1>, vector<32x64xf32>
    %86 = arith.truncf %85 : vector<32x64xf32> to vector<32x64xbf16>
    %cst_45 = arith.constant dense<0.000000e+00> : vector<32x128xf32>
    %87 = tpu.matmul %86, %69, %cst_45 {dimension_numbers = #tpu.dot_dimension_numbers<[1], [0], [0], [1], [0, 0, 1, 1], [], []>} : vector<32x64xbf16>, vector<64x128xbf16>, vector<32x128xf32> -> vector<32x128xf32>
    %88 = arith.maximumf %77, %87 : vector<32x128xf32>
    %c1_i32_46 = arith.constant 1 : i32
    %89 = vector.broadcast %c1_i32_46 : i32 to vector<128x1xi32>
    %90 = arith.shrsi %1, %89 : vector<128x1xi32>
    %c1_i32_47 = arith.constant 1 : i32
    %91 = vector.broadcast %c1_i32_47 : i32 to vector<1x128xi32>
    %92 = arith.shrsi %2, %91 : vector<1x128xi32>
    %93 = tpu.iota {dimensions = array<i32: 1>} : vector<128x32xi32>
    %94 = vector.broadcast %90 : vector<128x1xi32> to vector<128x32xi32>
    %95 = arith.cmpi eq, %94, %93 : vector<128x32xi32>
    %cst_48 = arith.constant 1.000000e+00 : f32
    %cst_49 = arith.constant 0.000000e+00 : f32
    %96 = vector.broadcast %cst_48 : f32 to vector<128x32xf32>
    %97 = vector.broadcast %cst_49 : f32 to vector<128x32xf32>
    %98 = arith.select %95, %96, %97 : vector<128x32xi1>, vector<128x32xf32>
    %99 = arith.truncf %98 : vector<128x32xf32> to vector<128x32xbf16>
    %100 = arith.truncf %88 : vector<32x128xf32> to vector<32x128xbf16>
    %cst_50 = arith.constant dense<0.000000e+00> : vector<128x128xf32>
    %101 = tpu.matmul %99, %100, %cst_50 {dimension_numbers = #tpu.dot_dimension_numbers<[1], [0], [0], [1], [0, 0, 1, 1], [], []>} : vector<128x32xbf16>, vector<32x128xbf16>, vector<128x128xf32> -> vector<128x128xf32>
    %c0_51 = arith.constant 0 : index
    %c0_52 = arith.constant 0 : index
    %102 = vector.load %arg14[%c0_51, %c0_52] : memref<1x32xf32, #tpu.memory_space<vmem>>, vector<1x32xf32>
    %c0_53 = arith.constant 0 : index
    %c0_54 = arith.constant 0 : index
    %103 = vector.load %arg15[%c0_53, %c0_54] : memref<1x32xf32, #tpu.memory_space<vmem>>, vector<1x32xf32>
    %c0_55 = arith.constant 0 : index
    %c0_56 = arith.constant 0 : index
    %104 = vector.load %arg16[%c0_55, %c0_56] : memref<1536x128xbf16, #tpu.memory_space<vmem>>, vector<1536x128xbf16>
    %c0_57 = arith.constant 0 : index
    %c0_58 = arith.constant 0 : index
    %105 = vector.load %arg17[%c0_57, %c0_58] : memref<128x128xbf16, #tpu.memory_space<vmem>>, vector<128x128xbf16>
    %c0_59 = arith.constant 0 : index
    %c0_60 = arith.constant 0 : index
    %106 = vector.load %arg18[%c0_59, %c0_60] : memref<128x128xbf16, #tpu.memory_space<vmem>>, vector<128x128xbf16>
    %c0_61 = arith.constant 0 : index
    %c0_62 = arith.constant 0 : index
    %107 = vector.load %arg19[%c0_61, %c0_62] : memref<1x128xf32, #tpu.memory_space<vmem>>, vector<1x128xf32>
    %c0_63 = arith.constant 0 : index
    %c0_64 = arith.constant 0 : index
    %108 = vector.load %arg20[%c0_63, %c0_64] : memref<128x1536xbf16, #tpu.memory_space<vmem>>, vector<128x1536xbf16>
    %c0_65 = arith.constant 0 : index
    %c0_66 = arith.constant 0 : index
    %109 = vector.load %arg21[%c0_65, %c0_66] : memref<32x1536xbf16, #tpu.memory_space<vmem>>, vector<32x1536xbf16>
    %110 = vector.broadcast %3 : vector<128x1xf32> to vector<128x32xf32>
    %111 = vector.broadcast %102 : vector<1x32xf32> to vector<128x32xf32>
    %112 = arith.mulf %110, %111 : vector<128x32xf32>
    %113 = vector.broadcast %103 : vector<1x32xf32> to vector<128x32xf32>
    %114 = arith.addf %112, %113 : vector<128x32xf32>
    %cst_67 = arith.constant 0.000000e+00 : f32
    %115 = vector.broadcast %cst_67 : f32 to vector<128x32xf32>
    %116 = arith.maximumf %114, %115 : vector<128x32xf32>
    %117 = arith.truncf %101 : vector<128x128xf32> to vector<128x128xbf16>
    %cst_68 = arith.constant dense<0.000000e+00> : vector<128x1536xf32>
    %118 = tpu.matmul %117, %108, %cst_68 {dimension_numbers = #tpu.dot_dimension_numbers<[1], [0], [0], [1], [0, 0, 1, 1], [], []>} : vector<128x128xbf16>, vector<128x1536xbf16>, vector<128x1536xf32> -> vector<128x1536xf32>
    %119 = arith.truncf %116 : vector<128x32xf32> to vector<128x32xbf16>
    %cst_69 = arith.constant dense<0.000000e+00> : vector<128x1536xf32>
    %120 = tpu.matmul %119, %109, %cst_69 {dimension_numbers = #tpu.dot_dimension_numbers<[1], [0], [0], [1], [0, 0, 1, 1], [], []>} : vector<128x32xbf16>, vector<32x1536xbf16>, vector<128x1536xf32> -> vector<128x1536xf32>
    %121 = arith.mulf %118, %120 : vector<128x1536xf32>
    %122 = arith.truncf %121 : vector<128x1536xf32> to vector<128x1536xbf16>
    %cst_70 = arith.constant dense<0.000000e+00> : vector<128x128xf32>
    %123 = tpu.matmul %122, %104, %cst_70 {dimension_numbers = #tpu.dot_dimension_numbers<[1], [0], [0], [1], [0, 0, 1, 1], [], []>} : vector<128x1536xbf16>, vector<1536x128xbf16>, vector<128x128xf32> -> vector<128x128xf32>
    %cst_71 = arith.constant dense<0.000000e+00> : vector<128x128xf32>
    %124 = tpu.matmul %117, %105, %cst_71 {dimension_numbers = #tpu.dot_dimension_numbers<[1], [0], [0], [1], [0, 0, 1, 1], [], []>} : vector<128x128xbf16>, vector<128x128xbf16>, vector<128x128xf32> -> vector<128x128xf32>
    %125 = arith.addf %123, %124 : vector<128x128xf32>
    %126 = tpu.iota {dimensions = array<i32: 0>} : vector<32x128xi32>
    %127 = vector.broadcast %92 : vector<1x128xi32> to vector<32x128xi32>
    %128 = arith.cmpi eq, %127, %126 : vector<32x128xi32>
    %cst_72 = arith.constant 1.000000e+00 : f32
    %cst_73 = arith.constant 0.000000e+00 : f32
    %129 = vector.broadcast %cst_72 : f32 to vector<32x128xf32>
    %130 = vector.broadcast %cst_73 : f32 to vector<32x128xf32>
    %131 = arith.select %128, %129, %130 : vector<32x128xi1>, vector<32x128xf32>
    %132 = arith.truncf %131 : vector<32x128xf32> to vector<32x128xbf16>
    %133 = arith.extf %132 : vector<32x128xbf16> to vector<32x128xf32>
    %cst_74 = arith.constant dense<0.000000e+00> : vector<32xf32>
    %134 = vector.multi_reduction <add>, %133, %cst_74 [1] : vector<32x128xf32> to vector<32xf32>
    %135 = vector.shape_cast %134 : vector<32xf32> to vector<32x1xf32>
    %cst_75 = arith.constant 1.000000e+00 : f32
    %136 = vector.broadcast %cst_75 : f32 to vector<32x1xf32>
    %137 = arith.maximumf %135, %136 : vector<32x1xf32>
    %138 = tpu.reciprocal %137 {approx = true} : vector<32x1xf32> -> vector<32x1xf32>
    %139 = arith.truncf %125 : vector<128x128xf32> to vector<128x128xbf16>
    %cst_76 = arith.constant dense<0.000000e+00> : vector<32x128xf32>
    %140 = tpu.matmul %132, %139, %cst_76 {dimension_numbers = #tpu.dot_dimension_numbers<[1], [0], [0], [1], [0, 0, 1, 1], [], []>} : vector<32x128xbf16>, vector<128x128xbf16>, vector<32x128xf32> -> vector<32x128xf32>
    %141 = vector.broadcast %138 : vector<32x1xf32> to vector<32x128xf32>
    %142 = arith.mulf %140, %141 : vector<32x128xf32>
    %143 = arith.truncf %88 : vector<32x128xf32> to vector<32x128xbf16>
    %cst_77 = arith.constant dense<0.000000e+00> : vector<32x128xf32>
    %144 = tpu.matmul %143, %106, %cst_77 {dimension_numbers = #tpu.dot_dimension_numbers<[1], [0], [0], [1], [0, 0, 1, 1], [], []>} : vector<32x128xbf16>, vector<128x128xbf16>, vector<32x128xf32> -> vector<32x128xf32>
    %145 = arith.addf %144, %142 : vector<32x128xf32>
    %146 = vector.broadcast %107 : vector<1x128xf32> to vector<32x128xf32>
    %147 = arith.addf %145, %146 : vector<32x128xf32>
    %cst_78 = arith.constant 0.000000e+00 : f32
    %148 = vector.broadcast %cst_78 : f32 to vector<32x128xf32>
    %149 = arith.cmpf ogt, %147, %148 : vector<32x128xf32>
    %cst_79 = arith.constant 0.000000e+00 : f32
    %150 = vector.broadcast %cst_79 : f32 to vector<32x128xf32>
    %151 = arith.minimumf %147, %150 : vector<32x128xf32>
    %152 = math.exp %151 : vector<32x128xf32>
    %cst_80 = arith.constant 1.000000e+00 : f32
    %153 = vector.broadcast %cst_80 : f32 to vector<32x128xf32>
    %154 = arith.subf %152, %153 : vector<32x128xf32>
    %155 = arith.select %149, %147, %154 : vector<32x128xi1>, vector<32x128xf32>
    %156 = tpu.iota {dimensions = array<i32: 0>} : vector<16x32xi32>
    %157 = tpu.iota {dimensions = array<i32: 1>} : vector<16x32xi32>
    %158 = arith.truncf %155 : vector<32x128xf32> to vector<32x128xbf16>
    %c2_i32_81 = arith.constant 2 : i32
    %159 = vector.broadcast %c2_i32_81 : i32 to vector<16x32xi32>
    %160 = arith.muli %159, %156 : vector<16x32xi32>
    %161 = arith.cmpi eq, %157, %160 : vector<16x32xi32>
    %cst_82 = arith.constant 1.000000e+00 : f32
    %cst_83 = arith.constant 0.000000e+00 : f32
    %162 = vector.broadcast %cst_82 : f32 to vector<16x32xf32>
    %163 = vector.broadcast %cst_83 : f32 to vector<16x32xf32>
    %164 = arith.select %161, %162, %163 : vector<16x32xi1>, vector<16x32xf32>
    %165 = arith.truncf %164 : vector<16x32xf32> to vector<16x32xbf16>
    %cst_84 = arith.constant dense<0.000000e+00> : vector<16x128xf32>
    %166 = tpu.matmul %165, %158, %cst_84 {dimension_numbers = #tpu.dot_dimension_numbers<[1], [0], [0], [1], [0, 0, 1, 1], [], []>} : vector<16x32xbf16>, vector<32x128xbf16>, vector<16x128xf32> -> vector<16x128xf32>
    %c2_i32_85 = arith.constant 2 : i32
    %167 = vector.broadcast %c2_i32_85 : i32 to vector<16x32xi32>
    %168 = arith.muli %167, %156 : vector<16x32xi32>
    %c1_i32_86 = arith.constant 1 : i32
    %169 = vector.broadcast %c1_i32_86 : i32 to vector<16x32xi32>
    %170 = arith.addi %168, %169 : vector<16x32xi32>
    %171 = arith.cmpi eq, %157, %170 : vector<16x32xi32>
    %cst_87 = arith.constant 1.000000e+00 : f32
    %cst_88 = arith.constant 0.000000e+00 : f32
    %172 = vector.broadcast %cst_87 : f32 to vector<16x32xf32>
    %173 = vector.broadcast %cst_88 : f32 to vector<16x32xf32>
    %174 = arith.select %171, %172, %173 : vector<16x32xi1>, vector<16x32xf32>
    %175 = arith.truncf %174 : vector<16x32xf32> to vector<16x32xbf16>
    %cst_89 = arith.constant dense<0.000000e+00> : vector<16x128xf32>
    %176 = tpu.matmul %175, %158, %cst_89 {dimension_numbers = #tpu.dot_dimension_numbers<[1], [0], [0], [1], [0, 0, 1, 1], [], []>} : vector<16x32xbf16>, vector<32x128xbf16>, vector<16x128xf32> -> vector<16x128xf32>
    %177 = arith.maximumf %166, %176 : vector<16x128xf32>
    %c0_90 = arith.constant 0 : index
    %c0_91 = arith.constant 0 : index
    %178 = vector.load %arg5[%c0_90, %c0_91] : memref<1x16xi32, #tpu.memory_space<vmem>>, vector<1x16xi32>
    %179 = tpu.iota {dimensions = array<i32: 0>} : vector<2x16xi32>
    %180 = vector.broadcast %178 : vector<1x16xi32> to vector<2x16xi32>
    %181 = arith.cmpi eq, %180, %179 : vector<2x16xi32>
    %cst_92 = arith.constant 1.000000e+00 : f32
    %cst_93 = arith.constant 0.000000e+00 : f32
    %182 = vector.broadcast %cst_92 : f32 to vector<2x16xf32>
    %183 = vector.broadcast %cst_93 : f32 to vector<2x16xf32>
    %184 = arith.select %181, %182, %183 : vector<2x16xi1>, vector<2x16xf32>
    %185 = arith.truncf %184 : vector<2x16xf32> to vector<2x16xbf16>
    %186 = arith.extf %185 : vector<2x16xbf16> to vector<2x16xf32>
    %cst_94 = arith.constant dense<0.000000e+00> : vector<2xf32>
    %187 = vector.multi_reduction <add>, %186, %cst_94 [1] : vector<2x16xf32> to vector<2xf32>
    %188 = vector.shape_cast %187 : vector<2xf32> to vector<2x1xf32>
    %cst_95 = arith.constant 1.000000e+00 : f32
    %189 = vector.broadcast %cst_95 : f32 to vector<2x1xf32>
    %190 = arith.maximumf %188, %189 : vector<2x1xf32>
    %191 = tpu.reciprocal %190 {approx = true} : vector<2x1xf32> -> vector<2x1xf32>
    %192 = arith.truncf %177 : vector<16x128xf32> to vector<16x128xbf16>
    %cst_96 = arith.constant dense<0.000000e+00> : vector<2x128xf32>
    %193 = tpu.matmul %185, %192, %cst_96 {dimension_numbers = #tpu.dot_dimension_numbers<[1], [0], [0], [1], [0, 0, 1, 1], [], []>} : vector<2x16xbf16>, vector<16x128xbf16>, vector<2x128xf32> -> vector<2x128xf32>
    %194 = vector.broadcast %191 : vector<2x1xf32> to vector<2x128xf32>
    %195 = arith.mulf %193, %194 : vector<2x128xf32>
    %196 = arith.truncf %195 : vector<2x128xf32> to vector<2x128xbf16>
    %c0_97 = arith.constant 0 : index
    %c0_98 = arith.constant 0 : index
    %197 = vector.load %arg22[%c0_97, %c0_98] : memref<128x128xbf16, #tpu.memory_space<vmem>>, vector<128x128xbf16>
    %cst_99 = arith.constant dense<0.000000e+00> : vector<2x128xf32>
    %198 = tpu.matmul %196, %197, %cst_99 {dimension_numbers = #tpu.dot_dimension_numbers<[1], [0], [0], [1], [0, 0, 1, 1], [], []>} : vector<2x128xbf16>, vector<128x128xbf16>, vector<2x128xf32> -> vector<2x128xf32>
    %c0_100 = arith.constant 0 : index
    %c0_101 = arith.constant 0 : index
    %199 = vector.load %arg23[%c0_100, %c0_101] : memref<1x128xf32, #tpu.memory_space<vmem>>, vector<1x128xf32>
    %200 = vector.broadcast %199 : vector<1x128xf32> to vector<2x128xf32>
    %201 = arith.addf %198, %200 : vector<2x128xf32>
    %cst_102 = arith.constant 0.000000e+00 : f32
    %202 = vector.broadcast %cst_102 : f32 to vector<2x128xf32>
    %203 = arith.cmpf ogt, %201, %202 : vector<2x128xf32>
    %cst_103 = arith.constant 0.000000e+00 : f32
    %204 = vector.broadcast %cst_103 : f32 to vector<2x128xf32>
    %205 = arith.minimumf %201, %204 : vector<2x128xf32>
    %206 = math.exp %205 : vector<2x128xf32>
    %cst_104 = arith.constant 1.000000e+00 : f32
    %207 = vector.broadcast %cst_104 : f32 to vector<2x128xf32>
    %208 = arith.subf %206, %207 : vector<2x128xf32>
    %209 = arith.select %203, %201, %208 : vector<2x128xi1>, vector<2x128xf32>
    %210 = arith.truncf %209 : vector<2x128xf32> to vector<2x128xbf16>
    %c0_105 = arith.constant 0 : index
    %c0_106 = arith.constant 0 : index
    %211 = vector.load %arg24[%c0_105, %c0_106] : memref<128x128xbf16, #tpu.memory_space<vmem>>, vector<128x128xbf16>
    %cst_107 = arith.constant dense<0.000000e+00> : vector<2x128xf32>
    %212 = tpu.matmul %210, %211, %cst_107 {dimension_numbers = #tpu.dot_dimension_numbers<[1], [0], [0], [1], [0, 0, 1, 1], [], []>} : vector<2x128xbf16>, vector<128x128xbf16>, vector<2x128xf32> -> vector<2x128xf32>
    %c0_108 = arith.constant 0 : index
    %c0_109 = arith.constant 0 : index
    %213 = vector.load %arg25[%c0_108, %c0_109] : memref<1x128xf32, #tpu.memory_space<vmem>>, vector<1x128xf32>
    %214 = vector.broadcast %213 : vector<1x128xf32> to vector<2x128xf32>
    %215 = arith.addf %212, %214 : vector<2x128xf32>
    %cst_110 = arith.constant dense<0xFF800000> : vector<2xf32>
    %216 = vector.multi_reduction <maximumf>, %215, %cst_110 [1] : vector<2x128xf32> to vector<2xf32>
    %217 = vector.shape_cast %216 : vector<2xf32> to vector<2x1xf32>
    %218 = vector.broadcast %217 : vector<2x1xf32> to vector<2x128xf32>
    %219 = arith.subf %215, %218 : vector<2x128xf32>
    %220 = math.exp %219 : vector<2x128xf32>
    %cst_111 = arith.constant dense<0.000000e+00> : vector<2xf32>
    %221 = vector.multi_reduction <add>, %220, %cst_111 [1] : vector<2x128xf32> to vector<2xf32>
    %222 = vector.shape_cast %221 : vector<2xf32> to vector<2x1xf32>
    %223 = math.log %222 : vector<2x1xf32>
    %224 = vector.broadcast %223 : vector<2x1xf32> to vector<2x128xf32>
    %225 = arith.subf %219, %224 : vector<2x128xf32>
    %c0_112 = arith.constant 0 : index
    %c0_113 = arith.constant 0 : index
    %226 = vector.load %arg26[%c0_112, %c0_113] : memref<2x128xf32, #tpu.memory_space<vmem>>, vector<2x128xf32>
    tpu.vector_store %arg26[%c0_112, %c0_113], %225 {strides = array<i32>} : memref<2x128xf32, #tpu.memory_space<vmem>>, vector<2x128xf32>,
    return
  }
  func.func @transform_0(%arg0: i32) -> (i32, i32) {
    %c0_i32 = arith.constant 0 : i32
    %c0_i32_0 = arith.constant 0 : i32
    %c0_i32_1 = arith.constant 0 : i32
    return %c0_i32, %c0_i32_0 : i32, i32
  }
  func.func @transform_1(%arg0: i32) -> (i32, i32) {
    %c0_i32 = arith.constant 0 : i32
    %c0_i32_0 = arith.constant 0 : i32
    %c0_i32_1 = arith.constant 0 : i32
    return %c0_i32, %c0_i32_0 : i32, i32
  }
  func.func @transform_2(%arg0: i32) -> (i32, i32) {
    %c0_i32 = arith.constant 0 : i32
    %c0_i32_0 = arith.constant 0 : i32
    %c0_i32_1 = arith.constant 0 : i32
    return %c0_i32, %c0_i32_0 : i32, i32
  }
  func.func @transform_3(%arg0: i32) -> (i32, i32) {
    %c0_i32 = arith.constant 0 : i32
    %c0_i32_0 = arith.constant 0 : i32
    %c0_i32_1 = arith.constant 0 : i32
    return %c0_i32, %c0_i32_0 : i32, i32
  }
  func.func @transform_4(%arg0: i32) -> (i32, i32) {
    %c0_i32 = arith.constant 0 : i32
    %c0_i32_0 = arith.constant 0 : i32
    %c0_i32_1 = arith.constant 0 : i32
    return %c0_i32, %c0_i32_0 : i32, i32
  }
  func.func @transform_5(%arg0: i32) -> (i32, i32) {
    %c0_i32 = arith.constant 0 : i32
    %c0_i32_0 = arith.constant 0 : i32
    %c0_i32_1 = arith.constant 0 : i32
    return %c0_i32, %c0_i32_0 : i32, i32
  }
  func.func @transform_6(%arg0: i32) -> (i32, i32) {
    %c0_i32 = arith.constant 0 : i32
    %c0_i32_0 = arith.constant 0 : i32
    %c0_i32_1 = arith.constant 0 : i32
    return %c0_i32, %c0_i32_0 : i32, i32
  }
  func.func @transform_7(%arg0: i32) -> (i32, i32) {
    %c0_i32 = arith.constant 0 : i32
    %c0_i32_0 = arith.constant 0 : i32
    %c0_i32_1 = arith.constant 0 : i32
    return %c0_i32, %c0_i32_0 : i32, i32
  }
  func.func @transform_8(%arg0: i32) -> (i32, i32) {
    %c0_i32 = arith.constant 0 : i32
    %c0_i32_0 = arith.constant 0 : i32
    %c0_i32_1 = arith.constant 0 : i32
    return %c0_i32, %c0_i32_0 : i32, i32
  }
  func.func @transform_9(%arg0: i32) -> (i32, i32) {
    %c0_i32 = arith.constant 0 : i32
    %c0_i32_0 = arith.constant 0 : i32
    %c0_i32_1 = arith.constant 0 : i32
    return %c0_i32, %c0_i32_0 : i32, i32
  }
  func.func @transform_10(%arg0: i32) -> (i32, i32) {
    %c0_i32 = arith.constant 0 : i32
    %c0_i32_0 = arith.constant 0 : i32
    %c0_i32_1 = arith.constant 0 : i32
    return %c0_i32, %c0_i32_0 : i32, i32
  }
  func.func @transform_11(%arg0: i32) -> (i32, i32) {
    %c0_i32 = arith.constant 0 : i32
    %c0_i32_0 = arith.constant 0 : i32
    %c0_i32_1 = arith.constant 0 : i32
    return %c0_i32, %c0_i32_0 : i32, i32
  }
  func.func @transform_12(%arg0: i32) -> (i32, i32) {
    %c0_i32 = arith.constant 0 : i32
    %c0_i32_0 = arith.constant 0 : i32
    %c0_i32_1 = arith.constant 0 : i32
    return %c0_i32, %c0_i32_0 : i32, i32
  }
  func.func @transform_13(%arg0: i32) -> (i32, i32) {
    %c0_i32 = arith.constant 0 : i32
    %c0_i32_0 = arith.constant 0 : i32
    %c0_i32_1 = arith.constant 0 : i32
    return %c0_i32, %c0_i32_0 : i32, i32
  }
  func.func @transform_14(%arg0: i32) -> (i32, i32) {
    %c0_i32 = arith.constant 0 : i32
    %c0_i32_0 = arith.constant 0 : i32
    %c0_i32_1 = arith.constant 0 : i32
    return %c0_i32, %c0_i32_0 : i32, i32
  }
  func.func @transform_15(%arg0: i32) -> (i32, i32) {
    %c0_i32 = arith.constant 0 : i32
    %c0_i32_0 = arith.constant 0 : i32
    %c0_i32_1 = arith.constant 0 : i32
    return %c0_i32, %c0_i32_0 : i32, i32
  }
  func.func @transform_16(%arg0: i32) -> (i32, i32) {
    %c0_i32 = arith.constant 0 : i32
    %c0_i32_0 = arith.constant 0 : i32
    %c0_i32_1 = arith.constant 0 : i32
    return %c0_i32, %c0_i32_0 : i32, i32
  }
  func.func @transform_17(%arg0: i32) -> (i32, i32) {
    %c0_i32 = arith.constant 0 : i32
    %c0_i32_0 = arith.constant 0 : i32
    %c0_i32_1 = arith.constant 0 : i32
    return %c0_i32, %c0_i32_0 : i32, i32
  }
  func.func @transform_18(%arg0: i32) -> (i32, i32) {
    %c0_i32 = arith.constant 0 : i32
    %c0_i32_0 = arith.constant 0 : i32
    %c0_i32_1 = arith.constant 0 : i32
    return %c0_i32, %c0_i32_0 : i32, i32
  }
  func.func @transform_19(%arg0: i32) -> (i32, i32) {
    %c0_i32 = arith.constant 0 : i32
    %c0_i32_0 = arith.constant 0 : i32
    %c0_i32_1 = arith.constant 0 : i32
    return %c0_i32, %c0_i32_0 : i32, i32
  }
  func.func @transform_20(%arg0: i32) -> (i32, i32) {
    %c0_i32 = arith.constant 0 : i32
    %c0_i32_0 = arith.constant 0 : i32
    %c0_i32_1 = arith.constant 0 : i32
    return %c0_i32, %c0_i32_0 : i32, i32
  }
  func.func @transform_21(%arg0: i32) -> (i32, i32) {
    %c0_i32 = arith.constant 0 : i32
    %c0_i32_0 = arith.constant 0 : i32
    %c0_i32_1 = arith.constant 0 : i32
    return %c0_i32, %c0_i32_0 : i32, i32
  }
  func.func @transform_22(%arg0: i32) -> (i32, i32) {
    %c0_i32 = arith.constant 0 : i32
    %c0_i32_0 = arith.constant 0 : i32
    %c0_i32_1 = arith.constant 0 : i32
    return %c0_i32, %c0_i32_0 : i32, i32
  }
  func.func @transform_23(%arg0: i32) -> (i32, i32) {
    %c0_i32 = arith.constant 0 : i32
    %c0_i32_0 = arith.constant 0 : i32
    %c0_i32_1 = arith.constant 0 : i32
    return %c0_i32, %c0_i32_0 : i32, i32
  }
  func.func @transform_24(%arg0: i32) -> (i32, i32) {
    %c0_i32 = arith.constant 0 : i32
    %c0_i32_0 = arith.constant 0 : i32
    %c0_i32_1 = arith.constant 0 : i32
    return %c0_i32, %c0_i32_0 : i32, i32
  }
  func.func @transform_25(%arg0: i32) -> (i32, i32) {
    %c0_i32 = arith.constant 0 : i32
    %c0_i32_0 = arith.constant 0 : i32
    %c0_i32_1 = arith.constant 0 : i32
    return %c0_i32, %c0_i32_0 : i32, i32
  }
}

</mosaic_0001>

<bundles_post_ra>
// kernel: net_forward.1
= control target key start
LH: loop header
LB: loop body
LE: loop exit
PB: predicated region body
PF: predicated region fallthrough
CT: control target
= control target key end

     0   :  { %s10287_s0 = inlined_call_operand.vmem [shape: f32[64,4], index: 0, kind: input, shape index: {}]   ;;  %s10288_s1 = inlined_call_operand.vmem [shape: s32[128,1], index: 1, kind: input, shape index: {}]   ;;  %s10289_s2 = inlined_call_operand.vmem [shape: s32[1,128], index: 2, kind: input, shape index: {}]   ;;  %s10290_s3 = inlined_call_operand.vmem [shape: f32[128,1], index: 3, kind: input, shape index: {}]   ;;  %s10291_s4 = inlined_call_operand.vmem [shape: s32[1,16], index: 4, kind: input, shape index: {}]   ;;  %s10292_s5 = inlined_call_operand.vmem [shape: f32[1,32], index: 5, kind: input, shape index: {}]   ;;  %s10293_s6 = inlined_call_operand.vmem [shape: f32[1,32], index: 6, kind: input, shape index: {}]   ;;  %s10294_s7 = inlined_call_operand.vmem [shape: bf16[128,128], index: 7, kind: input, shape index: {}]   ;;  %s10295_s8 = inlined_call_operand.vmem [shape: bf16[4,128], index: 8, kind: input, shape index: {}]   ;;  %s10296_s9 = inlined_call_operand.vmem [shape: bf16[4,128], index: 9, kind: input, shape index: {}]   ;;  %s10297_s10 = inlined_call_operand.vmem [shape: f32[1,128], index: 10, kind: input, shape index: {}]   ;;  %s10298_s11 = inlined_call_operand.vmem [shape: bf16[4,128], index: 11, kind: input, shape index: {}]   ;;  %s10299_s12 = inlined_call_operand.hbm [shape: bf16[32,128], index: 12, kind: input, shape index: {}]   ;;  %s10300_s13 = inlined_call_operand.vmem [shape: f32[1,32], index: 13, kind: input, shape index: {}]   ;;  %s10301_s14 = inlined_call_operand.vmem [shape: f32[1,32], index: 14, kind: input, shape index: {}]   ;;  %s10302_s15 = inlined_call_operand.hbm [shape: bf16[1536,128], index: 15, kind: input, shape index: {}]   ;;  %s10303_s16 = inlined_call_operand.vmem [shape: bf16[128,128], index: 16, kind: input, shape index: {}]   ;;  %s10304_s17 = inlined_call_operand.hbm [shape: bf16[128,128], index: 17, kind: input, shape index: {}]   ;;  %s10305_s18 = inlined_call_operand.vmem [shape: f32[1,128], index: 18, kind: input, shape index: {}]   ;;  %s10306_s19 = inlined_call_operand.hbm [shape: bf16[128,1536], index: 19, kind: input, shape index: {}]   ;;  %s10307_s20 = inlined_call_operand.vmem [shape: bf16[32,1536], index: 20, kind: input, shape index: {}]   ;;  %s10308_s21 = inlined_call_operand.hbm [shape: bf16[128,128], index: 21, kind: input, shape index: {}]   ;;  %s10309_s22 = inlined_call_operand.vmem [shape: f32[1,128], index: 22, kind: input, shape index: {}]   ;;  %s10310_s23 = inlined_call_operand.hbm [shape: bf16[128,128], index: 23, kind: input, shape index: {}]   ;;  %s10311_s24 = inlined_call_operand.vmem [shape: f32[1,128], index: 24, kind: input, shape index: {}]   ;;  %s10312_s25 = inlined_call_operand.hbm [shape: f32[2,128], index: 25, kind: output, shape index: {}]  }
   0x1   :  { %10461 = sst [smem:[#allocation192_spill]] %s10287_s0 }
   0x2   :  { %10462 = sst [smem:[#allocation193_spill]] %s10288_s1 }
   0x3   :  { %10463 = sst [smem:[#allocation194_spill]] %s10289_s2 }
   0x4   :  { %10464 = sst [smem:[#allocation195_spill]] %s10290_s3 }
   0x5   :  { %10465 = sst [smem:[#allocation196_spill]] %s10291_s4 }
   0x6   :  { %10466 = sst [smem:[#allocation197_spill]] %s10292_s5 }
   0x7   :  { %10467 = sst [smem:[#allocation198_spill]] %s10293_s6 }
   0x8   :  { %10468 = sst [smem:[#allocation199_spill]] %s10294_s7 }
   0x9   :  { %10469 = sst [smem:[#allocation200_spill]] %s10295_s8 }
   0xa   :  { %10470 = sst [smem:[#allocation201_spill]] %s10296_s9 }
   0xb   :  { %30 = vsyncpa [#allocation3], 0 }
   0xc   :  { %31 = vsyncpa [#allocation6], 0 }
   0xd   :  { %32 = vsyncpa [#allocation9], 0 }
   0xe   :  { %33 = vsyncpa [#allocation12], 0 }
   0xf   :  { %34 = vsyncpa [#allocation4], 0  ;;  %s80_s6 = sshll.u32 %s10302_s15, 4  ;;  %s7303_s30 = smov [#allocation5]   ;;  %s81_s6 = int_to_ptr.hbm [resolvable:$true] %s80_s6 }
  0x10   :  { %s82_s7 = sshll.u32 %s7303_s30, 4  ;;  %s110_s1 = sshll.u32 %s10306_s19, 4  ;;  %s83_s7 = int_to_ptr.vmem [resolvable:$true] %s82_s7  ;;  %s111_s1 = int_to_ptr.hbm [resolvable:$true] %s110_s1 }
  0x11   :  { %s7304_s8 = smov 64   ;;  %s7305_s27 = smov 4  }
  0x12   :  { %88 = dma.hbm_to_vmem [thread:$0]  %s81_s6, 12288, %s83_s7, [#allocation6], %s7304_s8, %s7304_s8, %s7305_s27  }
  0x13   :  { %s7306_s4 = smov [#allocation8]   ;;  %s7307_s9 = smov 768  }
  0x14   :  { %s112_s28 = sshll.u32 %s7306_s4, 4  ;;  %s7308_s15 = smov 48   ;;  %s113_s28 = int_to_ptr.vmem [resolvable:$true] %s112_s28 }
  0x15   :  { %118 = dma.hbm_to_vmem [thread:$0]  %s111_s1, 12288, %s113_s28, [#allocation9], %s7307_s9, %s7307_s9, %s7308_s15  }
  0x16   :  { %s63_s29 = sshll.u32 %s10299_s12, 4  ;;  %s7309_s2 = smov [#allocation2]   ;;  %s64_s29 = int_to_ptr.hbm [resolvable:$true] %s63_s29 }
  0x17   :  { %s65_s19 = sshll.u32 %s7309_s2, 4  ;;  %s95_s26 = sshll.u32 %s10304_s17, 4  ;;  %s66_s19 = int_to_ptr.vmem [resolvable:$true] %s65_s19  ;;  %s96_s26 = int_to_ptr.hbm [resolvable:$true] %s95_s26 }
  0x18   :  { %71 = dma.hbm_to_vmem [thread:$0]  %s64_s29, 256, %s66_s19, [#allocation3], %s7304_s8, %s7304_s8, %s7305_s27  }
  0x19   :  { %s7310_s6 = smov [#allocation7]   ;;  %s125_s28 = sshll.u32 %s10308_s21, 4  ;;  %s126_s28 = int_to_ptr.hbm [resolvable:$true] %s125_s28 }
  0x1a   :  { %s97_s7 = sshll.u32 %s7310_s6, 4  ;;  %s140_s17 = sshll.u32 %s10310_s23, 4  ;;  %s98_s7 = int_to_ptr.vmem [resolvable:$true] %s97_s7  ;;  %s141_s17 = int_to_ptr.hbm [resolvable:$true] %s140_s17 }
  0x1b   :  { %103 = dma.hbm_to_vmem [thread:$0]  %s96_s26, 1024, %s98_s7, [#allocation6], %s7304_s8, %s7304_s8, %s7305_s27  }
  0x1c   :  { %s7311_s15 = smov [#allocation10]   ;;  %s7312_s0 = smov [#allocation11]  }
  0x1d   :  { %s127_s5 = sshll.u32 %s7311_s15, 4  ;;  %s142_s21 = sshll.u32 %s7312_s0, 4  ;;  %s128_s5 = int_to_ptr.vmem [resolvable:$true] %s127_s5  ;;  %s143_s21 = int_to_ptr.vmem [resolvable:$true] %s142_s21 }
  0x1e   :  { %133 = dma.hbm_to_vmem [thread:$0]  %s126_s28, 1024, %s128_s5, [#allocation9], %s7304_s8, %s7304_s8, %s7305_s27  }
  0x1f   :  { %148 = dma.hbm_to_vmem [thread:$0]  %s141_s17, 1024, %s143_s21, [#allocation12], %s7304_s8, %s7304_s8, %s7305_s27  }
  0x20   :  { %7293 = dma.done.wait [#allocation3], 256  }
  0x21   :  { %7294 = vsyncadd [#allocation3], 4294967040 }
  0x22   :  { %7295 = dma.done.wait [#allocation6], 13312  }
  0x23   :  { %7296 = vsyncadd [#allocation6], 4294953984 }
  0x24   :  { %7297 = dma.done.wait [#allocation9], 13312  }
  0x25   :  { %7298 = vsyncadd [#allocation9], 4294953984 }
  0x26   :  { %7299 = dma.done.wait [#allocation12], 1024  }
  0x27   :  { %7300 = vsyncadd [#allocation12], 4294966272  ;;  %v7313_v0 = vmov 0   ;;  %s10471_s2 = sld [smem:[#allocation193_spill]]  ;;  %v217_v46 = vlaneseq  ;;  %v10318_v53 = vmov 0.0   ;;  %vm311_vm10 = vcmask 523264  }
  0x28   :  { %7056 = vset.pattern.permute.xlu2 %v7313_v0  ;;  %7055 = vset.pattern.permute.xlu1 %v7313_v0  ;;  %s10472_s28 = sld [smem:[#allocation195_spill]] }
  0x29   :  { %7054 = vset.pattern.permute.xlu0 %v7313_v0  ;;  %v7662_v47 = vshrl.u32 %v217_v46, 7  ;;  %s10475_s30 = sld [smem:[#allocation194_spill]]  ;;  %v7714_v61 = vand.u32 127, %v217_v46 }
  0x2a   :  { %s10481_s27 = sld [smem:[#allocation197_spill]] }
  0x2b   :  { %10474 = vst [vmem:[#allocation19_spill] sm:$0xff] %v7662_v47  ;;  %v7670_v49 = vadd.s32 8, %v7662_v47  ;;  %v7673_v50 = vadd.s32 48, %v7662_v47  ;;  %v7698_v55 = vadd.s32 40, %v7662_v47  ;;  %v7701_v56 = vadd.s32 32, %v7662_v47  ;;  %s10482_s1 = sld [smem:[#allocation198_spill]] }
  0x2c   :  { %v7704_v57 = vadd.s32 56, %v7662_v47  ;;  %v7725_v0 = vadd.s32 16, %v7662_v47  ;;  %s10486_s5 = sld [smem:[#allocation200_spill]] }
  0x2d   :  { %v7483_v1 = vld [vmem:[%s10471_s2 + $0x20] sm:$0xff]  ;;  %v7488_v2 = vld [vmem:[%s10471_s2 + $0x10] sm:$0xff]  ;;  %v7501_v4 = vld [vmem:[%s10471_s2 + $0x28] sm:$0xff]  ;;  %10476 = vst [vmem:[#allocation20_spill] sm:$0xff] %v7670_v49  ;;  %s10489_s21 = sld [smem:[#allocation199_spill]] }
  0x2e   :  { %v7493_v3 = vld [vmem:[%s10471_s2] sm:$0xff]  ;;  %232 = vperm.xlu2 %7056, %v7483_v1   ;;  %226 = vperm.xlu1 %7055, %v7488_v2   ;;  %v7506_v5 = vld [vmem:[%s10471_s2 + $0x18] sm:$0xff]  ;;  %v7511_v6 = vld [vmem:[%s10471_s2 + $0x8] sm:$0xff]  ;;  %10479 = vst [vmem:[#allocation21_spill] sm:$0xff] %v7725_v0  ;;  %s10490_s15 = sld [smem:[#allocation201_spill]] }
  0x2f   :  { %220 = vperm.xlu0 %7054, %v7493_v3   ;;  %v7519_v7 = vld [vmem:[%s10471_s2 + $0x40] sm:$0xff]  ;;  %v7524_v8 = vld [vmem:[%s10471_s2 + $0x38] sm:$0xff]  ;;  %v7529_v9 = vld [vmem:[%s10471_s2 + $0x30] sm:$0xff] }
  0x30   :  { %v7537_v10 = vld [vmem:[%s10471_s2 + $0x58] sm:$0xff]  ;;  %v7542_v11 = vld [vmem:[%s10471_s2 + $0x50] sm:$0xff]  ;;  %v7547_v12 = vld [vmem:[%s10471_s2 + $0x48] sm:$0xff] }
  0x31   :  { %v7555_v13 = vld [vmem:[%s10471_s2 + $0x70] sm:$0xff]  ;;  %v7560_v14 = vld [vmem:[%s10471_s2 + $0x68] sm:$0xff]  ;;  %v7565_v15 = vld [vmem:[%s10471_s2 + $0x60] sm:$0xff] }
  0x32   :  { %v202_v16 = vld [vmem:[%s10472_s28 + $0x8] sm:$0xff]  ;;  %v201_v17 = vld [vmem:[%s10472_s28] sm:$0xff]  ;;  %v7579_v18 = vld [vmem:[%s10471_s2 + $0x78] sm:$0xff]  ;;  %s10473_s2 = sld [smem:[#allocation192_spill]] }
  0x33   :  { %v205_v19 = vld [vmem:[%s10472_s28 + $0x20] sm:$0xff]  ;;  %v204_v20 = vld [vmem:[%s10472_s28 + $0x18] sm:$0xff]  ;;  %v203_v21 = vld [vmem:[%s10472_s28 + $0x10] sm:$0xff] }
  0x34   :  { %v208_v22 = vld [vmem:[%s10472_s28 + $0x38] sm:$0xff]  ;;  %v207_v23 = vld [vmem:[%s10472_s28 + $0x30] sm:$0xff]  ;;  %v206_v24 = vld [vmem:[%s10472_s28 + $0x28] sm:$0xff] }
  0x35   :  { %v211_v25 = vld [vmem:[%s10472_s28 + $0x50] sm:$0xff]  ;;  %v210_v26 = vld [vmem:[%s10472_s28 + $0x48] sm:$0xff]  ;;  %v209_v27 = vld [vmem:[%s10472_s28 + $0x40] sm:$0xff] }
  0x36   :  { %235 = vperm.xlu2 %7056, %v7501_v4   ;;  %229 = vperm.xlu1 %7055, %v7506_v5   ;;  %v214_v28 = vld [vmem:[%s10472_s28 + $0x68] sm:$0xff]  ;;  %v213_v29 = vld [vmem:[%s10472_s28 + $0x60] sm:$0xff]  ;;  %v212_v30 = vld [vmem:[%s10472_s28 + $0x58] sm:$0xff] }
  0x37   :  { %223 = vperm.xlu0 %7054, %v7511_v6   ;;  %v216_v33 = vld [vmem:[%s10472_s28 + $0x78] sm:$0xff]  ;;  %v215_v35 = vld [vmem:[%s10472_s28 + $0x70] sm:$0xff]  ;;  %v7667_v48 = vld [vmem:[%s10475_s30] ss:$0 sm:$0xff] }
  0x38   :  { %v182_v31 = vld [vmem:[%s10473_s2 + $0x30] sm:$0xff]  ;;  %v183_v32 = vld [vmem:[%s10473_s2 + $0x38] sm:$0xff]  ;;  %v180_v36 = vld [vmem:[%s10473_s2 + $0x20] sm:$0xff]  ;;  %vm908_vm0 = vcmp.eq.s32.totalorder %v7667_v48, %v7662_v47  ;;  %vm909_vm1 = vcmp.eq.s32.totalorder %v7667_v48, %v7670_v49  ;;  %vm914_vm3 = vcmp.eq.s32.totalorder %v7667_v48, %v7673_v50  ;;  %vm913_vm4 = vcmp.eq.s32.totalorder %v7667_v48, %v7698_v55 }
  0x39   :  { %v7627_v34 = vpack.c.bf16 %v183_v32, %v182_v31  ;;  %v181_v37 = vld [vmem:[%s10473_s2 + $0x28] sm:$0xff]  ;;  %v178_v39 = vld [vmem:[%s10473_s2 + $0x10] sm:$0xff]  ;;  %v179_v40 = vld [vmem:[%s10473_s2 + $0x18] sm:$0xff]  ;;  %v922_v54 = vsel %vm914_vm3, 1.0, %v10318_v53  ;;  %vm912_vm5 = vcmp.eq.s32.totalorder %v7667_v48, %v7701_v56  ;;  %vm915_vm6 = vcmp.eq.s32.totalorder %v7667_v48, %v7704_v57 }
  0x3a   :  { %v7639_v38 = vpack.c.bf16 %v181_v37, %v180_v36  ;;  %v7648_v41 = vpack.c.bf16 %v179_v40, %v178_v39  ;;  %v176_v42 = vld [vmem:[%s10473_s2] sm:$0xff]  ;;  %v177_v43 = vld [vmem:[%s10473_s2 + $0x8] sm:$0xff]  ;;  %vm7687_vm2 = vmpackc.low %vm909_vm1, %vm908_vm0  ;;  %v921_v62 = vsel %vm913_vm4, 1.0, %v10318_v53  ;;  %v920_v63 = vsel %vm912_vm5, 1.0, %v10318_v53  ;;  %s5565_s2 = sshll.u32 %s10312_s25, 4  ;;  %s5566_s2 = int_to_ptr.hbm [resolvable:$true] %s5565_s2 }
  0x3b   :  { %340 = vmatpush.bf16.msra.mxu0 %v7627_v34  ;;  %v7657_v44 = vpack.c.bf16 %v177_v43, %v176_v42  ;;  %vm910_vm8 = vcmp.eq.s32.totalorder %v7667_v48, %v7725_v0 }
  0x3e   :  { %244 = vperm.xlu2 %7056, %v7519_v7   ;;  %241 = vperm.xlu1 %7055, %v7524_v8  }
  0x3f   :  { %238 = vperm.xlu0 %7054, %v7529_v9   ;;  %341 = vmatpush.bf16.msra.mxu0 %v7639_v38 }
  0x43   :  { %342 = vmatpush.bf16.msra.mxu0 %v7648_v41 }
  0x46   :  { %253 = vperm.xlu2 %7056, %v7537_v10   ;;  %250 = vperm.xlu1 %7055, %v7542_v11  }
  0x47   :  { %247 = vperm.xlu0 %7054, %v7547_v12   ;;  %343 = vmatpush.bf16.msra.mxu0 %v7657_v44 }
  0x4e   :  { %262 = vperm.xlu2 %7056, %v7555_v13   ;;  %259 = vperm.xlu1 %7055, %v7560_v14  }
  0x4f   :  { %256 = vperm.xlu0 %7054, %v7565_v15  }
  0x56   :  { %418 = vperm.xlu2 %7056, %v202_v16   ;;  %413 = vperm.xlu1 %7055, %v201_v17   ;;  %v923_v16 = vsel %vm915_vm6, 1.0, %v10318_v53  ;;  %v7732_v17 = vadd.s32 24, %v7662_v47 }
  0x57   :  { %265 = vperm.xlu0 %7054, %v7579_v18  }
  0x58   :  { %10480 = vst [vmem:[#allocation22_spill] sm:$0xff] %v7732_v17  ;;  %vm911_vm11 = vcmp.eq.s32.totalorder %v7667_v48, %v7732_v17 }
  0x5e   :  { %433 = vperm.xlu2 %7056, %v205_v19   ;;  %428 = vperm.xlu1 %7055, %v204_v20  }
  0x5f   :  { %423 = vperm.xlu0 %7054, %v203_v21  }
  0x66   :  { %448 = vperm.xlu2 %7056, %v208_v22   ;;  %443 = vperm.xlu1 %7055, %v207_v23  }
  0x67   :  { %438 = vperm.xlu0 %7054, %v206_v24   ;;  %v6791_v24 = vld [vmem:[#allocation2 + $0x8] sm:$0xff] }
  0x68   :  { %682 = vmatpush.bf16.msra.mxu2 %v6791_v24 }
  0x6e   :  { %463 = vperm.xlu2 %7056, %v211_v25   ;;  %458 = vperm.xlu1 %7055, %v210_v26   ;;  %v918_v26 = vsel %vm910_vm8, 1.0, %v10318_v53 }
  0x6f   :  { %453 = vperm.xlu0 %7054, %v209_v27   ;;  %v916_v27 = vsel %vm908_vm0, 1.0, %v10318_v53 }
  0x76   :  { %478 = vperm.xlu2 %7056, %v214_v28   ;;  %473 = vperm.xlu1 %7055, %v213_v29   ;;  %v919_v28 = vsel %vm911_vm11, 1.0, %v10318_v53  ;;  %v6790_v29 = vld [vmem:[#allocation2] sm:$0xff] }
  0x77   :  { %468 = vperm.xlu0 %7054, %v212_v30   ;;  %683 = vmatpush.bf16.msra.mxu2 %v6790_v29 }
  0x7e   :  { %488 = vperm.xlu1 %7055, %v216_v33   ;;  %v917_v33 = vsel %vm909_vm1, 1.0, %v10318_v53 }
  0x7f   :  { %483 = vperm.xlu0 %7054, %v215_v35  }
  0x88   :  { %v7660_v45 = vpop.permute.xlu2 %232 }
  0x90   :  { %v7675_v51 = vpop.permute.xlu2 %235 }
  0x98   :  { %v7706_v58 = vpop.permute.xlu2 %244 }
  0x9f   :  { %948 = vadd.xlane.f32.xlu2 %v922_v54 }
  0xa0   :  { %v227_v59 = vpop.permute.xlu1 %226  ;;  %v254_v21 = vpop.permute.xlu2 %253 }
  0xa1   :  { %v221_v60 = vpop.permute.xlu0 %220  ;;  %vm278_vm12 = vcmp.eq.s32.totalorder %v254_v21, %v7714_v61  ;;  %vm269_vm13 = vcmp.eq.s32.totalorder %v227_v59, %v7714_v61 }
  0xa2   :  { %vm267_vm7 = vcmp.eq.s32.totalorder %v221_v60, %v7714_v61  ;;  %v7767_v35 = vsel %vm278_vm12, 1.0, %v10318_v53  ;;  %v285_v37 = vsel %vm269_vm13, 1.0, %v10318_v53  ;;  %v1202_v60 = vshra.s32 %v7493_v3, 1 }
  0xa3   :  { %v283_v22 = vsel %vm267_vm7, 1.0, %v10318_v53  ;;  %vm271_vm7 = vcmp.eq.s32.totalorder %v7660_v45, %v7714_v61  ;;  %v1205_v45 = vshra.s32 %v7506_v5, 1  ;;  %v1204_v5 = vshra.s32 %v7488_v2, 1 }
  0xa7   :  { %946 = vadd.xlane.f32.xlu2 %v921_v62  ;;  %v7784_v62 = vld [vmem:[%s10481_s27] ss:$0 sm:$0xff] }
  0xa8   :  { %944 = vadd.xlane.f32.xlu1 %v920_v63  ;;  %v230_v19 = vpop.permute.xlu1 %229  ;;  %v263_v32 = vpop.permute.xlu2 %262  ;;  %v7789_v63 = vld [vmem:[%s10300_s13] ss:$0 sm:$0xff] }
  0xa9   :  { %950 = vadd.xlane.f32.xlu0 %v923_v16  ;;  %v224_v20 = vpop.permute.xlu0 %223  ;;  %vm270_vm14 = vcmp.eq.s32.totalorder %v230_v19, %v7714_v61  ;;  %vm281_vm12 = vcmp.eq.s32.totalorder %v263_v32, %v7714_v61 }
  0xaa   :  { %vm268_vm9 = vcmp.eq.s32.totalorder %v224_v20, %v7714_v61  ;;  %v286_v39 = vsel %vm270_vm14, 1.0, %v10318_v53  ;;  %v1203_v20 = vshra.s32 %v7511_v6, 1  ;;  %vm651_vm14 = vcmask 261120  }
  0xab   :  { %v284_v23 = vsel %vm268_vm9, 1.0, %v10318_v53  ;;  %v300_v46 = vpack.c.bf16 %v286_v39, %v285_v37  ;;  %vm272_vm9 = vcmp.eq.s32.totalorder %v7675_v51, %v7714_v61 }
  0xac   :  { %v299_v25 = vpack.c.bf16 %v284_v23, %v283_v22  ;;  %v7809_v22 = vld [vmem:[%s10482_s1] ss:$0 sm:$0xff]  ;;  %v288_v51 = vsel %vm272_vm9, 1.0, %v10318_v53  ;;  %vm578_vm9 = vcmask 1041408  }
  0xad   :  { %v7814_v23 = vld [vmem:[%s10301_s14] ss:$0 sm:$0xff] }
  0xae   :  { %5578 = vmatmul.msk.bf16.vlgmr.msra.gmra.mxu0 %vm311_vm10, %v299_v25  ;;  %v287_v25 = vsel %vm271_vm7, 1.0, %v10318_v53 }
  0xaf   :  { %940 = vadd.xlane.f32.xlu2 %v918_v26 }
  0xb0   :  { %936 = vadd.xlane.f32.xlu1 %v916_v27  ;;  %v7755_v30 = vpop.permute.xlu1 %241  ;;  %v419_v54 = vpop.permute.xlu2 %418 }
  0xb1   :  { %942 = vadd.xlane.f32.xlu0 %v919_v28  ;;  %v7757_v31 = vpop.permute.xlu0 %238  ;;  %v495_v6 = vmul.f32 %v7784_v62, %v419_v54  ;;  %v1733_v24 = vmul.f32 %v7789_v63, %v419_v54  ;;  %v7833_v54 = vsel %vm281_vm12, 1.0, %v10318_v53  ;;  %vm553_vm12 = vcmask 31744  }
  0xb3   :  { %v514_v28 = vadd.f32 %v7809_v22, %v495_v6  ;;  %v1752_v29 = vadd.f32 %v7814_v23, %v1733_v24 }
  0xb7   :  { %938 = vadd.xlane.f32.xlu2 %v917_v33 }
  0xb8   :  { %v251_v36 = vpop.permute.xlu1 %250  ;;  %v7822_v26 = vpop.permute.xlu2 %433 }
  0xb9   :  { %vm277_vm15 = vcmp.eq.s32.totalorder %v251_v36, %v7714_v61  ;;  %v7772_v40 = vpop.permute.xlu0 %247 }
  0xba   :  { %v7775_v42 = vsel %vm277_vm15, 1.0, %v10318_v53  ;;  %vm274_vm15 = vcmp.eq.s32.totalorder %v7755_v30, %v7714_v61  ;;  %vm276_vm7 = vcmp.eq.s32.totalorder %v7772_v40, %v7714_v61 }
  0xbb   :  { %v304_v43 = vpack.c.bf16 %v7767_v35, %v7775_v42  ;;  %v290_v30 = vsel %vm274_vm15, 1.0, %v10318_v53  ;;  %v406_v42 = vld [vmem:[%s10298_s11] sm:$0x3]  ;;  %vm5654_vm15 = vmpackc.low %vm913_vm4, %vm912_vm5 }
  0xbe   :  { %5579 = vmatmul.msk.bf16.gmra.mxu0 %vm311_vm10, %v300_v46  ;;  %v301_v46 = vpack.c.bf16 %v288_v51, %v287_v25 }
  0xc0   :  { %v260_v59 = vpop.permute.xlu1 %259 }
  0xc1   :  { %vm280_vm0 = vcmp.eq.s32.totalorder %v260_v59, %v7714_v61  ;;  %v257_v16 = vpop.permute.xlu0 %256 }
  0xc2   :  { %v7793_v19 = vsel %vm280_vm0, 1.0, %v10318_v53  ;;  %vm279_vm1 = vcmp.eq.s32.totalorder %v257_v16, %v7714_v61  ;;  %v1768_v16 = vmax.f32 %v1752_v29, 0.0  ;;  %vm273_vm0 = vcmp.eq.s32.totalorder %v7757_v31, %v7714_v61 }
  0xc3   :  { %v7797_v3 = vsel %vm279_vm1, 1.0, %v10318_v53  ;;  %vm275_vm1 = vcmp.eq.s32.totalorder %v7706_v58, %v7714_v61 }
  0xc5   :  { %1220 = vperm.xlu0 %7054, %v1202_v60   ;;  %v530_v60 = vmax.f32 %v514_v28, 0.0 }
  0xc8   :  { %v414_v27 = vpop.permute.xlu1 %413 }
  0xc9   :  { %v494_v33 = vmul.f32 %v7784_v62, %v414_v27  ;;  %v1732_v36 = vmul.f32 %v7789_v63, %v414_v27  ;;  %v266_v37 = vpop.permute.xlu0 %265  ;;  %1223 = vperm.xlu1 %7055, %v1203_v20   ;;  %v1206_v20 = vshra.s32 %v7483_v1, 1 }
  0xca   :  { %vm282_vm13 = vcmp.eq.s32.totalorder %v266_v37, %v7714_v61 }
  0xcb   :  { %v513_v39 = vadd.f32 %v7809_v22, %v494_v33  ;;  %v1751_v32 = vadd.f32 %v7814_v23, %v1732_v36  ;;  %v7836_v59 = vsel %vm282_vm13, 1.0, %v10318_v53  ;;  %v1207_v33 = vshra.s32 %v7501_v4, 1  ;;  %vm5652_vm13 = vmpackc.low %vm911_vm11, %vm910_vm8 }
  0xcc   :  { %v1208_v36 = vshra.s32 %v7529_v9, 1  ;;  %v1736_v9 = vmul.f32 %v7789_v63, %v7822_v26 }
  0xcd   :  { %v529_v6 = vmax.f32 %v513_v39, 0.0  ;;  %v1767_v24 = vmax.f32 %v1751_v32, 0.0  ;;  %1229 = vperm.xlu0 %7054, %v1205_v45   ;;  %v7847_v45 = vpop.permute.xlu2 %448  ;;  %v1209_v32 = vshra.s32 %v7524_v8, 1  ;;  %v1210_v8 = vshra.s32 %v7519_v7, 1 }
  0xce   :  { %5580 = vmatmul.msk.bf16.gmra.mxu0 %vm311_vm10, %v301_v46  ;;  %v1739_v46 = vmul.f32 %v7789_v63, %v7847_v45  ;;  %v1211_v7 = vshra.s32 %v7547_v12, 1 }
  0xcf   :  { %v7842_v25 = vpack.c.bf16 %v1768_v16, %v1767_v24  ;;  %1226 = vperm.xlu2 %7056, %v1204_v5   ;;  %v631_v51 = vpack.c.bf16 %v530_v60, %v529_v6 }
  0xd0   :  { %v429_v27 = vpop.permute.xlu1 %428  ;;  %v1758_v31 = vadd.f32 %v7814_v23, %v1739_v46 }
  0xd1   :  { %v1735_v28 = vmul.f32 %v7789_v63, %v429_v27  ;;  %v424_v29 = vpop.permute.xlu0 %423  ;;  %5602 = vmatmul.msk.bf16.vlgmr.msra.gmra.mxu2 %vm651_vm14, %v631_v51  ;;  %1232 = vperm.xlu1 %7055, %v1206_v20   ;;  %v497_v37 = vmul.f32 %v7784_v62, %v429_v27  ;;  %v289_v27 = vsel %vm273_vm0, 1.0, %v10318_v53 }
  0xd2   :  { %v1734_v1 = vmul.f32 %v7789_v63, %v424_v29  ;;  %v496_v39 = vmul.f32 %v7784_v62, %v424_v29  ;;  %v1755_v29 = vadd.f32 %v7814_v23, %v1736_v9 }
  0xd3   :  { %v1754_v5 = vadd.f32 %v7814_v23, %v1735_v28  ;;  %v516_v6 = vadd.f32 %v7809_v22, %v497_v37 }
  0xd4   :  { %v1753_v4 = vadd.f32 %v7814_v23, %v1734_v1  ;;  %v515_v24 = vadd.f32 %v7809_v22, %v496_v39  ;;  %v302_v39 = vpack.c.bf16 %v290_v30, %v289_v27  ;;  %v1771_v2 = vmax.f32 %v1755_v29, 0.0 }
  0xd5   :  { %v1770_v60 = vmax.f32 %v1754_v5, 0.0  ;;  %1235 = vperm.xlu0 %7054, %v1207_v33   ;;  %v1214_v27 = vshra.s32 %v7565_v15, 1  ;;  %v498_v29 = vmul.f32 %v7784_v62, %v7822_v26  ;;  %v1216_v26 = vshra.s32 %v7555_v13, 1 }
  0xd6   :  { %v1769_v16 = vmax.f32 %v1753_v4, 0.0  ;;  %v531_v37 = vmax.f32 %v515_v24, 0.0  ;;  %v1213_v24 = vshra.s32 %v7537_v10, 1  ;;  %v1215_v10 = vshra.s32 %v7560_v14, 1 }
  0xd7   :  { %1238 = vperm.xlu2 %7056, %v1208_v36   ;;  %v532_v36 = vmax.f32 %v516_v6, 0.0  ;;  %v517_v58 = vadd.f32 %v7809_v22, %v498_v29 }
  0xd8   :  { %v7867_v20 = vpack.c.bf16 %v1770_v60, %v1769_v16  ;;  %v7869_v51 = vpop.permute.xlu1 %443  ;;  %v1774_v60 = vmax.f32 %v1758_v31, 0.0  ;;  %v1212_v16 = vshra.s32 %v7542_v11, 1  ;;  %v7895_v31 = vpop.permute.xlu2 %463 }
  0xd9   :  { %v1738_v33 = vmul.f32 %v7789_v63, %v7869_v51  ;;  %v439_v28 = vpop.permute.xlu0 %438  ;;  %1241 = vperm.xlu1 %7055, %v1209_v32   ;;  %v632_v12 = vpack.c.bf16 %v532_v36, %v531_v37  ;;  %v1742_v15 = vmul.f32 %v7789_v63, %v7895_v31  ;;  %v291_v37 = vsel %vm275_vm1, 1.0, %v10318_v53 }
  0xda   :  { %v1737_v1 = vmul.f32 %v7789_v63, %v439_v28 }
  0xdb   :  { %v1757_v5 = vadd.f32 %v7814_v23, %v1738_v33 }
  0xdc   :  { %v1756_v4 = vadd.f32 %v7814_v23, %v1737_v1 }
  0xdd   :  { %v1773_v46 = vmax.f32 %v1757_v5, 0.0  ;;  %1244 = vperm.xlu0 %7054, %v1210_v8   ;;  %v292_v5 = vsel %vm276_vm7, 1.0, %v10318_v53 }
  0xde   :  { %v1772_v21 = vmax.f32 %v1756_v4, 0.0  ;;  %5581 = vmatmul.msk.bf16.gmra.mxu0 %vm311_vm10, %v302_v39  ;;  %v1761_v39 = vadd.f32 %v7814_v23, %v1742_v15  ;;  %v501_v15 = vmul.f32 %v7784_v62, %v7847_v45 }
  0xdf   :  { %v7883_v9 = vpack.c.bf16 %v1774_v60, %v1773_v46  ;;  %1247 = vperm.xlu2 %7056, %v1211_v7   ;;  %v1217_v60 = vshra.s32 %v7579_v18, 1 }
  0xe0   :  { %v7885_v32 = vpack.c.bf16 %v1772_v21, %v1771_v2  ;;  %v7887_v6 = vpop.permute.xlu1 %458  ;;  %v499_v21 = vmul.f32 %v7784_v62, %v439_v28  ;;  %v1777_v13 = vmax.f32 %v1761_v39, 0.0 }
  0xe1   :  { %v1741_v30 = vmul.f32 %v7789_v63, %v7887_v6  ;;  %v454_v8 = vpop.permute.xlu0 %453  ;;  %5603 = vmatmul.msk.bf16.gmra.mxu2 %vm651_vm14, %v632_v12  ;;  %1250 = vperm.xlu1 %7055, %v1212_v16   ;;  %v303_v16 = vpack.c.bf16 %v292_v5, %v291_v37 }
  0xe2   :  { %v1740_v11 = vmul.f32 %v7789_v63, %v454_v8  ;;  %v518_v7 = vadd.f32 %v7809_v22, %v499_v21  ;;  %v502_v45 = vmul.f32 %v7784_v62, %v454_v8 }
  0xe3   :  { %v1760_v2 = vadd.f32 %v7814_v23, %v1741_v30 }
  0xe4   :  { %v1759_v33 = vadd.f32 %v7814_v23, %v1740_v11  ;;  %v534_v46 = vmax.f32 %v518_v7, 0.0 }
  0xe5   :  { %v1776_v1 = vmax.f32 %v1760_v2, 0.0  ;;  %1253 = vperm.xlu0 %7054, %v1213_v24   ;;  %v533_v24 = vmax.f32 %v517_v58, 0.0  ;;  %v520_v58 = vadd.f32 %v7809_v22, %v501_v15 }
  0xe6   :  { %v1775_v28 = vmax.f32 %v1759_v33, 0.0 }
  0xe7   :  { %1256 = vperm.xlu2 %7056, %v1214_v27   ;;  %v633_v11 = vpack.c.bf16 %v534_v46, %v533_v24 }
  0xe8   :  { %v7910_v36 = vpack.c.bf16 %v1776_v1, %v1775_v28  ;;  %v7912_v14 = vpop.permute.xlu1 %473 }
  0xe9   :  { %10483 = vst [vmem:[#allocation23_spill] sm:$0xff] %v7912_v14  ;;  %v469_v40 = vpop.permute.xlu0 %468  ;;  %1259 = vperm.xlu1 %7055, %v1215_v10   ;;  %v500_v10 = vmul.f32 %v7784_v62, %v7869_v51 }
  0xea   :  { %v1743_v4 = vmul.f32 %v7789_v63, %v469_v40 }
  0xec   :  { %v1762_v12 = vadd.f32 %v7814_v23, %v1743_v4  ;;  %v521_v4 = vadd.f32 %v7809_v22, %v502_v45 }
  0xed   :  { %1262 = vperm.xlu0 %7054, %v1216_v26   ;;  %v519_v26 = vadd.f32 %v7809_v22, %v500_v10 }
  0xee   :  { %v1778_v30 = vmax.f32 %v1762_v12, 0.0  ;;  %5582 = vmatmul.msk.bf16.gmra.mxu0 %vm311_vm10, %v303_v16  ;;  %v537_v46 = vmax.f32 %v521_v4, 0.0  ;;  %v10485_v16 = vpack.c.bf16 %v7793_v19, %v7797_v3  ;;  %v505_v19 = vmul.f32 %v7784_v62, %v469_v40  ;;  %v7971_v40 = vpop.permute.xlu2 %478 }
  0xef   :  { %1265 = vperm.xlu2 %7056, %v1217_v60   ;;  %v535_v5 = vmax.f32 %v519_v26, 0.0  ;;  %v504_v3 = vmul.f32 %v7784_v62, %v7895_v31  ;;  %10488 = vst [vmem:[#allocation25_spill] sm:$0xff] %v7971_v40  ;;  %v507_v31 = vmul.f32 %v7784_v62, %v7971_v40 }
  0xf0   :  { %v7923_v27 = vpack.c.bf16 %v1778_v30, %v1777_v13  ;;  %v489_v21 = vpop.permute.xlu1 %488  ;;  %v524_v12 = vadd.f32 %v7809_v22, %v505_v19 }
  0xf1   :  { %v1747_v2 = vmul.f32 %v7789_v63, %v489_v21  ;;  %v484_v33 = vpop.permute.xlu0 %483  ;;  %5604 = vmatmul.msk.bf16.gmra.mxu2 %vm651_vm14, %v633_v11  ;;  %v523_v24 = vadd.f32 %v7809_v22, %v504_v3  ;;  %v10487_v11 = vpack.c.bf16 %v7836_v59, %v7833_v54 }
  0xf2   :  { %v1746_v18 = vmul.f32 %v7789_v63, %v484_v33  ;;  %v536_v63 = vmax.f32 %v520_v58, 0.0  ;;  %v540_v13 = vmax.f32 %v524_v12, 0.0  ;;  %v6788_v12 = vld [vmem:[%s10489_s21 + $0x30] sm:$0xff] }
  0xf3   :  { %v1766_v29 = vadd.f32 %v7814_v23, %v1747_v2  ;;  %v539_v30 = vmax.f32 %v523_v24, 0.0  ;;  %v6787_v24 = vld [vmem:[%s10489_s21 + $0x28] sm:$0xff] }
  0xf4   :  { %v1765_v1 = vadd.f32 %v7814_v23, %v1746_v18  ;;  %v634_v51 = vpack.c.bf16 %v536_v63, %v535_v5  ;;  %v503_v23 = vmul.f32 %v7784_v62, %v7887_v6  ;;  %v580_v6 = vsel %vm578_vm9, %v406_v42, 0 }
  0xf5   :  { %v1782_v28 = vmax.f32 %v1766_v29, 0.0  ;;  %589 = vmatpush.bf16.msra.mxu1 %v580_v6  ;;  %v636_v2 = vpack.c.bf16 %v540_v13, %v539_v30  ;;  %v506_v18 = vmul.f32 %v7784_v62, %v7912_v14  ;;  %v526_v29 = vadd.f32 %v7809_v22, %v507_v31  ;;  %v6786_v30 = vld [vmem:[%s10489_s21 + $0x20] sm:$0xff]  ;;  %v6784_v31 = vld [vmem:[%s10489_s21 + $0x10] sm:$0xff] }
  0xf6   :  { %v1781_v7 = vmax.f32 %v1765_v1, 0.0  ;;  %v522_v39 = vadd.f32 %v7809_v22, %v503_v23 }
  0xf7   :  { %v525_v10 = vadd.f32 %v7809_v22, %v506_v18  ;;  %v542_v54 = vmax.f32 %v526_v29, 0.0  ;;  %v6783_v29 = vld [vmem:[%s10489_s21 + $0x8] sm:$0xff] }
  0xf8   :  { %v7935_v37 = vpack.c.bf16 %v1782_v28, %v1781_v7  ;;  %v538_v60 = vmax.f32 %v522_v39, 0.0  ;;  %v509_v28 = vmul.f32 %v7784_v62, %v489_v21  ;;  %v508_v7 = vmul.f32 %v7784_v62, %v484_v33 }
  0xf9   :  { %v541_v1 = vmax.f32 %v525_v10, 0.0 }
  0xfa   :  { %10484 = vst [vmem:[#allocation24_spill] sm:$0xff] %v7935_v37  ;;  %v635_v35 = vpack.c.bf16 %v538_v60, %v537_v46  ;;  %v528_v5 = vadd.f32 %v7809_v22, %v509_v28  ;;  %v527_v63 = vadd.f32 %v7809_v22, %v508_v7 }
  0xfb   :  { %v637_v59 = vpack.c.bf16 %v542_v54, %v541_v1 }
  0xfc   :  { %v543_v23 = vmax.f32 %v527_v63, 0.0 }
  0xfe   :  { %5583 = vmatmul.msk.bf16.gmra.mxu0 %vm311_vm10, %v304_v43  ;;  %v403_v43 = vld [vmem:[%s10486_s5] sm:$0x3] }
  0xff   :  { %v750_v8 = vsel %vm578_vm9, %v403_v43, 0 }
 0x100   :  { %759 = vmatpush.bf16.msra.mxu3 %v750_v8  ;;  %v6789_v8 = vld [vmem:[%s10489_s21 + $0x38] sm:$0xff] }
 0x101   :  { %5605 = vmatmul.msk.bf16.gmra.mxu2 %vm651_vm14, %v634_v51  ;;  %v544_v51 = vmax.f32 %v528_v5, 0.0  ;;  %849 = vmatpush.bf16.msrb.mxu1 %v6789_v8 }
 0x103   :  { %v638_v39 = vpack.c.bf16 %v544_v51, %v543_v23 }
 0x105   :  { %850 = vmatpush.bf16.msrb.mxu1 %v6788_v12 }
 0x109   :  { %851 = vmatpush.bf16.msrb.mxu1 %v6787_v24 }
 0x10d   :  { %852 = vmatpush.bf16.msrb.mxu1 %v6786_v30 }
 0x10e   :  { %5584 = vmatmul.msk.bf16.gmra.mxu0 %vm311_vm10, %v10485_v16 }
 0x111   :  { %5606 = vmatmul.msk.bf16.gmra.mxu2 %vm651_vm14, %v635_v35 }
 0x112   :  { %v949_v50 = vpop.xlane.xlu2 %948 }
 0x11a   :  { %v947_v48 = vpop.xlane.xlu2 %946 }
 0x11e   :  { %5585 = vmatmul.msk.bf16.gmra.mxu0 %vm311_vm10, %v10487_v11  ;;  %v6785_v11 = vld [vmem:[%s10489_s21 + $0x18] sm:$0xff] }
 0x11f   :  { %853 = vmatpush.bf16.msrb.mxu1 %v6785_v11 }
 0x121   :  { %5607 = vmatmul.msk.bf16.gmra.mxu2 %vm651_vm14, %v636_v2 }
 0x123   :  { %854 = vmatpush.bf16.msrb.mxu1 %v6784_v31 }
 0x127   :  { %855 = vmatpush.bf16.msrb.mxu1 %v6783_v29 }
 0x12b   :  { %v345_v15 = vpop.f32.mrf.mxu0 }
 0x131   :  { %5608 = vmatmul.msk.bf16.gmra.mxu2 %vm651_vm14, %v637_v59 }
 0x133   :  { %v347_v26 = vpop.f32.mrf.mxu0 }
 0x134   :  { %v545_v58 = vpack.c.bf16 %v347_v26, %v345_v15  ;;  %v6782_v15 = vld [vmem:[%s10489_s21] sm:$0xff] }
 0x135   :  { %856 = vmatpush.bf16.msrb.mxu1 %v6782_v15 }
 0x136   :  { %5586 = vmatmul.msk.bf16.vlgmr.msra.gmra.mxu1 %vm553_vm12, %v545_v58  ;;  %5610 = vmatmul.msk.bf16.vlgmr.msra.gmra.mxu3 %vm553_vm12, %v545_v58 }
 0x13b   :  { %v350_v45 = vpop.f32.mrf.mxu0 }
 0x141   :  { %5609 = vmatmul.msk.bf16.gmra.mxu2 %vm651_vm14, %v638_v39 }
 0x143   :  { %v352_v21 = vpop.f32.mrf.mxu0 }
 0x144   :  { %v546_v4 = vpack.c.bf16 %v352_v21, %v350_v45 }
 0x146   :  { %5587 = vmatmul.msk.bf16.gmra.mxu1 %vm553_vm12, %v546_v4  ;;  %5611 = vmatmul.msk.bf16.gmra.mxu3 %vm553_vm12, %v546_v4 }
 0x14b   :  { %v355_v62 = vpop.f32.mrf.mxu0 }
 0x153   :  { %v357_v33 = vpop.f32.mrf.mxu0 }
 0x154   :  { %v547_v60 = vpack.c.bf16 %v357_v33, %v355_v62  ;;  %v685_v10 = vpop.f32.mrf.mxu2 }
 0x156   :  { %5588 = vmatmul.msk.bf16.gmra.mxu1 %vm553_vm12, %v547_v60  ;;  %5612 = vmatmul.msk.bf16.gmra.mxu3 %vm553_vm12, %v547_v60 }
 0x15b   :  { %v360_v22 = vpop.f32.mrf.mxu0 }
 0x15c   :  { %v687_v54 = vpop.f32.mrf.mxu2 }
 0x163   :  { %v362_v46 = vpop.f32.mrf.mxu0 }
 0x164   :  { %v548_v16 = vpack.c.bf16 %v362_v46, %v360_v22  ;;  %v690_v7 = vpop.f32.mrf.mxu2 }
 0x166   :  { %5589 = vmatmul.msk.bf16.gmra.mxu1 %vm553_vm12, %v548_v16  ;;  %5613 = vmatmul.msk.bf16.gmra.mxu3 %vm553_vm12, %v548_v16 }
 0x16b   :  { %v365_v35 = vpop.f32.mrf.mxu0 }
 0x16c   :  { %v692_v26 = vpop.f32.mrf.mxu2 }
 0x173   :  { %v367_v42 = vpop.f32.mrf.mxu0 }
 0x174   :  { %v549_v43 = vpack.c.bf16 %v367_v42, %v365_v35  ;;  %v695_v23 = vpop.f32.mrf.mxu2 }
 0x176   :  { %5590 = vmatmul.msk.bf16.gmra.mxu1 %vm553_vm12, %v549_v43  ;;  %5614 = vmatmul.msk.bf16.gmra.mxu3 %vm553_vm12, %v549_v43 }
 0x17b   :  { %v370_v6 = vpop.f32.mrf.mxu0 }
 0x17c   :  { %v697_v21 = vpop.f32.mrf.mxu2 }
 0x183   :  { %v372_v19 = vpop.f32.mrf.mxu0 }
 0x184   :  { %v550_v3 = vpack.c.bf16 %v372_v19, %v370_v6  ;;  %v700_v22 = vpop.f32.mrf.mxu2 }
 0x186   :  { %5591 = vmatmul.msk.bf16.gmra.mxu1 %vm553_vm12, %v550_v3  ;;  %5615 = vmatmul.msk.bf16.gmra.mxu3 %vm553_vm12, %v550_v3 }
 0x18b   :  { %v375_v13 = vpop.f32.mrf.mxu0 }
 0x18c   :  { %v702_v16 = vpop.f32.mrf.mxu2 }
 0x193   :  { %v377_v2 = vpop.f32.mrf.mxu0 }
 0x194   :  { %v551_v18 = vpack.c.bf16 %v377_v2, %v375_v13  ;;  %v705_v19 = vpop.f32.mrf.mxu2 }
 0x196   :  { %5592 = vmatmul.msk.bf16.gmra.mxu1 %vm553_vm12, %v551_v18  ;;  %5616 = vmatmul.msk.bf16.gmra.mxu3 %vm553_vm12, %v551_v18 }
 0x19b   :  { %v380_v1 = vpop.f32.mrf.mxu0 }
 0x19c   :  { %v707_v30 = vpop.f32.mrf.mxu2 }
 0x1a3   :  { %v382_v59 = vpop.f32.mrf.mxu0 }
 0x1a4   :  { %v552_v28 = vpack.c.bf16 %v382_v59, %v380_v1  ;;  %v710_v2 = vpop.f32.mrf.mxu2 }
 0x1a6   :  { %5593 = vmatmul.msk.bf16.gmra.mxu1 %vm553_vm12, %v552_v28  ;;  %5617 = vmatmul.msk.bf16.gmra.mxu3 %vm553_vm12, %v552_v28 }
 0x1ac   :  { %v712_v1 = vpop.f32.mrf.mxu2 }
 0x1b3   :  { %v591_v58 = vpop.f32.mrf.mxu1 }
 0x1b4   :  { %v725_v63 = vmul.f32 %v685_v10, %v591_v58 }
 0x1bb   :  { %v593_v5 = vpop.f32.mrf.mxu1 }
 0x1bc   :  { %v726_v51 = vmul.f32 %v687_v54, %v593_v5 }
 0x1be   :  { %v741_v45 = vpack.c.bf16 %v726_v51, %v725_v63 }
 0x1c0   :  { %857 = vmatmul.bf16.vlgmr.msrb.gmra.mxu1 %v741_v45 }
 0x1c3   :  { %v596_v39 = vpop.f32.mrf.mxu1 }
 0x1c4   :  { %v727_v62 = vmul.f32 %v690_v7, %v596_v39  ;;  %v715_v7 = vpop.f32.mrf.mxu2  ;;  %v8025_v39 = vpop.f32.mrf.mxu3 }
 0x1cb   :  { %v598_v4 = vpop.f32.mrf.mxu1 }
 0x1cc   :  { %v728_v33 = vmul.f32 %v692_v26, %v598_v4  ;;  %v717_v5 = vpop.f32.mrf.mxu2 }
 0x1ce   :  { %v742_v60 = vpack.c.bf16 %v728_v33, %v727_v62  ;;  %v8027_v62 = vpop.f32.mrf.mxu3 }
 0x1d0   :  { %862 = vmatmul.bf16.gmra.mxu1 %v742_v60 }
 0x1d3   :  { %v601_v46 = vpop.f32.mrf.mxu1 }
 0x1d4   :  { %v729_v42 = vmul.f32 %v695_v23, %v601_v46 }
 0x1db   :  { %v603_v35 = vpop.f32.mrf.mxu1 }
 0x1dc   :  { %v730_v43 = vmul.f32 %v697_v21, %v603_v35  ;;  %v720_v21 = vpop.f32.mrf.mxu2  ;;  %v766_v35 = vpop.f32.mrf.mxu3 }
 0x1de   :  { %v743_v6 = vpack.c.bf16 %v730_v43, %v729_v42 }
 0x1e0   :  { %867 = vmatmul.bf16.gmra.mxu1 %v743_v6 }
 0x1e3   :  { %v606_v8 = vpop.f32.mrf.mxu1 }
 0x1e4   :  { %v731_v12 = vmul.f32 %v700_v22, %v606_v8  ;;  %v722_v33 = vpop.f32.mrf.mxu2  ;;  %v768_v42 = vpop.f32.mrf.mxu3 }
 0x1eb   :  { %v608_v3 = vpop.f32.mrf.mxu1 }
 0x1ec   :  { %v732_v24 = vmul.f32 %v702_v16, %v608_v3  ;;  %v771_v8 = vpop.f32.mrf.mxu3 }
 0x1ee   :  { %v744_v13 = vpack.c.bf16 %v732_v24, %v731_v12 }
 0x1f0   :  { %872 = vmatmul.bf16.gmra.mxu1 %v744_v13 }
 0x1f3   :  { %v611_v11 = vpop.f32.mrf.mxu1 }
 0x1f4   :  { %v733_v31 = vmul.f32 %v705_v19, %v611_v11  ;;  %v773_v3 = vpop.f32.mrf.mxu3 }
 0x1fb   :  { %v613_v18 = vpop.f32.mrf.mxu1 }
 0x1fc   :  { %v734_v10 = vmul.f32 %v707_v30, %v613_v18  ;;  %v776_v24 = vpop.f32.mrf.mxu3 }
 0x1fe   :  { %v745_v29 = vpack.c.bf16 %v734_v10, %v733_v31 }
 0x200   :  { %877 = vmatmul.bf16.gmra.mxu1 %v745_v29 }
 0x203   :  { %v616_v15 = vpop.f32.mrf.mxu1 }
 0x204   :  { %v735_v59 = vmul.f32 %v710_v2, %v616_v15  ;;  %v778_v30 = vpop.f32.mrf.mxu3 }
 0x20b   :  { %v618_v54 = vpop.f32.mrf.mxu1 }
 0x20c   :  { %v736_v28 = vmul.f32 %v712_v1, %v618_v54  ;;  %v781_v18 = vpop.f32.mrf.mxu3 }
 0x20e   :  { %v746_v26 = vpack.c.bf16 %v736_v28, %v735_v59 }
 0x210   :  { %882 = vmatmul.bf16.gmra.mxu1 %v746_v26 }
 0x213   :  { %v621_v58 = vpop.f32.mrf.mxu1 }
 0x214   :  { %v737_v51 = vmul.f32 %v715_v7, %v621_v58  ;;  %v783_v10 = vpop.f32.mrf.mxu3 }
 0x21b   :  { %v623_v63 = vpop.f32.mrf.mxu1 }
 0x21c   :  { %v738_v23 = vmul.f32 %v717_v5, %v623_v63  ;;  %v786_v15 = vpop.f32.mrf.mxu3 }
 0x21e   :  { %v747_v45 = vpack.c.bf16 %v738_v23, %v737_v51 }
 0x220   :  { %887 = vmatmul.bf16.gmra.mxu1 %v747_v45  ;;  %v404_v45 = vld [vmem:[%s10490_s15] sm:$0x3] }
 0x223   :  { %v626_v4 = vpop.f32.mrf.mxu1 }
 0x224   :  { %v739_v22 = vmul.f32 %v720_v21, %v626_v4  ;;  %v788_v59 = vpop.f32.mrf.mxu3  ;;  %v1026_v21 = vsel %vm578_vm9, %v404_v45, 0 }
 0x225   :  { %1035 = vmatpush.bf16.msrb.mxu2 %v1026_v21 }
 0x228   :  { %5658 = vmatmul.msk.bf16.vlgmr.msrb.gmra.mxu2 %vm553_vm12, %v7657_v44 }
 0x22b   :  { %v628_v60 = vpop.f32.mrf.mxu1 }
 0x22c   :  { %v740_v46 = vmul.f32 %v722_v33, %v628_v60  ;;  %v791_v26 = vpop.f32.mrf.mxu3 }
 0x22e   :  { %v748_v16 = vpack.c.bf16 %v740_v46, %v739_v22 }
 0x230   :  { %892 = vmatmul.bf16.gmra.mxu1 %v748_v16 }
 0x234   :  { %v793_v5 = vpop.f32.mrf.mxu3 }
 0x238   :  { %5659 = vmatmul.msk.bf16.gmra.mxu2 %vm553_vm12, %v7648_v41 }
 0x23c   :  { %v796_v51 = vpop.f32.mrf.mxu3 }
 0x23d   :  { %v858_v43 = vpop.f32.mrf.mxu1 }
 0x244   :  { %v798_v4 = vpop.f32.mrf.mxu3 }
 0x245   :  { %v860_v6 = vpop.f32.mrf.mxu1 }
 0x248   :  { %5660 = vmatmul.msk.bf16.gmra.mxu2 %vm553_vm12, %v7639_v38 }
 0x24d   :  { %v863_v19 = vpop.f32.mrf.mxu1 }
 0x255   :  { %v865_v12 = vpop.f32.mrf.mxu1 }
 0x258   :  { %5661 = vmatmul.msk.bf16.gmra.mxu2 %vm553_vm12, %v7627_v34  ;;  %v945_v34 = vpop.xlane.xlu1 %944 }
 0x25d   :  { %v868_v13 = vpop.f32.mrf.mxu1 }
 0x260   :  { %v937_v38 = vpop.xlane.xlu1 %936 }
 0x261   :  { %v952_v52 = vmax.f32 %v937_v38, 1.0 }
 0x263   :  { %7067 = vrcp.f32 %v952_v52 }
 0x265   :  { %v870_v11 = vpop.f32.mrf.mxu1 }
 0x269   :  { %v7068_v56 = vpop.eup %7067 }
 0x26d   :  { %v873_v2 = vpop.f32.mrf.mxu1 }
 0x26e   :  { %v874_v21 = vadd.f32 %v873_v2, %v776_v24  ;;  %v957_v24 = vmax.f32 %v947_v48, 1.0 }
 0x270   :  { %7069 = vrcp.f32 %v957_v24 }
 0x275   :  { %v875_v31 = vpop.f32.mrf.mxu1 }
 0x276   :  { %v876_v45 = vadd.f32 %v875_v31, %v778_v30  ;;  %v956_v30 = vmax.f32 %v945_v34, 1.0  ;;  %v958_v31 = vmax.f32 %v949_v50, 1.0 }
 0x278   :  { %7071 = vrcp.f32 %v956_v30 }
 0x27d   :  { %v878_v29 = vpop.f32.mrf.mxu1 }
 0x27e   :  { %v879_v1 = vadd.f32 %v878_v29, %v781_v18 }
 0x285   :  { %v880_v54 = vpop.f32.mrf.mxu1 }
 0x286   :  { %v881_v40 = vadd.f32 %v880_v54, %v783_v10 }
 0x288   :  { %v972_v44 = vpack.c.bf16 %v881_v40, %v879_v1 }
 0x28d   :  { %v883_v28 = vpop.f32.mrf.mxu1 }
 0x28e   :  { %v884_v37 = vadd.f32 %v883_v28, %v786_v15 }
 0x295   :  { %v885_v7 = vpop.f32.mrf.mxu1 }
 0x296   :  { %v886_v29 = vadd.f32 %v885_v7, %v788_v59  ;;  %v864_v59 = vadd.f32 %v863_v19, %v766_v35  ;;  %v951_v19 = vpop.xlane.xlu0 %950 }
 0x298   :  { %v973_v14 = vpack.c.bf16 %v886_v29, %v884_v37  ;;  %v10323_v37 = vmov 1.0|1.0  }
 0x29d   :  { %v888_v58 = vpop.f32.mrf.mxu1 }
 0x29e   :  { %v889_v18 = vadd.f32 %v888_v58, %v791_v26  ;;  %v866_v26 = vadd.f32 %v865_v12, %v768_v42  ;;  %v941_v12 = vpop.xlane.xlu2 %940 }
 0x29f   :  { %v954_v1 = vmax.f32 %v941_v12, 1.0 }
 0x2a0   :  { %v969_v10 = vpack.c.bf16 %v866_v26, %v864_v59  ;;  %v7062_v26 = vld [vmem:[%s10297_s10] ss:$0 sm:$0xff]  ;;  %s11153_s10 = sld [smem:[#allocation196_spill]] }
 0x2a5   :  { %v890_v63 = vpop.f32.mrf.mxu1 }
 0x2a6   :  { %v891_v46 = vadd.f32 %v890_v63, %v793_v5  ;;  %v869_v5 = vadd.f32 %v868_v13, %v771_v8  ;;  %v939_v54 = vpop.xlane.xlu2 %938  ;;  %v7070_v63 = vpop.eup %7069 }
 0x2a7   :  { %v953_v28 = vmax.f32 %v939_v54, 1.0 }
 0x2a8   :  { %v974_v53 = vpack.c.bf16 %v891_v46, %v889_v18 }
 0x2ab   :  { %v1037_v40 = vpop.f32.mrf.mxu2 }
 0x2ad   :  { %v893_v23 = vpop.f32.mrf.mxu1 }
 0x2ae   :  { %v894_v60 = vadd.f32 %v893_v23, %v796_v51  ;;  %v871_v51 = vadd.f32 %v870_v11, %v773_v3  ;;  %v971_v23 = vpack.c.bf16 %v876_v45, %v874_v21  ;;  %v943_v11 = vpop.xlane.xlu0 %942 }
 0x2af   :  { %v955_v2 = vmax.f32 %v943_v11, 1.0 }
 0x2b0   :  { %v970_v58 = vpack.c.bf16 %v871_v51, %v869_v5 }
 0x2b1   :  { %7073 = vrcp.f32 %v955_v2 }
 0x2b2   :  { %7075 = vrcp.f32 %v958_v31 }
 0x2b3   :  { %7077 = vrcp.f32 %v954_v1 }
 0x2b4   :  { %7079 = vrcp.f32 %v953_v28 }
 0x2b5   :  { %v895_v33 = vpop.f32.mrf.mxu1 }
 0x2b6   :  { %v896_v22 = vadd.f32 %v895_v33, %v798_v4  ;;  %v7072_v4 = vpop.eup %7071  ;;  %v959_v33 = vmax.f32 %v951_v19, 1.0 }
 0x2b8   :  { %v975_v16 = vpack.c.bf16 %v896_v22, %v894_v60  ;;  %v7074_v22 = vpop.eup %7073  ;;  %7081 = vrcp.f32 %v959_v33 }
 0x2ba   :  { %976 = vmatpush.bf16.msrb.mxu3 %v975_v16  ;;  %v7076_v16 = vpop.eup %7075 }
 0x2bb   :  { %v7078_v18 = vpop.eup %7077 }
 0x2be   :  { %977 = vmatpush.bf16.msrb.mxu3 %v974_v53  ;;  %v861_v53 = vadd.f32 %v860_v6, %v8027_v62 }
 0x2c2   :  { %978 = vmatpush.bf16.msrb.mxu3 %v973_v14  ;;  %v859_v14 = vadd.f32 %v858_v43, %v8025_v39  ;;  %v1039_v39 = vpop.f32.mrf.mxu2 }
 0x2c4   :  { %v968_v41 = vpack.c.bf16 %v861_v53, %v859_v14 }
 0x2c6   :  { %979 = vmatpush.bf16.msrb.mxu3 %v972_v44 }
 0x2ca   :  { %980 = vmatpush.bf16.msrb.mxu3 %v971_v23  ;;  %v1042_v43 = vpop.f32.mrf.mxu2  ;;  %v7080_v23 = vpop.eup %7079 }
 0x2cb   :  { %v7082_v34 = vpop.eup %7081 }
 0x2ce   :  { %981 = vmatpush.bf16.msrb.mxu3 %v970_v58 }
 0x2d2   :  { %982 = vmatpush.bf16.msrb.mxu3 %v969_v10  ;;  %v1044_v8 = vpop.f32.mrf.mxu2 }
 0x2d6   :  { %983 = vmatpush.bf16.msrb.mxu3 %v968_v41 }
 0x2d9   :  { %5651 = vmatmul.msk.bf16.vlgmr.msrb.gmra.mxu3 %vm7687_vm2, %v10323_v37  ;;  %vm5656_vm2 = vmpackc.low %vm915_vm6, %vm914_vm3 }
 0x2da   :  { %v1047_v3 = vpop.f32.mrf.mxu2 }
 0x2e2   :  { %v1049_v15 = vpop.f32.mrf.mxu2 }
 0x2e9   :  { %5653 = vmatmul.msk.bf16.gmra.mxu3 %vm5652_vm13, %v10323_v37 }
 0x2ea   :  { %v1052_v29 = vpop.f32.mrf.mxu2 }
 0x2f2   :  { %v1054_v19 = vpop.f32.mrf.mxu2 }
 0x2f9   :  { %5655 = vmatmul.msk.bf16.gmra.mxu3 %vm5654_vm15, %v10323_v37 }
 0x309   :  { %5657 = vmatmul.msk.bf16.gmra.mxu3 %vm5656_vm2, %v10323_v37  ;;  %v6999_v37 = vld [vmem:[#allocation8 + $0x2f4] sm:$0xf0] }
 0x35c   :  { %v985_v55 = vpop.f32.mrf.mxu3 }
 0x35d   :  { %v1005_v62 = vmul.f32 %v7068_v56, %v985_v55 }
 0x35f   :  { %v8067_v35 = vadd.f32 %v1037_v40, %v1005_v62 }
 0x361   :  { %v1060_v11 = vadd.f32 %v7062_v26, %v8067_v35 }
 0x363   :  { %vm1068_vm12 = vcmp.gt.f32.partialorder %v1060_v11, 0.0 }
 0x364   :  { %v987_v42 = vpop.f32.mrf.mxu3 }
 0x365   :  { %v1006_v53 = vmul.f32 %v7080_v23, %v987_v42 }
 0x367   :  { %v1040_v55 = vadd.f32 %v1039_v39, %v1006_v53  ;;  %v1120_v53 = vmul.u32 2, %v7662_v47  ;;  %v6986_v47 = vld [vmem:[#allocation8 + $0x28c] sm:$0xf0] }
 0x369   :  { %vm1124_vm0 = vcmp.eq.s32.totalorder %v7714_v61, %v1120_v53 }
 0x36c   :  { %v990_v6 = vpop.f32.mrf.mxu3 }
 0x36d   :  { %v1007_v58 = vmul.f32 %v7078_v18, %v990_v6  ;;  %v1061_v6 = vadd.f32 %v7062_v26, %v1040_v55 }
 0x36f   :  { %v1043_v52 = vadd.f32 %v1042_v43, %v1007_v58  ;;  %v1077_v1 = vmin.f32 %v1061_v6, 0.0  ;;  %vm1069_vm7 = vcmp.gt.f32.partialorder %v1061_v6, 0.0 }
 0x374   :  { %v992_v57 = vpop.f32.mrf.mxu3 }
 0x375   :  { %v1008_v44 = vmul.f32 %v7074_v22, %v992_v57 }
 0x377   :  { %v1045_v10 = vadd.f32 %v1044_v8, %v1008_v44 }
 0x379   :  { %v1063_v62 = vadd.f32 %v7062_v26, %v1045_v10 }
 0x37b   :  { %v1079_v8 = vmin.f32 %v1063_v62, 0.0  ;;  %vm1071_vm8 = vcmp.gt.f32.partialorder %v1063_v62, 0.0 }
 0x37c   :  { %v995_v13 = vpop.f32.mrf.mxu3 }
 0x37d   :  { %v1009_v46 = vmul.f32 %v7072_v4, %v995_v13  ;;  %v1090_v39 = vmul.f32 1.442695, %v1079_v8  ;;  %v1159_v8 = vadd.s32 1, %v1120_v53 }
 0x37f   :  { %v1048_v5 = vadd.f32 %v1047_v3, %v1009_v46  ;;  %v1062_v3 = vadd.f32 %v7062_v26, %v1043_v52  ;;  %vm1163_vm2 = vcmp.eq.s32.totalorder %v7714_v61, %v1159_v8  ;;  %v6988_v8 = vld [vmem:[#allocation8 + $0x2a4] sm:$0xf] }
 0x381   :  { %v1064_v38 = vadd.f32 %v7062_v26, %v1048_v5  ;;  %v1078_v2 = vmin.f32 %v1062_v3, 0.0  ;;  %vm1070_vm11 = vcmp.gt.f32.partialorder %v1062_v3, 0.0 }
 0x383   :  { %v1080_v57 = vmin.f32 %v1064_v38, 0.0  ;;  %v1088_v54 = vmul.f32 1.442695, %v1078_v2  ;;  %vm1072_vm6 = vcmp.gt.f32.partialorder %v1064_v38, 0.0 }
 0x384   :  { %v997_v7 = vpop.f32.mrf.mxu3 }
 0x385   :  { %v1010_v60 = vmul.f32 %v7070_v63, %v997_v7  ;;  %v1092_v30 = vmul.f32 1.442695, %v1080_v57  ;;  %v1086_v7 = vmul.f32 1.442695, %v1077_v1 }
 0x387   :  { %v1050_v21 = vadd.f32 %v1049_v15, %v1010_v60  ;;  %v1076_v15 = vmin.f32 %v1060_v11, 0.0 }
 0x389   :  { %v1065_v14 = vadd.f32 %v7062_v26, %v1050_v21  ;;  %v1084_v4 = vmul.f32 1.442695, %v1076_v15 }
 0x38b   :  { %v1081_v48 = vmin.f32 %v1065_v14, 0.0  ;;  %vm1073_vm5 = vcmp.gt.f32.partialorder %v1065_v14, 0.0 }
 0x38c   :  { %v1000_v45 = vpop.f32.mrf.mxu3 }
 0x38d   :  { %v1011_v51 = vmul.f32 %v7076_v16, %v1000_v45  ;;  %v1094_v42 = vmul.f32 1.442695, %v1081_v48 }
 0x38f   :  { %v1053_v59 = vadd.f32 %v1052_v29, %v1011_v51 }
 0x391   :  { %v1066_v41 = vadd.f32 %v7062_v26, %v1053_v59 }
 0x393   :  { %v1082_v40 = vmin.f32 %v1066_v41, 0.0  ;;  %vm1074_vm3 = vcmp.gt.f32.partialorder %v1066_v41, 0.0 }
 0x394   :  { %v1002_v56 = vpop.f32.mrf.mxu3 }
 0x395   :  { %v1012_v50 = vmul.f32 %v7082_v34, %v1002_v56  ;;  %v1096_v24 = vmul.f32 1.442695, %v1082_v40 }
 0x397   :  { %v1055_v12 = vadd.f32 %v1054_v19, %v1012_v50  ;;  %7083 = vpow2.f32 %v1096_v24 }
 0x398   :  { %7085 = vpow2.f32 %v1094_v42 }
 0x399   :  { %v1067_v13 = vadd.f32 %v7062_v26, %v1055_v12  ;;  %7087 = vpow2.f32 %v1092_v30  ;;  %v1121_v26 = vmul.u32 2, %v7670_v49  ;;  %v1123_v12 = vmul.u32 2, %v7732_v17 }
 0x39b   :  { %v1083_v43 = vmin.f32 %v1067_v13, 0.0  ;;  %vm1075_vm4 = vcmp.gt.f32.partialorder %v1067_v13, 0.0  ;;  %vm1125_vm1 = vcmp.eq.s32.totalorder %v7714_v61, %v1121_v26  ;;  %vm1127_vm15 = vcmp.eq.s32.totalorder %v7714_v61, %v1123_v12 }
 0x39c   :  { %v1160_v42 = vadd.s32 1, %v1121_v26 }
 0x39d   :  { %v1098_v31 = vmul.f32 1.442695, %v1083_v43  ;;  %v7084_v28 = vpop.eup %7083 }
 0x39e   :  { %v7086_v63 = vpop.eup %7085  ;;  %v5668_v60 = vadd.f32 -1.0, %v7084_v28 }
 0x39f   :  { %7089 = vpow2.f32 %v1098_v31  ;;  %v7088_v33 = vpop.eup %7087  ;;  %v5667_v46 = vadd.f32 -1.0, %v7086_v63  ;;  %v1162_v31 = vadd.s32 1, %v1123_v12 }
 0x3a0   :  { %7091 = vpow2.f32 %v1090_v39  ;;  %v1114_v18 = vsel %vm1074_vm3, %v1066_v41, %v5668_v60  ;;  %v5666_v45 = vadd.f32 -1.0, %v7088_v33  ;;  %vm1164_vm3 = vcmp.eq.s32.totalorder %v7714_v61, %v1160_v42  ;;  %v6994_v42 = vld [vmem:[#allocation8 + $0x2cc] sm:$0xf0] }
 0x3a1   :  { %7093 = vpow2.f32 %v1088_v54  ;;  %v1113_v51 = vsel %vm1073_vm5, %v1065_v14, %v5667_v46  ;;  %vm1166_vm5 = vcmp.eq.s32.totalorder %v7714_v61, %v1162_v31  ;;  %v6995_v31 = vld [vmem:[#allocation8 + $0x2d4] sm:$0xf0] }
 0x3a2   :  { %7095 = vpow2.f32 %v1086_v7  ;;  %v1112_v58 = vsel %vm1072_vm6, %v1064_v38, %v5666_v45  ;;  %v10491_v38 = vmov 0.0  }
 0x3a3   :  { %7097 = vpow2.f32 %v1084_v4  ;;  %v1118_v34 = vpack.c.bf16 %v1113_v51, %v1112_v58  ;;  %v1128_v50 = vsel %vm1124_vm0, 1.0, %v10491_v38  ;;  %v1129_v48 = vsel %vm1125_vm1, 1.0, %v10491_v38  ;;  %v1227_v58 = vpop.permute.xlu2 %1226 }
 0x3a4   :  { %v8079_v19 = vpack.c.bf16 %v1129_v48, %v1128_v50  ;;  %v1167_v30 = vsel %vm1163_vm2, 1.0, %v10491_v38  ;;  %v1170_v1 = vsel %vm1166_vm5, 1.0, %v10491_v38 }
 0x3a5   :  { %v7090_v35 = vpop.eup %7089 }
 0x3a6   :  { %v5669_v22 = vadd.f32 -1.0, %v7090_v35  ;;  %v7092_v16 = vpop.eup %7091  ;;  %10492 = vst [vmem:[#allocation26_spill] sm:$0xff] %v8079_v19 }
 0x3a7   :  { %v7094_v44 = vpop.eup %7093  ;;  %v5665_v23 = vadd.f32 -1.0, %v7092_v16 }
 0x3a8   :  { %v1115_v29 = vsel %vm1075_vm4, %v1067_v13, %v5669_v22  ;;  %v7096_v5 = vpop.eup %7095  ;;  %v5664_v59 = vadd.f32 -1.0, %v7094_v44  ;;  %v1224_v22 = vpop.permute.xlu1 %1223 }
 0x3a9   :  { %v1119_v21 = vpack.c.bf16 %v1115_v29, %v1114_v18  ;;  %v7098_v10 = vpop.eup %7097  ;;  %v1111_v41 = vsel %vm1071_vm8, %v1063_v62, %v5665_v23  ;;  %v5663_v52 = vadd.f32 -1.0, %v7096_v5  ;;  %v1221_v18 = vpop.permute.xlu0 %1220  ;;  %vm1268_vm6 = vcmp.eq.s32.totalorder %v1224_v22, %v7714_v61  ;;  %v6982_v22 = vld [vmem:[#allocation8 + $0x26c] sm:$0xf0] }
 0x3aa   :  { %v1110_v40 = vsel %vm1070_vm11, %v1062_v3, %v5664_v59  ;;  %v5662_v56 = vadd.f32 -1.0, %v7098_v10  ;;  %v1122_v3 = vmul.u32 2, %v7725_v0  ;;  %vm1269_vm11 = vcmp.eq.s32.totalorder %v1227_v58, %v7714_v61  ;;  %v5924_v58 = vld [vmem:[#allocation8 + $0x1e0] sm:$0xf] }
 0x3ab   :  { %1144 = vmatpush.bf16.msrb.mxu0 %v1119_v21  ;;  %v1117_v14 = vpack.c.bf16 %v1111_v41, %v1110_v40  ;;  %v1109_v55 = vsel %vm1069_vm7, %v1061_v6, %v5663_v52  ;;  %v1131_v6 = vsel %vm1127_vm15, 1.0, %v10491_v38  ;;  %v1285_v53 = vsel %vm1269_vm11, 1.0, %v10491_v38  ;;  %v6004_v0 = vld [vmem:[#allocation8 + $0x260] sm:$0xf] }
 0x3ac   :  { %v1108_v57 = vsel %vm1068_vm12, %v1060_v11, %v5662_v56  ;;  %vm1126_vm13 = vcmp.eq.s32.totalorder %v7714_v61, %v1122_v3  ;;  %v1168_v11 = vsel %vm1164_vm3, 1.0, %v10491_v38  ;;  %v1161_v43 = vadd.s32 1, %v1122_v3 }
 0x3ad   :  { %v1116_v62 = vpack.c.bf16 %v1109_v55, %v1108_v57  ;;  %v1130_v24 = vsel %vm1126_vm13, 1.0, %v10491_v38  ;;  %v8094_v2 = vpack.c.bf16 %v1168_v11, %v1167_v30  ;;  %v1239_v55 = vpop.permute.xlu2 %1238  ;;  %v6022_v11 = vld [vmem:[#allocation8 + $0x2d0] sm:$0xf0] }
 0x3ae   :  { %v1133_v13 = vpack.c.bf16 %v1131_v6, %v1130_v24  ;;  %vm1165_vm4 = vcmp.eq.s32.totalorder %v7714_v61, %v1161_v43  ;;  %vm1273_vm12 = vcmp.eq.s32.totalorder %v1239_v55, %v7714_v61  ;;  %v6028_v43 = vld [vmem:[#allocation8 + $0x2a8] sm:$0xf] }
 0x3af   :  { %1145 = vmatpush.bf16.msrb.mxu0 %v1118_v34  ;;  %10493 = vst [vmem:[#allocation27_spill] sm:$0xff] %v8094_v2  ;;  %v1169_v39 = vsel %vm1165_vm4, 1.0, %v10491_v38  ;;  %v1289_v48 = vsel %vm1273_vm12, 1.0, %v10491_v38 }
 0x3b0   :  { %v1172_v15 = vpack.c.bf16 %v1170_v1, %v1169_v39  ;;  %v1233_v41 = vpop.permute.xlu1 %1232  ;;  %v6025_v39 = vor.u32 %v6988_v8, %v6022_v11  ;;  %v6029_v1 = vor.u32 %v6995_v31, %v6028_v43  ;;  %v6959_v8 = vld [vmem:[#allocation8 + $0x1b4] sm:$0xf0]  ;;  %v5886_v11 = vld [vmem:[#allocation8 + $0x1b8] sm:$0xf0] }
 0x3b1   :  { %v1230_v26 = vpop.permute.xlu0 %1229  ;;  %vm1271_vm1 = vcmp.eq.s32.totalorder %v1233_v41, %v7714_v61 }
 0x3b2   :  { %vm1270_vm8 = vcmp.eq.s32.totalorder %v1230_v26, %v7714_v61  ;;  %v1287_v40 = vsel %vm1271_vm1, 1.0, %v10491_v38  ;;  %2369 = vmatpush.bf16.msra.mxu1 %v6029_v1  ;;  %v5982_v26 = vld [vmem:[#allocation8 + $0x278] sm:$0xf0]  ;;  %v6946_v1 = vld [vmem:[#allocation8 + $0x14c] sm:$0xf0] }
 0x3b3   :  { %1146 = vmatpush.bf16.msrb.mxu0 %v1117_v14  ;;  %v1286_v59 = vsel %vm1270_vm8, 1.0, %v10491_v38 }
 0x3b4   :  { %v1300_v10 = vpack.c.bf16 %v1286_v59, %v1285_v53  ;;  %v6970_v53 = vld [vmem:[#allocation8 + $0x20c] sm:$0xf0] }
 0x3b5   :  { %v1248_v3 = vpop.permute.xlu2 %1247  ;;  %v5925_v41 = vor.u32 %v6970_v53, %v5924_v58  ;;  %v5782_v58 = vld [vmem:[#allocation8 + $0xf0] sm:$0xf0]  ;;  %v6935_v53 = vld [vmem:[#allocation8 + $0xf4] sm:$0xf0] }
 0x3b6   :  { %vm1276_vm15 = vcmp.eq.s32.totalorder %v1248_v3, %v7714_v61 }
 0x3b7   :  { %1147 = vmatpush.bf16.msrb.mxu0 %v1116_v62  ;;  %v1292_v24 = vsel %vm1276_vm15, 1.0, %v10491_v38 }
 0x3ba   :  { %5670 = vmatmul.msk.bf16.vlgmr.msrb.gmra.mxu0 %vm311_vm10, %v8079_v19 }
 0x3bb   :  { %1183 = vmatpush.bf16.msra.mxu0 %v1119_v21  ;;  %v1284_v21 = vsel %vm1268_vm6, 1.0, %v10491_v38 }
 0x3bf   :  { %1184 = vmatpush.bf16.msra.mxu0 %v1118_v34  ;;  %v1236_v34 = vpop.permute.xlu0 %1235 }
 0x3c0   :  { %vm1272_vm0 = vcmp.eq.s32.totalorder %v1236_v34, %v7714_v61  ;;  %v5926_v34 = vld [vmem:[#allocation8 + $0x210] sm:$0xf0] }
 0x3c1   :  { %v1288_v52 = vsel %vm1272_vm0, 1.0, %v10491_v38 }
 0x3c2   :  { %v1301_v56 = vpack.c.bf16 %v1288_v52, %v1287_v40  ;;  %v5932_v40 = vld [vmem:[#allocation8 + $0x1e8] sm:$0xf] }
 0x3c3   :  { %1185 = vmatpush.bf16.msra.mxu0 %v1117_v14  ;;  %v1242_v14 = vpop.permute.xlu1 %1241 }
 0x3c4   :  { %vm1274_vm7 = vcmp.eq.s32.totalorder %v1242_v14, %v7714_v61  ;;  %v6965_v14 = vld [vmem:[#allocation8 + $0x1ec] sm:$0xf] }
 0x3c5   :  { %v1290_v50 = vsel %vm1274_vm7, 1.0, %v10491_v38 }
 0x3c6   :  { %v1302_v57 = vpack.c.bf16 %v1290_v50, %v1289_v48  ;;  %v5934_v48 = vld [vmem:[#allocation8 + $0x218] sm:$0xf0] }
 0x3c7   :  { %1186 = vmatpush.bf16.msra.mxu0 %v1116_v62  ;;  %v1245_v62 = vpop.permute.xlu0 %1244  ;;  %v5937_v3 = vor.u32 %v6965_v14, %v5934_v48  ;;  %v6922_v14 = vld [vmem:[#allocation8 + $0x8c] sm:$0xf0] }
 0x3c8   :  { %vm1275_vm13 = vcmp.eq.s32.totalorder %v1245_v62, %v7714_v61  ;;  %v6958_v62 = vld [vmem:[#allocation8 + $0x1ac] sm:$0xf0] }
 0x3c9   :  { %v1291_v12 = vsel %vm1275_vm13, 1.0, %v10491_v38 }
 0x3ca   :  { %5671 = vmatmul.msk.bf16.gmra.mxu0 %vm311_vm10, %v1133_v13  ;;  %v1303_v6 = vpack.c.bf16 %v1292_v24, %v1291_v12  ;;  %v6020_v13 = vld [vmem:[#allocation8 + $0x2a0] sm:$0xf]  ;;  %v6952_v12 = vld [vmem:[#allocation8 + $0x184] sm:$0xf]  ;;  %v5878_v24 = vld [vmem:[#allocation8 + $0x1b0] sm:$0xf0] }
 0x3cb   :  { %v6021_v30 = vor.u32 %v6994_v42, %v6020_v13  ;;  %2320 = vmatpush.bf16.msrb.mxu0 %v6025_v39  ;;  %v1257_v13 = vpop.permute.xlu2 %1256  ;;  %v5881_v43 = vor.u32 %v6952_v12, %v5878_v24  ;;  %v5828_v39 = vld [vmem:[#allocation8 + $0x120] sm:$0xf]  ;;  %v6917_v12 = vld [vmem:[#allocation8 + $0x6c] sm:$0xf] }
 0x3cc   :  { %vm1279_vm5 = vcmp.eq.s32.totalorder %v1257_v13, %v7714_v61  ;;  %v5742_v13 = vld [vmem:[#allocation8 + $0x98] sm:$0xf0] }
 0x3cd   :  { %2271 = vmatpush.bf16.msra.mxu2 %v6021_v30  ;;  %v6953_v30 = vld [vmem:[#allocation8 + $0x18c] sm:$0xf] }
 0x3d3   :  { %v1266_v24 = vpop.permute.xlu2 %1265 }
 0x3da   :  { %5672 = vmatmul.msk.bf16.vlgmr.msra.gmra.mxu0 %vm311_vm10, %v8094_v2 }
 0x3ea   :  { %5673 = vmatmul.msk.bf16.gmra.mxu0 %vm311_vm10, %v1172_v15  ;;  %vm1267_vm10 = vcmp.eq.s32.totalorder %v1221_v18, %v7714_v61  ;;  %v6989_v15 = vld [vmem:[#allocation8 + $0x2ac] sm:$0xf]  ;;  %v5974_v18 = vld [vmem:[#allocation8 + $0x270] sm:$0xf0] }
 0x3eb   :  { %v1283_v23 = vsel %vm1267_vm10, 1.0, %v10491_v38  ;;  %vm1282_vm10 = vcmp.eq.s32.totalorder %v1266_v24, %v7714_v61  ;;  %v6978_v24 = vld [vmem:[#allocation8 + $0x254] sm:$0xf] }
 0x3ec   :  { %v1299_v5 = vpack.c.bf16 %v1284_v21, %v1283_v23 }
 0x437   :  { %v1149_v54 = vpop.f32.mrf.mxu0 }
 0x43f   :  { %v1151_v28 = vpop.f32.mrf.mxu0 }
 0x447   :  { %v1154_v7 = vpop.f32.mrf.mxu0 }
 0x44f   :  { %v1156_v63 = vpop.f32.mrf.mxu0 }
 0x457   :  { %v1188_v4 = vpop.f32.mrf.mxu0 }
 0x458   :  { %v1198_v44 = vmax.f32 %v1149_v54, %v1188_v4  ;;  %v6030_v54 = vld [vmem:[#allocation8 + $0x2d8] sm:$0xf0] }
 0x45f   :  { %v1190_v33 = vpop.f32.mrf.mxu0 }
 0x460   :  { %v1199_v29 = vmax.f32 %v1151_v28, %v1190_v33  ;;  %v6033_v28 = vor.u32 %v6989_v15, %v6030_v54  ;;  %v5889_v15 = vor.u32 %v6953_v30, %v5886_v11  ;;  %v6940_v54 = vld [vmem:[#allocation8 + $0x124] sm:$0xf]  ;;  %v5684_v30 = vld [vmem:[#allocation8] sm:$0xf]  ;;  %v6910_v11 = vld [vmem:[#allocation8 + $0x2c] sm:$0xf0] }
 0x462   :  { %v8109_v51 = vpack.c.bf16 %v1199_v29, %v1198_v44  ;;  %v5980_v29 = vld [vmem:[#allocation8 + $0x248] sm:$0xf]  ;;  %v6983_v44 = vld [vmem:[#allocation8 + $0x274] sm:$0xf0] }
 0x463   :  { %v5981_v23 = vor.u32 %v6983_v44, %v5980_v29  ;;  %v5780_v44 = vld [vmem:[#allocation8 + $0xc0] sm:$0xf] }
 0x464   :  { %10495 = vst [vmem:[#allocation29_spill] sm:$0xff] %v8109_v51 }
 0x465   :  { %2370 = vmatpush.bf16.msra.mxu1 %v5981_v23  ;;  %v6928_v23 = vld [vmem:[#allocation8 + $0xc4] sm:$0xf] }
 0x467   :  { %v1193_v60 = vpop.f32.mrf.mxu0 }
 0x468   :  { %v1200_v46 = vmax.f32 %v1154_v7, %v1193_v60  ;;  %v1254_v7 = vpop.permute.xlu0 %1253 }
 0x469   :  { %vm1278_vm2 = vcmp.eq.s32.totalorder %v1254_v7, %v7714_v61  ;;  %v5836_v7 = vld [vmem:[#allocation8 + $0x128] sm:$0xf] }
 0x46a   :  { %v1294_v4 = vsel %vm1278_vm2, 1.0, %v10491_v38 }
 0x46f   :  { %v1195_v35 = vpop.f32.mrf.mxu0 }
 0x470   :  { %v1201_v16 = vmax.f32 %v1156_v63, %v1195_v35  ;;  %v1251_v63 = vpop.permute.xlu1 %1250  ;;  %v5972_v35 = vld [vmem:[#allocation8 + $0x240] sm:$0xf] }
 0x471   :  { %vm1277_vm3 = vcmp.eq.s32.totalorder %v1251_v63, %v7714_v61  ;;  %v6947_v63 = vld [vmem:[#allocation8 + $0x154] sm:$0xf0] }
 0x472   :  { %v8103_v45 = vpack.c.bf16 %v1201_v16, %v1200_v46  ;;  %v1293_v33 = vsel %vm1277_vm3, 1.0, %v10491_v38  ;;  %v6976_v46 = vld [vmem:[#allocation8 + $0x244] sm:$0xf]  ;;  %v5973_v16 = vor.u32 %v6982_v22, %v5972_v35  ;;  %v5829_v35 = vor.u32 %v6946_v1, %v5828_v39  ;;  %v5686_v39 = vld [vmem:[#allocation8 + $0x30] sm:$0xf0] }
 0x473   :  { %v1304_v60 = vpack.c.bf16 %v1294_v4, %v1293_v33  ;;  %v5977_v21 = vor.u32 %v6976_v46, %v5974_v18  ;;  %v6941_v4 = vld [vmem:[#allocation8 + $0x12c] sm:$0xf]  ;;  %v5838_v33 = vld [vmem:[#allocation8 + $0x158] sm:$0xf0]  ;;  %v1295_v46 = vsel %vm1279_vm5, 1.0, %v10491_v38  ;;  %vm5350_vm5 = vcmask 123904  }
 0x474   :  { %10494 = vst [vmem:[#allocation28_spill] sm:$0xff] %v8103_v45  ;;  %1339 = vmatpush.bf16.msra.mxu3 %v8103_v45  ;;  %2272 = vmatpush.bf16.msra.mxu2 %v5973_v16  ;;  %v5837_v16 = vor.u32 %v6947_v63, %v5836_v7  ;;  %v5841_v18 = vor.u32 %v6941_v4, %v5838_v33  ;;  %v5692_v1 = vld [vmem:[#allocation8 + $0x8] sm:$0xf]  ;;  %v6905_v7 = vld [vmem:[#allocation8 + $0xc] sm:$0xf]  ;;  %v1298_v4 = vsel %vm1282_vm10, 1.0, %v10491_v38 }
 0x475   :  { %2321 = vmatpush.bf16.msrb.mxu0 %v5977_v21  ;;  %v6934_v21 = vld [vmem:[#allocation8 + $0xec] sm:$0xf0]  ;;  %v5694_v63 = vld [vmem:[#allocation8 + $0x38] sm:$0xf0]  ;;  %v6993_v45 = vld [vmem:[#allocation8 + $0x2cc] sm:$0xf] }
 0x476   :  { %v5697_v33 = vor.u32 %v6905_v7, %v5694_v63  ;;  %v5942_v7 = vld [vmem:[#allocation8 + $0x220] sm:$0xf0] }
 0x478   :  { %1340 = vmatpush.bf16.msra.mxu3 %v8109_v51  ;;  %v1260_v55 = vpop.permute.xlu1 %1259  ;;  %2273 = vmatpush.bf16.msra.mxu2 %v5925_v41  ;;  %v6929_v41 = vld [vmem:[#allocation8 + $0xcc] sm:$0xf]  ;;  %v6062_v51 = vld [vmem:[#allocation8 + $0x2f8] sm:$0xf0] }
 0x479   :  { %vm1280_vm4 = vcmp.eq.s32.totalorder %v1260_v55, %v7714_v61  ;;  %v6916_v55 = vld [vmem:[#allocation8 + $0x64] sm:$0xf]  ;;  %v6065_v49 = vor.u32 %v6993_v45, %v6062_v51  ;;  %v6014_v45 = vld [vmem:[#allocation8 + $0x298] sm:$0xf0]  ;;  %v5956_v51 = vld [vmem:[#allocation8 + $0x200] sm:$0xf] }
 0x47b   :  { %5674 = vmatmul.msk.bf16.vlgmr.msra.gmra.mxu3 %vm651_vm14, %v1299_v5  ;;  %v6977_v5 = vld [vmem:[#allocation8 + $0x24c] sm:$0xf] }
 0x47c   :  { %2418 = vmatpush.bf16.msrb.mxu3 %v6033_v28  ;;  %v5985_v59 = vor.u32 %v6977_v5, %v5982_v26  ;;  %v5830_v28 = vld [vmem:[#allocation8 + $0x150] sm:$0xf0]  ;;  %v1263_v5 = vpop.permute.xlu0 %1262  ;;  %v5781_v26 = vor.u32 %v6934_v21, %v5780_v44 }
 0x47d   :  { %v5833_v22 = vor.u32 %v6940_v54, %v5830_v28  ;;  %vm1281_vm6 = vcmp.eq.s32.totalorder %v1263_v5, %v7714_v61 }
 0x480   :  { %2419 = vmatpush.bf16.msrb.mxu3 %v5985_v59  ;;  %v5788_v59 = vld [vmem:[#allocation8 + $0xc8] sm:$0xf] }
 0x484   :  { %2420 = vmatpush.bf16.msrb.mxu3 %v5937_v3  ;;  %v6923_v3 = vld [vmem:[#allocation8 + $0x94] sm:$0xf0] }
 0x488   :  { %2421 = vmatpush.bf16.msrb.mxu3 %v5889_v15  ;;  %v6911_v15 = vld [vmem:[#allocation8 + $0x34] sm:$0xf0] }
 0x489   :  { %v5693_v28 = vor.u32 %v6911_v15, %v5692_v1  ;;  %v5940_v1 = vld [vmem:[#allocation8 + $0x1f0] sm:$0xf] }
 0x48b   :  { %5675 = vmatmul.msk.bf16.gmra.mxu3 %vm651_vm14, %v1300_v10  ;;  %v6964_v10 = vld [vmem:[#allocation8 + $0x1e4] sm:$0xf] }
 0x48c   :  { %v5929_v52 = vor.u32 %v6964_v10, %v5926_v34  ;;  %2422 = vmatpush.bf16.msrb.mxu3 %v5841_v18  ;;  %v5785_v10 = vor.u32 %v6928_v23, %v5782_v58  ;;  %v5789_v34 = vor.u32 %v6935_v53, %v5788_v59 }
 0x48e   :  { %2322 = vmatpush.bf16.msrb.mxu0 %v5929_v52  ;;  %v5790_v52 = vld [vmem:[#allocation8 + $0xf8] sm:$0xf0] }
 0x492   :  { %2323 = vmatpush.bf16.msrb.mxu0 %v5881_v43  ;;  %v6904_v43 = vld [vmem:[#allocation8 + $0x4] sm:$0xf] }
 0x493   :  { %v5689_v54 = vor.u32 %v6904_v43, %v5686_v39  ;;  %v5998_v39 = vld [vmem:[#allocation8 + $0x288] sm:$0xf0] }
 0x496   :  { %2324 = vmatpush.bf16.msrb.mxu0 %v5833_v22 }
 0x49a   :  { %2325 = vmatpush.bf16.msrb.mxu0 %v5785_v10  ;;  %v6036_v10 = vld [vmem:[#allocation8 + $0x2b0] sm:$0xf] }
 0x49b   :  { %5676 = vmatmul.msk.bf16.gmra.mxu3 %vm651_vm14, %v1301_v56  ;;  %v6971_v56 = vld [vmem:[#allocation8 + $0x214] sm:$0xf0] }
 0x49c   :  { %v5933_v50 = vor.u32 %v6971_v56, %v5932_v40  ;;  %v5732_v40 = vld [vmem:[#allocation8 + $0x60] sm:$0xf]  ;;  %v5793_v56 = vor.u32 %v6929_v41, %v5790_v52  ;;  %v6990_v41 = vld [vmem:[#allocation8 + $0x2b4] sm:$0xf] }
 0x49d   :  { %v5733_v48 = vor.u32 %v6922_v14, %v5732_v40  ;;  %v6038_v40 = vld [vmem:[#allocation8 + $0x2e0] sm:$0xf0]  ;;  %v6997_v14 = vld [vmem:[#allocation8 + $0x2e4] sm:$0xf0] }
 0x49e   :  { %2371 = vmatpush.bf16.msra.mxu1 %v5933_v50  ;;  %v5734_v50 = vld [vmem:[#allocation8 + $0x90] sm:$0xf0]  ;;  %2423 = vmatpush.bf16.msrb.mxu3 %v5793_v56  ;;  %v6044_v56 = vld [vmem:[#allocation8 + $0x2b8] sm:$0xf] }
 0x4ab   :  { %5677 = vmatmul.msk.bf16.gmra.mxu3 %vm651_vm14, %v1302_v57  ;;  %v5876_v57 = vld [vmem:[#allocation8 + $0x180] sm:$0xf] }
 0x4ac   :  { %v5877_v42 = vor.u32 %v6958_v62, %v5876_v57  ;;  %v5737_v57 = vor.u32 %v6916_v55, %v5734_v50  ;;  %v5740_v62 = vld [vmem:[#allocation8 + $0x68] sm:$0xf]  ;;  %v6041_v55 = vor.u32 %v6990_v41, %v6038_v40  ;;  %v6045_v50 = vor.u32 %v6997_v14, %v6044_v56  ;;  %v6955_v56 = vld [vmem:[#allocation8 + $0x19c] sm:$0xf]  ;;  %v5902_v14 = vld [vmem:[#allocation8 + $0x1c8] sm:$0xf0] }
 0x4ae   :  { %2274 = vmatpush.bf16.msra.mxu2 %v5877_v42  ;;  %v5745_v42 = vor.u32 %v6917_v12, %v5742_v13  ;;  %2326 = vmatpush.bf16.msrb.mxu0 %v5737_v57  ;;  %v6046_v57 = vld [vmem:[#allocation8 + $0x2e8] sm:$0xf0]  ;;  %v6984_v12 = vld [vmem:[#allocation8 + $0x27c] sm:$0xf0] }
 0x4b0   :  { %2424 = vmatpush.bf16.msrb.mxu3 %v5745_v42  ;;  %v5990_v42 = vld [vmem:[#allocation8 + $0x280] sm:$0xf0] }
 0x4b2   :  { %2275 = vmatpush.bf16.msra.mxu2 %v5829_v35  ;;  %2327 = vmatpush.bf16.msrb.mxu0 %v5689_v54  ;;  %v6972_v54 = vld [vmem:[#allocation8 + $0x21c] sm:$0xf0] }
 0x4b3   :  { %v5941_v63 = vor.u32 %v6972_v54, %v5940_v1  ;;  %v6937_v54 = vld [vmem:[#allocation8 + $0x104] sm:$0xf0] }
 0x4b4   :  { %2425 = vmatpush.bf16.msrb.mxu3 %v5697_v33  ;;  %v5948_v33 = vld [vmem:[#allocation8 + $0x1f8] sm:$0xf] }
 0x4b6   :  { %2276 = vmatpush.bf16.msra.mxu2 %v5781_v26  ;;  %2516 = vmatpush.bf16.msra.mxu0 %v6041_v55  ;;  %v5905_v55 = vor.u32 %v6955_v56, %v5902_v14  ;;  %v6906_v56 = vld [vmem:[#allocation8 + $0x14] sm:$0xf] }
 0x4ba   :  { %2277 = vmatpush.bf16.msra.mxu2 %v5733_v48  ;;  %v6991_v48 = vld [vmem:[#allocation8 + $0x2bc] sm:$0xf] }
 0x4bb   :  { %5678 = vmatmul.msk.bf16.gmra.mxu3 %vm651_vm14, %v1303_v6  ;;  %v5884_v6 = vld [vmem:[#allocation8 + $0x188] sm:$0xf] }
 0x4bc   :  { %v5885_v31 = vor.u32 %v6959_v8, %v5884_v6  ;;  %v5741_v6 = vor.u32 %v6923_v3, %v5740_v62  ;;  %v1297_v8 = vsel %vm1281_vm6, 1.0, %v10491_v38  ;;  %v6049_v62 = vor.u32 %v6991_v48, %v6046_v57  ;;  %v5988_v3 = vld [vmem:[#allocation8 + $0x250] sm:$0xf]  ;;  %v6948_v48 = vld [vmem:[#allocation8 + $0x15c] sm:$0xf0] }
 0x4bd   :  { %v5989_v13 = vor.u32 %v6984_v12, %v5988_v3  ;;  %v6942_v57 = vld [vmem:[#allocation8 + $0x134] sm:$0xf]  ;;  %v5846_v3 = vld [vmem:[#allocation8 + $0x160] sm:$0xf0]  ;;  %v5852_v12 = vld [vmem:[#allocation8 + $0x138] sm:$0xf] }
 0x4be   :  { %2372 = vmatpush.bf16.msra.mxu1 %v5885_v31  ;;  %v5685_v31 = vor.u32 %v6910_v11, %v5684_v30  ;;  %2614 = vmatpush.bf16.msra.mxu3 %v6049_v62  ;;  %v6985_v30 = vld [vmem:[#allocation8 + $0x284] sm:$0xf0]  ;;  %v5993_v11 = vor.u32 %v6978_v24, %v5990_v42  ;;  %v6943_v42 = vld [vmem:[#allocation8 + $0x13c] sm:$0xf] }
 0x4bf   :  { %v6949_v24 = vld [vmem:[#allocation8 + $0x164] sm:$0xf0] }
 0x4c0   :  { %2278 = vmatpush.bf16.msra.mxu2 %v5685_v31  ;;  %v6979_v31 = vld [vmem:[#allocation8 + $0x25c] sm:$0xf]  ;;  %2517 = vmatpush.bf16.msra.mxu0 %v5993_v11 }
 0x4c1   :  { %v6001_v15 = vor.u32 %v6979_v31, %v5998_v39  ;;  %v6930_v31 = vld [vmem:[#allocation8 + $0xd4] sm:$0xf]  ;;  %v5798_v39 = vld [vmem:[#allocation8 + $0x100] sm:$0xf0] }
 0x4c2   :  { %2373 = vmatpush.bf16.msra.mxu1 %v5837_v16 }
 0x4c3   :  { %2615 = vmatpush.bf16.msra.mxu3 %v6001_v15  ;;  %v5804_v15 = vld [vmem:[#allocation8 + $0xd8] sm:$0xf] }
 0x4c6   :  { %2374 = vmatpush.bf16.msra.mxu1 %v5789_v34  ;;  %v6996_v34 = vld [vmem:[#allocation8 + $0x2dc] sm:$0xf0] }
 0x4c7   :  { %v6037_v52 = vor.u32 %v6996_v34, %v6036_v10  ;;  %v5900_v10 = vld [vmem:[#allocation8 + $0x198] sm:$0xf]  ;;  %v6961_v34 = vld [vmem:[#allocation8 + $0x1c4] sm:$0xf0] }
 0x4c8   :  { %v5901_v40 = vor.u32 %v6961_v34, %v5900_v10 }
 0x4c9   :  { %2467 = vmatpush.bf16.msrb.mxu2 %v6037_v52 }
 0x4ca   :  { %2375 = vmatpush.bf16.msra.mxu1 %v5741_v6 }
 0x4cb   :  { %5679 = vmatmul.msk.bf16.gmra.mxu3 %vm651_vm14, %v1304_v60  ;;  %v1296_v60 = vsel %vm1280_vm4, 1.0, %v10491_v38 }
 0x4cc   :  { %v1305_v29 = vpack.c.bf16 %v1296_v60, %v1295_v46  ;;  %v1306_v60 = vpack.c.bf16 %v1298_v4, %v1297_v8  ;;  %v5996_v8 = vld [vmem:[#allocation8 + $0x258] sm:$0xf] }
 0x4cd   :  { %v5997_v43 = vor.u32 %v6985_v30, %v5996_v8  ;;  %2468 = vmatpush.bf16.msrb.mxu2 %v5989_v13  ;;  %v5853_v13 = vor.u32 %v6949_v24, %v5852_v12  ;;  %v5854_v8 = vld [vmem:[#allocation8 + $0x168] sm:$0xf0]  ;;  %v5796_v30 = vld [vmem:[#allocation8 + $0xd0] sm:$0xf]  ;;  %v6907_v24 = vld [vmem:[#allocation8 + $0x1c] sm:$0xf] }
 0x4ce   :  { %2376 = vmatpush.bf16.msra.mxu1 %v5693_v28  ;;  %v6966_v28 = vld [vmem:[#allocation8 + $0x1f4] sm:$0xf]  ;;  %v5857_v11 = vor.u32 %v6943_v42, %v5854_v8 }
 0x4cf   :  { %v5945_v4 = vor.u32 %v6966_v28, %v5942_v7  ;;  %v6931_v28 = vld [vmem:[#allocation8 + $0xdc] sm:$0xf] }
 0x4d1   :  { %2469 = vmatpush.bf16.msrb.mxu2 %v5941_v63  ;;  %2518 = vmatpush.bf16.msra.mxu0 %v5945_v4  ;;  %v5806_v63 = vld [vmem:[#allocation8 + $0x108] sm:$0xf0]  ;;  %v5748_v4 = vld [vmem:[#allocation8 + $0x70] sm:$0xf] }
 0x4d2   :  { %2565 = vmatpush.bf16.msrb.mxu1 %v6045_v50  ;;  %v5844_v50 = vld [vmem:[#allocation8 + $0x130] sm:$0xf] }
 0x4d3   :  { %v5845_v62 = vor.u32 %v6948_v48, %v5844_v50  ;;  %v5702_v50 = vld [vmem:[#allocation8 + $0x40] sm:$0xf0]  ;;  %v5708_v48 = vld [vmem:[#allocation8 + $0x18] sm:$0xf] }
 0x4d6   :  { %2566 = vmatpush.bf16.msrb.mxu1 %v5997_v43  ;;  %v6936_v43 = vld [vmem:[#allocation8 + $0xfc] sm:$0xf0] }
 0x4d7   :  { %v5797_v1 = vor.u32 %v6936_v43, %v5796_v30 }
 0x4db   :  { %5680 = vmatmul.msk.bf16.gmra.mxu3 %vm651_vm14, %v1305_v29 }
 0x4eb   :  { %5681 = vmatmul.msk.bf16.gmra.mxu3 %vm651_vm14, %v1306_v60  ;;  %v6973_v60 = vld [vmem:[#allocation8 + $0x224] sm:$0xf0] }
 0x4fe   :  { %v1342_v61 = vpop.f32.mrf.mxu3 }
 0x506   :  { %v1344_v35 = vpop.f32.mrf.mxu3 }
 0x507   :  { %v8151_v22 = vpack.c.bf16 %v1344_v35, %v1342_v61  ;;  %v6967_v61 = vld [vmem:[#allocation8 + $0x1fc] sm:$0xf]  ;;  %v5949_v35 = vor.u32 %v6973_v60, %v5948_v33  ;;  %v6924_v33 = vld [vmem:[#allocation8 + $0x9c] sm:$0xf0]  ;;  %v5801_v60 = vor.u32 %v6930_v31, %v5798_v39 }
 0x509   :  { %10496 = vst [vmem:[#allocation30_spill] sm:$0xff] %v8151_v22  ;;  %2279 = vmatmul.bf16.vlgmr.msra.gmra.mxu2 %v8151_v22  ;;  %2328 = vmatmul.bf16.vlgmr.msrb.gmra.mxu0 %v8151_v22 }
 0x50a   :  { %2377 = vmatmul.bf16.vlgmr.msra.gmra.mxu1 %v8151_v22  ;;  %2426 = vmatmul.bf16.vlgmr.msrb.gmra.mxu3 %v8151_v22 }
 0x50b   :  { %2567 = vmatpush.bf16.msrb.mxu1 %v5949_v35  ;;  %v6918_v35 = vld [vmem:[#allocation8 + $0x74] sm:$0xf] }
 0x50e   :  { %v1347_v46 = vpop.f32.mrf.mxu3 }
 0x50f   :  { %2568 = vmatpush.bf16.msrb.mxu1 %v5901_v40  ;;  %v6912_v40 = vld [vmem:[#allocation8 + $0x3c] sm:$0xf0] }
 0x513   :  { %2569 = vmatpush.bf16.msrb.mxu1 %v5853_v13 }
 0x516   :  { %v1349_v16 = vpop.f32.mrf.mxu3 }
 0x517   :  { %v8157_v18 = vpack.c.bf16 %v1349_v16, %v1347_v46  ;;  %v5950_v46 = vld [vmem:[#allocation8 + $0x228] sm:$0xf0] }
 0x518   :  { %v5953_v16 = vor.u32 %v6967_v61, %v5950_v46  ;;  %v5805_v61 = vor.u32 %v6937_v54, %v5804_v15  ;;  %v5809_v46 = vor.u32 %v6931_v28, %v5806_v63 }
 0x519   :  { %10497 = vst [vmem:[#allocation31_spill] sm:$0xff] %v8157_v18  ;;  %2284 = vmatmul.bf16.gmra.mxu2 %v8157_v18  ;;  %2333 = vmatmul.bf16.gmra.mxu0 %v8157_v18 }
 0x51a   :  { %2382 = vmatmul.bf16.gmra.mxu1 %v8157_v18  ;;  %2431 = vmatmul.bf16.gmra.mxu3 %v8157_v18 }
 0x51b   :  { %2616 = vmatpush.bf16.msra.mxu3 %v5953_v16  ;;  %v5749_v16 = vor.u32 %v6924_v33, %v5748_v4  ;;  %2570 = vmatpush.bf16.msrb.mxu1 %v5805_v61 }
 0x51e   :  { %v1352_v29 = vpop.f32.mrf.mxu3 }
 0x51f   :  { %2617 = vmatpush.bf16.msra.mxu3 %v5905_v55 }
 0x523   :  { %2618 = vmatpush.bf16.msra.mxu3 %v5857_v11 }
 0x526   :  { %v1354_v44 = vpop.f32.mrf.mxu3 }
 0x527   :  { %v8163_v21 = vpack.c.bf16 %v1354_v44, %v1352_v29  ;;  %v5892_v29 = vld [vmem:[#allocation8 + $0x190] sm:$0xf]  ;;  %v6960_v44 = vld [vmem:[#allocation8 + $0x1bc] sm:$0xf0]  ;;  %2619 = vmatpush.bf16.msra.mxu3 %v5809_v46 }
 0x529   :  { %10498 = vst [vmem:[#allocation32_spill] sm:$0xff] %v8163_v21  ;;  %2289 = vmatmul.bf16.gmra.mxu2 %v8163_v21  ;;  %2338 = vmatmul.bf16.gmra.mxu0 %v8163_v21 }
 0x52a   :  { %2387 = vmatmul.bf16.gmra.mxu1 %v8163_v21  ;;  %2436 = vmatmul.bf16.gmra.mxu3 %v8163_v21 }
 0x52e   :  { %v1357_v23 = vpop.f32.mrf.mxu3 }
 0x536   :  { %v1359_v5 = vpop.f32.mrf.mxu3 }
 0x537   :  { %v8169_v26 = vpack.c.bf16 %v1359_v5, %v1357_v23  ;;  %v6954_v23 = vld [vmem:[#allocation8 + $0x194] sm:$0xf] }
 0x539   :  { %10499 = vst [vmem:[#allocation33_spill] sm:$0xff] %v8169_v26  ;;  %2294 = vmatmul.bf16.gmra.mxu2 %v8169_v26  ;;  %2343 = vmatmul.bf16.gmra.mxu0 %v8169_v26 }
 0x53a   :  { %2392 = vmatmul.bf16.gmra.mxu1 %v8169_v26  ;;  %2441 = vmatmul.bf16.gmra.mxu3 %v8169_v26 }
 0x53e   :  { %v1362_v58 = vpop.f32.mrf.mxu3 }
 0x546   :  { %v1364_v59 = vpop.f32.mrf.mxu3 }
 0x547   :  { %v8175_v53 = vpack.c.bf16 %v1364_v59, %v1362_v58  ;;  %v5893_v58 = vor.u32 %v6960_v44, %v5892_v29  ;;  %v5894_v59 = vld [vmem:[#allocation8 + $0x1c0] sm:$0xf0]  ;;  %v5756_v44 = vld [vmem:[#allocation8 + $0x78] sm:$0xf] }
 0x548   :  { %v5897_v52 = vor.u32 %v6954_v23, %v5894_v59  ;;  %v5750_v29 = vld [vmem:[#allocation8 + $0xa0] sm:$0xf0]  ;;  %v6925_v23 = vld [vmem:[#allocation8 + $0xa4] sm:$0xf0] }
 0x549   :  { %10500 = vst [vmem:[#allocation34_spill] sm:$0xff] %v8175_v53  ;;  %2299 = vmatmul.bf16.gmra.mxu2 %v8175_v53  ;;  %2348 = vmatmul.bf16.gmra.mxu0 %v8175_v53  ;;  %v5753_v59 = vor.u32 %v6918_v35, %v5750_v29  ;;  %v5757_v10 = vor.u32 %v6925_v23, %v5756_v44 }
 0x54a   :  { %2397 = vmatmul.bf16.gmra.mxu1 %v8175_v53  ;;  %2446 = vmatmul.bf16.gmra.mxu3 %v8175_v53 }
 0x54b   :  { %2470 = vmatpush.bf16.msrb.mxu2 %v5893_v58  ;;  %2519 = vmatpush.bf16.msra.mxu0 %v5897_v52  ;;  %v5758_v58 = vld [vmem:[#allocation8 + $0xa8] sm:$0xf0]  ;;  %v5700_v52 = vld [vmem:[#allocation8 + $0x10] sm:$0xf] }
 0x54c   :  { %v5701_v55 = vor.u32 %v6912_v40, %v5700_v52  ;;  %2571 = vmatpush.bf16.msrb.mxu1 %v5757_v10 }
 0x54e   :  { %v1367_v6 = vpop.f32.mrf.mxu3 }
 0x54f   :  { %2471 = vmatpush.bf16.msrb.mxu2 %v5845_v62 }
 0x553   :  { %2472 = vmatpush.bf16.msrb.mxu2 %v5797_v1 }
 0x556   :  { %v1369_v5 = vpop.f32.mrf.mxu3 }
 0x557   :  { %v8181_v41 = vpack.c.bf16 %v1369_v5, %v1367_v6  ;;  %v5849_v6 = vor.u32 %v6942_v57, %v5846_v3  ;;  %v6919_v5 = vld [vmem:[#allocation8 + $0x7c] sm:$0xf]  ;;  %2473 = vmatpush.bf16.msrb.mxu2 %v5749_v16  ;;  %v6913_v57 = vld [vmem:[#allocation8 + $0x44] sm:$0xf0]  ;;  %v5705_v3 = vor.u32 %v6906_v56, %v5702_v50 }
 0x558   :  { %v5761_v34 = vor.u32 %v6919_v5, %v5758_v58  ;;  %v5709_v12 = vor.u32 %v6913_v57, %v5708_v48 }
 0x559   :  { %10501 = vst [vmem:[#allocation35_spill] sm:$0xff] %v8181_v41  ;;  %2304 = vmatmul.bf16.gmra.mxu2 %v8181_v41  ;;  %2353 = vmatmul.bf16.gmra.mxu0 %v8181_v41 }
 0x55a   :  { %2402 = vmatmul.bf16.gmra.mxu1 %v8181_v41  ;;  %2451 = vmatmul.bf16.gmra.mxu3 %v8181_v41 }
 0x55b   :  { %2520 = vmatpush.bf16.msra.mxu0 %v5849_v6  ;;  %v5710_v6 = vld [vmem:[#allocation8 + $0x48] sm:$0xf0]  ;;  %2620 = vmatpush.bf16.msra.mxu3 %v5761_v34 }
 0x55c   :  { %2474 = vmatpush.bf16.msrb.mxu2 %v5701_v55  ;;  %v5713_v13 = vor.u32 %v6907_v24, %v5710_v6  ;;  %2572 = vmatpush.bf16.msrb.mxu1 %v5709_v12  ;;  %v6052_v12 = vld [vmem:[#allocation8 + $0x2c0] sm:$0xf]  ;;  %v6998_v24 = vld [vmem:[#allocation8 + $0x2ec] sm:$0xf0]  ;;  %v6992_v6 = vld [vmem:[#allocation8 + $0x2c4] sm:$0xf] }
 0x55e   :  { %v1372_v7 = vpop.f32.mrf.mxu3 }
 0x55f   :  { %2521 = vmatpush.bf16.msra.mxu0 %v5801_v60  ;;  %2621 = vmatpush.bf16.msra.mxu3 %v5713_v13  ;;  %v6053_v13 = vor.u32 %v6998_v24, %v6052_v12  ;;  %v6005_v12 = vor.u32 %v6986_v47, %v6004_v0  ;;  %v6006_v24 = vld [vmem:[#allocation8 + $0x290] sm:$0xf0]  ;;  %v5964_v47 = vld [vmem:[#allocation8 + $0x208] sm:$0xf]  ;;  %v6975_v0 = vld [vmem:[#allocation8 + $0x234] sm:$0xf0] }
 0x561   :  { %2663 = vmatpush.bf16.msra.mxu2 %v6053_v13  ;;  %v6981_v13 = vld [vmem:[#allocation8 + $0x26c] sm:$0xf] }
 0x563   :  { %2522 = vmatpush.bf16.msra.mxu0 %v5753_v59  ;;  %2810 = vmatpush.bf16.msrb.mxu3 %v6065_v49 }
 0x565   :  { %2664 = vmatpush.bf16.msra.mxu2 %v6005_v12  ;;  %v5908_v12 = vld [vmem:[#allocation8 + $0x1a0] sm:$0xf] }
 0x566   :  { %v1374_v14 = vpop.f32.mrf.mxu3 }
 0x567   :  { %v8187_v62 = vpack.c.bf16 %v1374_v14, %v1372_v7  ;;  %2523 = vmatpush.bf16.msra.mxu0 %v5705_v3 }
 0x569   :  { %10502 = vst [vmem:[#allocation36_spill] sm:$0xff] %v8187_v62  ;;  %2309 = vmatmul.bf16.gmra.mxu2 %v8187_v62  ;;  %2358 = vmatmul.bf16.gmra.mxu0 %v8187_v62 }
 0x56a   :  { %2407 = vmatmul.bf16.gmra.mxu1 %v8187_v62  ;;  %2456 = vmatmul.bf16.gmra.mxu3 %v8187_v62 }
 0x56e   :  { %v1377_v42 = vpop.f32.mrf.mxu3 }
 0x576   :  { %v1379_v8 = vpop.f32.mrf.mxu3 }
 0x577   :  { %v8193_v30 = vpack.c.bf16 %v1379_v8, %v1377_v42  ;;  %v6054_v42 = vld [vmem:[#allocation8 + $0x2f0] sm:$0xf0]  ;;  %v6060_v8 = vld [vmem:[#allocation8 + $0x2c8] sm:$0xf] }
 0x578   :  { %v6057_v2 = vor.u32 %v6992_v6, %v6054_v42  ;;  %v6061_v19 = vor.u32 %v6999_v37, %v6060_v8  ;;  %v6012_v6 = vld [vmem:[#allocation8 + $0x268] sm:$0xf]  ;;  %v6987_v37 = vld [vmem:[#allocation8 + $0x294] sm:$0xf0] }
 0x579   :  { %10503 = vst [vmem:[#allocation37_spill] sm:$0xff] %v8193_v30  ;;  %2314 = vmatmul.bf16.gmra.mxu2 %v8193_v30  ;;  %2363 = vmatmul.bf16.gmra.mxu0 %v8193_v30 }
 0x57a   :  { %2412 = vmatmul.bf16.gmra.mxu1 %v8193_v30  ;;  %2461 = vmatmul.bf16.gmra.mxu3 %v8193_v30 }
 0x57b   :  { %2712 = vmatpush.bf16.msrb.mxu0 %v6057_v2  ;;  %2761 = vmatpush.bf16.msra.mxu1 %v6061_v19  ;;  %v6017_v2 = vor.u32 %v6981_v13, %v6014_v45  ;;  %v6974_v19 = vld [vmem:[#allocation8 + $0x22c] sm:$0xf0]  ;;  %v5916_v13 = vld [vmem:[#allocation8 + $0x1a8] sm:$0xf]  ;;  %v6963_v45 = vld [vmem:[#allocation8 + $0x1d4] sm:$0xf0] }
 0x57d   :  { %2811 = vmatpush.bf16.msrb.mxu3 %v6017_v2  ;;  %v6957_v2 = vld [vmem:[#allocation8 + $0x1ac] sm:$0xf] }
 0x586   :  { %v8199_v11 = vpop.f32.mrf.mxu0 }
 0x587   :  { %v8201_v43 = vpop.f32.mrf.mxu1 }
 0x589   :  { %2475 = vmatmul.bf16.vlgmr.msrb.gmra.mxu2 %v8151_v22  ;;  %2524 = vmatmul.bf16.vlgmr.msra.gmra.mxu0 %v8151_v22 }
 0x58a   :  { %2573 = vmatmul.bf16.vlgmr.msrb.gmra.mxu1 %v8151_v22  ;;  %2622 = vmatmul.bf16.vlgmr.msra.gmra.mxu3 %v8151_v22 }
 0x58c   :  { %v8207_v31 = vpop.f32.mrf.mxu2 }
 0x58d   :  { %v8209_v39 = vpop.f32.mrf.mxu3 }
 0x58e   :  { %v8211_v1 = vpop.f32.mrf.mxu0 }
 0x58f   :  { %v8213_v15 = vpop.f32.mrf.mxu1 }
 0x594   :  { %v8215_v54 = vpop.f32.mrf.mxu2 }
 0x595   :  { %v8217_v28 = vpop.f32.mrf.mxu3 }
 0x596   :  { %v8219_v7 = vpop.f32.mrf.mxu0 }
 0x597   :  { %v8221_v63 = vpop.f32.mrf.mxu1 }
 0x599   :  { %2480 = vmatmul.bf16.gmra.mxu2 %v8157_v18  ;;  %2529 = vmatmul.bf16.gmra.mxu0 %v8157_v18 }
 0x59a   :  { %2578 = vmatmul.bf16.gmra.mxu1 %v8157_v18  ;;  %2627 = vmatmul.bf16.gmra.mxu3 %v8157_v18 }
 0x59c   :  { %v8227_v4 = vpop.f32.mrf.mxu2 }
 0x59d   :  { %v8229_v33 = vpop.f32.mrf.mxu3 }
 0x59e   :  { %v8231_v60 = vpop.f32.mrf.mxu0 }
 0x59f   :  { %v8233_v61 = vpop.f32.mrf.mxu1 }
 0x5a4   :  { %v8235_v35 = vpop.f32.mrf.mxu2 }
 0x5a5   :  { %v8237_v46 = vpop.f32.mrf.mxu3 }
 0x5a6   :  { %v8239_v16 = vpop.f32.mrf.mxu0 }
 0x5a7   :  { %v8241_v29 = vpop.f32.mrf.mxu1 }
 0x5a9   :  { %2485 = vmatmul.bf16.gmra.mxu2 %v8163_v21  ;;  %2534 = vmatmul.bf16.gmra.mxu0 %v8163_v21 }
 0x5aa   :  { %2583 = vmatmul.bf16.gmra.mxu1 %v8163_v21  ;;  %2632 = vmatmul.bf16.gmra.mxu3 %v8163_v21 }
 0x5ac   :  { %v8247_v44 = vpop.f32.mrf.mxu2 }
 0x5ad   :  { %v8249_v23 = vpop.f32.mrf.mxu3 }
 0x5ae   :  { %v8251_v5 = vpop.f32.mrf.mxu0 }
 0x5af   :  { %v8253_v58 = vpop.f32.mrf.mxu1 }
 0x5b4   :  { %v8255_v59 = vpop.f32.mrf.mxu2 }
 0x5b5   :  { %v8257_v10 = vpop.f32.mrf.mxu3 }
 0x5b6   :  { %v8259_v34 = vpop.f32.mrf.mxu0 }
 0x5b7   :  { %v8261_v52 = vpop.f32.mrf.mxu1 }
 0x5b9   :  { %2490 = vmatmul.bf16.gmra.mxu2 %v8169_v26  ;;  %2539 = vmatmul.bf16.gmra.mxu0 %v8169_v26 }
 0x5ba   :  { %2588 = vmatmul.bf16.gmra.mxu1 %v8169_v26  ;;  %2637 = vmatmul.bf16.gmra.mxu3 %v8169_v26 }
 0x5bc   :  { %v8267_v40 = vpop.f32.mrf.mxu2 }
 0x5bd   :  { %10504 = vst [vmem:[#allocation38_spill] sm:$0xff] %v8267_v40  ;;  %v8269_v56 = vpop.f32.mrf.mxu3  ;;  %v6921_v40 = vld [vmem:[#allocation8 + $0x8c] sm:$0xf] }
 0x5be   :  { %10505 = vst [vmem:[#allocation39_spill] sm:$0xff] %v8269_v56  ;;  %v8271_v14 = vpop.f32.mrf.mxu0  ;;  %v6969_v56 = vld [vmem:[#allocation8 + $0x20c] sm:$0xf] }
 0x5bf   :  { %v8273_v55 = vpop.f32.mrf.mxu1 }
 0x5c0   :  { %10506 = vst [vmem:[#allocation40_spill] sm:$0xff] %v8273_v55  ;;  %v5774_v55 = vld [vmem:[#allocation8 + $0xb8] sm:$0xf0] }
 0x5c4   :  { %v8275_v50 = vpop.f32.mrf.mxu2 }
 0x5c5   :  { %10507 = vst [vmem:[#allocation41_spill] sm:$0xff] %v8275_v50  ;;  %v8277_v48 = vpop.f32.mrf.mxu3  ;;  %v5965_v50 = vor.u32 %v6975_v0, %v5964_v47  ;;  %v6944_v47 = vld [vmem:[#allocation8 + $0x144] sm:$0xf] }
 0x5c6   :  { %10508 = vst [vmem:[#allocation42_spill] sm:$0xff] %v8277_v48  ;;  %v8279_v57 = vpop.f32.mrf.mxu0  ;;  %v5958_v48 = vld [vmem:[#allocation8 + $0x230] sm:$0xf0] }
 0x5c7   :  { %10509 = vst [vmem:[#allocation43_spill] sm:$0xff] %v8279_v57  ;;  %v8281_v3 = vpop.f32.mrf.mxu1 }
 0x5c8   :  { %10510 = vst [vmem:[#allocation44_spill] sm:$0xff] %v8281_v3  ;;  %v6980_v3 = vld [vmem:[#allocation8 + $0x264] sm:$0xf] }
 0x5c9   :  { %2495 = vmatmul.bf16.gmra.mxu2 %v8175_v53  ;;  %2544 = vmatmul.bf16.gmra.mxu0 %v8175_v53  ;;  %v6009_v8 = vor.u32 %v6980_v3, %v6006_v24 }
 0x5ca   :  { %2593 = vmatmul.bf16.gmra.mxu1 %v8175_v53  ;;  %2642 = vmatmul.bf16.gmra.mxu3 %v8175_v53 }
 0x5cb   :  { %2713 = vmatpush.bf16.msrb.mxu0 %v6009_v8  ;;  %v6956_v8 = vld [vmem:[#allocation8 + $0x1a4] sm:$0xf] }
 0x5cc   :  { %v8287_v17 = vpop.f32.mrf.mxu2 }
 0x5cd   :  { %10511 = vst [vmem:[#allocation45_spill] sm:$0xff] %v8287_v17  ;;  %v8289_v38 = vpop.f32.mrf.mxu3  ;;  %v6013_v17 = vor.u32 %v6987_v37, %v6012_v6  ;;  %v6962_v37 = vld [vmem:[#allocation8 + $0x1cc] sm:$0xf0] }
 0x5ce   :  { %10512 = vst [vmem:[#allocation46_spill] sm:$0xff] %v8289_v38  ;;  %v8291_v57 = vpop.f32.mrf.mxu0  ;;  %v6968_v38 = vld [vmem:[#allocation8 + $0x204] sm:$0xf] }
 0x5cf   :  { %10513 = vst [vmem:[#allocation47_spill] sm:$0xff] %v8291_v57  ;;  %v8293_v42 = vpop.f32.mrf.mxu1  ;;  %2762 = vmatpush.bf16.msra.mxu1 %v6013_v17  ;;  %v5957_v57 = vor.u32 %v6974_v19, %v5956_v51  ;;  %v5961_v49 = vor.u32 %v6968_v38, %v5958_v48  ;;  %v5909_v38 = vor.u32 %v6962_v37, %v5908_v12  ;;  %v5910_v48 = vld [vmem:[#allocation8 + $0x1d0] sm:$0xf0]  ;;  %v5868_v12 = vld [vmem:[#allocation8 + $0x148] sm:$0xf] }
 0x5d0   :  { %10514 = vst [vmem:[#allocation48_spill] sm:$0xff] %v8293_v42  ;;  %v5966_v42 = vld [vmem:[#allocation8 + $0x238] sm:$0xf0]  ;;  %v6951_v37 = vld [vmem:[#allocation8 + $0x174] sm:$0xf0] }
 0x5d1   :  { %v5969_v3 = vor.u32 %v6969_v56, %v5966_v42  ;;  %2665 = vmatpush.bf16.msra.mxu2 %v5957_v57  ;;  %2714 = vmatpush.bf16.msrb.mxu0 %v5961_v49  ;;  %v5913_v56 = vor.u32 %v6956_v8, %v5910_v48  ;;  %v5917_v42 = vor.u32 %v6963_v45, %v5916_v13  ;;  %v5918_v57 = vld [vmem:[#allocation8 + $0x1d8] sm:$0xf0]  ;;  %v6950_v49 = vld [vmem:[#allocation8 + $0x16c] sm:$0xf0]  ;;  %v6945_v48 = vld [vmem:[#allocation8 + $0x14c] sm:$0xf] }
 0x5d2   :  { %v5921_v19 = vor.u32 %v6957_v2, %v5918_v57  ;;  %v5870_v13 = vld [vmem:[#allocation8 + $0x178] sm:$0xf0] }
 0x5d3   :  { %2763 = vmatpush.bf16.msra.mxu1 %v5965_v50  ;;  %2812 = vmatpush.bf16.msrb.mxu3 %v5969_v3  ;;  %v5860_v50 = vld [vmem:[#allocation8 + $0x140] sm:$0xf]  ;;  %v5862_v3 = vld [vmem:[#allocation8 + $0x170] sm:$0xf0]  ;;  %v5873_v2 = vor.u32 %v6945_v48, %v5870_v13  ;;  %v6926_v13 = vld [vmem:[#allocation8 + $0xac] sm:$0xf0] }
 0x5d4   :  { %v8295_v24 = vpop.f32.mrf.mxu2  ;;  %v5861_v0 = vor.u32 %v6950_v49, %v5860_v50  ;;  %v5865_v8 = vor.u32 %v6944_v47, %v5862_v3 }
 0x5d5   :  { %10515 = vst [vmem:[#allocation49_spill] sm:$0xff] %v8295_v24  ;;  %v8297_v6 = vpop.f32.mrf.mxu3  ;;  %2666 = vmatpush.bf16.msra.mxu2 %v5909_v38  ;;  %2715 = vmatpush.bf16.msrb.mxu0 %v5913_v56  ;;  %v5869_v38 = vor.u32 %v6951_v37, %v5868_v12  ;;  %v5814_v24 = vld [vmem:[#allocation8 + $0x110] sm:$0xf0]  ;;  %v5820_v56 = vld [vmem:[#allocation8 + $0xe8] sm:$0xf] }
 0x5d6   :  { %10516 = vst [vmem:[#allocation50_spill] sm:$0xff] %v8297_v6  ;;  %v8299_v17 = vpop.f32.mrf.mxu0  ;;  %v6932_v6 = vld [vmem:[#allocation8 + $0xe4] sm:$0xf]  ;;  %v5764_v37 = vld [vmem:[#allocation8 + $0x80] sm:$0xf] }
 0x5d7   :  { %10517 = vst [vmem:[#allocation51_spill] sm:$0xff] %v8299_v17  ;;  %v8301_v51 = vpop.f32.mrf.mxu1  ;;  %2764 = vmatpush.bf16.msra.mxu1 %v5917_v42  ;;  %2813 = vmatpush.bf16.msrb.mxu3 %v5921_v19  ;;  %v6938_v17 = vld [vmem:[#allocation8 + $0x10c] sm:$0xf0]  ;;  %v6939_v42 = vld [vmem:[#allocation8 + $0x114] sm:$0xf0]  ;;  %v5817_v3 = vor.u32 %v6932_v6, %v5814_v24  ;;  %v5777_v6 = vor.u32 %v6921_v40, %v5774_v55 }
 0x5d8   :  { %10518 = vst [vmem:[#allocation52_spill] sm:$0xff] %v8301_v51  ;;  %v5812_v51 = vld [vmem:[#allocation8 + $0xe0] sm:$0xf]  ;;  %v5821_v12 = vor.u32 %v6939_v42, %v5820_v56  ;;  %v6933_v19 = vld [vmem:[#allocation8 + $0xec] sm:$0xf] }
 0x5d9   :  { %2500 = vmatmul.bf16.gmra.mxu2 %v8181_v41  ;;  %2549 = vmatmul.bf16.gmra.mxu0 %v8181_v41  ;;  %v5813_v49 = vor.u32 %v6938_v17, %v5812_v51  ;;  %v5772_v17 = vld [vmem:[#allocation8 + $0x88] sm:$0xf]  ;;  %v6927_v51 = vld [vmem:[#allocation8 + $0xb4] sm:$0xf0]  ;;  %v6914_v56 = vld [vmem:[#allocation8 + $0x4c] sm:$0xf0] }
 0x5da   :  { %2598 = vmatmul.bf16.gmra.mxu1 %v8181_v41  ;;  %2647 = vmatmul.bf16.gmra.mxu3 %v8181_v41  ;;  %v6908_v42 = vld [vmem:[#allocation8 + $0x24] sm:$0xf] }
 0x5db   :  { %2667 = vmatpush.bf16.msra.mxu2 %v5861_v0  ;;  %2716 = vmatpush.bf16.msrb.mxu0 %v5865_v8  ;;  %v5822_v0 = vld [vmem:[#allocation8 + $0x118] sm:$0xf0] }
 0x5dc   :  { %v8307_v45 = vpop.f32.mrf.mxu2  ;;  %2765 = vmatpush.bf16.msra.mxu1 %v5869_v38  ;;  %2814 = vmatpush.bf16.msrb.mxu3 %v5873_v2  ;;  %v5825_v48 = vor.u32 %v6933_v19, %v5822_v0  ;;  %v5773_v38 = vor.u32 %v6927_v51, %v5772_v17 }
 0x5dd   :  { %10519 = vst [vmem:[#allocation53_spill] sm:$0xff] %v8307_v45  ;;  %v8309_v57 = vpop.f32.mrf.mxu3  ;;  %v5766_v45 = vld [vmem:[#allocation8 + $0xb0] sm:$0xf0] }
 0x5de   :  { %10520 = vst [vmem:[#allocation54_spill] sm:$0xff] %v8309_v57  ;;  %v8311_v50 = vpop.f32.mrf.mxu0  ;;  %v6920_v57 = vld [vmem:[#allocation8 + $0x84] sm:$0xf] }
 0x5df   :  { %10521 = vst [vmem:[#allocation55_spill] sm:$0xff] %v8311_v50  ;;  %v8313_v47 = vpop.f32.mrf.mxu1  ;;  %2668 = vmatpush.bf16.msra.mxu2 %v5813_v49  ;;  %v5765_v50 = vor.u32 %v6926_v13, %v5764_v37  ;;  %2717 = vmatpush.bf16.msrb.mxu0 %v5817_v3  ;;  %v5769_v8 = vor.u32 %v6920_v57, %v5766_v45  ;;  %v5716_v49 = vld [vmem:[#allocation8 + $0x20] sm:$0xf]  ;;  %v5718_v37 = vld [vmem:[#allocation8 + $0x50] sm:$0xf0] }
 0x5e0   :  { %10522 = vst [vmem:[#allocation56_spill] sm:$0xff] %v8313_v47  ;;  %2766 = vmatpush.bf16.msra.mxu1 %v5821_v12  ;;  %2815 = vmatpush.bf16.msrb.mxu3 %v5825_v48  ;;  %v5717_v0 = vor.u32 %v6914_v56, %v5716_v49  ;;  %v5724_v13 = vld [vmem:[#allocation8 + $0x28] sm:$0xf]  ;;  %v6915_v47 = vld [vmem:[#allocation8 + $0x54] sm:$0xf0]  ;;  %v5721_v45 = vor.u32 %v6908_v42, %v5718_v37 }
 0x5e1   :  { %v5725_v57 = vor.u32 %v6915_v47, %v5724_v13  ;;  %v6909_v12 = vld [vmem:[#allocation8 + $0x2c] sm:$0xf] }
 0x5e3   :  { %2669 = vmatpush.bf16.msra.mxu2 %v5765_v50  ;;  %2718 = vmatpush.bf16.msrb.mxu0 %v5769_v8  ;;  %v5726_v50 = vld [vmem:[#allocation8 + $0x58] sm:$0xf0] }
 0x5e4   :  { %v8315_v24 = vpop.f32.mrf.mxu2  ;;  %2767 = vmatpush.bf16.msra.mxu1 %v5773_v38  ;;  %2816 = vmatpush.bf16.msrb.mxu3 %v5777_v6  ;;  %v5729_v40 = vor.u32 %v6909_v12, %v5726_v50 }
 0x5e5   :  { %v8317_v2 = vpop.f32.mrf.mxu3 }
 0x5e6   :  { %v8319_v19 = vpop.f32.mrf.mxu0 }
 0x5e7   :  { %v8321_v3 = vpop.f32.mrf.mxu1  ;;  %2670 = vmatpush.bf16.msra.mxu2 %v5717_v0  ;;  %2719 = vmatpush.bf16.msrb.mxu0 %v5721_v45 }
 0x5e8   :  { %2768 = vmatpush.bf16.msra.mxu1 %v5725_v57  ;;  %2817 = vmatpush.bf16.msrb.mxu3 %v5729_v40 }
 0x5e9   :  { %2505 = vmatmul.bf16.gmra.mxu2 %v8187_v62  ;;  %2554 = vmatmul.bf16.gmra.mxu0 %v8187_v62 }
 0x5ea   :  { %2603 = vmatmul.bf16.gmra.mxu1 %v8187_v62  ;;  %2652 = vmatmul.bf16.gmra.mxu3 %v8187_v62 }
 0x5ec   :  { %v8327_v55 = vpop.f32.mrf.mxu2 }
 0x5ed   :  { %v8329_v48 = vpop.f32.mrf.mxu3 }
 0x5ee   :  { %v8331_v47 = vpop.f32.mrf.mxu0 }
 0x5ef   :  { %v8333_v17 = vpop.f32.mrf.mxu1 }
 0x5f4   :  { %v8335_v51 = vpop.f32.mrf.mxu2 }
 0x5f5   :  { %v8337_v8 = vpop.f32.mrf.mxu3 }
 0x5f6   :  { %v8339_v38 = vpop.f32.mrf.mxu0 }
 0x5f7   :  { %v8341_v6 = vpop.f32.mrf.mxu1 }
 0x5f9   :  { %2510 = vmatmul.bf16.gmra.mxu2 %v8193_v30  ;;  %2559 = vmatmul.bf16.gmra.mxu0 %v8193_v30 }
 0x5fa   :  { %2608 = vmatmul.bf16.gmra.mxu1 %v8193_v30  ;;  %2657 = vmatmul.bf16.gmra.mxu3 %v8193_v30 }
 0x5fc   :  { %v8347_v49 = vpop.f32.mrf.mxu2 }
 0x5fd   :  { %v8349_v56 = vpop.f32.mrf.mxu3 }
 0x5fe   :  { %10523 = vst [vmem:[#allocation57_spill] sm:$0xff] %v8349_v56  ;;  %v8351_v42 = vpop.f32.mrf.mxu0 }
 0x5ff   :  { %v8353_v0 = vpop.f32.mrf.mxu1 }
 0x604   :  { %v8355_v37 = vpop.f32.mrf.mxu2 }
 0x605   :  { %10524 = vst [vmem:[#allocation58_spill] sm:$0xff] %v8355_v37  ;;  %v8357_v13 = vpop.f32.mrf.mxu3 }
 0x606   :  { %10525 = vst [vmem:[#allocation59_spill] sm:$0xff] %v8357_v13  ;;  %v8359_v45 = vpop.f32.mrf.mxu0 }
 0x607   :  { %10526 = vst [vmem:[#allocation60_spill] sm:$0xff] %v8359_v45  ;;  %v8361_v57 = vpop.f32.mrf.mxu1 }
 0x608   :  { %10527 = vst [vmem:[#allocation61_spill] sm:$0xff] %v8361_v57 }
 0x609   :  { %2671 = vmatmul.bf16.vlgmr.msra.gmra.mxu2 %v8151_v22  ;;  %2720 = vmatmul.bf16.vlgmr.msrb.gmra.mxu0 %v8151_v22 }
 0x60a   :  { %2769 = vmatmul.bf16.vlgmr.msra.gmra.mxu1 %v8151_v22  ;;  %2818 = vmatmul.bf16.vlgmr.msrb.gmra.mxu3 %v8151_v22 }
 0x60c   :  { %v8367_v12 = vpop.f32.mrf.mxu2 }
 0x60d   :  { %10528 = vst [vmem:[#allocation62_spill] sm:$0xff] %v8367_v12  ;;  %v8369_v50 = vpop.f32.mrf.mxu3 }
 0x60e   :  { %10529 = vst [vmem:[#allocation63_spill] sm:$0xff] %v8369_v50  ;;  %v8371_v40 = vpop.f32.mrf.mxu0 }
 0x60f   :  { %10530 = vst [vmem:[#allocation64_spill] sm:$0xff] %v8371_v40  ;;  %v8373_v56 = vpop.f32.mrf.mxu1 }
 0x610   :  { %10531 = vst [vmem:[#allocation65_spill] sm:$0xff] %v8373_v56 }
 0x614   :  { %v8375_v13 = vpop.f32.mrf.mxu2 }
 0x615   :  { %10532 = vst [vmem:[#allocation66_spill] sm:$0xff] %v8375_v13  ;;  %v8377_v45 = vpop.f32.mrf.mxu3 }
 0x616   :  { %10533 = vst [vmem:[#allocation67_spill] sm:$0xff] %v8377_v45  ;;  %v8379_v57 = vpop.f32.mrf.mxu0 }
 0x617   :  { %10534 = vst [vmem:[#allocation68_spill] sm:$0xff] %v8379_v57  ;;  %v8381_v37 = vpop.f32.mrf.mxu1 }
 0x618   :  { %10535 = vst [vmem:[#allocation69_spill] sm:$0xff] %v8381_v37 }
 0x619   :  { %2676 = vmatmul.bf16.gmra.mxu2 %v8157_v18  ;;  %2725 = vmatmul.bf16.gmra.mxu0 %v8157_v18 }
 0x61a   :  { %2774 = vmatmul.bf16.gmra.mxu1 %v8157_v18  ;;  %2823 = vmatmul.bf16.gmra.mxu3 %v8157_v18 }
 0x61c   :  { %v8387_v22 = vpop.f32.mrf.mxu2 }
 0x61d   :  { %10536 = vst [vmem:[#allocation70_spill] sm:$0xff] %v8387_v22  ;;  %v8389_v50 = vpop.f32.mrf.mxu3 }
 0x61e   :  { %10537 = vst [vmem:[#allocation71_spill] sm:$0xff] %v8389_v50  ;;  %v8391_v12 = vpop.f32.mrf.mxu0 }
 0x61f   :  { %10538 = vst [vmem:[#allocation72_spill] sm:$0xff] %v8391_v12  ;;  %v8393_v13 = vpop.f32.mrf.mxu1 }
 0x620   :  { %10539 = vst [vmem:[#allocation73_spill] sm:$0xff] %v8393_v13 }
 0x624   :  { %v8395_v45 = vpop.f32.mrf.mxu2 }
 0x625   :  { %10540 = vst [vmem:[#allocation74_spill] sm:$0xff] %v8395_v45  ;;  %v8397_v57 = vpop.f32.mrf.mxu3 }
 0x626   :  { %10541 = vst [vmem:[#allocation75_spill] sm:$0xff] %v8397_v57  ;;  %v8399_v37 = vpop.f32.mrf.mxu0 }
 0x627   :  { %10542 = vst [vmem:[#allocation76_spill] sm:$0xff] %v8399_v37  ;;  %v8401_v56 = vpop.f32.mrf.mxu1 }
 0x628   :  { %10543 = vst [vmem:[#allocation77_spill] sm:$0xff] %v8401_v56 }
 0x629   :  { %2681 = vmatmul.bf16.gmra.mxu2 %v8163_v21  ;;  %2730 = vmatmul.bf16.gmra.mxu0 %v8163_v21 }
 0x62a   :  { %2779 = vmatmul.bf16.gmra.mxu1 %v8163_v21  ;;  %2828 = vmatmul.bf16.gmra.mxu3 %v8163_v21 }
 0x62c   :  { %v8407_v18 = vpop.f32.mrf.mxu2 }
 0x62d   :  { %10544 = vst [vmem:[#allocation78_spill] sm:$0xff] %v8407_v18  ;;  %v8409_v50 = vpop.f32.mrf.mxu3 }
 0x62e   :  { %10545 = vst [vmem:[#allocation79_spill] sm:$0xff] %v8409_v50  ;;  %v8411_v22 = vpop.f32.mrf.mxu0 }
 0x62f   :  { %10546 = vst [vmem:[#allocation80_spill] sm:$0xff] %v8411_v22  ;;  %v8413_v45 = vpop.f32.mrf.mxu1 }
 0x630   :  { %10547 = vst [vmem:[#allocation81_spill] sm:$0xff] %v8413_v45 }
 0x634   :  { %v8415_v57 = vpop.f32.mrf.mxu2 }
 0x635   :  { %10548 = vst [vmem:[#allocation82_spill] sm:$0xff] %v8415_v57  ;;  %v8417_v37 = vpop.f32.mrf.mxu3 }
 0x636   :  { %10549 = vst [vmem:[#allocation83_spill] sm:$0xff] %v8417_v37  ;;  %v8419_v56 = vpop.f32.mrf.mxu0 }
 0x637   :  { %10550 = vst [vmem:[#allocation84_spill] sm:$0xff] %v8419_v56  ;;  %v8421_v13 = vpop.f32.mrf.mxu1 }
 0x638   :  { %10551 = vst [vmem:[#allocation85_spill] sm:$0xff] %v8421_v13 }
 0x639   :  { %2686 = vmatmul.bf16.gmra.mxu2 %v8169_v26  ;;  %2735 = vmatmul.bf16.gmra.mxu0 %v8169_v26 }
 0x63a   :  { %2784 = vmatmul.bf16.gmra.mxu1 %v8169_v26  ;;  %2833 = vmatmul.bf16.gmra.mxu3 %v8169_v26 }
 0x63c   :  { %v8427_v21 = vpop.f32.mrf.mxu2 }
 0x63d   :  { %10552 = vst [vmem:[#allocation86_spill] sm:$0xff] %v8427_v21  ;;  %v8429_v50 = vpop.f32.mrf.mxu3 }
 0x63e   :  { %10553 = vst [vmem:[#allocation87_spill] sm:$0xff] %v8429_v50  ;;  %v8431_v18 = vpop.f32.mrf.mxu0 }
 0x63f   :  { %10554 = vst [vmem:[#allocation88_spill] sm:$0xff] %v8431_v18  ;;  %v8433_v57 = vpop.f32.mrf.mxu1 }
 0x640   :  { %10555 = vst [vmem:[#allocation89_spill] sm:$0xff] %v8433_v57 }
 0x644   :  { %v8435_v37 = vpop.f32.mrf.mxu2 }
 0x645   :  { %10556 = vst [vmem:[#allocation90_spill] sm:$0xff] %v8435_v37  ;;  %v8437_v56 = vpop.f32.mrf.mxu3 }
 0x646   :  { %10557 = vst [vmem:[#allocation91_spill] sm:$0xff] %v8437_v56  ;;  %v8439_v13 = vpop.f32.mrf.mxu0 }
 0x647   :  { %10558 = vst [vmem:[#allocation92_spill] sm:$0xff] %v8439_v13  ;;  %v8441_v45 = vpop.f32.mrf.mxu1 }
 0x648   :  { %10559 = vst [vmem:[#allocation93_spill] sm:$0xff] %v8441_v45 }
 0x649   :  { %2691 = vmatmul.bf16.gmra.mxu2 %v8175_v53  ;;  %2740 = vmatmul.bf16.gmra.mxu0 %v8175_v53 }
 0x64a   :  { %2789 = vmatmul.bf16.gmra.mxu1 %v8175_v53  ;;  %2838 = vmatmul.bf16.gmra.mxu3 %v8175_v53 }
 0x64c   :  { %v8447_v26 = vpop.f32.mrf.mxu2 }
 0x64d   :  { %10560 = vst [vmem:[#allocation94_spill] sm:$0xff] %v8447_v26  ;;  %v8449_v50 = vpop.f32.mrf.mxu3 }
 0x64e   :  { %10561 = vst [vmem:[#allocation95_spill] sm:$0xff] %v8449_v50  ;;  %v8451_v21 = vpop.f32.mrf.mxu0 }
 0x64f   :  { %10562 = vst [vmem:[#allocation96_spill] sm:$0xff] %v8451_v21  ;;  %v8453_v37 = vpop.f32.mrf.mxu1  ;;  %v7013_v21 = vld [vmem:[%s10307_s20 + $0x6c] sm:$0xf] }
 0x650   :  { %10563 = vst [vmem:[#allocation97_spill] sm:$0xff] %v8453_v37 }
 0x654   :  { %v8455_v56 = vpop.f32.mrf.mxu2 }
 0x655   :  { %10564 = vst [vmem:[#allocation98_spill] sm:$0xff] %v8455_v56  ;;  %v8457_v13 = vpop.f32.mrf.mxu3 }
 0x656   :  { %10565 = vst [vmem:[#allocation99_spill] sm:$0xff] %v8457_v13  ;;  %v8459_v45 = vpop.f32.mrf.mxu0 }
 0x657   :  { %10566 = vst [vmem:[#allocation100_spill] sm:$0xff] %v8459_v45  ;;  %v8461_v57 = vpop.f32.mrf.mxu1  ;;  %v7018_v45 = vld [vmem:[%s10307_s20 + $0x8c] sm:$0xf0] }
 0x658   :  { %10567 = vst [vmem:[#allocation101_spill] sm:$0xff] %v8461_v57  ;;  %v6116_v57 = vld [vmem:[%s10307_s20 + $0x60] sm:$0xf] }
 0x659   :  { %2696 = vmatmul.bf16.gmra.mxu2 %v8181_v41  ;;  %2745 = vmatmul.bf16.gmra.mxu0 %v8181_v41  ;;  %v6117_v13 = vor.u32 %v7018_v45, %v6116_v57  ;;  %v6126_v45 = vld [vmem:[%s10307_s20 + $0x98] sm:$0xf0] }
 0x65a   :  { %2794 = vmatmul.bf16.gmra.mxu1 %v8181_v41  ;;  %2843 = vmatmul.bf16.gmra.mxu3 %v8181_v41  ;;  %v7012_v41 = vld [vmem:[%s10307_s20 + $0x64] sm:$0xf]  ;;  %v6129_v57 = vor.u32 %v7013_v21, %v6126_v45 }
 0x65b   :  { %3017 = vmatpush.bf16.msrb.mxu2 %v6117_v13  ;;  %v6076_v13 = vld [vmem:[%s10307_s20 + $0x8] sm:$0xf] }
 0x65c   :  { %v8467_v53 = vpop.f32.mrf.mxu2  ;;  %3164 = vmatpush.bf16.msra.mxu3 %v6129_v57 }
 0x65d   :  { %10568 = vst [vmem:[#allocation102_spill] sm:$0xff] %v8467_v53  ;;  %v8469_v50 = vpop.f32.mrf.mxu3  ;;  %v6124_v53 = vld [vmem:[%s10307_s20 + $0x68] sm:$0xf] }
 0x65e   :  { %10569 = vst [vmem:[#allocation103_spill] sm:$0xff] %v8469_v50  ;;  %v8471_v26 = vpop.f32.mrf.mxu0  ;;  %v6118_v50 = vld [vmem:[%s10307_s20 + $0x90] sm:$0xf0] }
 0x65f   :  { %10570 = vst [vmem:[#allocation104_spill] sm:$0xff] %v8471_v26  ;;  %v8473_v56 = vpop.f32.mrf.mxu1  ;;  %v6121_v26 = vor.u32 %v7012_v41, %v6118_v50  ;;  %v7006_v41 = vld [vmem:[%s10307_s20 + $0x2c] sm:$0xf0]  ;;  %v7007_v50 = vld [vmem:[%s10307_s20 + $0x34] sm:$0xf0] }
 0x660   :  { %10571 = vst [vmem:[#allocation105_spill] sm:$0xff] %v8473_v56  ;;  %v7019_v56 = vld [vmem:[%s10307_s20 + $0x94] sm:$0xf0] }
 0x661   :  { %v6125_v37 = vor.u32 %v7019_v56, %v6124_v53  ;;  %3066 = vmatpush.bf16.msra.mxu0 %v6121_v26  ;;  %v6068_v53 = vld [vmem:[%s10307_s20] sm:$0xf]  ;;  %v7000_v56 = vld [vmem:[%s10307_s20 + $0x4] sm:$0xf] }
 0x662   :  { %v6069_v26 = vor.u32 %v7006_v41, %v6068_v53  ;;  %v7001_v53 = vld [vmem:[%s10307_s20 + $0xc] sm:$0xf]  ;;  %v6078_v41 = vld [vmem:[%s10307_s20 + $0x38] sm:$0xf0] }
 0x663   :  { %3115 = vmatpush.bf16.msrb.mxu1 %v6125_v37  ;;  %v6070_v37 = vld [vmem:[%s10307_s20 + $0x30] sm:$0xf0] }
 0x664   :  { %v8499_v18 = vpop.f32.mrf.mxu2  ;;  %v6073_v57 = vor.u32 %v7000_v56, %v6070_v37  ;;  %3018 = vmatpush.bf16.msrb.mxu2 %v6069_v26 }
 0x665   :  { %10572 = vst [vmem:[#allocation106_spill] sm:$0xff] %v8499_v18  ;;  %v8501_v22 = vpop.f32.mrf.mxu3  ;;  %v7015_v18 = vld [vmem:[%s10307_s20 + $0x7c] sm:$0xf] }
 0x666   :  { %10573 = vst [vmem:[#allocation107_spill] sm:$0xff] %v8501_v22  ;;  %v8512_v21 = vpop.f32.mrf.mxu0  ;;  %v6077_v22 = vor.u32 %v7007_v50, %v6076_v13  ;;  %3067 = vmatpush.bf16.msra.mxu0 %v6073_v57 }
 0x667   :  { %10574 = vst [vmem:[#allocation108_spill] sm:$0xff] %v8512_v21  ;;  %v8523_v45 = vpop.f32.mrf.mxu1  ;;  %v6081_v21 = vor.u32 %v7001_v53, %v6078_v41 }
 0x668   :  { %10575 = vst [vmem:[#allocation109_spill] sm:$0xff] %v8523_v45  ;;  %3116 = vmatpush.bf16.msrb.mxu1 %v6077_v22 }
 0x669   :  { %2701 = vmatmul.bf16.gmra.mxu2 %v8187_v62  ;;  %2750 = vmatmul.bf16.gmra.mxu0 %v8187_v62 }
 0x66a   :  { %2799 = vmatmul.bf16.gmra.mxu1 %v8187_v62  ;;  %2848 = vmatmul.bf16.gmra.mxu3 %v8187_v62 }
 0x66b   :  { %3165 = vmatpush.bf16.msra.mxu3 %v6081_v21 }
 0x66c   :  { %v8535_v56 = vpop.f32.mrf.mxu2 }
 0x66d   :  { %10576 = vst [vmem:[#allocation110_spill] sm:$0xff] %v8535_v56  ;;  %v8537_v37 = vpop.f32.mrf.mxu3 }
 0x66e   :  { %10577 = vst [vmem:[#allocation111_spill] sm:$0xff] %v8537_v37  ;;  %v8539_v13 = vpop.f32.mrf.mxu0 }
 0x66f   :  { %10578 = vst [vmem:[#allocation112_spill] sm:$0xff] %v8539_v13  ;;  %v8541_v50 = vpop.f32.mrf.mxu1 }
 0x670   :  { %10579 = vst [vmem:[#allocation113_spill] sm:$0xff] %v8541_v50  ;;  %v6132_v50 = vld [vmem:[%s10307_s20 + $0x70] sm:$0xf] }
 0x674   :  { %v8543_v26 = vpop.f32.mrf.mxu2 }
 0x675   :  { %10580 = vst [vmem:[#allocation114_spill] sm:$0xff] %v8543_v26  ;;  %v8545_v53 = vpop.f32.mrf.mxu3 }
 0x676   :  { %10581 = vst [vmem:[#allocation115_spill] sm:$0xff] %v8545_v53  ;;  %v8547_v41 = vpop.f32.mrf.mxu0 }
 0x677   :  { %10582 = vst [vmem:[#allocation116_spill] sm:$0xff] %v8547_v41  ;;  %v8549_v45 = vpop.f32.mrf.mxu1 }
 0x678   :  { %10583 = vst [vmem:[#allocation117_spill] sm:$0xff] %v8549_v45 }
 0x679   :  { %2706 = vmatmul.bf16.gmra.mxu2 %v8193_v30  ;;  %2755 = vmatmul.bf16.gmra.mxu0 %v8193_v30 }
 0x67a   :  { %2804 = vmatmul.bf16.gmra.mxu1 %v8193_v30  ;;  %2853 = vmatmul.bf16.gmra.mxu3 %v8193_v30 }
 0x67c   :  { %v8555_v22 = vpop.f32.mrf.mxu2 }
 0x67d   :  { %10584 = vst [vmem:[#allocation118_spill] sm:$0xff] %v8555_v22  ;;  %v8557_v21 = vpop.f32.mrf.mxu3 }
 0x67e   :  { %10585 = vst [vmem:[#allocation119_spill] sm:$0xff] %v8557_v21  ;;  %v8559_v57 = vpop.f32.mrf.mxu0 }
 0x67f   :  { %10586 = vst [vmem:[#allocation120_spill] sm:$0xff] %v8559_v57  ;;  %v8561_v62 = vpop.f32.mrf.mxu1  ;;  %v7124_v57 = vld [vmem:[%s10301_s14] ss:$0 sm:$0xff] }
 0x680   :  { %10587 = vst [vmem:[#allocation121_spill] sm:$0xff] %v8561_v62 }
 0x684   :  { %v8563_v53 = vpop.f32.mrf.mxu2 }
 0x685   :  { %10588 = vst [vmem:[#allocation122_spill] sm:$0xff] %v8563_v53  ;;  %v8565_v41 = vpop.f32.mrf.mxu3 }
 0x686   :  { %10589 = vst [vmem:[#allocation123_spill] sm:$0xff] %v8565_v41  ;;  %v8567_v45 = vpop.f32.mrf.mxu0 }
 0x687   :  { %10590 = vst [vmem:[#allocation124_spill] sm:$0xff] %v8567_v45  ;;  %v8569_v37 = vpop.f32.mrf.mxu1 }
 0x688   :  { %10591 = vst [vmem:[#allocation125_spill] sm:$0xff] %v8569_v37 }
 0x689   :  { %6162 = vmatmul.msk.bf16.vlgmr.msrb.gmra.mxu2 %vm651_vm14, %v7842_v25  ;;  %6170 = vmatmul.msk.bf16.vlgmr.msra.gmra.mxu0 %vm651_vm14, %v7842_v25 }
 0x68a   :  { %6178 = vmatmul.msk.bf16.vlgmr.msrb.gmra.mxu1 %vm651_vm14, %v7842_v25  ;;  %6186 = vmatmul.msk.bf16.vlgmr.msra.gmra.mxu3 %vm651_vm14, %v7842_v25 }
 0x68c   :  { %v8579_v30 = vpop.f32.mrf.mxu2 }
 0x68d   :  { %10592 = vst [vmem:[#allocation126_spill] sm:$0xff] %v8579_v30  ;;  %v8581_v21 = vpop.f32.mrf.mxu3 }
 0x68e   :  { %10593 = vst [vmem:[#allocation127_spill] sm:$0xff] %v8581_v21  ;;  %v8583_v41 = vpop.f32.mrf.mxu0 }
 0x68f   :  { %10594 = vst [vmem:[#allocation128_spill] sm:$0xff] %v8583_v41  ;;  %v8585_v45 = vpop.f32.mrf.mxu1 }
 0x690   :  { %10595 = vst [vmem:[#allocation129_spill] sm:$0xff] %v8585_v45 }
 0x694   :  { %v8587_v37 = vpop.f32.mrf.mxu2 }
 0x695   :  { %10596 = vst [vmem:[#allocation130_spill] sm:$0xff] %v8587_v37  ;;  %v8589_v53 = vpop.f32.mrf.mxu3 }
 0x696   :  { %10597 = vst [vmem:[#allocation131_spill] sm:$0xff] %v8589_v53  ;;  %v8591_v22 = vpop.f32.mrf.mxu0 }
 0x697   :  { %10598 = vst [vmem:[#allocation132_spill] sm:$0xff] %v8591_v22  ;;  %v8593_v62 = vpop.f32.mrf.mxu1 }
 0x698   :  { %10599 = vst [vmem:[#allocation133_spill] sm:$0xff] %v8593_v62 }
 0x699   :  { %6163 = vmatmul.msk.bf16.gmra.mxu2 %vm651_vm14, %v7867_v20  ;;  %6171 = vmatmul.msk.bf16.gmra.mxu0 %vm651_vm14, %v7867_v20 }
 0x69a   :  { %6179 = vmatmul.msk.bf16.gmra.mxu1 %vm651_vm14, %v7867_v20  ;;  %6187 = vmatmul.msk.bf16.gmra.mxu3 %vm651_vm14, %v7867_v20 }
 0x69c   :  { %v8603_v21 = vpop.f32.mrf.mxu2 }
 0x69d   :  { %10600 = vst [vmem:[#allocation134_spill] sm:$0xff] %v8603_v21  ;;  %v8605_v37 = vpop.f32.mrf.mxu3 }
 0x69e   :  { %10601 = vst [vmem:[#allocation135_spill] sm:$0xff] %v8605_v37  ;;  %v8607_v53 = vpop.f32.mrf.mxu0 }
 0x69f   :  { %10602 = vst [vmem:[#allocation136_spill] sm:$0xff] %v8607_v53  ;;  %v8609_v22 = vpop.f32.mrf.mxu1 }
 0x6a0   :  { %10603 = vst [vmem:[#allocation137_spill] sm:$0xff] %v8609_v22 }
 0x6a4   :  { %v8611_v62 = vpop.f32.mrf.mxu2 }
 0x6a5   :  { %10604 = vst [vmem:[#allocation138_spill] sm:$0xff] %v8611_v62  ;;  %v8613_v30 = vpop.f32.mrf.mxu3 }
 0x6a6   :  { %10605 = vst [vmem:[#allocation139_spill] sm:$0xff] %v8613_v30  ;;  %v8615_v45 = vpop.f32.mrf.mxu0 }
 0x6a7   :  { %10606 = vst [vmem:[#allocation140_spill] sm:$0xff] %v8615_v45  ;;  %v8617_v41 = vpop.f32.mrf.mxu1 }
 0x6a8   :  { %10607 = vst [vmem:[#allocation141_spill] sm:$0xff] %v8617_v41 }
 0x6a9   :  { %6164 = vmatmul.msk.bf16.gmra.mxu2 %vm651_vm14, %v7885_v32  ;;  %6172 = vmatmul.msk.bf16.gmra.mxu0 %vm651_vm14, %v7885_v32 }
 0x6aa   :  { %6180 = vmatmul.msk.bf16.gmra.mxu1 %vm651_vm14, %v7885_v32  ;;  %6188 = vmatmul.msk.bf16.gmra.mxu3 %vm651_vm14, %v7885_v32 }
 0x6ac   :  { %v8627_v37 = vpop.f32.mrf.mxu2 }
 0x6ad   :  { %10608 = vst [vmem:[#allocation142_spill] sm:$0xff] %v8627_v37  ;;  %v8629_v62 = vpop.f32.mrf.mxu3 }
 0x6ae   :  { %10609 = vst [vmem:[#allocation143_spill] sm:$0xff] %v8629_v62  ;;  %v8631_v30 = vpop.f32.mrf.mxu0 }
 0x6af   :  { %10610 = vst [vmem:[#allocation144_spill] sm:$0xff] %v8631_v30  ;;  %v8633_v45 = vpop.f32.mrf.mxu1 }
 0x6b0   :  { %10611 = vst [vmem:[#allocation145_spill] sm:$0xff] %v8633_v45 }
 0x6b4   :  { %v8635_v41 = vpop.f32.mrf.mxu2 }
 0x6b5   :  { %10612 = vst [vmem:[#allocation146_spill] sm:$0xff] %v8635_v41  ;;  %v8637_v21 = vpop.f32.mrf.mxu3 }
 0x6b6   :  { %10613 = vst [vmem:[#allocation147_spill] sm:$0xff] %v8637_v21  ;;  %v8639_v22 = vpop.f32.mrf.mxu0 }
 0x6b7   :  { %10614 = vst [vmem:[#allocation148_spill] sm:$0xff] %v8639_v22  ;;  %v8641_v53 = vpop.f32.mrf.mxu1 }
 0x6b8   :  { %10615 = vst [vmem:[#allocation149_spill] sm:$0xff] %v8641_v53 }
 0x6b9   :  { %6165 = vmatmul.msk.bf16.gmra.mxu2 %vm651_vm14, %v7883_v9  ;;  %6173 = vmatmul.msk.bf16.gmra.mxu0 %vm651_vm14, %v7883_v9 }
 0x6ba   :  { %6181 = vmatmul.msk.bf16.gmra.mxu1 %vm651_vm14, %v7883_v9  ;;  %6189 = vmatmul.msk.bf16.gmra.mxu3 %vm651_vm14, %v7883_v9 }
 0x6bc   :  { %v8651_v62 = vpop.f32.mrf.mxu2 }
 0x6bd   :  { %10616 = vst [vmem:[#allocation150_spill] sm:$0xff] %v8651_v62  ;;  %v8653_v41 = vpop.f32.mrf.mxu3 }
 0x6be   :  { %10617 = vst [vmem:[#allocation151_spill] sm:$0xff] %v8653_v41  ;;  %v8655_v21 = vpop.f32.mrf.mxu0 }
 0x6bf   :  { %10618 = vst [vmem:[#allocation152_spill] sm:$0xff] %v8655_v21  ;;  %v8657_v22 = vpop.f32.mrf.mxu1 }
 0x6c0   :  { %10619 = vst [vmem:[#allocation153_spill] sm:$0xff] %v8657_v22 }
 0x6c4   :  { %v8659_v53 = vpop.f32.mrf.mxu2 }
 0x6c5   :  { %10620 = vst [vmem:[#allocation154_spill] sm:$0xff] %v8659_v53  ;;  %v8661_v37 = vpop.f32.mrf.mxu3 }
 0x6c6   :  { %10621 = vst [vmem:[#allocation155_spill] sm:$0xff] %v8661_v37  ;;  %v8663_v45 = vpop.f32.mrf.mxu0 }
 0x6c7   :  { %10622 = vst [vmem:[#allocation156_spill] sm:$0xff] %v8663_v45  ;;  %v8665_v30 = vpop.f32.mrf.mxu1 }
 0x6c8   :  { %10623 = vst [vmem:[#allocation157_spill] sm:$0xff] %v8665_v30 }
 0x6c9   :  { %6166 = vmatmul.msk.bf16.gmra.mxu2 %vm651_vm14, %v7910_v36  ;;  %6174 = vmatmul.msk.bf16.gmra.mxu0 %vm651_vm14, %v7910_v36 }
 0x6ca   :  { %6182 = vmatmul.msk.bf16.gmra.mxu1 %vm651_vm14, %v7910_v36  ;;  %6190 = vmatmul.msk.bf16.gmra.mxu3 %vm651_vm14, %v7910_v36 }
 0x6cc   :  { %v8675_v41 = vpop.f32.mrf.mxu2 }
 0x6cd   :  { %10624 = vst [vmem:[#allocation158_spill] sm:$0xff] %v8675_v41  ;;  %v8677_v53 = vpop.f32.mrf.mxu3 }
 0x6ce   :  { %10625 = vst [vmem:[#allocation159_spill] sm:$0xff] %v8677_v53  ;;  %v8679_v37 = vpop.f32.mrf.mxu0  ;;  %v10632_v53 = vld [vmem:[#allocation23_spill] sm:$0xff] }
 0x6cf   :  { %10626 = vst [vmem:[#allocation160_spill] sm:$0xff] %v8679_v37  ;;  %v8681_v45 = vpop.f32.mrf.mxu1 }
 0x6d0   :  { %10627 = vst [vmem:[#allocation161_spill] sm:$0xff] %v8681_v45 }
 0x6d4   :  { %v8683_v30 = vpop.f32.mrf.mxu2 }
 0x6d5   :  { %10628 = vst [vmem:[#allocation162_spill] sm:$0xff] %v8683_v30  ;;  %v8685_v62 = vpop.f32.mrf.mxu3  ;;  %v10633_v30 = vld [vmem:[#allocation25_spill] sm:$0xff] }
 0x6d6   :  { %10629 = vst [vmem:[#allocation163_spill] sm:$0xff] %v8685_v62  ;;  %v8687_v22 = vpop.f32.mrf.mxu0  ;;  %v7123_v62 = vld [vmem:[%s10300_s13] ss:$0 sm:$0xff] }
 0x6d7   :  { %10630 = vst [vmem:[#allocation164_spill] sm:$0xff] %v8687_v22  ;;  %v8689_v21 = vpop.f32.mrf.mxu1  ;;  %v1744_v22 = vmul.f32 %v7123_v62, %v10632_v53 }
 0x6d8   :  { %10631 = vst [vmem:[#allocation165_spill] sm:$0xff] %v8689_v21  ;;  %v1745_v21 = vmul.f32 %v7123_v62, %v10633_v30  ;;  %v7020_v62 = vld [vmem:[%s10307_s20 + $0x9c] sm:$0xf0]  ;;  %v7014_v30 = vld [vmem:[%s10307_s20 + $0x74] sm:$0xf] }
 0x6d9   :  { %6167 = vmatmul.msk.bf16.gmra.mxu2 %vm651_vm14, %v7923_v27  ;;  %6175 = vmatmul.msk.bf16.gmra.mxu0 %vm651_vm14, %v7923_v27  ;;  %v1763_v26 = vadd.f32 %v7124_v57, %v1744_v22  ;;  %v6134_v22 = vld [vmem:[%s10307_s20 + $0xa0] sm:$0xf0] }
 0x6da   :  { %6183 = vmatmul.msk.bf16.gmra.mxu1 %vm651_vm14, %v7923_v27  ;;  %6191 = vmatmul.msk.bf16.gmra.mxu3 %vm651_vm14, %v7923_v27  ;;  %v1764_v53 = vadd.f32 %v7124_v57, %v1745_v21 }
 0x6db   :  { %v1779_v57 = vmax.f32 %v1763_v26, 0.0  ;;  %v6092_v26 = vld [vmem:[%s10307_s20 + $0x18] sm:$0xf] }
 0x6dc   :  { %v8704_v41 = vpop.f32.mrf.mxu2 }
 0x6dd   :  { %10634 = vst [vmem:[#allocation23_spill] sm:$0xff] %v8704_v41  ;;  %v8706_v45 = vpop.f32.mrf.mxu3  ;;  %v6140_v41 = vld [vmem:[%s10307_s20 + $0x78] sm:$0xf] }
 0x6de   :  { %10635 = vst [vmem:[#allocation25_spill] sm:$0xff] %v8706_v45  ;;  %v8708_v37 = vpop.f32.mrf.mxu0  ;;  %v6133_v45 = vor.u32 %v7020_v62, %v6132_v50  ;;  %v6142_v50 = vld [vmem:[%s10307_s20 + $0xa8] sm:$0xf0]  ;;  %v1780_v62 = vmax.f32 %v1764_v53, 0.0 }
 0x6df   :  { %10636 = vst [vmem:[#allocation166_spill] sm:$0xff] %v8708_v37  ;;  %v8713_v56 = vpop.f32.mrf.mxu1  ;;  %v6137_v37 = vor.u32 %v7014_v30, %v6134_v22  ;;  %v6145_v21 = vor.u32 %v7015_v18, %v6142_v50  ;;  %v7002_v18 = vld [vmem:[%s10307_s20 + $0x14] sm:$0xf]  ;;  %v7009_v30 = vld [vmem:[%s10307_s20 + $0x44] sm:$0xf0] }
 0x6e0   :  { %10637 = vst [vmem:[#allocation167_spill] sm:$0xff] %v8713_v56  ;;  %v7021_v56 = vld [vmem:[%s10307_s20 + $0xa4] sm:$0xf0]  ;;  %3213 = vmatpush.bf16.msra.mxu2 %v6133_v45  ;;  %v8763_v53 = vpack.c.bf16 %v1780_v62, %v1779_v57 }
 0x6e1   :  { %v6141_v13 = vor.u32 %v7021_v56, %v6140_v41  ;;  %3262 = vmatpush.bf16.msrb.mxu0 %v6137_v37  ;;  %3360 = vmatpush.bf16.msrb.mxu3 %v6145_v21  ;;  %v6084_v56 = vld [vmem:[%s10307_s20 + $0x10] sm:$0xf]  ;;  %v7008_v41 = vld [vmem:[%s10307_s20 + $0x3c] sm:$0xf0]  ;;  %v6093_v21 = vor.u32 %v7009_v30, %v6092_v26 }
 0x6e2   :  { %v6085_v37 = vor.u32 %v7008_v41, %v6084_v56  ;;  %v7003_v56 = vld [vmem:[%s10307_s20 + $0x1c] sm:$0xf]  ;;  %v6094_v41 = vld [vmem:[%s10307_s20 + $0x48] sm:$0xf0] }
 0x6e3   :  { %3311 = vmatpush.bf16.msra.mxu1 %v6141_v13  ;;  %v6086_v13 = vld [vmem:[%s10307_s20 + $0x40] sm:$0xf0] }
 0x6e4   :  { %v8739_v12 = vpop.f32.mrf.mxu2  ;;  %v6089_v50 = vor.u32 %v7002_v18, %v6086_v13  ;;  %3214 = vmatpush.bf16.msra.mxu2 %v6085_v37 }
 0x6e5   :  { %10638 = vst [vmem:[#allocation168_spill] sm:$0xff] %v8739_v12  ;;  %v8741_v40 = vpop.f32.mrf.mxu3 }
 0x6e6   :  { %10639 = vst [vmem:[#allocation169_spill] sm:$0xff] %v8741_v40  ;;  %v8752_v45 = vpop.f32.mrf.mxu0  ;;  %3263 = vmatpush.bf16.msrb.mxu0 %v6089_v50 }
 0x6e7   :  { %10640 = vst [vmem:[#allocation170_spill] sm:$0xff] %v8752_v45  ;;  %v8765_v22 = vpop.f32.mrf.mxu1  ;;  %v6097_v45 = vor.u32 %v7003_v56, %v6094_v41  ;;  %3312 = vmatpush.bf16.msra.mxu1 %v6093_v21  ;;  %v10650_v41 = vld [vmem:[#allocation24_spill] sm:$0xff] }
 0x6e8   :  { %10641 = vst [vmem:[#allocation171_spill] sm:$0xff] %v8765_v22 }
 0x6e9   :  { %6168 = vmatmul.msk.bf16.gmra.mxu2 %vm651_vm14, %v8763_v53  ;;  %6176 = vmatmul.msk.bf16.gmra.mxu0 %vm651_vm14, %v8763_v53 }
 0x6ea   :  { %6184 = vmatmul.msk.bf16.gmra.mxu1 %vm651_vm14, %v8763_v53  ;;  %6192 = vmatmul.msk.bf16.gmra.mxu3 %vm651_vm14, %v8763_v53 }
 0x6eb   :  { %3361 = vmatpush.bf16.msrb.mxu3 %v6097_v45 }
 0x6ec   :  { %v8781_v57 = vpop.f32.mrf.mxu2 }
 0x6ed   :  { %10642 = vst [vmem:[#allocation172_spill] sm:$0xff] %v8781_v57  ;;  %v8783_v62 = vpop.f32.mrf.mxu3 }
 0x6ee   :  { %10643 = vst [vmem:[#allocation173_spill] sm:$0xff] %v8783_v62  ;;  %v8785_v18 = vpop.f32.mrf.mxu0 }
 0x6ef   :  { %10644 = vst [vmem:[#allocation174_spill] sm:$0xff] %v8785_v18  ;;  %v8787_v37 = vpop.f32.mrf.mxu1 }
 0x6f0   :  { %10645 = vst [vmem:[#allocation175_spill] sm:$0xff] %v8787_v37 }
 0x6f4   :  { %v8789_v13 = vpop.f32.mrf.mxu2 }
 0x6f5   :  { %10646 = vst [vmem:[#allocation176_spill] sm:$0xff] %v8789_v13  ;;  %v8791_v26 = vpop.f32.mrf.mxu3 }
 0x6f6   :  { %10647 = vst [vmem:[#allocation177_spill] sm:$0xff] %v8791_v26  ;;  %v8793_v30 = vpop.f32.mrf.mxu0 }
 0x6f7   :  { %10648 = vst [vmem:[#allocation178_spill] sm:$0xff] %v8793_v30  ;;  %v8795_v56 = vpop.f32.mrf.mxu1 }
 0x6f8   :  { %10649 = vst [vmem:[#allocation179_spill] sm:$0xff] %v8795_v56 }
 0x6f9   :  { %6169 = vmatmul.msk.bf16.gmra.mxu2 %vm651_vm14, %v10650_v41  ;;  %6177 = vmatmul.msk.bf16.gmra.mxu0 %vm651_vm14, %v10650_v41 }
 0x6fa   :  { %6185 = vmatmul.msk.bf16.gmra.mxu1 %vm651_vm14, %v10650_v41  ;;  %6193 = vmatmul.msk.bf16.gmra.mxu3 %vm651_vm14, %v10650_v41 }
 0x6fc   :  { %v8805_v45 = vpop.f32.mrf.mxu2 }
 0x6fd   :  { %10651 = vst [vmem:[#allocation24_spill] sm:$0xff] %v8805_v45  ;;  %v8807_v50 = vpop.f32.mrf.mxu3 }
 0x6fe   :  { %10652 = vst [vmem:[#allocation180_spill] sm:$0xff] %v8807_v50  ;;  %v8809_v21 = vpop.f32.mrf.mxu0 }
 0x6ff   :  { %10653 = vst [vmem:[#allocation181_spill] sm:$0xff] %v8809_v21  ;;  %v8811_v30 = vpop.f32.mrf.mxu1 }
 0x700   :  { %10654 = vst [vmem:[#allocation182_spill] sm:$0xff] %v8811_v30 }
 0x704   :  { %v8813_v56 = vpop.f32.mrf.mxu2 }
 0x705   :  { %10655 = vst [vmem:[#allocation183_spill] sm:$0xff] %v8813_v56  ;;  %v8815_v26 = vpop.f32.mrf.mxu3 }
 0x706   :  { %10656 = vst [vmem:[#allocation184_spill] sm:$0xff] %v8815_v26  ;;  %v3069_v62 = vpop.f32.mrf.mxu0 }
 0x707   :  { %v3118_v13 = vpop.f32.mrf.mxu1  ;;  %v8826_v56 = vmul.f32 %v3069_v62, %v8199_v11 }
 0x708   :  { %v8832_v57 = vmul.f32 %v3118_v13, %v8201_v43 }
 0x709   :  { %6194 = vmatmul.msk.bf16.vlgmr.msra.gmra.mxu2 %vm651_vm14, %v7842_v25  ;;  %6202 = vmatmul.msk.bf16.vlgmr.msrb.gmra.mxu0 %vm651_vm14, %v7842_v25 }
 0x70a   :  { %6210 = vmatmul.msk.bf16.vlgmr.msra.gmra.mxu1 %vm651_vm14, %v7842_v25  ;;  %6218 = vmatmul.msk.bf16.vlgmr.msrb.gmra.mxu3 %vm651_vm14, %v7842_v25 }
 0x70c   :  { %v3020_v50 = vpop.f32.mrf.mxu2 }
 0x70d   :  { %v3167_v45 = vpop.f32.mrf.mxu3  ;;  %v8842_v11 = vmul.f32 %v3020_v50, %v8207_v31 }
 0x70e   :  { %v3071_v30 = vpop.f32.mrf.mxu0  ;;  %v8848_v43 = vmul.f32 %v3167_v45, %v8209_v39 }
 0x70f   :  { %v8829_v26 = vmul.f32 %v3071_v30, %v8211_v1  ;;  %v3120_v21 = vpop.f32.mrf.mxu1 }
 0x710   :  { %v8835_v37 = vmul.f32 %v3120_v21, %v8213_v15  ;;  %10657 = vst [vmem:[#allocation185_spill] sm:$0xff] %v8848_v43 }
 0x714   :  { %v3022_v40 = vpop.f32.mrf.mxu2 }
 0x715   :  { %v8845_v1 = vmul.f32 %v3022_v40, %v8215_v54  ;;  %v3169_v62 = vpop.f32.mrf.mxu3 }
 0x716   :  { %v8851_v15 = vmul.f32 %v3169_v62, %v8217_v28  ;;  %v3074_v13 = vpop.f32.mrf.mxu0 }
 0x717   :  { %v3123_v21 = vpop.f32.mrf.mxu1  ;;  %v8866_v28 = vmul.f32 %v3074_v13, %v8219_v7 }
 0x718   :  { %10658 = vst [vmem:[#allocation186_spill] sm:$0xff] %v8851_v15  ;;  %v8872_v50 = vmul.f32 %v3123_v21, %v8221_v63  ;;  %v10690_v15 = vld [vmem:[#allocation52_spill] sm:$0xff] }
 0x719   :  { %6195 = vmatmul.msk.bf16.gmra.mxu2 %vm651_vm14, %v7867_v20  ;;  %6203 = vmatmul.msk.bf16.gmra.mxu0 %vm651_vm14, %v7867_v20 }
 0x71a   :  { %6211 = vmatmul.msk.bf16.gmra.mxu1 %vm651_vm14, %v7867_v20  ;;  %6219 = vmatmul.msk.bf16.gmra.mxu3 %vm651_vm14, %v7867_v20 }
 0x71c   :  { %v3025_v31 = vpop.f32.mrf.mxu2 }
 0x71d   :  { %v3172_v39 = vpop.f32.mrf.mxu3  ;;  %v8882_v7 = vmul.f32 %v3025_v31, %v8227_v4 }
 0x71e   :  { %v3076_v54 = vpop.f32.mrf.mxu0  ;;  %v8888_v63 = vmul.f32 %v3172_v39, %v8229_v33 }
 0x71f   :  { %v8869_v40 = vmul.f32 %v3076_v54, %v8231_v60  ;;  %v3125_v45 = vpop.f32.mrf.mxu1 }
 0x720   :  { %v8875_v62 = vmul.f32 %v3125_v45, %v8233_v61  ;;  %10659 = vst [vmem:[#allocation187_spill] sm:$0xff] %v8888_v63  ;;  %v10668_v63 = vld [vmem:[#allocation39_spill] sm:$0xff] }
 0x724   :  { %v3027_v30 = vpop.f32.mrf.mxu2 }
 0x725   :  { %v8885_v60 = vmul.f32 %v3027_v30, %v8235_v35  ;;  %v3174_v13 = vpop.f32.mrf.mxu3 }
 0x726   :  { %v8891_v61 = vmul.f32 %v3174_v13, %v8237_v46  ;;  %v3079_v21 = vpop.f32.mrf.mxu0 }
 0x727   :  { %v3128_v45 = vpop.f32.mrf.mxu1  ;;  %v8906_v46 = vmul.f32 %v3079_v21, %v8239_v16 }
 0x728   :  { %10660 = vst [vmem:[#allocation188_spill] sm:$0xff] %v8891_v61  ;;  %v8912_v39 = vmul.f32 %v3128_v45, %v8241_v29 }
 0x729   :  { %6196 = vmatmul.msk.bf16.gmra.mxu2 %vm651_vm14, %v7885_v32  ;;  %6204 = vmatmul.msk.bf16.gmra.mxu0 %vm651_vm14, %v7885_v32 }
 0x72a   :  { %6212 = vmatmul.msk.bf16.gmra.mxu1 %vm651_vm14, %v7885_v32  ;;  %6220 = vmatmul.msk.bf16.gmra.mxu3 %vm651_vm14, %v7885_v32 }
 0x72c   :  { %v3030_v4 = vpop.f32.mrf.mxu2 }
 0x72d   :  { %v3177_v33 = vpop.f32.mrf.mxu3  ;;  %v8922_v16 = vmul.f32 %v3030_v4, %v8247_v44 }
 0x72e   :  { %v3081_v35 = vpop.f32.mrf.mxu0  ;;  %v8928_v29 = vmul.f32 %v3177_v33, %v8249_v23 }
 0x72f   :  { %v8909_v30 = vmul.f32 %v3081_v35, %v8251_v5  ;;  %v3130_v31 = vpop.f32.mrf.mxu1  ;;  %v10676_v35 = vld [vmem:[#allocation44_spill] sm:$0xff] }
 0x730   :  { %v8915_v13 = vmul.f32 %v3130_v31, %v8253_v58  ;;  %10661 = vst [vmem:[#allocation189_spill] sm:$0xff] %v8928_v29 }
 0x734   :  { %v3032_v54 = vpop.f32.mrf.mxu2 }
 0x735   :  { %v8925_v5 = vmul.f32 %v3032_v54, %v8255_v59  ;;  %v3179_v21 = vpop.f32.mrf.mxu3 }
 0x736   :  { %v8931_v58 = vmul.f32 %v3179_v21, %v8257_v10  ;;  %v3084_v45 = vpop.f32.mrf.mxu0  ;;  %v10664_v21 = vld [vmem:[#allocation40_spill] sm:$0xff] }
 0x737   :  { %v3133_v31 = vpop.f32.mrf.mxu1  ;;  %v8946_v10 = vmul.f32 %v3084_v45, %v8259_v34  ;;  %v10667_v45 = vld [vmem:[#allocation41_spill] sm:$0xff] }
 0x738   :  { %10662 = vst [vmem:[#allocation190_spill] sm:$0xff] %v8931_v58  ;;  %v8952_v33 = vmul.f32 %v3133_v31, %v8261_v52  ;;  %v10666_v58 = vld [vmem:[#allocation38_spill] sm:$0xff] }
 0x739   :  { %6197 = vmatmul.msk.bf16.gmra.mxu2 %vm651_vm14, %v7883_v9  ;;  %6205 = vmatmul.msk.bf16.gmra.mxu0 %vm651_vm14, %v7883_v9  ;;  %v10670_v31 = vld [vmem:[#allocation42_spill] sm:$0xff] }
 0x73a   :  { %6213 = vmatmul.msk.bf16.gmra.mxu1 %vm651_vm14, %v7883_v9  ;;  %6221 = vmatmul.msk.bf16.gmra.mxu3 %vm651_vm14, %v7883_v9  ;;  %10663 = vst [vmem:[#allocation191_spill] sm:$0xff] %v8952_v33  ;;  %v10680_v33 = vld [vmem:[#allocation45_spill] sm:$0xff] }
 0x73c   :  { %v3035_v44 = vpop.f32.mrf.mxu2 }
 0x73d   :  { %v3182_v23 = vpop.f32.mrf.mxu3  ;;  %v8962_v34 = vmul.f32 %v3035_v44, %v10666_v58  ;;  %v10672_v44 = vld [vmem:[#allocation43_spill] sm:$0xff] }
 0x73e   :  { %v3086_v59 = vpop.f32.mrf.mxu0  ;;  %v8968_v52 = vmul.f32 %v3182_v23, %v10668_v63 }
 0x73f   :  { %v8949_v54 = vmul.f32 %v3086_v59, %v8271_v14  ;;  %v3135_v4 = vpop.f32.mrf.mxu1 }
 0x740   :  { %v8955_v18 = vmul.f32 %v3135_v4, %v10664_v21  ;;  %10669 = vst [vmem:[#allocation38_spill] sm:$0xff] %v8968_v52  ;;  %v10678_v52 = vld [vmem:[#allocation48_spill] sm:$0xff] }
 0x742   :  { %10665 = vst [vmem:[#allocation40_spill] sm:$0xff] %v8955_v18  ;;  %v10682_v18 = vld [vmem:[#allocation46_spill] sm:$0xff] }
 0x744   :  { %v3037_v29 = vpop.f32.mrf.mxu2 }
 0x745   :  { %v8965_v14 = vmul.f32 %v3037_v29, %v10667_v45  ;;  %v3184_v59 = vpop.f32.mrf.mxu3  ;;  %v10674_v45 = vld [vmem:[#allocation47_spill] sm:$0xff] }
 0x746   :  { %v8971_v4 = vmul.f32 %v3184_v59, %v10670_v31  ;;  %v3089_v21 = vpop.f32.mrf.mxu0 }
 0x747   :  { %v3138_v61 = vpop.f32.mrf.mxu1  ;;  %v8986_v23 = vmul.f32 %v3089_v21, %v10672_v44  ;;  %v10681_v44 = vld [vmem:[#allocation49_spill] sm:$0xff] }
 0x748   :  { %10671 = vst [vmem:[#allocation41_spill] sm:$0xff] %v8971_v4  ;;  %v8992_v22 = vmul.f32 %v3138_v61, %v10676_v35  ;;  %v10684_v35 = vld [vmem:[#allocation50_spill] sm:$0xff] }
 0x749   :  { %6198 = vmatmul.msk.bf16.gmra.mxu2 %vm651_vm14, %v7910_v36  ;;  %6206 = vmatmul.msk.bf16.gmra.mxu0 %vm651_vm14, %v7910_v36  ;;  %10673 = vst [vmem:[#allocation39_spill] sm:$0xff] %v8986_v23 }
 0x74a   :  { %6214 = vmatmul.msk.bf16.gmra.mxu1 %vm651_vm14, %v7910_v36  ;;  %6222 = vmatmul.msk.bf16.gmra.mxu3 %vm651_vm14, %v7910_v36  ;;  %10677 = vst [vmem:[#allocation43_spill] sm:$0xff] %v8992_v22 }
 0x74c   :  { %v3040_v63 = vpop.f32.mrf.mxu2 }
 0x74d   :  { %v3187_v29 = vpop.f32.mrf.mxu3  ;;  %v9002_v21 = vmul.f32 %v3040_v63, %v10680_v33  ;;  %v10686_v63 = vld [vmem:[#allocation51_spill] sm:$0xff] }
 0x74e   :  { %v3091_v58 = vpop.f32.mrf.mxu0  ;;  %v9008_v61 = vmul.f32 %v3187_v29, %v10682_v18 }
 0x74f   :  { %v8989_v59 = vmul.f32 %v3091_v58, %v10674_v45  ;;  %v3140_v31 = vpop.f32.mrf.mxu1 }
 0x750   :  { %v8995_v4 = vmul.f32 %v3140_v31, %v10678_v52  ;;  %10683 = vst [vmem:[#allocation44_spill] sm:$0xff] %v9008_v61  ;;  %v10692_v61 = vld [vmem:[#allocation56_spill] sm:$0xff] }
 0x751   :  { %10675 = vst [vmem:[#allocation42_spill] sm:$0xff] %v8989_v59 }
 0x752   :  { %10679 = vst [vmem:[#allocation47_spill] sm:$0xff] %v8995_v4  ;;  %v6148_v4 = vld [vmem:[%s10307_s20 + $0x80] sm:$0xf] }
 0x754   :  { %v3042_v12 = vpop.f32.mrf.mxu2 }
 0x755   :  { %v9005_v58 = vmul.f32 %v3042_v12, %v10681_v44  ;;  %v3189_v45 = vpop.f32.mrf.mxu3  ;;  %v10688_v44 = vld [vmem:[#allocation55_spill] sm:$0xff] }
 0x756   :  { %v9011_v52 = vmul.f32 %v3189_v45, %v10684_v35  ;;  %v3094_v31 = vpop.f32.mrf.mxu0 }
 0x757   :  { %v3143_v23 = vpop.f32.mrf.mxu1  ;;  %v9026_v29 = vmul.f32 %v3094_v31, %v10686_v63  ;;  %v7022_v31 = vld [vmem:[%s10307_s20 + $0xac] sm:$0xf0]  ;;  %v6156_v63 = vld [vmem:[%s10307_s20 + $0x88] sm:$0xf] }
 0x758   :  { %10685 = vst [vmem:[#allocation48_spill] sm:$0xff] %v9011_v52  ;;  %v9032_v43 = vmul.f32 %v3143_v23, %v10690_v15  ;;  %v6149_v23 = vor.u32 %v7022_v31, %v6148_v4  ;;  %v6158_v4 = vld [vmem:[%s10307_s20 + $0xb8] sm:$0xf0] }
 0x759   :  { %6199 = vmatmul.msk.bf16.gmra.mxu2 %vm651_vm14, %v7923_v27  ;;  %6207 = vmatmul.msk.bf16.gmra.mxu0 %vm651_vm14, %v7923_v27  ;;  %10687 = vst [vmem:[#allocation45_spill] sm:$0xff] %v9026_v29  ;;  %v7017_v29 = vld [vmem:[%s10307_s20 + $0x8c] sm:$0xf] }
 0x75a   :  { %6215 = vmatmul.msk.bf16.gmra.mxu1 %vm651_vm14, %v7923_v27  ;;  %6223 = vmatmul.msk.bf16.gmra.mxu3 %vm651_vm14, %v7923_v27  ;;  %10691 = vst [vmem:[#allocation46_spill] sm:$0xff] %v9032_v43  ;;  %v6161_v15 = vor.u32 %v7017_v29, %v6158_v4  ;;  %v10694_v43 = vld [vmem:[#allocation53_spill] sm:$0xff] }
 0x75b   :  { %3409 = vmatpush.bf16.msrb.mxu2 %v6149_v23  ;;  %v7004_v29 = vld [vmem:[%s10307_s20 + $0x24] sm:$0xf] }
 0x75c   :  { %v3045_v12 = vpop.f32.mrf.mxu2  ;;  %3556 = vmatpush.bf16.msra.mxu3 %v6161_v15  ;;  %v7005_v15 = vld [vmem:[%s10307_s20 + $0x2c] sm:$0xf] }
 0x75d   :  { %v3192_v18 = vpop.f32.mrf.mxu3 }
 0x75e   :  { %v3096_v33 = vpop.f32.mrf.mxu0 }
 0x75f   :  { %v9029_v45 = vmul.f32 %v3096_v33, %v10688_v44  ;;  %v3145_v35 = vpop.f32.mrf.mxu1  ;;  %v7016_v33 = vld [vmem:[%s10307_s20 + $0x84] sm:$0xf]  ;;  %v7023_v44 = vld [vmem:[%s10307_s20 + $0xb4] sm:$0xf0] }
 0x760   :  { %v9035_v52 = vmul.f32 %v3145_v35, %v10692_v61  ;;  %v6150_v61 = vld [vmem:[%s10307_s20 + $0xb0] sm:$0xf0]  ;;  %v6157_v22 = vor.u32 %v7023_v44, %v6156_v63  ;;  %v6108_v44 = vld [vmem:[%s10307_s20 + $0x28] sm:$0xf] }
 0x761   :  { %10689 = vst [vmem:[#allocation49_spill] sm:$0xff] %v9029_v45  ;;  %v6153_v35 = vor.u32 %v7016_v33, %v6150_v61  ;;  %v6100_v33 = vld [vmem:[%s10307_s20 + $0x20] sm:$0xf]  ;;  %v7010_v61 = vld [vmem:[%s10307_s20 + $0x4c] sm:$0xf0] }
 0x762   :  { %10693 = vst [vmem:[#allocation50_spill] sm:$0xff] %v9035_v52  ;;  %v9066_v52 = vmul.f32 %v3045_v12, %v10694_v43  ;;  %3507 = vmatpush.bf16.msrb.mxu1 %v6157_v22  ;;  %v10695_v43 = vld [vmem:[#allocation54_spill] sm:$0xff]  ;;  %v6101_v22 = vor.u32 %v7010_v61, %v6100_v33  ;;  %v6102_v63 = vld [vmem:[%s10307_s20 + $0x50] sm:$0xf0] }
 0x763   :  { %3458 = vmatpush.bf16.msra.mxu0 %v6153_v35  ;;  %v9081_v12 = vmul.f32 %v3192_v18, %v10695_v43  ;;  %v7011_v35 = vld [vmem:[%s10307_s20 + $0x54] sm:$0xf0] }
 0x764   :  { %v3047_v31 = vpop.f32.mrf.mxu2  ;;  %v6109_v4 = vor.u32 %v7011_v35, %v6108_v44  ;;  %3410 = vmatpush.bf16.msrb.mxu2 %v6101_v22 }
 0x765   :  { %v9069_v45 = vmul.f32 %v3047_v31, %v8315_v24  ;;  %v3194_v59 = vpop.f32.mrf.mxu3  ;;  %10696 = vst [vmem:[#allocation51_spill] sm:$0xff] %v9081_v12  ;;  %v6110_v31 = vld [vmem:[%s10307_s20 + $0x58] sm:$0xf0]  ;;  %v10713_v12 = vld [vmem:[#allocation62_spill] sm:$0xff] }
 0x766   :  { %v9084_v24 = vmul.f32 %v3194_v59, %v8317_v2  ;;  %v3099_v23 = vpop.f32.mrf.mxu0  ;;  %v6105_v59 = vor.u32 %v7004_v29, %v6102_v63  ;;  %v6113_v61 = vor.u32 %v7005_v15, %v6110_v31  ;;  %3508 = vmatpush.bf16.msrb.mxu1 %v6109_v4  ;;  %v10709_v4 = vld [vmem:[#allocation61_spill] sm:$0xff] }
 0x767   :  { %v3148_v2 = vpop.f32.mrf.mxu1  ;;  %v9114_v22 = vmul.f32 %v3099_v23, %v8319_v19 }
 0x768   :  { %10697 = vst [vmem:[#allocation55_spill] sm:$0xff] %v9084_v24  ;;  %3459 = vmatpush.bf16.msra.mxu0 %v6105_v59  ;;  %3557 = vmatpush.bf16.msra.mxu3 %v6113_v61  ;;  %v9120_v15 = vmul.f32 %v3148_v2, %v8321_v3  ;;  %v10716_v24 = vld [vmem:[#allocation63_spill] sm:$0xff] }
 0x769   :  { %6200 = vmatmul.msk.bf16.gmra.mxu2 %vm651_vm14, %v8763_v53  ;;  %6208 = vmatmul.msk.bf16.gmra.mxu0 %vm651_vm14, %v8763_v53 }
 0x76a   :  { %6216 = vmatmul.msk.bf16.gmra.mxu1 %vm651_vm14, %v8763_v53  ;;  %6224 = vmatmul.msk.bf16.gmra.mxu3 %vm651_vm14, %v8763_v53 }
 0x76c   :  { %v3050_v29 = vpop.f32.mrf.mxu2 }
 0x76d   :  { %v3197_v43 = vpop.f32.mrf.mxu3  ;;  %v9130_v19 = vmul.f32 %v3050_v29, %v8327_v55 }
 0x76e   :  { %v3101_v63 = vpop.f32.mrf.mxu0  ;;  %v9136_v3 = vmul.f32 %v3197_v43, %v8329_v48 }
 0x76f   :  { %v9117_v44 = vmul.f32 %v3101_v63, %v8331_v47  ;;  %v3150_v35 = vpop.f32.mrf.mxu1  ;;  %v10701_v63 = vld [vmem:[#allocation57_spill] sm:$0xff] }
 0x770   :  { %v9123_v31 = vmul.f32 %v3150_v35, %v8333_v17  ;;  %10698 = vst [vmem:[#allocation52_spill] sm:$0xff] %v9136_v3 }
 0x774   :  { %v3052_v61 = vpop.f32.mrf.mxu2 }
 0x775   :  { %v9133_v47 = vmul.f32 %v3052_v61, %v8335_v51  ;;  %v3199_v23 = vpop.f32.mrf.mxu3 }
 0x776   :  { %v9139_v17 = vmul.f32 %v3199_v23, %v8337_v8  ;;  %v3104_v2 = vpop.f32.mrf.mxu0 }
 0x777   :  { %v3153_v35 = vpop.f32.mrf.mxu1  ;;  %v9154_v8 = vmul.f32 %v3104_v2, %v8339_v38  ;;  %v10700_v2 = vld [vmem:[#allocation58_spill] sm:$0xff] }
 0x778   :  { %10699 = vst [vmem:[#allocation56_spill] sm:$0xff] %v9139_v17  ;;  %v9160_v61 = vmul.f32 %v3153_v35, %v8341_v6  ;;  %v10703_v35 = vld [vmem:[#allocation59_spill] sm:$0xff] }
 0x779   :  { %6201 = vmatmul.msk.bf16.gmra.mxu2 %vm651_vm14, %v10650_v41  ;;  %6209 = vmatmul.msk.bf16.gmra.mxu0 %vm651_vm14, %v10650_v41 }
 0x77a   :  { %6217 = vmatmul.msk.bf16.gmra.mxu1 %vm651_vm14, %v10650_v41  ;;  %6225 = vmatmul.msk.bf16.gmra.mxu3 %vm651_vm14, %v10650_v41 }
 0x77c   :  { %v3055_v55 = vpop.f32.mrf.mxu2 }
 0x77d   :  { %v3202_v48 = vpop.f32.mrf.mxu3  ;;  %v9170_v38 = vmul.f32 %v3055_v55, %v8347_v49  ;;  %v10705_v55 = vld [vmem:[#allocation60_spill] sm:$0xff] }
 0x77e   :  { %v3106_v51 = vpop.f32.mrf.mxu0  ;;  %v9176_v6 = vmul.f32 %v3202_v48, %v10701_v63 }
 0x77f   :  { %v9157_v29 = vmul.f32 %v3106_v51, %v8351_v42  ;;  %v3155_v43 = vpop.f32.mrf.mxu1 }
 0x780   :  { %v9163_v23 = vmul.f32 %v3155_v43, %v8353_v0  ;;  %10702 = vst [vmem:[#allocation53_spill] sm:$0xff] %v9176_v6  ;;  %v10711_v6 = vld [vmem:[#allocation65_spill] sm:$0xff] }
 0x784   :  { %v3057_v59 = vpop.f32.mrf.mxu2 }
 0x785   :  { %v9173_v42 = vmul.f32 %v3057_v59, %v10700_v2  ;;  %v3204_v51 = vpop.f32.mrf.mxu3  ;;  %v10707_v2 = vld [vmem:[#allocation64_spill] sm:$0xff] }
 0x786   :  { %v9179_v0 = vmul.f32 %v3204_v51, %v10703_v35  ;;  %v3265_v43 = vpop.f32.mrf.mxu0 }
 0x787   :  { %v3314_v18 = vpop.f32.mrf.mxu1  ;;  %v9194_v48 = vmul.f32 %v3265_v43, %v10705_v55  ;;  %v10715_v55 = vld [vmem:[#allocation66_spill] sm:$0xff] }
 0x788   :  { %10704 = vst [vmem:[#allocation54_spill] sm:$0xff] %v9179_v0  ;;  %v9200_v33 = vmul.f32 %v3314_v18, %v10709_v4  ;;  %v10718_v4 = vld [vmem:[#allocation67_spill] sm:$0xff] }
 0x789   :  { %6226 = vmatmul.msk.bf16.vlgmr.msrb.gmra.mxu2 %vm651_vm14, %v7842_v25  ;;  %6234 = vmatmul.msk.bf16.vlgmr.msra.gmra.mxu0 %vm651_vm14, %v7842_v25  ;;  %10706 = vst [vmem:[#allocation58_spill] sm:$0xff] %v9194_v48 }
 0x78a   :  { %6242 = vmatmul.msk.bf16.vlgmr.msrb.gmra.mxu1 %vm651_vm14, %v7842_v25  ;;  %6250 = vmatmul.msk.bf16.vlgmr.msra.gmra.mxu3 %vm651_vm14, %v7842_v25  ;;  %10710 = vst [vmem:[#allocation59_spill] sm:$0xff] %v9200_v33  ;;  %v10724_v25 = vld [vmem:[#allocation69_spill] sm:$0xff] }
 0x78c   :  { %v3216_v49 = vpop.f32.mrf.mxu2 }
 0x78d   :  { %v3363_v59 = vpop.f32.mrf.mxu3  ;;  %v9210_v43 = vmul.f32 %v3216_v49, %v10713_v12  ;;  %v10720_v49 = vld [vmem:[#allocation68_spill] sm:$0xff] }
 0x78e   :  { %v3267_v63 = vpop.f32.mrf.mxu0  ;;  %v9216_v18 = vmul.f32 %v3363_v59, %v10716_v24 }
 0x78f   :  { %v9197_v51 = vmul.f32 %v3267_v63, %v10707_v2  ;;  %v3316_v35 = vpop.f32.mrf.mxu1  ;;  %10714 = vst [vmem:[#allocation64_spill] sm:$0xff] %v9210_v43  ;;  %v10731_v43 = vld [vmem:[#allocation71_spill] sm:$0xff] }
 0x790   :  { %v9203_v0 = vmul.f32 %v3316_v35, %v10711_v6  ;;  %10717 = vst [vmem:[#allocation61_spill] sm:$0xff] %v9216_v18  ;;  %v10726_v18 = vld [vmem:[#allocation73_spill] sm:$0xff] }
 0x791   :  { %10708 = vst [vmem:[#allocation57_spill] sm:$0xff] %v9197_v51  ;;  %v10728_v51 = vld [vmem:[#allocation70_spill] sm:$0xff] }
 0x792   :  { %10712 = vst [vmem:[#allocation60_spill] sm:$0xff] %v9203_v0 }
 0x794   :  { %v3218_v17 = vpop.f32.mrf.mxu2 }
 0x795   :  { %v9213_v63 = vmul.f32 %v3218_v17, %v10715_v55  ;;  %v3365_v2 = vpop.f32.mrf.mxu3  ;;  %v10722_v55 = vld [vmem:[#allocation72_spill] sm:$0xff] }
 0x796   :  { %v9219_v6 = vmul.f32 %v3365_v2, %v10718_v4  ;;  %v3270_v35 = vpop.f32.mrf.mxu0 }
 0x797   :  { %v3319_v48 = vpop.f32.mrf.mxu1  ;;  %v9234_v59 = vmul.f32 %v3270_v35, %v10720_v49  ;;  %v10730_v49 = vld [vmem:[#allocation74_spill] sm:$0xff] }
 0x798   :  { %10719 = vst [vmem:[#allocation65_spill] sm:$0xff] %v9219_v6  ;;  %v9240_v3 = vmul.f32 %v3319_v48, %v10724_v25  ;;  %v10733_v25 = vld [vmem:[#allocation75_spill] sm:$0xff] }
 0x799   :  { %6227 = vmatmul.msk.bf16.gmra.mxu2 %vm651_vm14, %v7867_v20  ;;  %6235 = vmatmul.msk.bf16.gmra.mxu0 %vm651_vm14, %v7867_v20  ;;  %10721 = vst [vmem:[#allocation62_spill] sm:$0xff] %v9234_v59 }
 0x79a   :  { %6243 = vmatmul.msk.bf16.gmra.mxu1 %vm651_vm14, %v7867_v20  ;;  %6251 = vmatmul.msk.bf16.gmra.mxu3 %vm651_vm14, %v7867_v20  ;;  %10725 = vst [vmem:[#allocation63_spill] sm:$0xff] %v9240_v3  ;;  %v10739_v20 = vld [vmem:[#allocation77_spill] sm:$0xff] }
 0x79c   :  { %v3221_v12 = vpop.f32.mrf.mxu2 }
 0x79d   :  { %v3368_v24 = vpop.f32.mrf.mxu3  ;;  %v9250_v35 = vmul.f32 %v3221_v12, %v10728_v51  ;;  %v10735_v12 = vld [vmem:[#allocation76_spill] sm:$0xff] }
 0x79e   :  { %v3272_v17 = vpop.f32.mrf.mxu0  ;;  %v9256_v48 = vmul.f32 %v3368_v24, %v10731_v43 }
 0x79f   :  { %v9237_v2 = vmul.f32 %v3272_v17, %v10722_v55  ;;  %v3321_v4 = vpop.f32.mrf.mxu1  ;;  %10729 = vst [vmem:[#allocation68_spill] sm:$0xff] %v9250_v35  ;;  %v10746_v35 = vld [vmem:[#allocation79_spill] sm:$0xff] }
 0x7a0   :  { %v9243_v6 = vmul.f32 %v3321_v4, %v10726_v18  ;;  %10732 = vst [vmem:[#allocation72_spill] sm:$0xff] %v9256_v48  ;;  %v10741_v48 = vld [vmem:[#allocation81_spill] sm:$0xff] }
 0x7a1   :  { %10723 = vst [vmem:[#allocation66_spill] sm:$0xff] %v9237_v2  ;;  %v10743_v2 = vld [vmem:[#allocation78_spill] sm:$0xff] }
 0x7a2   :  { %10727 = vst [vmem:[#allocation67_spill] sm:$0xff] %v9243_v6 }
 0x7a4   :  { %v3223_v0 = vpop.f32.mrf.mxu2 }
 0x7a5   :  { %v9253_v17 = vmul.f32 %v3223_v0, %v10730_v49  ;;  %v3370_v55 = vpop.f32.mrf.mxu3  ;;  %v10737_v49 = vld [vmem:[#allocation80_spill] sm:$0xff] }
 0x7a6   :  { %v9259_v18 = vmul.f32 %v3370_v55, %v10733_v25  ;;  %v3275_v4 = vpop.f32.mrf.mxu0 }
 0x7a7   :  { %v3324_v59 = vpop.f32.mrf.mxu1  ;;  %v9274_v24 = vmul.f32 %v3275_v4, %v10735_v12  ;;  %v10745_v12 = vld [vmem:[#allocation82_spill] sm:$0xff] }
 0x7a8   :  { %10734 = vst [vmem:[#allocation69_spill] sm:$0xff] %v9259_v18  ;;  %v9280_v33 = vmul.f32 %v3324_v59, %v10739_v20  ;;  %v10748_v20 = vld [vmem:[#allocation83_spill] sm:$0xff] }
 0x7a9   :  { %6228 = vmatmul.msk.bf16.gmra.mxu2 %vm651_vm14, %v7885_v32  ;;  %6236 = vmatmul.msk.bf16.gmra.mxu0 %vm651_vm14, %v7885_v32  ;;  %10736 = vst [vmem:[#allocation73_spill] sm:$0xff] %v9274_v24 }
 0x7aa   :  { %6244 = vmatmul.msk.bf16.gmra.mxu1 %vm651_vm14, %v7885_v32  ;;  %6252 = vmatmul.msk.bf16.gmra.mxu3 %vm651_vm14, %v7885_v32  ;;  %10740 = vst [vmem:[#allocation74_spill] sm:$0xff] %v9280_v33  ;;  %v10754_v32 = vld [vmem:[#allocation85_spill] sm:$0xff]  ;;  %v10765_v33 = vld [vmem:[#allocation92_spill] sm:$0xff] }
 0x7ac   :  { %v3226_v0 = vpop.f32.mrf.mxu2 }
 0x7ad   :  { %v3373_v51 = vpop.f32.mrf.mxu3  ;;  %v9290_v4 = vmul.f32 %v3226_v0, %v10743_v2  ;;  %v10750_v0 = vld [vmem:[#allocation84_spill] sm:$0xff] }
 0x7ae   :  { %v3277_v43 = vpop.f32.mrf.mxu0  ;;  %v9296_v59 = vmul.f32 %v3373_v51, %v10746_v35 }
 0x7af   :  { %v9277_v55 = vmul.f32 %v3277_v43, %v10737_v49  ;;  %v3326_v25 = vpop.f32.mrf.mxu1  ;;  %10744 = vst [vmem:[#allocation75_spill] sm:$0xff] %v9290_v4  ;;  %v10761_v4 = vld [vmem:[#allocation87_spill] sm:$0xff] }
 0x7b0   :  { %v9283_v18 = vmul.f32 %v3326_v25, %v10741_v48  ;;  %10747 = vst [vmem:[#allocation76_spill] sm:$0xff] %v9296_v59  ;;  %v10756_v59 = vld [vmem:[#allocation89_spill] sm:$0xff] }
 0x7b1   :  { %10738 = vst [vmem:[#allocation70_spill] sm:$0xff] %v9277_v55  ;;  %v10758_v55 = vld [vmem:[#allocation86_spill] sm:$0xff] }
 0x7b2   :  { %10742 = vst [vmem:[#allocation71_spill] sm:$0xff] %v9283_v18 }
 0x7b4   :  { %v3228_v6 = vpop.f32.mrf.mxu2 }
 0x7b5   :  { %v9293_v43 = vmul.f32 %v3228_v6, %v10745_v12  ;;  %v3375_v49 = vpop.f32.mrf.mxu3  ;;  %v10752_v12 = vld [vmem:[#allocation88_spill] sm:$0xff] }
 0x7b6   :  { %v9299_v48 = vmul.f32 %v3375_v49, %v10748_v20  ;;  %v3280_v25 = vpop.f32.mrf.mxu0 }
 0x7b7   :  { %v3329_v24 = vpop.f32.mrf.mxu1  ;;  %v9314_v51 = vmul.f32 %v3280_v25, %v10750_v0  ;;  %v10760_v0 = vld [vmem:[#allocation90_spill] sm:$0xff] }
 0x7b8   :  { %10749 = vst [vmem:[#allocation80_spill] sm:$0xff] %v9299_v48  ;;  %v9320_v3 = vmul.f32 %v3329_v24, %v10754_v32  ;;  %v10763_v32 = vld [vmem:[#allocation91_spill] sm:$0xff] }
 0x7b9   :  { %6229 = vmatmul.msk.bf16.gmra.mxu2 %vm651_vm14, %v7883_v9  ;;  %6237 = vmatmul.msk.bf16.gmra.mxu0 %vm651_vm14, %v7883_v9  ;;  %10751 = vst [vmem:[#allocation77_spill] sm:$0xff] %v9314_v51 }
 0x7ba   :  { %6245 = vmatmul.msk.bf16.gmra.mxu1 %vm651_vm14, %v7883_v9  ;;  %6253 = vmatmul.msk.bf16.gmra.mxu3 %vm651_vm14, %v7883_v9  ;;  %10755 = vst [vmem:[#allocation78_spill] sm:$0xff] %v9320_v3  ;;  %v6798_v9 = vld [vmem:[#allocation5 + $0x30] sm:$0xff] }
 0x7bc   :  { %v3231_v6 = vpop.f32.mrf.mxu2 }
 0x7bd   :  { %v3378_v2 = vpop.f32.mrf.mxu3  ;;  %v9330_v25 = vmul.f32 %v3231_v6, %v10758_v55  ;;  %v6799_v55 = vld [vmem:[#allocation5 + $0x38] sm:$0xff] }
 0x7be   :  { %v3282_v35 = vpop.f32.mrf.mxu0  ;;  %v9336_v24 = vmul.f32 %v3378_v2, %v10761_v4  ;;  %v6807_v4 = vld [vmem:[#allocation5 + $0x78] sm:$0xff]  ;;  %4560 = vmatpush.bf16.msrb.mxu0 %v6799_v55 }
 0x7bf   :  { %v9317_v49 = vmul.f32 %v3282_v35, %v10752_v12  ;;  %v3331_v20 = vpop.f32.mrf.mxu1  ;;  %10759 = vst [vmem:[#allocation79_spill] sm:$0xff] %v9330_v25  ;;  %v6815_v6 = vld [vmem:[#allocation5 + $0xb8] sm:$0xff]  ;;  %4609 = vmatpush.bf16.msra.mxu1 %v6807_v4  ;;  %v10779_v25 = vld [vmem:[#allocation99_spill] sm:$0xff] }
 0x7c0   :  { %v9323_v48 = vmul.f32 %v3331_v20, %v10756_v59  ;;  %10762 = vst [vmem:[#allocation83_spill] sm:$0xff] %v9336_v24  ;;  %4658 = vmatpush.bf16.msrb.mxu3 %v6815_v6  ;;  %v10771_v4 = vld [vmem:[#allocation97_spill] sm:$0xff] }
 0x7c1   :  { %10753 = vst [vmem:[#allocation81_spill] sm:$0xff] %v9317_v49  ;;  %v6814_v49 = vld [vmem:[#allocation5 + $0xb0] sm:$0xff] }
 0x7c2   :  { %10757 = vst [vmem:[#allocation82_spill] sm:$0xff] %v9323_v48  ;;  %4561 = vmatpush.bf16.msrb.mxu0 %v6798_v9 }
 0x7c4   :  { %v3233_v18 = vpop.f32.mrf.mxu2  ;;  %4659 = vmatpush.bf16.msrb.mxu3 %v6814_v49 }
 0x7c5   :  { %v9333_v35 = vmul.f32 %v3233_v18, %v10760_v0  ;;  %v3380_v12 = vpop.f32.mrf.mxu3  ;;  %v6895_v18 = vld [vmem:[%s10303_s16 + $0x38] sm:$0xff] }
 0x7c6   :  { %v9339_v59 = vmul.f32 %v3380_v12, %v10763_v32  ;;  %v3285_v20 = vpop.f32.mrf.mxu0  ;;  %3935 = vmatpush.bf16.msra.mxu2 %v6895_v18  ;;  %v6894_v32 = vld [vmem:[%s10303_s16 + $0x30] sm:$0xff]  ;;  %v10769_v18 = vld [vmem:[#allocation93_spill] sm:$0xff] }
 0x7c7   :  { %v3334_v51 = vpop.f32.mrf.mxu1  ;;  %v9360_v24 = vmul.f32 %v3285_v20, %v10765_v33  ;;  %v6797_v20 = vld [vmem:[#allocation5 + $0x28] sm:$0xff] }
 0x7c8   :  { %10764 = vst [vmem:[#allocation84_spill] sm:$0xff] %v9339_v59  ;;  %v10767_v59 = vld [vmem:[#allocation96_spill] sm:$0xff]  ;;  %v9366_v55 = vmul.f32 %v3334_v51, %v10769_v18  ;;  %4562 = vmatpush.bf16.msrb.mxu0 %v6797_v20  ;;  %v6796_v20 = vld [vmem:[#allocation5 + $0x20] sm:$0xff] }
 0x7c9   :  { %6230 = vmatmul.msk.bf16.gmra.mxu2 %vm651_vm14, %v7910_v36  ;;  %6238 = vmatmul.msk.bf16.gmra.mxu0 %vm651_vm14, %v7910_v36  ;;  %10766 = vst [vmem:[#allocation88_spill] sm:$0xff] %v9360_v24  ;;  %v6805_v51 = vld [vmem:[#allocation5 + $0x68] sm:$0xff] }
 0x7ca   :  { %6246 = vmatmul.msk.bf16.gmra.mxu1 %vm651_vm14, %v7910_v36  ;;  %6254 = vmatmul.msk.bf16.gmra.mxu3 %vm651_vm14, %v7910_v36  ;;  %v6806_v36 = vld [vmem:[#allocation5 + $0x70] sm:$0xff]  ;;  %10770 = vst [vmem:[#allocation89_spill] sm:$0xff] %v9366_v55 }
 0x7cb   :  { %3936 = vmatpush.bf16.msra.mxu2 %v6894_v32  ;;  %4610 = vmatpush.bf16.msra.mxu1 %v6806_v36  ;;  %v10775_v32 = vld [vmem:[#allocation98_spill] sm:$0xff]  ;;  %v10777_v36 = vld [vmem:[#allocation95_spill] sm:$0xff] }
 0x7cc   :  { %v3236_v2 = vpop.f32.mrf.mxu2  ;;  %4563 = vmatpush.bf16.msrb.mxu0 %v6796_v20 }
 0x7cd   :  { %v3383_v0 = vpop.f32.mrf.mxu3 }
 0x7ce   :  { %v3287_v12 = vpop.f32.mrf.mxu0  ;;  %v9385_v33 = vmul.f32 %v3383_v0, %v10777_v36  ;;  %v6795_v0 = vld [vmem:[#allocation5 + $0x18] sm:$0xff] }
 0x7cf   :  { %v9363_v3 = vmul.f32 %v3287_v12, %v10767_v59  ;;  %v3336_v48 = vpop.f32.mrf.mxu1  ;;  %v6893_v59 = vld [vmem:[%s10303_s16 + $0x28] sm:$0xff]  ;;  %v6813_v12 = vld [vmem:[#allocation5 + $0xa8] sm:$0xff]  ;;  %4611 = vmatpush.bf16.msra.mxu1 %v6805_v51  ;;  %v6890_v51 = vld [vmem:[%s10303_s16 + $0x10] sm:$0xff] }
 0x7d0   :  { %v9369_v6 = vmul.f32 %v3336_v48, %v10771_v4  ;;  %3937 = vmatpush.bf16.msra.mxu2 %v6893_v59  ;;  %v10773_v48 = vld [vmem:[#allocation94_spill] sm:$0xff]  ;;  %4660 = vmatpush.bf16.msrb.mxu3 %v6813_v12  ;;  %10778 = vst [vmem:[#allocation91_spill] sm:$0xff] %v9385_v33  ;;  %v6892_v59 = vld [vmem:[%s10303_s16 + $0x20] sm:$0xff] }
 0x7d1   :  { %10768 = vst [vmem:[#allocation85_spill] sm:$0xff] %v9363_v3  ;;  %v9379_v9 = vmul.f32 %v3236_v2, %v10773_v48  ;;  %v6804_v48 = vld [vmem:[#allocation5 + $0x60] sm:$0xff]  ;;  %v6803_v12 = vld [vmem:[#allocation5 + $0x58] sm:$0xff]  ;;  %4564 = vmatpush.bf16.msrb.mxu0 %v6795_v0  ;;  %v6794_v2 = vld [vmem:[#allocation5 + $0x10] sm:$0xff] }
 0x7d2   :  { %10772 = vst [vmem:[#allocation86_spill] sm:$0xff] %v9369_v6  ;;  %v6810_v3 = vld [vmem:[#allocation5 + $0x90] sm:$0xff] }
 0x7d3   :  { %10774 = vst [vmem:[#allocation90_spill] sm:$0xff] %v9379_v9  ;;  %4612 = vmatpush.bf16.msra.mxu1 %v6804_v48  ;;  %v10787_v9 = vld [vmem:[#allocation105_spill] sm:$0xff] }
 0x7d4   :  { %v3238_v18 = vpop.f32.mrf.mxu2  ;;  %3938 = vmatpush.bf16.msra.mxu2 %v6892_v59 }
 0x7d5   :  { %v9382_v4 = vmul.f32 %v3238_v18, %v10775_v32  ;;  %v3385_v49 = vpop.f32.mrf.mxu3  ;;  %v6812_v32 = vld [vmem:[#allocation5 + $0xa0] sm:$0xff]  ;;  %4565 = vmatpush.bf16.msrb.mxu0 %v6794_v2 }
 0x7d6   :  { %v9388_v55 = vmul.f32 %v3385_v49, %v10779_v25  ;;  %v3290_v6 = vpop.f32.mrf.mxu0  ;;  %v6891_v25 = vld [vmem:[%s10303_s16 + $0x18] sm:$0xff]  ;;  %4661 = vmatpush.bf16.msrb.mxu3 %v6812_v32  ;;  %v6811_v49 = vld [vmem:[#allocation5 + $0x98] sm:$0xff]  ;;  %v6802_v32 = vld [vmem:[#allocation5 + $0x50] sm:$0xff] }
 0x7d7   :  { %10776 = vst [vmem:[#allocation87_spill] sm:$0xff] %v9382_v4  ;;  %v3339_v18 = vpop.f32.mrf.mxu1  ;;  %4613 = vmatpush.bf16.msra.mxu1 %v6803_v12  ;;  %v6889_v12 = vld [vmem:[%s10303_s16 + $0x8] sm:$0xff] }
 0x7d8   :  { %10780 = vst [vmem:[#allocation92_spill] sm:$0xff] %v9388_v55  ;;  %3939 = vmatpush.bf16.msra.mxu2 %v6891_v25  ;;  %v10783_v55 = vld [vmem:[#allocation104_spill] sm:$0xff]  ;;  %v10785_v25 = vld [vmem:[#allocation101_spill] sm:$0xff] }
 0x7d9   :  { %6231 = vmatmul.msk.bf16.gmra.mxu2 %vm651_vm14, %v7923_v27  ;;  %6239 = vmatmul.msk.bf16.gmra.mxu0 %vm651_vm14, %v7923_v27  ;;  %v9418_v0 = vmul.f32 %v3339_v18, %v10785_v25  ;;  %v6801_v18 = vld [vmem:[#allocation5 + $0x48] sm:$0xff] }
 0x7da   :  { %6247 = vmatmul.msk.bf16.gmra.mxu1 %vm651_vm14, %v7923_v27  ;;  %6255 = vmatmul.msk.bf16.gmra.mxu3 %vm651_vm14, %v7923_v27  ;;  %v10781_v27 = vld [vmem:[#allocation100_spill] sm:$0xff] }
 0x7db   :  { %v9412_v33 = vmul.f32 %v3290_v6, %v10781_v27  ;;  %4662 = vmatpush.bf16.msrb.mxu3 %v6811_v49  ;;  %10786 = vst [vmem:[#allocation97_spill] sm:$0xff] %v9418_v0  ;;  %v6793_v49 = vld [vmem:[#allocation5 + $0x8] sm:$0xff]  ;;  %4614 = vmatpush.bf16.msra.mxu1 %v6802_v32 }
 0x7dc   :  { %v3241_v36 = vpop.f32.mrf.mxu2  ;;  %3940 = vmatpush.bf16.msra.mxu2 %v6890_v51  ;;  %4566 = vmatpush.bf16.msrb.mxu0 %v6793_v49  ;;  %v10790_v51 = vld [vmem:[#allocation106_spill] sm:$0xff]  ;;  %v10793_v0 = vld [vmem:[#allocation107_spill] sm:$0xff] }
 0x7dd   :  { %v3388_v59 = vpop.f32.mrf.mxu3  ;;  %10782 = vst [vmem:[#allocation96_spill] sm:$0xff] %v9412_v33  ;;  %v10803_v33 = vld [vmem:[#allocation110_spill] sm:$0xff] }
 0x7de   :  { %v3292_v20 = vpop.f32.mrf.mxu0 }
 0x7df   :  { %v9415_v24 = vmul.f32 %v3292_v20, %v10783_v55  ;;  %v3341_v48 = vpop.f32.mrf.mxu1  ;;  %4663 = vmatpush.bf16.msrb.mxu3 %v6810_v3  ;;  %v6809_v20 = vld [vmem:[#allocation5 + $0x88] sm:$0xff]  ;;  %v6888_v3 = vld [vmem:[%s10303_s16] sm:$0xff]  ;;  %4615 = vmatpush.bf16.msra.mxu1 %v6801_v18 }
 0x7e0   :  { %v9421_v4 = vmul.f32 %v3341_v48, %v10787_v9  ;;  %3941 = vmatpush.bf16.msra.mxu2 %v6889_v12  ;;  %v10789_v9 = vld [vmem:[#allocation102_spill] sm:$0xff]  ;;  %v10791_v55 = vld [vmem:[#allocation103_spill] sm:$0xff] }
 0x7e1   :  { %10784 = vst [vmem:[#allocation93_spill] sm:$0xff] %v9415_v24  ;;  %v9431_v2 = vmul.f32 %v3241_v36, %v10789_v9  ;;  %v9437_v6 = vmul.f32 %v3388_v59, %v10791_v55  ;;  %v6792_v12 = vld [vmem:[#allocation5] sm:$0xff]  ;;  %v10799_v59 = vld [vmem:[#allocation109_spill] sm:$0xff] }
 0x7e2   :  { %10788 = vst [vmem:[#allocation94_spill] sm:$0xff] %v9421_v4  ;;  %v6808_v9 = vld [vmem:[#allocation5 + $0x80] sm:$0xff]  ;;  %4567 = vmatpush.bf16.msrb.mxu0 %v6792_v12 }
 0x7e3   :  { %10792 = vst [vmem:[#allocation98_spill] sm:$0xff] %v9437_v6  ;;  %4664 = vmatpush.bf16.msrb.mxu3 %v6809_v20  ;;  %v10795_v20 = vld [vmem:[#allocation108_spill] sm:$0xff]  ;;  %v10801_v6 = vld [vmem:[#allocation113_spill] sm:$0xff]  ;;  %v10806_v24 = vld [vmem:[#allocation111_spill] sm:$0xff] }
 0x7e4   :  { %v3243_v27 = vpop.f32.mrf.mxu2  ;;  %3942 = vmatpush.bf16.msra.mxu2 %v6888_v3 }
 0x7e5   :  { %v9434_v48 = vmul.f32 %v3243_v27, %v10790_v51  ;;  %v3390_v25 = vpop.f32.mrf.mxu3  ;;  %v6800_v27 = vld [vmem:[#allocation5 + $0x40] sm:$0xff] }
 0x7e6   :  { %v9440_v4 = vmul.f32 %v3390_v25, %v10793_v0  ;;  %v3295_v32 = vpop.f32.mrf.mxu0  ;;  %4616 = vmatpush.bf16.msra.mxu1 %v6800_v27  ;;  %v10797_v25 = vld [vmem:[#allocation112_spill] sm:$0xff]  ;;  %v10813_v27 = vld [vmem:[#allocation117_spill] sm:$0xff] }
 0x7e7   :  { %v3344_v49 = vpop.f32.mrf.mxu1  ;;  %4665 = vmatpush.bf16.msrb.mxu3 %v6808_v9  ;;  %v9458_v51 = vmul.f32 %v3295_v32, %v10795_v20  ;;  %v10805_v20 = vld [vmem:[#allocation114_spill] sm:$0xff] }
 0x7e8   :  { %10794 = vst [vmem:[#allocation95_spill] sm:$0xff] %v9440_v4  ;;  %v9464_v36 = vmul.f32 %v3344_v49, %v10799_v59  ;;  %v10808_v59 = vld [vmem:[#allocation115_spill] sm:$0xff] }
 0x7e9   :  { %6232 = vmatmul.msk.bf16.gmra.mxu2 %vm651_vm14, %v8763_v53  ;;  %6240 = vmatmul.msk.bf16.gmra.mxu0 %vm651_vm14, %v8763_v53  ;;  %10796 = vst [vmem:[#allocation99_spill] sm:$0xff] %v9458_v51 }
 0x7ea   :  { %6248 = vmatmul.msk.bf16.gmra.mxu1 %vm651_vm14, %v8763_v53  ;;  %6256 = vmatmul.msk.bf16.gmra.mxu3 %vm651_vm14, %v8763_v53  ;;  %10800 = vst [vmem:[#allocation104_spill] sm:$0xff] %v9464_v36 }
 0x7ec   :  { %v3246_v0 = vpop.f32.mrf.mxu2 }
 0x7ed   :  { %v3393_v55 = vpop.f32.mrf.mxu3  ;;  %v9474_v32 = vmul.f32 %v3246_v0, %v10803_v33 }
 0x7ee   :  { %v3297_v18 = vpop.f32.mrf.mxu0  ;;  %v9480_v49 = vmul.f32 %v3393_v55, %v10806_v24  ;;  %v10810_v55 = vld [vmem:[#allocation116_spill] sm:$0xff] }
 0x7ef   :  { %v9461_v3 = vmul.f32 %v3297_v18, %v10797_v25  ;;  %v3346_v12 = vpop.f32.mrf.mxu1  ;;  %10804 = vst [vmem:[#allocation105_spill] sm:$0xff] %v9474_v32  ;;  %v10817_v32 = vld [vmem:[#allocation119_spill] sm:$0xff] }
 0x7f0   :  { %v9467_v4 = vmul.f32 %v3346_v12, %v10801_v6  ;;  %10807 = vst [vmem:[#allocation102_spill] sm:$0xff] %v9480_v49  ;;  %v10814_v49 = vld [vmem:[#allocation121_spill] sm:$0xff] }
 0x7f1   :  { %10798 = vst [vmem:[#allocation100_spill] sm:$0xff] %v9461_v3  ;;  %v10815_v3 = vld [vmem:[#allocation118_spill] sm:$0xff] }
 0x7f2   :  { %10802 = vst [vmem:[#allocation101_spill] sm:$0xff] %v9467_v4 }
 0x7f4   :  { %v3248_v9 = vpop.f32.mrf.mxu2 }
 0x7f5   :  { %v9477_v18 = vmul.f32 %v3248_v9, %v10805_v20  ;;  %v3395_v25 = vpop.f32.mrf.mxu3  ;;  %v10812_v20 = vld [vmem:[#allocation120_spill] sm:$0xff] }
 0x7f6   :  { %v9483_v6 = vmul.f32 %v3395_v25, %v10808_v59  ;;  %v3300_v12 = vpop.f32.mrf.mxu0 }
 0x7f7   :  { %v3349_v51 = vpop.f32.mrf.mxu1  ;;  %v9498_v9 = vmul.f32 %v3300_v12, %v10810_v55  ;;  %v10816_v55 = vld [vmem:[#allocation122_spill] sm:$0xff] }
 0x7f8   :  { %10809 = vst [vmem:[#allocation106_spill] sm:$0xff] %v9483_v6  ;;  %v9504_v53 = vmul.f32 %v3349_v51, %v10813_v27  ;;  %v10819_v27 = vld [vmem:[#allocation123_spill] sm:$0xff] }
 0x7f9   :  { %6233 = vmatmul.msk.bf16.gmra.mxu2 %vm651_vm14, %v10650_v41  ;;  %6241 = vmatmul.msk.bf16.gmra.mxu0 %vm651_vm14, %v10650_v41  ;;  %10811 = vst [vmem:[#allocation103_spill] sm:$0xff] %v9498_v9 }
 0x7fa   :  { %6249 = vmatmul.msk.bf16.gmra.mxu1 %vm651_vm14, %v10650_v41  ;;  %6257 = vmatmul.msk.bf16.gmra.mxu3 %vm651_vm14, %v10650_v41  ;;  %v10826_v41 = vld [vmem:[#allocation128_spill] sm:$0xff] }
 0x7fc   :  { %v3251_v24 = vpop.f32.mrf.mxu2 }
 0x7fd   :  { %v3398_v33 = vpop.f32.mrf.mxu3  ;;  %v9514_v12 = vmul.f32 %v3251_v24, %v10815_v3  ;;  %v10821_v3 = vld [vmem:[#allocation30_spill] sm:$0xff]  ;;  %v10824_v24 = vpack.c.bf16 %v8835_v37, %v8832_v57  ;;  %v10840_v37 = vld [vmem:[#allocation136_spill] sm:$0xff] }
 0x7fe   :  { %v3302_v0 = vpop.f32.mrf.mxu0  ;;  %v9520_v51 = vmul.f32 %v3398_v33, %v10817_v32  ;;  %v10823_v32 = vpack.c.bf16 %v8829_v26, %v8826_v56 }
 0x7ff   :  { %v9501_v25 = vmul.f32 %v3302_v0, %v10812_v20  ;;  %v3351_v59 = vpop.f32.mrf.mxu1 }
 0x800   :  { %v9507_v6 = vmul.f32 %v3351_v59, %v10814_v49  ;;  %10818 = vst [vmem:[#allocation107_spill] sm:$0xff] %v9520_v51 }
 0x804   :  { %v3253_v4 = vpop.f32.mrf.mxu2 }
 0x805   :  { %v9517_v0 = vmul.f32 %v3253_v4, %v10816_v55  ;;  %v3400_v20 = vpop.f32.mrf.mxu3  ;;  %v10822_v4 = vpack.c.bf16 %v8845_v1, %v8842_v11  ;;  %v10827_v11 = vld [vmem:[#allocation125_spill] sm:$0xff] }
 0x806   :  { %v9523_v49 = vmul.f32 %v3400_v20, %v10819_v27  ;;  %v3461_v59 = vpop.f32.mrf.mxu0  ;;  %v10825_v27 = vld [vmem:[#allocation124_spill] sm:$0xff] }
 0x807   :  { %v3510_v9 = vpop.f32.mrf.mxu1  ;;  %v9540_v36 = vmul.f32 %v3461_v59, %v10825_v27  ;;  %v10831_v27 = vld [vmem:[#allocation127_spill] sm:$0xff] }
 0x808   :  { %10820 = vst [vmem:[#allocation108_spill] sm:$0xff] %v9523_v49  ;;  %v9546_v1 = vmul.f32 %v3510_v9, %v10827_v11  ;;  %v10833_v11 = vld [vmem:[#allocation131_spill] sm:$0xff] }
 0x809   :  { %3943 = vmatmul.bf16.vlgmr.msra.gmra.mxu2 %v10821_v3  ;;  %4568 = vmatmul.bf16.vlgmr.msrb.gmra.mxu0 %v10822_v4  ;;  %v10828_v4 = vld [vmem:[#allocation129_spill] sm:$0xff] }
 0x80a   :  { %4617 = vmatmul.bf16.vlgmr.msra.gmra.mxu1 %v10823_v32  ;;  %4666 = vmatmul.bf16.vlgmr.msrb.gmra.mxu3 %v10824_v24  ;;  %v10829_v32 = vld [vmem:[#allocation126_spill] sm:$0xff] }
 0x80b   :  { %v10830_v24 = vld [vmem:[#allocation130_spill] sm:$0xff] }
 0x80c   :  { %v3412_v33 = vpop.f32.mrf.mxu2 }
 0x80d   :  { %v3559_v55 = vpop.f32.mrf.mxu3  ;;  %v9556_v59 = vmul.f32 %v3412_v33, %v10829_v32  ;;  %v10835_v33 = vld [vmem:[#allocation31_spill] sm:$0xff]  ;;  %v10838_v32 = vpack.c.bf16 %v8875_v62, %v8872_v50  ;;  %v10854_v50 = vld [vmem:[#allocation144_spill] sm:$0xff] }
 0x80e   :  { %v3463_v20 = vpop.f32.mrf.mxu0  ;;  %v9562_v9 = vmul.f32 %v3559_v55, %v10831_v27  ;;  %v10837_v55 = vpack.c.bf16 %v8869_v40, %v8866_v28 }
 0x80f   :  { %v9543_v3 = vmul.f32 %v3463_v20, %v10826_v41  ;;  %v3512_v51 = vpop.f32.mrf.mxu1 }
 0x810   :  { %v9549_v26 = vmul.f32 %v3512_v51, %v10828_v4  ;;  %10832 = vst [vmem:[#allocation112_spill] sm:$0xff] %v9562_v9 }
 0x814   :  { %v3414_v56 = vpop.f32.mrf.mxu2 }
 0x815   :  { %v9559_v41 = vmul.f32 %v3414_v56, %v10830_v24  ;;  %v3561_v20 = vpop.f32.mrf.mxu3  ;;  %v10836_v56 = vpack.c.bf16 %v8885_v60, %v8882_v7  ;;  %v10841_v7 = vld [vmem:[#allocation133_spill] sm:$0xff] }
 0x816   :  { %v9565_v51 = vmul.f32 %v3561_v20, %v10833_v11  ;;  %v3466_v4 = vpop.f32.mrf.mxu0  ;;  %v10839_v11 = vld [vmem:[#allocation132_spill] sm:$0xff] }
 0x817   :  { %v3515_v49 = vpop.f32.mrf.mxu1  ;;  %v9582_v57 = vmul.f32 %v3466_v4, %v10839_v11  ;;  %v10845_v11 = vld [vmem:[#allocation135_spill] sm:$0xff] }
 0x818   :  { %10834 = vst [vmem:[#allocation109_spill] sm:$0xff] %v9565_v51  ;;  %v9588_v60 = vmul.f32 %v3515_v49, %v10841_v7  ;;  %v10847_v7 = vld [vmem:[#allocation139_spill] sm:$0xff] }
 0x819   :  { %3948 = vmatmul.bf16.gmra.mxu2 %v10835_v33  ;;  %4573 = vmatmul.bf16.gmra.mxu0 %v10836_v56  ;;  %v10842_v56 = vld [vmem:[#allocation137_spill] sm:$0xff] }
 0x81a   :  { %4622 = vmatmul.bf16.gmra.mxu1 %v10837_v55  ;;  %4671 = vmatmul.bf16.gmra.mxu3 %v10838_v32  ;;  %v10843_v55 = vld [vmem:[#allocation134_spill] sm:$0xff] }
 0x81b   :  { %v10844_v32 = vld [vmem:[#allocation138_spill] sm:$0xff] }
 0x81c   :  { %v3417_v24 = vpop.f32.mrf.mxu2 }
 0x81d   :  { %v3564_v20 = vpop.f32.mrf.mxu3  ;;  %v9598_v4 = vmul.f32 %v3417_v24, %v10843_v55  ;;  %v10849_v24 = vld [vmem:[#allocation32_spill] sm:$0xff]  ;;  %v10852_v55 = vpack.c.bf16 %v8915_v13, %v8912_v39 }
 0x81e   :  { %v3468_v27 = vpop.f32.mrf.mxu0  ;;  %v9604_v49 = vmul.f32 %v3564_v20, %v10845_v11  ;;  %v10851_v20 = vpack.c.bf16 %v8909_v30, %v8906_v46  ;;  %v10873_v39 = vld [vmem:[#allocation152_spill] sm:$0xff] }
 0x81f   :  { %v9585_v33 = vmul.f32 %v3468_v27, %v10840_v37  ;;  %v3517_v9 = vpop.f32.mrf.mxu1 }
 0x820   :  { %v9591_v28 = vmul.f32 %v3517_v9, %v10842_v56  ;;  %10846 = vst [vmem:[#allocation113_spill] sm:$0xff] %v9604_v49 }
 0x824   :  { %v3419_v62 = vpop.f32.mrf.mxu2 }
 0x825   :  { %v9601_v37 = vmul.f32 %v3419_v62, %v10844_v32  ;;  %v3566_v27 = vpop.f32.mrf.mxu3  ;;  %v10850_v62 = vpack.c.bf16 %v8925_v5, %v8922_v16  ;;  %v10855_v16 = vld [vmem:[#allocation141_spill] sm:$0xff] }
 0x826   :  { %v9607_v9 = vmul.f32 %v3566_v27, %v10847_v7  ;;  %v3471_v56 = vpop.f32.mrf.mxu0  ;;  %v10853_v7 = vld [vmem:[#allocation140_spill] sm:$0xff] }
 0x827   :  { %v3520_v51 = vpop.f32.mrf.mxu1  ;;  %v9624_v40 = vmul.f32 %v3471_v56, %v10853_v7  ;;  %v10861_v7 = vld [vmem:[#allocation143_spill] sm:$0xff] }
 0x828   :  { %10848 = vst [vmem:[#allocation110_spill] sm:$0xff] %v9607_v9  ;;  %v9630_v5 = vmul.f32 %v3520_v51, %v10855_v16  ;;  %v10863_v16 = vld [vmem:[#allocation147_spill] sm:$0xff] }
 0x829   :  { %3953 = vmatmul.bf16.gmra.mxu2 %v10849_v24  ;;  %4578 = vmatmul.bf16.gmra.mxu0 %v10850_v62  ;;  %v10857_v62 = vld [vmem:[#allocation145_spill] sm:$0xff] }
 0x82a   :  { %4627 = vmatmul.bf16.gmra.mxu1 %v10851_v20  ;;  %4676 = vmatmul.bf16.gmra.mxu3 %v10852_v55  ;;  %10856 = vst [vmem:[#allocation114_spill] sm:$0xff] %v9630_v5  ;;  %v10859_v20 = vld [vmem:[#allocation142_spill] sm:$0xff]  ;;  %v10871_v5 = vld [vmem:[#allocation148_spill] sm:$0xff] }
 0x82b   :  { %v10860_v55 = vld [vmem:[#allocation146_spill] sm:$0xff] }
 0x82c   :  { %v3422_v32 = vpop.f32.mrf.mxu2 }
 0x82d   :  { %v3569_v27 = vpop.f32.mrf.mxu3  ;;  %v9640_v56 = vmul.f32 %v3422_v32, %v10859_v20  ;;  %v10865_v32 = vld [vmem:[#allocation33_spill] sm:$0xff]  ;;  %v10868_v20 = vld [vmem:[#allocation40_spill] sm:$0xff] }
 0x82e   :  { %v3473_v11 = vpop.f32.mrf.mxu0  ;;  %v9646_v51 = vmul.f32 %v3569_v27, %v10861_v7  ;;  %v10867_v27 = vpack.c.bf16 %v8949_v54, %v8946_v10  ;;  %v6831_v54 = vld [vmem:[#allocation5 + $0x138] sm:$0xff] }
 0x82f   :  { %v9627_v24 = vmul.f32 %v3473_v11, %v10854_v50  ;;  %v3522_v49 = vpop.f32.mrf.mxu1  ;;  %4756 = vmatpush.bf16.msra.mxu0 %v6831_v54 }
 0x830   :  { %v9633_v46 = vmul.f32 %v3522_v49, %v10857_v62  ;;  %10862 = vst [vmem:[#allocation115_spill] sm:$0xff] %v9646_v51 }
 0x832   :  { %10858 = vst [vmem:[#allocation111_spill] sm:$0xff] %v9633_v46 }
 0x834   :  { %v3424_v13 = vpop.f32.mrf.mxu2 }
 0x835   :  { %v9643_v50 = vmul.f32 %v3424_v13, %v10860_v55  ;;  %v3571_v11 = vpop.f32.mrf.mxu3  ;;  %v10866_v13 = vpack.c.bf16 %v8965_v14, %v8962_v34  ;;  %v10869_v55 = vld [vmem:[#allocation191_spill] sm:$0xff]  ;;  %v10875_v34 = vld [vmem:[#allocation149_spill] sm:$0xff] }
 0x836   :  { %v9649_v49 = vmul.f32 %v3571_v11, %v10863_v16  ;;  %v3476_v62 = vpop.f32.mrf.mxu0  ;;  %v10870_v11 = vpack.c.bf16 %v10868_v20, %v10869_v55  ;;  %v10879_v55 = vld [vmem:[#allocation150_spill] sm:$0xff] }
 0x837   :  { %v3525_v9 = vpop.f32.mrf.mxu1  ;;  %v9666_v46 = vmul.f32 %v3476_v62, %v10871_v5  ;;  %v10881_v62 = vld [vmem:[#allocation154_spill] sm:$0xff] }
 0x838   :  { %10864 = vst [vmem:[#allocation116_spill] sm:$0xff] %v9649_v49  ;;  %v9672_v14 = vmul.f32 %v3525_v9, %v10875_v34  ;;  %v10884_v34 = vld [vmem:[#allocation155_spill] sm:$0xff] }
 0x839   :  { %3958 = vmatmul.bf16.gmra.mxu2 %v10865_v32  ;;  %4583 = vmatmul.bf16.gmra.mxu0 %v10866_v13  ;;  %10872 = vst [vmem:[#allocation120_spill] sm:$0xff] %v9666_v46  ;;  %v10877_v13 = vld [vmem:[#allocation153_spill] sm:$0xff] }
 0x83a   :  { %4632 = vmatmul.bf16.gmra.mxu1 %v10867_v27  ;;  %4681 = vmatmul.bf16.gmra.mxu3 %v10870_v11  ;;  %10876 = vst [vmem:[#allocation121_spill] sm:$0xff] %v9672_v14  ;;  %v10882_v11 = vld [vmem:[#allocation151_spill] sm:$0xff]  ;;  %v6823_v14 = vld [vmem:[#allocation5 + $0xf8] sm:$0xff]  ;;  %v6838_v27 = vld [vmem:[#allocation5 + $0x170] sm:$0xff] }
 0x83b   :  { %v6847_v46 = vld [vmem:[#allocation5 + $0x1b8] sm:$0xff]  ;;  %4707 = vmatpush.bf16.msrb.mxu2 %v6823_v14 }
 0x83c   :  { %v3427_v7 = vpop.f32.mrf.mxu2  ;;  %4854 = vmatpush.bf16.msra.mxu3 %v6847_v46  ;;  %v10900_v14 = vld [vmem:[#allocation161_spill] sm:$0xff] }
 0x83d   :  { %v3574_v16 = vpop.f32.mrf.mxu3  ;;  %v9682_v5 = vmul.f32 %v3427_v7, %v10879_v55  ;;  %v10886_v7 = vld [vmem:[#allocation34_spill] sm:$0xff] }
 0x83e   :  { %v3478_v30 = vpop.f32.mrf.mxu0  ;;  %v9688_v9 = vmul.f32 %v3574_v16, %v10882_v11  ;;  %v10888_v55 = vld [vmem:[#allocation42_spill] sm:$0xff]  ;;  %v10889_v16 = vld [vmem:[#allocation39_spill] sm:$0xff] }
 0x83f   :  { %v9669_v32 = vmul.f32 %v3478_v30, %v10873_v39  ;;  %v3527_v51 = vpop.f32.mrf.mxu1  ;;  %10880 = vst [vmem:[#allocation122_spill] sm:$0xff] %v9682_v5  ;;  %v10892_v11 = vld [vmem:[#allocation43_spill] sm:$0xff] }
 0x840   :  { %v9675_v10 = vmul.f32 %v3527_v51, %v10877_v13  ;;  %10883 = vst [vmem:[#allocation119_spill] sm:$0xff] %v9688_v9  ;;  %v10898_v9 = vld [vmem:[#allocation157_spill] sm:$0xff] }
 0x841   :  { %10874 = vst [vmem:[#allocation117_spill] sm:$0xff] %v9669_v32 }
 0x842   :  { %10878 = vst [vmem:[#allocation118_spill] sm:$0xff] %v9675_v10  ;;  %v6839_v10 = vld [vmem:[#allocation5 + $0x178] sm:$0xff] }
 0x843   :  { %4805 = vmatpush.bf16.msrb.mxu1 %v6839_v10 }
 0x844   :  { %v3429_v20 = vpop.f32.mrf.mxu2 }
 0x845   :  { %v9685_v30 = vmul.f32 %v3429_v20, %v10881_v62  ;;  %v3576_v39 = vpop.f32.mrf.mxu3  ;;  %v10887_v20 = vpack.c.bf16 %v9005_v58, %v9002_v21  ;;  %v10890_v62 = vpack.c.bf16 %v10888_v55, %v10889_v16  ;;  %v6822_v58 = vld [vmem:[#allocation5 + $0xf0] sm:$0xff] }
 0x846   :  { %v9691_v51 = vmul.f32 %v3576_v39, %v10884_v34  ;;  %v3481_v13 = vpop.f32.mrf.mxu0  ;;  %v10891_v39 = vld [vmem:[#allocation47_spill] sm:$0xff]  ;;  %v10894_v55 = vld [vmem:[#allocation156_spill] sm:$0xff]  ;;  %4708 = vmatpush.bf16.msrb.mxu2 %v6822_v58  ;;  %v10903_v58 = vld [vmem:[#allocation162_spill] sm:$0xff] }
 0x847   :  { %v3530_v49 = vpop.f32.mrf.mxu1  ;;  %v10893_v34 = vpack.c.bf16 %v10891_v39, %v10892_v11  ;;  %v9708_v16 = vmul.f32 %v3481_v13, %v10894_v55  ;;  %4806 = vmatpush.bf16.msrb.mxu1 %v6838_v27  ;;  %v6821_v13 = vld [vmem:[#allocation5 + $0xe8] sm:$0xff] }
 0x848   :  { %10885 = vst [vmem:[#allocation123_spill] sm:$0xff] %v9691_v51  ;;  %v9714_v51 = vmul.f32 %v3530_v49, %v10898_v9  ;;  %v6837_v55 = vld [vmem:[#allocation5 + $0x168] sm:$0xff]  ;;  %v10902_v49 = vld [vmem:[#allocation158_spill] sm:$0xff] }
 0x849   :  { %3963 = vmatmul.bf16.gmra.mxu2 %v10886_v7  ;;  %4588 = vmatmul.bf16.gmra.mxu0 %v10887_v20  ;;  %v6830_v20 = vld [vmem:[#allocation5 + $0x130] sm:$0xff]  ;;  %10895 = vst [vmem:[#allocation30_spill] sm:$0xff] %v9708_v16  ;;  %v10904_v27 = vld [vmem:[#allocation159_spill] sm:$0xff]  ;;  %v6819_v16 = vld [vmem:[#allocation5 + $0xd8] sm:$0xff] }
 0x84a   :  { %4637 = vmatmul.bf16.gmra.mxu1 %v10890_v62  ;;  %4686 = vmatmul.bf16.gmra.mxu3 %v10893_v34  ;;  %v10896_v62 = vld [vmem:[#allocation160_spill] sm:$0xff]  ;;  %10899 = vst [vmem:[#allocation128_spill] sm:$0xff] %v9714_v51  ;;  %v6820_v51 = vld [vmem:[#allocation5 + $0xe0] sm:$0xff] }
 0x84b   :  { %v6846_v34 = vld [vmem:[#allocation5 + $0x1b0] sm:$0xff]  ;;  %4757 = vmatpush.bf16.msra.mxu0 %v6830_v20  ;;  %4709 = vmatpush.bf16.msrb.mxu2 %v6821_v13 }
 0x84c   :  { %v3432_v32 = vpop.f32.mrf.mxu2  ;;  %4855 = vmatpush.bf16.msra.mxu3 %v6846_v34  ;;  %4807 = vmatpush.bf16.msrb.mxu1 %v6837_v55  ;;  %v10908_v55 = vld [vmem:[#allocation35_spill] sm:$0xff] }
 0x84d   :  { %v3579_v7 = vpop.f32.mrf.mxu3  ;;  %v9724_v9 = vmul.f32 %v3432_v32, %v10902_v49  ;;  %v6844_v49 = vld [vmem:[#allocation5 + $0x1a0] sm:$0xff] }
 0x84e   :  { %v3483_v21 = vpop.f32.mrf.mxu0  ;;  %v9730_v34 = vmul.f32 %v3579_v7, %v10904_v27  ;;  %v10909_v7 = vpack.c.bf16 %v9069_v45, %v9066_v52  ;;  %v10913_v27 = vld [vmem:[#allocation50_spill] sm:$0xff]  ;;  %v6818_v45 = vld [vmem:[#allocation5 + $0xd0] sm:$0xff] }
 0x84f   :  { %v9711_v39 = vmul.f32 %v3483_v21, %v10896_v62  ;;  %v3532_v11 = vpop.f32.mrf.mxu1  ;;  %v6829_v21 = vld [vmem:[#allocation5 + $0x128] sm:$0xff]  ;;  %4710 = vmatpush.bf16.msrb.mxu2 %v6820_v51  ;;  %v6835_v51 = vld [vmem:[#allocation5 + $0x158] sm:$0xff] }
 0x850   :  { %v9717_v54 = vmul.f32 %v3532_v11, %v10900_v14  ;;  %v6845_v62 = vld [vmem:[#allocation5 + $0x1a8] sm:$0xff]  ;;  %4758 = vmatpush.bf16.msra.mxu0 %v6829_v21  ;;  %10905 = vst [vmem:[#allocation129_spill] sm:$0xff] %v9730_v34  ;;  %v6836_v21 = vld [vmem:[#allocation5 + $0x160] sm:$0xff] }
 0x851   :  { %10897 = vst [vmem:[#allocation124_spill] sm:$0xff] %v9711_v39  ;;  %4856 = vmatpush.bf16.msra.mxu3 %v6845_v62  ;;  %v10906_v14 = vld [vmem:[#allocation163_spill] sm:$0xff]  ;;  %v10910_v62 = vld [vmem:[#allocation49_spill] sm:$0xff]  ;;  %4808 = vmatpush.bf16.msrb.mxu1 %v6836_v21  ;;  %v10916_v34 = vld [vmem:[#allocation164_spill] sm:$0xff] }
 0x852   :  { %10901 = vst [vmem:[#allocation125_spill] sm:$0xff] %v9717_v54  ;;  %v6828_v54 = vld [vmem:[#allocation5 + $0x120] sm:$0xff]  ;;  %v6827_v39 = vld [vmem:[#allocation5 + $0x118] sm:$0xff]  ;;  %v6834_v21 = vld [vmem:[#allocation5 + $0x150] sm:$0xff] }
 0x853   :  { %4711 = vmatpush.bf16.msrb.mxu2 %v6819_v16  ;;  %v10920_v16 = vld [vmem:[#allocation167_spill] sm:$0xff] }
 0x854   :  { %v3434_v5 = vpop.f32.mrf.mxu2  ;;  %4759 = vmatpush.bf16.msra.mxu0 %v6828_v54  ;;  %v6843_v54 = vld [vmem:[#allocation5 + $0x198] sm:$0xff] }
 0x855   :  { %v9727_v20 = vmul.f32 %v3434_v5, %v10903_v58  ;;  %v3581_v11 = vpop.f32.mrf.mxu3  ;;  %v10911_v58 = vld [vmem:[#allocation45_spill] sm:$0xff]  ;;  %4857 = vmatpush.bf16.msra.mxu3 %v6844_v49  ;;  %4809 = vmatpush.bf16.msrb.mxu1 %v6835_v51  ;;  %v6833_v51 = vld [vmem:[#allocation5 + $0x148] sm:$0xff] }
 0x856   :  { %v9733_v10 = vmul.f32 %v3581_v11, %v10906_v14  ;;  %v3486_v46 = vpop.f32.mrf.mxu0  ;;  %v10912_v11 = vpack.c.bf16 %v10910_v62, %v10911_v58  ;;  %v10914_v14 = vld [vmem:[#allocation46_spill] sm:$0xff]  ;;  %v6842_v49 = vld [vmem:[#allocation5 + $0x190] sm:$0xff] }
 0x857   :  { %v3535_v32 = vpop.f32.mrf.mxu1  ;;  %v10915_v13 = vpack.c.bf16 %v10913_v27, %v10914_v14  ;;  %v9750_v62 = vmul.f32 %v3486_v46, %v10916_v34  ;;  %v10917_v58 = vld [vmem:[#allocation166_spill] sm:$0xff]  ;;  %v10918_v27 = vld [vmem:[#allocation165_spill] sm:$0xff]  ;;  %4712 = vmatpush.bf16.msrb.mxu2 %v6818_v45  ;;  %v10923_v45 = vld [vmem:[#allocation168_spill] sm:$0xff] }
 0x858   :  { %10907 = vst [vmem:[#allocation126_spill] sm:$0xff] %v9733_v10  ;;  %4760 = vmatpush.bf16.msra.mxu0 %v6827_v39  ;;  %v9756_v14 = vmul.f32 %v3535_v32, %v10918_v27  ;;  %v10922_v32 = vld [vmem:[#allocation23_spill] sm:$0xff]  ;;  %v10926_v34 = vld [vmem:[#allocation169_spill] sm:$0xff] }
 0x859   :  { %3968 = vmatmul.bf16.gmra.mxu2 %v10908_v55  ;;  %4593 = vmatmul.bf16.gmra.mxu0 %v10909_v7  ;;  %v6826_v7 = vld [vmem:[#allocation5 + $0x110] sm:$0xff] }
 0x85a   :  { %4642 = vmatmul.bf16.gmra.mxu1 %v10912_v11  ;;  %4691 = vmatmul.bf16.gmra.mxu3 %v10915_v13  ;;  %10919 = vst [vmem:[#allocation130_spill] sm:$0xff] %v9756_v14 }
 0x85b   :  { %4858 = vmatpush.bf16.msra.mxu3 %v6843_v54  ;;  %4810 = vmatpush.bf16.msrb.mxu1 %v6834_v21  ;;  %v6841_v54 = vld [vmem:[#allocation5 + $0x188] sm:$0xff] }
 0x85c   :  { %v3437_v5 = vpop.f32.mrf.mxu2  ;;  %4761 = vmatpush.bf16.msra.mxu0 %v6826_v7 }
 0x85d   :  { %v3584_v55 = vpop.f32.mrf.mxu3 }
 0x85e   :  { %v3488_v52 = vpop.f32.mrf.mxu0 }
 0x85f   :  { %v9753_v11 = vmul.f32 %v3488_v52, %v10917_v58  ;;  %v3537_v13 = vpop.f32.mrf.mxu1  ;;  %v6817_v52 = vld [vmem:[#allocation5 + $0xc8] sm:$0xff]  ;;  %4859 = vmatpush.bf16.msra.mxu3 %v6842_v49  ;;  %v6816_v49 = vld [vmem:[#allocation5 + $0xc0] sm:$0xff]  ;;  %4811 = vmatpush.bf16.msrb.mxu1 %v6833_v51  ;;  %v10931_v51 = vpack.c.bf16 %v9123_v31, %v9120_v15  ;;  %v10951_v31 = vld [vmem:[#allocation181_spill] sm:$0xff] }
 0x860   :  { %v9759_v39 = vmul.f32 %v3537_v13, %v10920_v16  ;;  %v6825_v58 = vld [vmem:[#allocation5 + $0x108] sm:$0xff]  ;;  %4713 = vmatpush.bf16.msrb.mxu2 %v6817_v52  ;;  %v9766_v13 = vmul.f32 %v3437_v5, %v10922_v32  ;;  %v10924_v16 = vld [vmem:[#allocation25_spill] sm:$0xff]  ;;  %v6832_v5 = vld [vmem:[#allocation5 + $0x140] sm:$0xff] }
 0x861   :  { %4762 = vmatpush.bf16.msra.mxu0 %v6825_v58  ;;  %v9772_v46 = vmul.f32 %v3584_v55, %v10924_v16  ;;  %v6840_v32 = vld [vmem:[#allocation5 + $0x180] sm:$0xff]  ;;  %v10928_v55 = vld [vmem:[#allocation36_spill] sm:$0xff] }
 0x862   :  { %10921 = vst [vmem:[#allocation127_spill] sm:$0xff] %v9759_v39  ;;  %v6824_v39 = vld [vmem:[#allocation5 + $0x100] sm:$0xff] }
 0x863   :  { %10925 = vst [vmem:[#allocation131_spill] sm:$0xff] %v9772_v46  ;;  %4860 = vmatpush.bf16.msra.mxu3 %v6841_v54  ;;  %4812 = vmatpush.bf16.msrb.mxu1 %v6832_v5  ;;  %v10974_v46 = vld [vmem:[#allocation59_spill] sm:$0xff] }
 0x864   :  { %v3439_v10 = vpop.f32.mrf.mxu2  ;;  %4714 = vmatpush.bf16.msrb.mxu2 %v6816_v49 }
 0x865   :  { %v9769_v7 = vmul.f32 %v3439_v10, %v10923_v45  ;;  %v3586_v27 = vpop.f32.mrf.mxu3  ;;  %4763 = vmatpush.bf16.msra.mxu0 %v6824_v39  ;;  %v10930_v45 = vpack.c.bf16 %v9117_v44, %v9114_v22  ;;  %v10932_v39 = vld [vmem:[#allocation170_spill] sm:$0xff]  ;;  %v10937_v22 = vld [vmem:[#allocation175_spill] sm:$0xff] }
 0x866   :  { %v9775_v14 = vmul.f32 %v3586_v27, %v10926_v34  ;;  %v3491_v21 = vpop.f32.mrf.mxu0  ;;  %v10929_v34 = vpack.c.bf16 %v9133_v47, %v9130_v19  ;;  %v10935_v47 = vld [vmem:[#allocation171_spill] sm:$0xff] }
 0x867   :  { %v3540_v58 = vpop.f32.mrf.mxu1  ;;  %4861 = vmatpush.bf16.msra.mxu3 %v6840_v32  ;;  %v9792_v49 = vmul.f32 %v3491_v21, %v10932_v39  ;;  %v10939_v32 = vld [vmem:[#allocation172_spill] sm:$0xff]  ;;  %v10941_v39 = vld [vmem:[#allocation173_spill] sm:$0xff] }
 0x868   :  { %10927 = vst [vmem:[#allocation31_spill] sm:$0xff] %v9775_v14 }
 0x869   :  { %3973 = vmatmul.bf16.gmra.mxu2 %v10928_v55  ;;  %4598 = vmatmul.bf16.gmra.mxu0 %v10929_v34  ;;  %10933 = vst [vmem:[#allocation132_spill] sm:$0xff] %v9792_v49  ;;  %v10934_v55 = vld [vmem:[#allocation174_spill] sm:$0xff]  ;;  %v9798_v34 = vmul.f32 %v3540_v58, %v10935_v47 }
 0x86a   :  { %4647 = vmatmul.bf16.gmra.mxu1 %v10930_v45  ;;  %4696 = vmatmul.bf16.gmra.mxu3 %v10931_v51  ;;  %v10940_v45 = vld [vmem:[#allocation176_spill] sm:$0xff] }
 0x86b   :  { %10936 = vst [vmem:[#allocation136_spill] sm:$0xff] %v9798_v34  ;;  %v11022_v34 = vld [vmem:[#allocation51_spill] sm:$0xff] }
 0x86c   :  { %v3442_v54 = vpop.f32.mrf.mxu2 }
 0x86d   :  { %v3589_v27 = vpop.f32.mrf.mxu3  ;;  %v9808_v21 = vmul.f32 %v3442_v54, %v10939_v32  ;;  %v10945_v54 = vld [vmem:[#allocation37_spill] sm:$0xff]  ;;  %v10948_v32 = vpack.c.bf16 %v9163_v23, %v9160_v61 }
 0x86e   :  { %v3493_v16 = vpop.f32.mrf.mxu0  ;;  %v9814_v58 = vmul.f32 %v3589_v27, %v10941_v39  ;;  %v10947_v27 = vpack.c.bf16 %v9157_v29, %v9154_v8 }
 0x86f   :  { %v9795_v10 = vmul.f32 %v3493_v16, %v10934_v55  ;;  %v3542_v19 = vpop.f32.mrf.mxu1  ;;  %v10943_v55 = vld [vmem:[#allocation177_spill] sm:$0xff] }
 0x870   :  { %v9801_v44 = vmul.f32 %v3542_v19, %v10937_v22  ;;  %10942 = vst [vmem:[#allocation137_spill] sm:$0xff] %v9814_v58 }
 0x872   :  { %10938 = vst [vmem:[#allocation133_spill] sm:$0xff] %v9801_v44 }
 0x874   :  { %v3444_v5 = vpop.f32.mrf.mxu2 }
 0x875   :  { %v9811_v51 = vmul.f32 %v3444_v5, %v10940_v45  ;;  %v3591_v16 = vpop.f32.mrf.mxu3  ;;  %v10946_v5 = vpack.c.bf16 %v9173_v42, %v9170_v38  ;;  %v10953_v38 = vld [vmem:[#allocation179_spill] sm:$0xff] }
 0x876   :  { %v9817_v19 = vmul.f32 %v3591_v16, %v10943_v55  ;;  %v3496_v47 = vpop.f32.mrf.mxu0  ;;  %v10949_v55 = vld [vmem:[#allocation178_spill] sm:$0xff] }
 0x877   :  { %v3545_v15 = vpop.f32.mrf.mxu1  ;;  %v9834_v22 = vmul.f32 %v3496_v47, %v10949_v55  ;;  %v10961_v55 = vld [vmem:[#allocation180_spill] sm:$0xff] }
 0x878   :  { %10944 = vst [vmem:[#allocation134_spill] sm:$0xff] %v9817_v19  ;;  %v9840_v42 = vmul.f32 %v3545_v15, %v10953_v38  ;;  %v10963_v38 = vld [vmem:[#allocation184_spill] sm:$0xff] }
 0x879   :  { %3978 = vmatmul.bf16.gmra.mxu2 %v10945_v54  ;;  %4603 = vmatmul.bf16.gmra.mxu0 %v10946_v5  ;;  %10950 = vst [vmem:[#allocation138_spill] sm:$0xff] %v9834_v22  ;;  %v10955_v5 = vld [vmem:[#allocation182_spill] sm:$0xff] }
 0x87a   :  { %4652 = vmatmul.bf16.gmra.mxu1 %v10947_v27  ;;  %4701 = vmatmul.bf16.gmra.mxu3 %v10948_v32  ;;  %10954 = vst [vmem:[#allocation139_spill] sm:$0xff] %v9840_v42  ;;  %v10957_v27 = vld [vmem:[#allocation24_spill] sm:$0xff]  ;;  %v10959_v32 = vld [vmem:[#allocation183_spill] sm:$0xff] }
 0x87c   :  { %v3447_v45 = vpop.f32.mrf.mxu2 }
 0x87d   :  { %v3594_v16 = vpop.f32.mrf.mxu3  ;;  %v9850_v47 = vmul.f32 %v3447_v45, %v10957_v27  ;;  %v10965_v45 = vld [vmem:[#allocation186_spill] sm:$0xff]  ;;  %v10966_v27 = vld [vmem:[#allocation185_spill] sm:$0xff] }
 0x87e   :  { %v3498_v39 = vpop.f32.mrf.mxu0  ;;  %v9856_v15 = vmul.f32 %v3594_v16, %v10961_v55  ;;  %v10967_v19 = vpack.c.bf16 %v10965_v45, %v10966_v27  ;;  %v10970_v16 = vld [vmem:[#allocation57_spill] sm:$0xff]  ;;  %v10971_v55 = vld [vmem:[#allocation58_spill] sm:$0xff] }
 0x87f   :  { %v9837_v54 = vmul.f32 %v3498_v39, %v10951_v31  ;;  %v3547_v52 = vpop.f32.mrf.mxu1  ;;  %10958 = vst [vmem:[#allocation140_spill] sm:$0xff] %v9850_v47 }
 0x880   :  { %v9843_v8 = vmul.f32 %v3547_v52, %v10955_v5  ;;  %10962 = vst [vmem:[#allocation141_spill] sm:$0xff] %v9856_v15 }
 0x881   :  { %10952 = vst [vmem:[#allocation135_spill] sm:$0xff] %v9837_v54 }
 0x882   :  { %10956 = vst [vmem:[#allocation32_spill] sm:$0xff] %v9843_v8 }
 0x884   :  { %v3449_v23 = vpop.f32.mrf.mxu2 }
 0x885   :  { %v9853_v31 = vmul.f32 %v3449_v23, %v10959_v32  ;;  %v3596_v39 = vpop.f32.mrf.mxu3  ;;  %v10968_v23 = vld [vmem:[#allocation64_spill] sm:$0xff] }
 0x886   :  { %v9859_v52 = vmul.f32 %v3596_v39, %v10963_v38  ;;  %v4569_v5 = vpop.f32.mrf.mxu0  ;;  %v10969_v32 = vpack.c.bf16 %v9213_v63, %v10968_v23  ;;  %v10972_v39 = vpack.c.bf16 %v10970_v16, %v10971_v55  ;;  %v10973_v38 = vld [vmem:[#allocation60_spill] sm:$0xff] }
 0x887   :  { %10960 = vst [vmem:[#allocation144_spill] sm:$0xff] %v9853_v31  ;;  %v4618_v58 = vpop.f32.mrf.mxu1  ;;  %v10975_v14 = vpack.c.bf16 %v10973_v38, %v10974_v46  ;;  %v10976_v55 = vld [vmem:[#allocation188_spill] sm:$0xff] }
 0x888   :  { %10964 = vst [vmem:[#allocation145_spill] sm:$0xff] %v9859_v52 }
 0x889   :  { %4715 = vmatmul.bf16.vlgmr.msrb.gmra.mxu2 %v10967_v19  ;;  %4764 = vmatmul.bf16.vlgmr.msra.gmra.mxu0 %v10969_v32 }
 0x88a   :  { %4813 = vmatmul.bf16.vlgmr.msrb.gmra.mxu1 %v10972_v39  ;;  %4862 = vmatmul.bf16.vlgmr.msra.gmra.mxu3 %v10975_v14  ;;  %v10977_v39 = vld [vmem:[#allocation187_spill] sm:$0xff]  ;;  %v10979_v14 = vld [vmem:[#allocation68_spill] sm:$0xff] }
 0x88b   :  { %v10978_v46 = vpack.c.bf16 %v10976_v55, %v10977_v39 }
 0x88c   :  { %v3944_v29 = vpop.f32.mrf.mxu2 }
 0x88d   :  { %v4570_v42 = vadd.f32 %v4569_v5, %v3944_v29  ;;  %v4667_v8 = vpop.f32.mrf.mxu3  ;;  %v10980_v29 = vpack.c.bf16 %v9253_v17, %v10979_v14 }
 0x88e   :  { %v4571_v61 = vpop.f32.mrf.mxu0 }
 0x88f   :  { %v4619_v15 = vadd.f32 %v4618_v58, %v4570_v42  ;;  %v4620_v52 = vpop.f32.mrf.mxu1  ;;  %v10981_v58 = vld [vmem:[#allocation66_spill] sm:$0xff] }
 0x890   :  { %v10982_v42 = vld [vmem:[#allocation62_spill] sm:$0xff] }
 0x891   :  { %v9877_v45 = vadd.f32 %v4667_v8, %v4619_v15  ;;  %v10983_v8 = vpack.c.bf16 %v10981_v58, %v10982_v42  ;;  %v10984_v15 = vld [vmem:[#allocation67_spill] sm:$0xff]  ;;  %v10987_v42 = vld [vmem:[#allocation190_spill] sm:$0xff] }
 0x894   :  { %v3946_v19 = vpop.f32.mrf.mxu2 }
 0x895   :  { %v4572_v27 = vadd.f32 %v4571_v61, %v3946_v19  ;;  %v4669_v63 = vpop.f32.mrf.mxu3  ;;  %v10985_v61 = vld [vmem:[#allocation63_spill] sm:$0xff] }
 0x896   :  { %v4574_v23 = vpop.f32.mrf.mxu0  ;;  %v10986_v5 = vpack.c.bf16 %v10984_v15, %v10985_v61 }
 0x897   :  { %v4621_v32 = vadd.f32 %v4620_v52, %v4572_v27  ;;  %v4623_v22 = vpop.f32.mrf.mxu1 }
 0x899   :  { %v9879_v16 = vadd.f32 %v4669_v63, %v4621_v32  ;;  %4720 = vmatmul.bf16.gmra.mxu2 %v10978_v46  ;;  %4769 = vmatmul.bf16.gmra.mxu0 %v10980_v29 }
 0x89a   :  { %4818 = vmatmul.bf16.gmra.mxu1 %v10983_v8  ;;  %4867 = vmatmul.bf16.gmra.mxu3 %v10986_v5  ;;  %v10988_v8 = vld [vmem:[#allocation189_spill] sm:$0xff] }
 0x89b   :  { %v10989_v15 = vpack.c.bf16 %v10987_v42, %v10988_v8  ;;  %v10993_v5 = vld [vmem:[#allocation73_spill] sm:$0xff] }
 0x89c   :  { %v3949_v52 = vpop.f32.mrf.mxu2 }
 0x89d   :  { %v4575_v38 = vadd.f32 %v4574_v23, %v3949_v52  ;;  %v4672_v19 = vpop.f32.mrf.mxu3  ;;  %v10990_v23 = vld [vmem:[#allocation75_spill] sm:$0xff] }
 0x89e   :  { %v4576_v27 = vpop.f32.mrf.mxu0  ;;  %v10991_v61 = vpack.c.bf16 %v9293_v43, %v10990_v23 }
 0x89f   :  { %v4624_v63 = vadd.f32 %v4623_v22, %v4575_v38  ;;  %v4625_v32 = vpop.f32.mrf.mxu1  ;;  %v10992_v22 = vld [vmem:[#allocation70_spill] sm:$0xff]  ;;  %v10995_v38 = vld [vmem:[#allocation71_spill] sm:$0xff] }
 0x8a0   :  { %v10994_v52 = vpack.c.bf16 %v10992_v22, %v10993_v5  ;;  %v10998_v5 = vld [vmem:[#allocation41_spill] sm:$0xff] }
 0x8a1   :  { %v9893_v55 = vadd.f32 %v4672_v19, %v4624_v63  ;;  %v10996_v19 = vld [vmem:[#allocation74_spill] sm:$0xff] }
 0x8a4   :  { %v3951_v39 = vpop.f32.mrf.mxu2 }
 0x8a5   :  { %v4577_v46 = vadd.f32 %v4576_v27, %v3951_v39  ;;  %v4674_v17 = vpop.f32.mrf.mxu3  ;;  %v10997_v27 = vpack.c.bf16 %v10995_v38, %v10996_v19 }
 0x8a6   :  { %v4579_v14 = vpop.f32.mrf.mxu0 }
 0x8a7   :  { %v4626_v29 = vadd.f32 %v4625_v32, %v4577_v46  ;;  %v4628_v54 = vpop.f32.mrf.mxu1 }
 0x8a9   :  { %v9895_v58 = vadd.f32 %v4674_v17, %v4626_v29  ;;  %4725 = vmatmul.bf16.gmra.mxu2 %v10989_v15  ;;  %4774 = vmatmul.bf16.gmra.mxu0 %v10991_v61 }
 0x8aa   :  { %4823 = vmatmul.bf16.gmra.mxu1 %v10994_v52  ;;  %4872 = vmatmul.bf16.gmra.mxu3 %v10997_v27  ;;  %v10999_v52 = vld [vmem:[#allocation38_spill] sm:$0xff]  ;;  %v11004_v27 = vld [vmem:[#allocation77_spill] sm:$0xff] }
 0x8ab   :  { %v11000_v38 = vpack.c.bf16 %v10998_v5, %v10999_v52 }
 0x8ac   :  { %v3954_v63 = vpop.f32.mrf.mxu2 }
 0x8ad   :  { %v4580_v32 = vadd.f32 %v4579_v14, %v3954_v63  ;;  %v4677_v39 = vpop.f32.mrf.mxu3  ;;  %v11001_v14 = vld [vmem:[#allocation79_spill] sm:$0xff] }
 0x8ae   :  { %v4581_v46 = vpop.f32.mrf.mxu0  ;;  %v11002_v19 = vpack.c.bf16 %v9333_v35, %v11001_v14 }
 0x8af   :  { %v4629_v17 = vadd.f32 %v4628_v54, %v4580_v32  ;;  %v4630_v29 = vpop.f32.mrf.mxu1  ;;  %v11003_v54 = vld [vmem:[#allocation81_spill] sm:$0xff]  ;;  %v11006_v32 = vld [vmem:[#allocation82_spill] sm:$0xff] }
 0x8b0   :  { %v11005_v63 = vpack.c.bf16 %v11003_v54, %v11004_v27  ;;  %v11009_v27 = vld [vmem:[#allocation48_spill] sm:$0xff] }
 0x8b1   :  { %v9909_v42 = vadd.f32 %v4677_v39, %v4629_v17  ;;  %v11007_v39 = vld [vmem:[#allocation78_spill] sm:$0xff] }
 0x8b4   :  { %v3956_v8 = vpop.f32.mrf.mxu2 }
 0x8b5   :  { %v4582_v15 = vadd.f32 %v4581_v46, %v3956_v8  ;;  %v4679_v43 = vpop.f32.mrf.mxu3  ;;  %v11008_v46 = vpack.c.bf16 %v11006_v32, %v11007_v39  ;;  %v11012_v39 = vld [vmem:[#allocation87_spill] sm:$0xff] }
 0x8b6   :  { %v4584_v23 = vpop.f32.mrf.mxu0 }
 0x8b7   :  { %v4631_v61 = vadd.f32 %v4630_v29, %v4582_v15  ;;  %v4633_v47 = vpop.f32.mrf.mxu1 }
 0x8b9   :  { %v9911_v22 = vadd.f32 %v4679_v43, %v4631_v61  ;;  %4730 = vmatmul.bf16.gmra.mxu2 %v11000_v38  ;;  %4779 = vmatmul.bf16.gmra.mxu0 %v11002_v19 }
 0x8ba   :  { %4828 = vmatmul.bf16.gmra.mxu1 %v11005_v63  ;;  %4877 = vmatmul.bf16.gmra.mxu3 %v11008_v46  ;;  %v11010_v63 = vld [vmem:[#allocation44_spill] sm:$0xff] }
 0x8bb   :  { %v11011_v32 = vpack.c.bf16 %v11009_v27, %v11010_v63 }
 0x8bc   :  { %v3959_v17 = vpop.f32.mrf.mxu2 }
 0x8bd   :  { %v4585_v29 = vadd.f32 %v4584_v23, %v3959_v17  ;;  %v4682_v8 = vpop.f32.mrf.mxu3  ;;  %v11013_v23 = vld [vmem:[#allocation90_spill] sm:$0xff]  ;;  %v11016_v17 = vld [vmem:[#allocation88_spill] sm:$0xff] }
 0x8be   :  { %v4586_v15 = vpop.f32.mrf.mxu0  ;;  %v11014_v46 = vpack.c.bf16 %v11012_v39, %v11013_v23  ;;  %v6854_v39 = vld [vmem:[#allocation5 + $0x1f0] sm:$0xff] }
 0x8bf   :  { %v4634_v43 = vadd.f32 %v4633_v47, %v4585_v29  ;;  %v4635_v61 = vpop.f32.mrf.mxu1  ;;  %v11015_v47 = vld [vmem:[#allocation85_spill] sm:$0xff] }
 0x8c0   :  { %v11017_v29 = vpack.c.bf16 %v11015_v47, %v11016_v17  ;;  %v6862_v23 = vld [vmem:[#allocation5 + $0x230] sm:$0xff] }
 0x8c1   :  { %v9925_v5 = vadd.f32 %v4682_v8, %v4634_v43  ;;  %v11018_v8 = vld [vmem:[#allocation86_spill] sm:$0xff] }
 0x8c4   :  { %v3961_v52 = vpop.f32.mrf.mxu2 }
 0x8c5   :  { %v4587_v38 = vadd.f32 %v4586_v15, %v3961_v52  ;;  %v4684_v35 = vpop.f32.mrf.mxu3  ;;  %v11019_v15 = vld [vmem:[#allocation89_spill] sm:$0xff] }
 0x8c6   :  { %v4589_v14 = vpop.f32.mrf.mxu0  ;;  %v11020_v43 = vpack.c.bf16 %v11018_v8, %v11019_v15  ;;  %v6863_v52 = vld [vmem:[#allocation5 + $0x238] sm:$0xff]  ;;  %v6853_v15 = vld [vmem:[#allocation5 + $0x1e8] sm:$0xff] }
 0x8c7   :  { %v4636_v19 = vadd.f32 %v4635_v61, %v4587_v38  ;;  %v4638_v31 = vpop.f32.mrf.mxu1  ;;  %v6855_v61 = vld [vmem:[#allocation5 + $0x1f8] sm:$0xff]  ;;  %4952 = vmatpush.bf16.msrb.mxu0 %v6863_v52 }
 0x8c8   :  { %v6871_v38 = vld [vmem:[#allocation5 + $0x278] sm:$0xff]  ;;  %4903 = vmatpush.bf16.msra.mxu2 %v6855_v61  ;;  %v6869_v61 = vld [vmem:[#allocation5 + $0x268] sm:$0xff] }
 0x8c9   :  { %v9927_v54 = vadd.f32 %v4684_v35, %v4636_v19  ;;  %4735 = vmatmul.bf16.gmra.mxu2 %v11011_v32  ;;  %4784 = vmatmul.bf16.gmra.mxu0 %v11014_v46  ;;  %v6879_v35 = vld [vmem:[#allocation5 + $0x2b8] sm:$0xff]  ;;  %v6870_v46 = vld [vmem:[#allocation5 + $0x270] sm:$0xff] }
 0x8ca   :  { %4833 = vmatmul.bf16.gmra.mxu1 %v11017_v29  ;;  %4882 = vmatmul.bf16.gmra.mxu3 %v11020_v43  ;;  %v6878_v29 = vld [vmem:[#allocation5 + $0x2b0] sm:$0xff]  ;;  %v6861_v43 = vld [vmem:[#allocation5 + $0x228] sm:$0xff] }
 0x8cb   :  { %5001 = vmatpush.bf16.msra.mxu1 %v6871_v38  ;;  %5050 = vmatpush.bf16.msrb.mxu3 %v6879_v35 }
 0x8cc   :  { %v3964_v19 = vpop.f32.mrf.mxu2  ;;  %4904 = vmatpush.bf16.msra.mxu2 %v6854_v39  ;;  %4953 = vmatpush.bf16.msrb.mxu0 %v6862_v23 }
 0x8cd   :  { %v4590_v27 = vadd.f32 %v4589_v14, %v3964_v19  ;;  %v4687_v63 = vpop.f32.mrf.mxu3  ;;  %v6877_v14 = vld [vmem:[#allocation5 + $0x2a8] sm:$0xff]  ;;  %v6852_v19 = vld [vmem:[#allocation5 + $0x1e0] sm:$0xff] }
 0x8ce   :  { %v4591_v32 = vpop.f32.mrf.mxu0 }
 0x8cf   :  { %v4639_v47 = vadd.f32 %v4638_v31, %v4590_v27  ;;  %v4640_v17 = vpop.f32.mrf.mxu1  ;;  %5002 = vmatpush.bf16.msra.mxu1 %v6870_v46  ;;  %5051 = vmatpush.bf16.msrb.mxu3 %v6878_v29  ;;  %v6860_v27 = vld [vmem:[#allocation5 + $0x220] sm:$0xff] }
 0x8d0   :  { %4905 = vmatpush.bf16.msra.mxu2 %v6853_v15  ;;  %4954 = vmatpush.bf16.msrb.mxu0 %v6861_v43  ;;  %v11021_v29 = vld [vmem:[#allocation55_spill] sm:$0xff]  ;;  %v11025_v15 = vld [vmem:[#allocation93_spill] sm:$0xff]  ;;  %v11026_v43 = vld [vmem:[#allocation96_spill] sm:$0xff] }
 0x8d1   :  { %v9941_v8 = vadd.f32 %v4687_v63, %v4639_v47  ;;  %v6868_v63 = vld [vmem:[#allocation5 + $0x260] sm:$0xff]  ;;  %v11023_v44 = vpack.c.bf16 %v11021_v29, %v11022_v34  ;;  %v6858_v29 = vld [vmem:[#allocation5 + $0x210] sm:$0xff] }
 0x8d2   :  { %v6876_v47 = vld [vmem:[#allocation5 + $0x2a0] sm:$0xff] }
 0x8d3   :  { %5003 = vmatpush.bf16.msra.mxu1 %v6869_v61  ;;  %5052 = vmatpush.bf16.msrb.mxu3 %v6877_v14  ;;  %v11027_v61 = vpack.c.bf16 %v11025_v15, %v11026_v43  ;;  %v11029_v14 = vld [vmem:[#allocation97_spill] sm:$0xff] }
 0x8d4   :  { %v3966_v52 = vpop.f32.mrf.mxu2  ;;  %4906 = vmatpush.bf16.msra.mxu2 %v6852_v19  ;;  %4955 = vmatpush.bf16.msrb.mxu0 %v6860_v27  ;;  %v6859_v19 = vld [vmem:[#allocation5 + $0x218] sm:$0xff]  ;;  %v6866_v43 = vld [vmem:[#allocation5 + $0x250] sm:$0xff] }
 0x8d5   :  { %v4592_v38 = vadd.f32 %v4591_v32, %v3966_v52  ;;  %v4689_v35 = vpop.f32.mrf.mxu3  ;;  %v11024_v32 = vpack.c.bf16 %v9434_v48, %v9431_v2  ;;  %v6875_v27 = vld [vmem:[#allocation5 + $0x298] sm:$0xff] }
 0x8d6   :  { %v4594_v31 = vpop.f32.mrf.mxu0 }
 0x8d7   :  { %v4641_v39 = vadd.f32 %v4640_v17, %v4592_v38  ;;  %v4643_v23 = vpop.f32.mrf.mxu1  ;;  %v11028_v17 = vld [vmem:[#allocation94_spill] sm:$0xff]  ;;  %5004 = vmatpush.bf16.msra.mxu1 %v6868_v63  ;;  %5053 = vmatpush.bf16.msrb.mxu3 %v6876_v47  ;;  %v6849_v47 = vld [vmem:[#allocation5 + $0x1c8] sm:$0xff] }
 0x8d8   :  { %v11030_v52 = vpack.c.bf16 %v11028_v17, %v11029_v14  ;;  %v6851_v38 = vld [vmem:[#allocation5 + $0x1d8] sm:$0xff]  ;;  %4956 = vmatpush.bf16.msrb.mxu0 %v6859_v19  ;;  %v6857_v17 = vld [vmem:[#allocation5 + $0x208] sm:$0xff] }
 0x8d9   :  { %v9943_v46 = vadd.f32 %v4689_v35, %v4641_v39  ;;  %4740 = vmatmul.bf16.gmra.mxu2 %v11023_v44  ;;  %4789 = vmatmul.bf16.gmra.mxu0 %v11024_v32  ;;  %v6867_v35 = vld [vmem:[#allocation5 + $0x258] sm:$0xff]  ;;  %v6850_v39 = vld [vmem:[#allocation5 + $0x1d0] sm:$0xff]  ;;  %v6865_v14 = vld [vmem:[#allocation5 + $0x248] sm:$0xff] }
 0x8da   :  { %4838 = vmatmul.bf16.gmra.mxu1 %v11027_v61  ;;  %4887 = vmatmul.bf16.gmra.mxu3 %v11030_v52  ;;  %v6874_v61 = vld [vmem:[#allocation5 + $0x290] sm:$0xff] }
 0x8db   :  { %4907 = vmatpush.bf16.msra.mxu2 %v6851_v38  ;;  %5005 = vmatpush.bf16.msra.mxu1 %v6867_v35  ;;  %v6848_v35 = vld [vmem:[#allocation5 + $0x1c0] sm:$0xff] }
 0x8dc   :  { %v3969_v34 = vpop.f32.mrf.mxu2  ;;  %5054 = vmatpush.bf16.msrb.mxu3 %v6875_v27  ;;  %4957 = vmatpush.bf16.msrb.mxu0 %v6858_v29  ;;  %v6856_v27 = vld [vmem:[#allocation5 + $0x200] sm:$0xff] }
 0x8dd   :  { %v4595_v44 = vadd.f32 %v4594_v31, %v3969_v34  ;;  %v4692_v2 = vpop.f32.mrf.mxu3  ;;  %v6873_v31 = vld [vmem:[#allocation5 + $0x288] sm:$0xff] }
 0x8de   :  { %v4596_v48 = vpop.f32.mrf.mxu0 }
 0x8df   :  { %v4644_v32 = vadd.f32 %v4643_v23, %v4595_v44  ;;  %v4645_v15 = vpop.f32.mrf.mxu1  ;;  %4908 = vmatpush.bf16.msra.mxu2 %v6850_v39  ;;  %5006 = vmatpush.bf16.msra.mxu1 %v6866_v43  ;;  %v6872_v39 = vld [vmem:[#allocation5 + $0x280] sm:$0xff]  ;;  %v11032_v43 = vld [vmem:[#allocation52_spill] sm:$0xff] }
 0x8e0   :  { %5055 = vmatpush.bf16.msrb.mxu3 %v6874_v61  ;;  %4958 = vmatpush.bf16.msrb.mxu0 %v6857_v17  ;;  %v11036_v17 = vld [vmem:[#allocation100_spill] sm:$0xff] }
 0x8e1   :  { %v9957_v63 = vadd.f32 %v4692_v2, %v4644_v32  ;;  %v6864_v2 = vld [vmem:[#allocation5 + $0x240] sm:$0xff]  ;;  %v11031_v32 = vld [vmem:[#allocation56_spill] sm:$0xff] }
 0x8e2   :  { %v11033_v61 = vpack.c.bf16 %v11031_v32, %v11032_v43 }
 0x8e3   :  { %4909 = vmatpush.bf16.msra.mxu2 %v6849_v47  ;;  %5007 = vmatpush.bf16.msra.mxu1 %v6865_v14  ;;  %v11039_v14 = vld [vmem:[#allocation101_spill] sm:$0xff] }
 0x8e4   :  { %v3971_v52 = vpop.f32.mrf.mxu2  ;;  %5056 = vmatpush.bf16.msrb.mxu3 %v6873_v31  ;;  %4959 = vmatpush.bf16.msrb.mxu0 %v6856_v27  ;;  %v11040_v31 = vld [vmem:[#allocation104_spill] sm:$0xff] }
 0x8e5   :  { %v4597_v38 = vadd.f32 %v4596_v48, %v3971_v52  ;;  %v4694_v23 = vpop.f32.mrf.mxu3  ;;  %v11034_v48 = vld [vmem:[#allocation105_spill] sm:$0xff]  ;;  %v11037_v52 = vld [vmem:[#allocation99_spill] sm:$0xff] }
 0x8e6   :  { %v4599_v19 = vpop.f32.mrf.mxu0  ;;  %v11035_v47 = vpack.c.bf16 %v9477_v18, %v11034_v48 }
 0x8e7   :  { %v4646_v34 = vadd.f32 %v4645_v15, %v4597_v38  ;;  %v4648_v44 = vpop.f32.mrf.mxu1  ;;  %4910 = vmatpush.bf16.msra.mxu2 %v6848_v35  ;;  %v11038_v15 = vpack.c.bf16 %v11036_v17, %v11037_v52  ;;  %v11041_v38 = vpack.c.bf16 %v11039_v14, %v11040_v31  ;;  %5008 = vmatpush.bf16.msra.mxu1 %v6864_v2  ;;  %v11042_v14 = vld [vmem:[#allocation54_spill] sm:$0xff]  ;;  %v11043_v31 = vld [vmem:[#allocation53_spill] sm:$0xff] }
 0x8e8   :  { %5057 = vmatpush.bf16.msrb.mxu3 %v6872_v39  ;;  %v11044_v2 = vpack.c.bf16 %v11042_v14, %v11043_v31  ;;  %v11049_v31 = vld [vmem:[#allocation65_spill] sm:$0xff] }
 0x8e9   :  { %v9959_v29 = vadd.f32 %v4694_v23, %v4646_v34  ;;  %4745 = vmatmul.bf16.gmra.mxu2 %v11033_v61  ;;  %4794 = vmatmul.bf16.gmra.mxu0 %v11035_v47 }
 0x8ea   :  { %4843 = vmatmul.bf16.gmra.mxu1 %v11038_v15  ;;  %4892 = vmatmul.bf16.gmra.mxu3 %v11041_v38  ;;  %v11048_v38 = vpack.c.bf16 %v9507_v6, %v9504_v53  ;;  %v11052_v6 = vpack.c.bf16 %v9559_v41, %v9556_v59 }
 0x8ec   :  { %v3974_v23 = vpop.f32.mrf.mxu2 }
 0x8ed   :  { %v4600_v35 = vadd.f32 %v4599_v19, %v3974_v23  ;;  %v4697_v27 = vpop.f32.mrf.mxu3  ;;  %v11045_v19 = vpack.c.bf16 %v9517_v0, %v9514_v12 }
 0x8ee   :  { %v4601_v34 = vpop.f32.mrf.mxu0 }
 0x8ef   :  { %v4649_v32 = vadd.f32 %v4648_v44, %v4600_v35  ;;  %v4650_v43 = vpop.f32.mrf.mxu1  ;;  %v11046_v44 = vld [vmem:[#allocation103_spill] sm:$0xff] }
 0x8f0   :  { %v11047_v39 = vpack.c.bf16 %v9501_v25, %v11046_v44 }
 0x8f1   :  { %v9973_v61 = vadd.f32 %v4697_v27, %v4649_v32 }
 0x8f4   :  { %v3976_v18 = vpop.f32.mrf.mxu2 }
 0x8f5   :  { %v4602_v48 = vadd.f32 %v4601_v34, %v3976_v18  ;;  %v4699_v47 = vpop.f32.mrf.mxu3 }
 0x8f6   :  { %v4604_v49 = vpop.f32.mrf.mxu0 }
 0x8f7   :  { %v4651_v17 = vadd.f32 %v4650_v43, %v4602_v48  ;;  %v4653_v52 = vpop.f32.mrf.mxu1 }
 0x8f9   :  { %v9975_v15 = vadd.f32 %v4699_v47, %v4651_v17  ;;  %4750 = vmatmul.bf16.gmra.mxu2 %v11044_v2  ;;  %4799 = vmatmul.bf16.gmra.mxu0 %v11045_v19  ;;  %v11050_v2 = vld [vmem:[#allocation61_spill] sm:$0xff] }
 0x8fa   :  { %4848 = vmatmul.bf16.gmra.mxu1 %v11047_v39  ;;  %4897 = vmatmul.bf16.gmra.mxu3 %v11048_v38  ;;  %v11051_v53 = vpack.c.bf16 %v11049_v31, %v11050_v2 }
 0x8fc   :  { %v3979_v23 = vpop.f32.mrf.mxu2 }
 0x8fd   :  { %v4605_v35 = vadd.f32 %v4604_v49, %v3979_v23  ;;  %v4702_v27 = vpop.f32.mrf.mxu3  ;;  %v11053_v49 = vpack.c.bf16 %v9543_v3, %v9540_v36 }
 0x8fe   :  { %v4606_v34 = vpop.f32.mrf.mxu0 }
 0x8ff   :  { %v4654_v32 = vadd.f32 %v4653_v52, %v4605_v35  ;;  %v4655_v43 = vpop.f32.mrf.mxu1  ;;  %v11054_v52 = vpack.c.bf16 %v9549_v26, %v9546_v1  ;;  %v11055_v1 = vld [vmem:[#allocation69_spill] sm:$0xff]  ;;  %v11056_v26 = vld [vmem:[#allocation72_spill] sm:$0xff] }
 0x901   :  { %v9989_v18 = vadd.f32 %v4702_v27, %v4654_v32 }
 0x904   :  { %v3981_v48 = vpop.f32.mrf.mxu2 }
 0x905   :  { %v4607_v47 = vadd.f32 %v4606_v34, %v3981_v48  ;;  %v4704_v12 = vpop.f32.mrf.mxu3 }
 0x906   :  { %v4765_v0 = vpop.f32.mrf.mxu0 }
 0x907   :  { %v4656_v17 = vadd.f32 %v4655_v43, %v4607_v47  ;;  %v4814_v14 = vpop.f32.mrf.mxu1  ;;  %v11057_v47 = vpack.c.bf16 %v11055_v1, %v11056_v26 }
 0x909   :  { %v9991_v25 = vadd.f32 %v4704_v12, %v4656_v17  ;;  %4911 = vmatmul.bf16.vlgmr.msra.gmra.mxu2 %v11051_v53  ;;  %4960 = vmatmul.bf16.vlgmr.msrb.gmra.mxu0 %v11052_v6  ;;  %v11059_v12 = vpack.c.bf16 %v9585_v33, %v9582_v57 }
 0x90a   :  { %5009 = vmatmul.bf16.vlgmr.msra.gmra.mxu1 %v11053_v49  ;;  %5058 = vmatmul.bf16.vlgmr.msrb.gmra.mxu3 %v11054_v52 }
 0x90c   :  { %v4716_v19 = vpop.f32.mrf.mxu2 }
 0x90d   :  { %v4717_v44 = vadd.f32 %v4716_v19, %v9877_v45  ;;  %v4863_v39 = vpop.f32.mrf.mxu3  ;;  %v11058_v45 = vpack.c.bf16 %v9601_v37, %v9598_v4 }
 0x90e   :  { %v4767_v38 = vpop.f32.mrf.mxu0 }
 0x90f   :  { %v4766_v23 = vadd.f32 %v4765_v0, %v4717_v44  ;;  %v4816_v35 = vpop.f32.mrf.mxu1  ;;  %v11061_v44 = vld [vmem:[#allocation80_spill] sm:$0xff] }
 0x911   :  { %v4815_v27 = vadd.f32 %v4814_v14, %v4766_v23  ;;  %v11065_v23 = vpack.c.bf16 %v9627_v24, %v9624_v40 }
 0x913   :  { %v10006_v34 = vadd.f32 %v4863_v39, %v4815_v27  ;;  %v11062_v39 = vld [vmem:[#allocation76_spill] sm:$0xff]  ;;  %v11067_v27 = vld [vmem:[#allocation114_spill] sm:$0xff] }
 0x914   :  { %v4718_v59 = vpop.f32.mrf.mxu2 }
 0x915   :  { %v4719_v41 = vadd.f32 %v4718_v59, %v9879_v16  ;;  %v4865_v32 = vpop.f32.mrf.mxu3  ;;  %v11060_v16 = vpack.c.bf16 %v9591_v28, %v9588_v60 }
 0x916   :  { %v4770_v36 = vpop.f32.mrf.mxu0 }
 0x917   :  { %v4768_v3 = vadd.f32 %v4767_v38, %v4719_v41  ;;  %v4819_v43 = vpop.f32.mrf.mxu1  ;;  %v11063_v38 = vpack.c.bf16 %v11061_v44, %v11062_v39 }
 0x919   :  { %v4817_v48 = vadd.f32 %v4816_v35, %v4768_v3  ;;  %4916 = vmatmul.bf16.gmra.mxu2 %v11057_v47  ;;  %4965 = vmatmul.bf16.gmra.mxu0 %v11058_v45  ;;  %v11066_v35 = vld [vmem:[#allocation111_spill] sm:$0xff] }
 0x91a   :  { %5014 = vmatmul.bf16.gmra.mxu1 %v11059_v12  ;;  %5063 = vmatmul.bf16.gmra.mxu3 %v11060_v16  ;;  %v11069_v16 = vld [vmem:[#allocation84_spill] sm:$0xff] }
 0x91b   :  { %v10021_v0 = vadd.f32 %v4865_v32, %v4817_v48 }
 0x91c   :  { %v4721_v17 = vpop.f32.mrf.mxu2 }
 0x91d   :  { %v4722_v14 = vadd.f32 %v4721_v17, %v9893_v55  ;;  %v4868_v31 = vpop.f32.mrf.mxu3  ;;  %v11064_v55 = vpack.c.bf16 %v9643_v50, %v9640_v56  ;;  %v11070_v17 = vld [vmem:[#allocation83_spill] sm:$0xff] }
 0x91e   :  { %v4772_v2 = vpop.f32.mrf.mxu0 }
 0x91f   :  { %v4771_v53 = vadd.f32 %v4770_v36, %v4722_v14  ;;  %v4821_v6 = vpop.f32.mrf.mxu1  ;;  %v11071_v14 = vpack.c.bf16 %v11069_v16, %v11070_v17  ;;  %v6886_v17 = vld [vmem:[#allocation5 + $0x2f0] sm:$0xff] }
 0x921   :  { %v4820_v49 = vadd.f32 %v4819_v43, %v4771_v53  ;;  %v11075_v53 = vld [vmem:[#allocation120_spill] sm:$0xff] }
 0x923   :  { %v10024_v4 = vadd.f32 %v4868_v31, %v4820_v49  ;;  %v11077_v49 = vld [vmem:[#allocation118_spill] sm:$0xff] }
 0x924   :  { %v4723_v37 = vpop.f32.mrf.mxu2 }
 0x925   :  { %v4724_v57 = vadd.f32 %v4723_v37, %v9895_v58  ;;  %v4870_v33 = vpop.f32.mrf.mxu3  ;;  %v11068_v58 = vpack.c.bf16 %v11066_v35, %v11067_v27  ;;  %v11078_v37 = vld [vmem:[#allocation121_spill] sm:$0xff] }
 0x926   :  { %v4775_v52 = vpop.f32.mrf.mxu0 }
 0x927   :  { %v4773_v19 = vadd.f32 %v4772_v2, %v4724_v57  ;;  %v4824_v60 = vpop.f32.mrf.mxu1  ;;  %v11074_v2 = vld [vmem:[#allocation117_spill] sm:$0xff] }
 0x929   :  { %v4822_v28 = vadd.f32 %v4821_v6, %v4773_v19  ;;  %4921 = vmatmul.bf16.gmra.mxu2 %v11063_v38  ;;  %4970 = vmatmul.bf16.gmra.mxu0 %v11064_v55  ;;  %v11076_v6 = vpack.c.bf16 %v11074_v2, %v11075_v53 }
 0x92a   :  { %5019 = vmatmul.bf16.gmra.mxu1 %v11065_v23  ;;  %5068 = vmatmul.bf16.gmra.mxu3 %v11068_v58 }
 0x92b   :  { %v10039_v59 = vadd.f32 %v4870_v33, %v4822_v28 }
 0x92c   :  { %v4726_v41 = vpop.f32.mrf.mxu2 }
 0x92d   :  { %v4727_v32 = vadd.f32 %v4726_v41, %v9909_v42  ;;  %v4873_v36 = vpop.f32.mrf.mxu3  ;;  %v11072_v42 = vld [vmem:[#allocation122_spill] sm:$0xff] }
 0x92e   :  { %v4777_v3 = vpop.f32.mrf.mxu0  ;;  %v11073_v31 = vpack.c.bf16 %v9685_v30, %v11072_v42  ;;  %v6885_v42 = vld [vmem:[#allocation5 + $0x2e8] sm:$0xff] }
 0x92f   :  { %v4776_v43 = vadd.f32 %v4775_v52, %v4727_v32  ;;  %v4826_v48 = vpop.f32.mrf.mxu1  ;;  %v11080_v32 = vld [vmem:[#allocation92_spill] sm:$0xff] }
 0x931   :  { %v4825_v1 = vadd.f32 %v4824_v60, %v4776_v43  ;;  %v11084_v43 = vld [vmem:[#allocation124_spill] sm:$0xff] }
 0x933   :  { %v10042_v56 = vadd.f32 %v4873_v36, %v4825_v1  ;;  %v11081_v36 = vld [vmem:[#allocation91_spill] sm:$0xff] }
 0x934   :  { %v4728_v50 = vpop.f32.mrf.mxu2 }
 0x935   :  { %v4729_v40 = vadd.f32 %v4728_v50, %v9911_v22  ;;  %v4875_v24 = vpop.f32.mrf.mxu3  ;;  %v11079_v22 = vpack.c.bf16 %v11077_v49, %v11078_v37  ;;  %v11087_v50 = vld [vmem:[#allocation125_spill] sm:$0xff]  ;;  %v6884_v37 = vld [vmem:[#allocation5 + $0x2e0] sm:$0xff] }
 0x936   :  { %v4780_v26 = vpop.f32.mrf.mxu0 }
 0x937   :  { %v4778_v47 = vadd.f32 %v4777_v3, %v4729_v40  ;;  %v4829_v45 = vpop.f32.mrf.mxu1  ;;  %v11082_v3 = vpack.c.bf16 %v11080_v32, %v11081_v36  ;;  %v11088_v40 = vld [vmem:[#allocation128_spill] sm:$0xff] }
 0x938   :  { %v6882_v32 = vld [vmem:[#allocation5 + $0x2d0] sm:$0xff] }
 0x939   :  { %v4827_v12 = vadd.f32 %v4826_v48, %v4778_v47  ;;  %4926 = vmatmul.bf16.gmra.mxu2 %v11071_v14  ;;  %4975 = vmatmul.bf16.gmra.mxu0 %v11073_v31  ;;  %v11085_v48 = vld [vmem:[#allocation30_spill] sm:$0xff] }
 0x93a   :  { %5024 = vmatmul.bf16.gmra.mxu1 %v11076_v6  ;;  %5073 = vmatmul.bf16.gmra.mxu3 %v11079_v22  ;;  %v11086_v1 = vpack.c.bf16 %v11084_v43, %v11085_v48 }
 0x93b   :  { %v10057_v57 = vadd.f32 %v4875_v24, %v4827_v12  ;;  %v6887_v24 = vld [vmem:[#allocation5 + $0x2f8] sm:$0xff] }
 0x93c   :  { %v4731_v33 = vpop.f32.mrf.mxu2  ;;  %5099 = vmatpush.bf16.msrb.mxu2 %v6887_v24  ;;  %v11099_v24 = vld [vmem:[#allocation102_spill] sm:$0xff] }
 0x93d   :  { %v4732_v52 = vadd.f32 %v4731_v33, %v9925_v5  ;;  %v4878_v19 = vpop.f32.mrf.mxu3  ;;  %v11083_v5 = vpack.c.bf16 %v9727_v20, %v9724_v9 }
 0x93e   :  { %v4782_v60 = vpop.f32.mrf.mxu0 }
 0x93f   :  { %v4781_v28 = vadd.f32 %v4780_v26, %v4732_v52  ;;  %v4831_v44 = vpop.f32.mrf.mxu1  ;;  %v11090_v52 = vld [vmem:[#allocation95_spill] sm:$0xff] }
 0x940   :  { %5100 = vmatpush.bf16.msrb.mxu2 %v6886_v17  ;;  %v11105_v17 = vld [vmem:[#allocation136_spill] sm:$0xff] }
 0x941   :  { %v4830_v39 = vadd.f32 %v4829_v45, %v4781_v28  ;;  %v11093_v28 = vpack.c.bf16 %v9769_v7, %v9766_v13 }
 0x943   :  { %v10060_v30 = vadd.f32 %v4878_v19, %v4830_v39  ;;  %v11091_v19 = vld [vmem:[#allocation98_spill] sm:$0xff] }
 0x944   :  { %v4733_v38 = vpop.f32.mrf.mxu2  ;;  %5101 = vmatpush.bf16.msrb.mxu2 %v6885_v42  ;;  %v11096_v39 = vld [vmem:[#allocation130_spill] sm:$0xff] }
 0x945   :  { %v4734_v55 = vadd.f32 %v4733_v38, %v9927_v54  ;;  %v4880_v23 = vpop.f32.mrf.mxu3  ;;  %v11089_v54 = vpack.c.bf16 %v11087_v50, %v11088_v40 }
 0x946   :  { %v4785_v35 = vpop.f32.mrf.mxu0 }
 0x947   :  { %v4783_v27 = vadd.f32 %v4782_v60, %v4734_v55  ;;  %v4834_v58 = vpop.f32.mrf.mxu1  ;;  %v11092_v60 = vpack.c.bf16 %v11090_v52, %v11091_v19  ;;  %v6883_v55 = vld [vmem:[#allocation5 + $0x2d8] sm:$0xff] }
 0x948   :  { %5102 = vmatpush.bf16.msrb.mxu2 %v6884_v37 }
 0x949   :  { %v4832_v41 = vadd.f32 %v4831_v44, %v4783_v27  ;;  %4931 = vmatmul.bf16.gmra.mxu2 %v11082_v3  ;;  %4980 = vmatmul.bf16.gmra.mxu0 %v11083_v5  ;;  %v11094_v44 = vpack.c.bf16 %v9753_v11, %v9750_v62  ;;  %v6881_v62 = vld [vmem:[#allocation5 + $0x2c8] sm:$0xff] }
 0x94a   :  { %5029 = vmatmul.bf16.gmra.mxu1 %v11086_v1  ;;  %5078 = vmatmul.bf16.gmra.mxu3 %v11089_v54  ;;  %v6880_v1 = vld [vmem:[#allocation5 + $0x2c0] sm:$0xff] }
 0x94b   :  { %v10075_v26 = vadd.f32 %v4880_v23, %v4832_v41  ;;  %v11098_v54 = vld [vmem:[#allocation106_spill] sm:$0xff] }
 0x94c   :  { %v4736_v47 = vpop.f32.mrf.mxu2  ;;  %5103 = vmatpush.bf16.msrb.mxu2 %v6883_v55  ;;  %v11114_v55 = vld [vmem:[#allocation138_spill] sm:$0xff] }
 0x94d   :  { %v4737_v45 = vadd.f32 %v4736_v47, %v9941_v8  ;;  %v4883_v12 = vpop.f32.mrf.mxu3  ;;  %v11100_v47 = vpack.c.bf16 %v11098_v54, %v11099_v24 }
 0x94e   :  { %v4787_v16 = vpop.f32.mrf.mxu0 }
 0x94f   :  { %v4786_v9 = vadd.f32 %v4785_v35, %v4737_v45  ;;  %v4836_v20 = vpop.f32.mrf.mxu1  ;;  %v11101_v45 = vpack.c.bf16 %v9811_v51, %v9808_v21 }
 0x950   :  { %5104 = vmatpush.bf16.msrb.mxu2 %v6882_v32 }
 0x951   :  { %v4835_v14 = vadd.f32 %v4834_v58, %v4786_v9 }
 0x953   :  { %v10078_v31 = vadd.f32 %v4883_v12, %v4835_v14  ;;  %v11102_v12 = vld [vmem:[#allocation132_spill] sm:$0xff] }
 0x954   :  { %v4738_v2 = vpop.f32.mrf.mxu2  ;;  %5105 = vmatpush.bf16.msrb.mxu2 %v6881_v62 }
 0x955   :  { %v4739_v53 = vadd.f32 %v4738_v2, %v9943_v46  ;;  %v4885_v6 = vpop.f32.mrf.mxu3  ;;  %v11095_v46 = vld [vmem:[#allocation127_spill] sm:$0xff] }
 0x956   :  { %v4790_v49 = vpop.f32.mrf.mxu0  ;;  %v11097_v38 = vpack.c.bf16 %v11095_v46, %v11096_v39  ;;  %v11111_v46 = vld [vmem:[#allocation140_spill] sm:$0xff] }
 0x957   :  { %v4788_v22 = vadd.f32 %v4787_v16, %v4739_v53  ;;  %v4839_v33 = vpop.f32.mrf.mxu1  ;;  %v11103_v16 = vpack.c.bf16 %v9795_v10, %v11102_v12 }
 0x958   :  { %5106 = vmatpush.bf16.msrb.mxu2 %v6880_v1 }
 0x959   :  { %v4837_v8 = vadd.f32 %v4836_v20, %v4788_v22  ;;  %4936 = vmatmul.bf16.gmra.mxu2 %v11092_v60  ;;  %4985 = vmatmul.bf16.gmra.mxu0 %v11093_v28  ;;  %v11107_v60 = vld [vmem:[#allocation108_spill] sm:$0xff]  ;;  %v11108_v28 = vld [vmem:[#allocation107_spill] sm:$0xff] }
 0x95a   :  { %5034 = vmatmul.bf16.gmra.mxu1 %v11094_v44  ;;  %5083 = vmatmul.bf16.gmra.mxu3 %v11097_v38  ;;  %v11109_v44 = vpack.c.bf16 %v11107_v60, %v11108_v28  ;;  %v11113_v38 = vld [vmem:[#allocation135_spill] sm:$0xff] }
 0x95b   :  { %v10093_v23 = vadd.f32 %v4885_v6, %v4837_v8 }
 0x95c   :  { %v4741_v35 = vpop.f32.mrf.mxu2 }
 0x95d   :  { %v4742_v27 = vadd.f32 %v4741_v35, %v9957_v63  ;;  %v4888_v58 = vpop.f32.mrf.mxu3  ;;  %v11115_v35 = vpack.c.bf16 %v11113_v38, %v11114_v55 }
 0x95e   :  { %v4792_v41 = vpop.f32.mrf.mxu0 }
 0x95f   :  { %v4791_v13 = vadd.f32 %v4790_v49, %v4742_v27  ;;  %v4841_v7 = vpop.f32.mrf.mxu1  ;;  %v11116_v27 = vld [vmem:[#allocation32_spill] sm:$0xff] }
 0x961   :  { %v4840_v36 = vadd.f32 %v4839_v33, %v4791_v13 }
 0x963   :  { %v10096_v11 = vadd.f32 %v4888_v58, %v4840_v36  ;;  %v11117_v58 = vld [vmem:[#allocation139_spill] sm:$0xff] }
 0x964   :  { %v4743_v3 = vpop.f32.mrf.mxu2 }
 0x965   :  { %v4744_v5 = vadd.f32 %v4743_v3, %v9959_v29  ;;  %v4890_v43 = vpop.f32.mrf.mxu3  ;;  %v11104_v29 = vld [vmem:[#allocation133_spill] sm:$0xff] }
 0x966   :  { %v4795_v48 = vpop.f32.mrf.mxu0  ;;  %v11106_v9 = vpack.c.bf16 %v11104_v29, %v11105_v17 }
 0x967   :  { %v4793_v50 = vadd.f32 %v4792_v41, %v4744_v5  ;;  %v4844_v40 = vpop.f32.mrf.mxu1 }
 0x969   :  { %v4842_v63 = vadd.f32 %v4841_v7, %v4793_v50  ;;  %4941 = vmatmul.bf16.gmra.mxu2 %v11100_v47  ;;  %4990 = vmatmul.bf16.gmra.mxu0 %v11101_v45  ;;  %v11119_v47 = vld [vmem:[#allocation109_spill] sm:$0xff]  ;;  %v11120_v45 = vld [vmem:[#allocation112_spill] sm:$0xff] }
 0x96a   :  { %5039 = vmatmul.bf16.gmra.mxu1 %v11103_v16  ;;  %5088 = vmatmul.bf16.gmra.mxu3 %v11106_v9  ;;  %v11121_v12 = vpack.c.bf16 %v11119_v47, %v11120_v45 }
 0x96b   :  { %v10111_v20 = vadd.f32 %v4890_v43, %v4842_v63 }
 0x96c   :  { %v4746_v14 = vpop.f32.mrf.mxu2 }
 0x96d   :  { %v4747_v42 = vadd.f32 %v4746_v14, %v9973_v61  ;;  %v4893_v2 = vpop.f32.mrf.mxu3  ;;  %v11110_v61 = vld [vmem:[#allocation144_spill] sm:$0xff] }
 0x96e   :  { %v4797_v53 = vpop.f32.mrf.mxu0  ;;  %v11112_v39 = vpack.c.bf16 %v11110_v61, %v11111_v46 }
 0x96f   :  { %v4796_v6 = vadd.f32 %v4795_v48, %v4747_v42  ;;  %v4846_v49 = vpop.f32.mrf.mxu1 }
 0x971   :  { %v4845_v37 = vadd.f32 %v4844_v40, %v4796_v6 }
 0x973   :  { %v10114_v21 = vadd.f32 %v4893_v2, %v4845_v37 }
 0x974   :  { %v4748_v51 = vpop.f32.mrf.mxu2 }
 0x975   :  { %v4749_v10 = vadd.f32 %v4748_v51, %v9975_v15  ;;  %v4895_v22 = vpop.f32.mrf.mxu3  ;;  %v11118_v15 = vpack.c.bf16 %v11116_v27, %v11117_v58 }
 0x976   :  { %v4800_v33 = vpop.f32.mrf.mxu0 }
 0x977   :  { %v4798_v8 = vadd.f32 %v4797_v53, %v4749_v10  ;;  %v4849_v52 = vpop.f32.mrf.mxu1 }
 0x979   :  { %v4847_v19 = vadd.f32 %v4846_v49, %v4798_v8  ;;  %4946 = vmatmul.bf16.gmra.mxu2 %v11109_v44  ;;  %4995 = vmatmul.bf16.gmra.mxu0 %v11112_v39  ;;  %v11123_v8 = vld [vmem:[#allocation113_spill] sm:$0xff] }
 0x97a   :  { %5044 = vmatmul.bf16.gmra.mxu1 %v11115_v35  ;;  %5093 = vmatmul.bf16.gmra.mxu3 %v11118_v15 }
 0x97b   :  { %v10129_v41 = vadd.f32 %v4895_v22, %v4847_v19 }
 0x97c   :  { %v4751_v32 = vpop.f32.mrf.mxu2 }
 0x97d   :  { %v4752_v13 = vadd.f32 %v4751_v32, %v9989_v18  ;;  %v4898_v7 = vpop.f32.mrf.mxu3 }
 0x97e   :  { %v4802_v36 = vpop.f32.mrf.mxu0 }
 0x97f   :  { %v4801_v62 = vadd.f32 %v4800_v33, %v4752_v13  ;;  %v4851_v3 = vpop.f32.mrf.mxu1  ;;  %v11122_v33 = vld [vmem:[#allocation110_spill] sm:$0xff]  ;;  %v11125_v13 = vld [vmem:[#allocation116_spill] sm:$0xff] }
 0x981   :  { %v4850_v5 = vadd.f32 %v4849_v52, %v4801_v62  ;;  %v11124_v52 = vpack.c.bf16 %v11122_v33, %v11123_v8 }
 0x983   :  { %v10132_v43 = vadd.f32 %v4898_v7, %v4850_v5  ;;  %v11126_v7 = vld [vmem:[#allocation115_spill] sm:$0xff] }
 0x984   :  { %v4753_v48 = vpop.f32.mrf.mxu2 }
 0x985   :  { %v4754_v1 = vadd.f32 %v4753_v48, %v9991_v25  ;;  %v4900_v50 = vpop.f32.mrf.mxu3 }
 0x986   :  { %v4961_v40 = vpop.f32.mrf.mxu0 }
 0x987   :  { %v4803_v63 = vadd.f32 %v4802_v36, %v4754_v1  ;;  %v5010_v54 = vpop.f32.mrf.mxu1  ;;  %v11127_v36 = vpack.c.bf16 %v11125_v13, %v11126_v7 }
 0x989   :  { %v4852_v24 = vadd.f32 %v4851_v3, %v4803_v63  ;;  %5107 = vmatmul.bf16.vlgmr.msrb.gmra.mxu2 %v11121_v12  ;;  %v11128_v12 = vld [vmem:[#allocation123_spill] sm:$0xff] }
 0x98b   :  { %v10138_v18 = vadd.f32 %v4900_v50, %v4852_v24 }
 0x98c   :  { %v4912_v16 = vpop.f32.mrf.mxu2 }
 0x98d   :  { %v4913_v29 = vadd.f32 %v4912_v16, %v10006_v34  ;;  %v5059_v17 = vpop.f32.mrf.mxu3  ;;  %v11129_v16 = vld [vmem:[#allocation119_spill] sm:$0xff] }
 0x98e   :  { %v4963_v9 = vpop.f32.mrf.mxu0 }
 0x98f   :  { %v4962_v14 = vadd.f32 %v4961_v40, %v4913_v29  ;;  %v5012_v42 = vpop.f32.mrf.mxu1  ;;  %v11130_v29 = vpack.c.bf16 %v11128_v12, %v11129_v16 }
 0x991   :  { %v5011_v2 = vadd.f32 %v5010_v54, %v4962_v14 }
 0x993   :  { %v10141_v25 = vadd.f32 %v5059_v17, %v5011_v2 }
 0x994   :  { %v4914_v53 = vpop.f32.mrf.mxu2 }
 0x995   :  { %v4915_v6 = vadd.f32 %v4914_v53, %v10021_v0  ;;  %v5061_v49 = vpop.f32.mrf.mxu3 }
 0x996   :  { %v4966_v37 = vpop.f32.mrf.mxu0 }
 0x997   :  { %v4964_v51 = vadd.f32 %v4963_v9, %v4915_v6  ;;  %v5015_v10 = vpop.f32.mrf.mxu1 }
 0x999   :  { %v5013_v22 = vadd.f32 %v5012_v42, %v4964_v51  ;;  %5112 = vmatmul.bf16.gmra.mxu2 %v11124_v52  ;;  %v11131_v52 = vld [vmem:[#allocation126_spill] sm:$0xff] }
 0x99b   :  { %v10147_v34 = vadd.f32 %v5061_v49, %v5013_v22 }
 0x99c   :  { %v4917_v19 = vpop.f32.mrf.mxu2 }
 0x99d   :  { %v4918_v60 = vadd.f32 %v4917_v19, %v10024_v4  ;;  %v5064_v28 = vpop.f32.mrf.mxu3  ;;  %v11132_v19 = vld [vmem:[#allocation129_spill] sm:$0xff] }
 0x99e   :  { %v4968_v44 = vpop.f32.mrf.mxu0 }
 0x99f   :  { %v4967_v61 = vadd.f32 %v4966_v37, %v4918_v60  ;;  %v5017_v46 = vpop.f32.mrf.mxu1  ;;  %v11133_v60 = vpack.c.bf16 %v11131_v52, %v11132_v19 }
 0x9a1   :  { %v5016_v39 = vadd.f32 %v5015_v10, %v4967_v61 }
 0x9a3   :  { %v10150_v0 = vadd.f32 %v5064_v28, %v5016_v39 }
 0x9a4   :  { %v4919_v38 = vpop.f32.mrf.mxu2 }
 0x9a5   :  { %v4920_v55 = vadd.f32 %v4919_v38, %v10039_v59  ;;  %v5066_v35 = vpop.f32.mrf.mxu3 }
 0x9a6   :  { %v4971_v27 = vpop.f32.mrf.mxu0 }
 0x9a7   :  { %v4969_v58 = vadd.f32 %v4968_v44, %v4920_v55  ;;  %v5020_v15 = vpop.f32.mrf.mxu1 }
 0x9a9   :  { %v5018_v32 = vadd.f32 %v5017_v46, %v4969_v58  ;;  %5117 = vmatmul.bf16.gmra.mxu2 %v11127_v36  ;;  %v11134_v58 = vld [vmem:[#allocation31_spill] sm:$0xff] }
 0x9ab   :  { %v10156_v4 = vadd.f32 %v5066_v35, %v5018_v32 }
 0x9ac   :  { %v4922_v62 = vpop.f32.mrf.mxu2 }
 0x9ad   :  { %v4923_v3 = vadd.f32 %v4922_v62, %v10042_v56  ;;  %v5069_v5 = vpop.f32.mrf.mxu3 }
 0x9ae   :  { %v4973_v1 = vpop.f32.mrf.mxu0 }
 0x9af   :  { %v4972_v48 = vadd.f32 %v4971_v27, %v4923_v3  ;;  %v5022_v40 = vpop.f32.mrf.mxu1  ;;  %v11138_v3 = vld [vmem:[#allocation137_spill] sm:$0xff] }
 0x9b1   :  { %v5021_v50 = vadd.f32 %v5020_v15, %v4972_v48  ;;  %v11135_v15 = vld [vmem:[#allocation131_spill] sm:$0xff] }
 0x9b2   :  { %v11136_v32 = vpack.c.bf16 %v11134_v58, %v11135_v15 }
 0x9b3   :  { %v5070_v59 = vadd.f32 %v5069_v5, %v5021_v50 }
 0x9b4   :  { %v4924_v63 = vpop.f32.mrf.mxu2 }
 0x9b5   :  { %v4925_v54 = vadd.f32 %v4924_v63, %v10057_v57  ;;  %v5071_v24 = vpop.f32.mrf.mxu3  ;;  %v11141_v63 = vld [vmem:[#allocation141_spill] sm:$0xff] }
 0x9b6   :  { %v4976_v17 = vpop.f32.mrf.mxu0 }
 0x9b7   :  { %v4974_v47 = vadd.f32 %v4973_v1, %v4925_v54  ;;  %v5025_v14 = vpop.f32.mrf.mxu1 }
 0x9b9   :  { %v5023_v45 = vadd.f32 %v5022_v40, %v4974_v47  ;;  %5122 = vmatmul.bf16.gmra.mxu2 %v11130_v29  ;;  %v11140_v40 = vld [vmem:[#allocation145_spill] sm:$0xff] }
 0x9ba   :  { %v11142_v54 = vpack.c.bf16 %v11140_v40, %v11141_v63 }
 0x9bb   :  { %v5072_v9 = vadd.f32 %v5071_v24, %v5023_v45 }
 0x9bc   :  { %v4927_v56 = vpop.f32.mrf.mxu2 }
 0x9bd   :  { %v4928_v42 = vadd.f32 %v4927_v56, %v10060_v30  ;;  %v5074_v2 = vpop.f32.mrf.mxu3 }
 0x9be   :  { %v4978_v37 = vpop.f32.mrf.mxu0 }
 0x9bf   :  { %v4977_v53 = vadd.f32 %v4976_v17, %v4928_v42  ;;  %v5027_v10 = vpop.f32.mrf.mxu1 }
 0x9c1   :  { %v5026_v6 = vadd.f32 %v5025_v14, %v4977_v53 }
 0x9c3   :  { %v5075_v49 = vadd.f32 %v5074_v2, %v5026_v6 }
 0x9c4   :  { %v4929_v51 = vpop.f32.mrf.mxu2 }
 0x9c5   :  { %v4930_v57 = vadd.f32 %v4929_v51, %v10075_v26  ;;  %v5076_v33 = vpop.f32.mrf.mxu3 }
 0x9c6   :  { %v4981_v61 = vpop.f32.mrf.mxu0 }
 0x9c7   :  { %v4979_v22 = vadd.f32 %v4978_v37, %v4930_v57  ;;  %v5030_v39 = vpop.f32.mrf.mxu1 }
 0x9c9   :  { %v5028_v8 = vadd.f32 %v5027_v10, %v4979_v22  ;;  %5127 = vmatmul.bf16.gmra.mxu2 %v11133_v60 }
 0x9cb   :  { %v5077_v28 = vadd.f32 %v5076_v33, %v5028_v8 }
 0x9cc   :  { %v4932_v44 = vpop.f32.mrf.mxu2 }
 0x9cd   :  { %v4933_v30 = vadd.f32 %v4932_v44, %v10078_v31  ;;  %v5079_v55 = vpop.f32.mrf.mxu3  ;;  %v11137_v31 = vld [vmem:[#allocation134_spill] sm:$0xff] }
 0x9ce   :  { %v11139_v5 = vpack.c.bf16 %v11137_v31, %v11138_v3 }
 0x9cf   :  { %v4982_v46 = vadd.f32 %v4981_v61, %v4933_v30  ;;  %v5032_v37 = vpop.f32.mrf.mxu1 }
 0x9d1   :  { %v5031_v38 = vadd.f32 %v5030_v39, %v4982_v46 }
 0x9d3   :  { %v5080_v35 = vadd.f32 %v5079_v55, %v5031_v38 }
 0x9d4   :  { %v4934_v27 = vpop.f32.mrf.mxu2 }
 0x9d5   :  { %v4935_v26 = vadd.f32 %v4934_v27, %v10093_v23  ;;  %v5081_v57 = vpop.f32.mrf.mxu3 }
 0x9d7   :  { %v5035_v33 = vpop.f32.mrf.mxu1 }
 0x9d9   :  { %5132 = vmatmul.bf16.gmra.mxu2 %v11136_v32 }
 0x9dc   :  { %v4937_v13 = vpop.f32.mrf.mxu2 }
 0x9dd   :  { %v4938_v7 = vadd.f32 %v4937_v13, %v10096_v11  ;;  %v5084_v19 = vpop.f32.mrf.mxu3 }
 0x9df   :  { %v5037_v61 = vpop.f32.mrf.mxu1 }
 0x9e4   :  { %v4939_v36 = vpop.f32.mrf.mxu2 }
 0x9e5   :  { %v4940_v62 = vadd.f32 %v4939_v36, %v10111_v20  ;;  %v5086_v46 = vpop.f32.mrf.mxu3 }
 0x9e9   :  { %5137 = vmatmul.bf16.gmra.mxu2 %v11139_v5 }
 0x9ec   :  { %v4942_v48 = vpop.f32.mrf.mxu2 }
 0x9ed   :  { %v4943_v1 = vadd.f32 %v4942_v48, %v10114_v21  ;;  %v5089_v13 = vpop.f32.mrf.mxu3 }
 0x9f4   :  { %v4944_v50 = vpop.f32.mrf.mxu2 }
 0x9f5   :  { %v4945_v23 = vadd.f32 %v4944_v50, %v10129_v41 }
 0x9f9   :  { %5142 = vmatmul.bf16.gmra.mxu2 %v11142_v54 }
 0x9fc   :  { %v4947_v24 = vpop.f32.mrf.mxu2 }
 0x9fd   :  { %v10184_v11 = vadd.f32 %v4947_v24, %v10132_v43  ;;  %v5091_v24 = vpop.f32.mrf.mxu3 }
 0xa04   :  { %v4949_v47 = vpop.f32.mrf.mxu2 }
 0xa05   :  { %v10187_v20 = vadd.f32 %v4949_v47, %v10138_v18 }
 0xa0c   :  { %v5108_v45 = vpop.f32.mrf.mxu2 }
 0xa0d   :  { %v10190_v12 = vadd.f32 %v5108_v45, %v10141_v25 }
 0xa14   :  { %v5110_v21 = vpop.f32.mrf.mxu2 }
 0xa15   :  { %v10193_v16 = vadd.f32 %v5110_v21, %v10147_v34 }
 0xa17   :  { %v5179_v41 = vpack.c.bf16 %v10193_v16, %v10190_v12  ;;  %v6898_v12 = vld [vmem:[#allocation7 + $0x10] sm:$0xff]  ;;  %v6897_v16 = vld [vmem:[#allocation7 + $0x8] sm:$0xff] }
 0xa1c   :  { %v5113_v29 = vpop.f32.mrf.mxu2 }
 0xa1d   :  { %v10198_v17 = vadd.f32 %v5113_v29, %v10150_v0  ;;  %v4983_v0 = vpop.f32.mrf.mxu0 }
 0xa1e   :  { %v4984_v22 = vadd.f32 %v4983_v0, %v4935_v26  ;;  %v5094_v0 = vpop.f32.mrf.mxu3 }
 0xa20   :  { %v5033_v52 = vadd.f32 %v5032_v37, %v4984_v22 }
 0xa24   :  { %v5115_v43 = vpop.f32.mrf.mxu2 }
 0xa25   :  { %v10201_v14 = vadd.f32 %v5115_v43, %v10156_v4 }
 0xa27   :  { %v5180_v18 = vpack.c.bf16 %v10201_v14, %v10198_v17  ;;  %v11149_v17 = vld [vmem:[#allocation29_spill] sm:$0xff]  ;;  %v11150_v14 = vld [vmem:[#allocation28_spill] sm:$0xff] }
 0xa2c   :  { %v5118_v25 = vpop.f32.mrf.mxu2 }
 0xa2d   :  { %v10205_v56 = vadd.f32 %v5118_v25, %v5070_v59  ;;  %v4986_v59 = vpop.f32.mrf.mxu0 }
 0xa2e   :  { %v4987_v39 = vadd.f32 %v4986_v59, %v4938_v7 }
 0xa30   :  { %v5036_v26 = vadd.f32 %v5035_v33, %v4987_v39  ;;  %v200_v33 = vld [vmem:[%s10475_s30] sm:$0x1] }
 0xa32   :  { %v5085_v15 = vadd.f32 %v5084_v19, %v5036_v26  ;;  %v11147_v26 = vld [vmem:[#allocation22_spill] sm:$0xff] }
 0xa34   :  { %v5120_v42 = vpop.f32.mrf.mxu2 }
 0xa35   :  { %v10207_v34 = vadd.f32 %v5120_v42, %v5072_v9  ;;  %v4988_v60 = vpop.f32.mrf.mxu0 }
 0xa36   :  { %v4989_v38 = vadd.f32 %v4988_v60, %v4940_v62  ;;  %v1218_v60 = vshra.s32 %v200_v33, 1 }
 0xa37   :  { %v5181_v2 = vpack.c.bf16 %v10207_v34, %v10205_v56  ;;  %v6900_v56 = vld [vmem:[#allocation7 + $0x20] sm:$0xff]  ;;  %v6899_v34 = vld [vmem:[#allocation7 + $0x18] sm:$0xff] }
 0xa38   :  { %v5038_v58 = vadd.f32 %v5037_v61, %v4989_v38 }
 0xa3a   :  { %v5087_v32 = vadd.f32 %v5086_v46, %v5038_v58  ;;  %v11145_v46 = vmov 0.0  }
 0xa3c   :  { %v5123_v53 = vpop.f32.mrf.mxu2 }
 0xa3d   :  { %v10211_v6 = vadd.f32 %v5123_v53, %v5075_v49  ;;  %v5082_v49 = vadd.f32 %v5081_v57, %v5033_v52  ;;  %v4991_v55 = vpop.f32.mrf.mxu0 }
 0xa3e   :  { %v4992_v40 = vadd.f32 %v4991_v55, %v4943_v1  ;;  %v11146_v55 = vld [vmem:[#allocation20_spill] sm:$0xff] }
 0xa44   :  { %v5125_v51 = vpop.f32.mrf.mxu2 }
 0xa45   :  { %v10213_v4 = vadd.f32 %v5125_v51, %v5077_v28  ;;  %v4993_v5 = vpop.f32.mrf.mxu0 }
 0xa46   :  { %v4994_v63 = vadd.f32 %v4993_v5, %v4945_v23 }
 0xa47   :  { %v5182_v10 = vpack.c.bf16 %v10213_v4, %v10211_v6  ;;  %v6902_v6 = vld [vmem:[#allocation7 + $0x30] sm:$0xff]  ;;  %v11148_v4 = vmov 1.0|1.0  }
 0xa4c   :  { %v5128_v9 = vpop.f32.mrf.mxu2 }
 0xa4d   :  { %v10217_v8 = vadd.f32 %v5128_v9, %v5080_v35  ;;  %v5040_v35 = vpop.f32.mrf.mxu1  ;;  %v4996_v47 = vpop.f32.mrf.mxu0 }
 0xa4e   :  { %v5041_v7 = vadd.f32 %v5040_v35, %v4992_v40  ;;  %v4997_v51 = vadd.f32 %v4996_v47, %v10184_v11  ;;  %v5096_v9 = vpop.f32.mrf.mxu3  ;;  %v11143_v11 = vld [vmem:[#allocation19_spill] sm:$0xff] }
 0xa50   :  { %v5090_v45 = vadd.f32 %v5089_v13, %v5041_v7 }
 0xa54   :  { %v5130_v44 = vpop.f32.mrf.mxu2 }
 0xa55   :  { %v10219_v30 = vadd.f32 %v5130_v44, %v5082_v49  ;;  %v5042_v50 = vpop.f32.mrf.mxu1  ;;  %v4998_v37 = vpop.f32.mrf.mxu0 }
 0xa56   :  { %v5043_v62 = vadd.f32 %v5042_v50, %v4994_v63  ;;  %v4999_v57 = vadd.f32 %v4998_v37, %v10187_v20  ;;  %v11144_v20 = vld [vmem:[#allocation21_spill] sm:$0xff] }
 0xa57   :  { %v5183_v28 = vpack.c.bf16 %v10219_v30, %v10217_v8  ;;  %v5148_v30 = vperm.slane %v1218_v60, 0 }
 0xa58   :  { %v5092_v21 = vadd.f32 %v5091_v24, %v5043_v62 }
 0xa59   :  { %vm5149_vm8 = vcmp.eq.s32.totalorder %v5148_v30, %v11143_v11  ;;  %vm5151_vm11 = vcmp.eq.s32.totalorder %v5148_v30, %v11144_v20  ;;  %vm5150_vm0 = vcmp.eq.s32.totalorder %v5148_v30, %v11146_v55  ;;  %vm5152_vm1 = vcmp.eq.s32.totalorder %v5148_v30, %v11147_v26 }
 0xa5a   :  { %v5153_v39 = vsel %vm5149_vm8, 1.0, %v11145_v46  ;;  %v5155_v38 = vsel %vm5151_vm11, 1.0, %v11145_v46  ;;  %v5156_v58 = vsel %vm5152_vm1, 1.0, %v11145_v46  ;;  %vm6674_vm7 = vmpackc.low %vm5150_vm0, %vm5149_vm8 }
 0xa5b   :  { %5163 = vadd.xlane.f32.xlu2 %v5153_v39  ;;  %5167 = vadd.xlane.f32.xlu1 %v5155_v38  ;;  %vm6676_vm12 = vmpackc.low %vm5152_vm1, %vm5151_vm11 }
 0xa5c   :  { %v5133_v27 = vpop.f32.mrf.mxu2  ;;  %5169 = vadd.xlane.f32.xlu0 %v5156_v58 }
 0xa5d   :  { %v5134_v31 = vadd.f32 %v5133_v27, %v5085_v15  ;;  %v5045_v29 = vpop.f32.mrf.mxu1  ;;  %v5154_v27 = vsel %vm5150_vm0, 1.0, %v11145_v46 }
 0xa5e   :  { %v5046_v59 = vadd.f32 %v5045_v29, %v4997_v51 }
 0xa60   :  { %v5095_v8 = vadd.f32 %v5094_v0, %v5046_v59 }
 0xa63   :  { %5165 = vadd.xlane.f32.xlu1 %v5154_v27 }
 0xa64   :  { %v5135_v36 = vpop.f32.mrf.mxu2 }
 0xa65   :  { %v5136_v3 = vadd.f32 %v5135_v36, %v5087_v32  ;;  %v5047_v23 = vpop.f32.mrf.mxu1 }
 0xa66   :  { %v5048_v22 = vadd.f32 %v5047_v23, %v4999_v57 }
 0xa67   :  { %v5184_v48 = vpack.c.bf16 %v5136_v3, %v5134_v31 }
 0xa68   :  { %v5097_v52 = vadd.f32 %v5096_v9, %v5048_v22 }
 0xa6c   :  { %v5138_v54 = vpop.f32.mrf.mxu2 }
 0xa6d   :  { %v5139_v25 = vadd.f32 %v5138_v54, %v5090_v45 }
 0xa74   :  { %v5140_v43 = vpop.f32.mrf.mxu2 }
 0xa75   :  { %v5141_v42 = vadd.f32 %v5140_v43, %v5092_v21  ;;  %v7063_v43 = vld [vmem:[%s10305_s18] ss:$0 sm:$0xff] }
 0xa77   :  { %v5185_v53 = vpack.c.bf16 %v5141_v42, %v5139_v25 }
 0xa7c   :  { %v5143_v1 = vpop.f32.mrf.mxu2 }
 0xa7d   :  { %v5144_v49 = vadd.f32 %v5143_v1, %v5095_v8 }
 0xa84   :  { %v5145_v19 = vpop.f32.mrf.mxu2 }
 0xa85   :  { %v5146_v44 = vadd.f32 %v5145_v19, %v5097_v52 }
 0xa87   :  { %v5186_v61 = vpack.c.bf16 %v5146_v44, %v5144_v49 }
 0xa89   :  { %5187 = vmatpush.bf16.msra.mxu0 %v5186_v61 }
 0xa8d   :  { %5188 = vmatpush.bf16.msra.mxu0 %v5185_v53 }
 0xa91   :  { %5189 = vmatpush.bf16.msra.mxu0 %v5184_v48 }
 0xa95   :  { %5190 = vmatpush.bf16.msra.mxu0 %v5183_v28  ;;  %v6903_v28 = vld [vmem:[#allocation7 + $0x38] sm:$0xff] }
 0xa99   :  { %5191 = vmatpush.bf16.msra.mxu0 %v5182_v10  ;;  %v6901_v10 = vld [vmem:[#allocation7 + $0x28] sm:$0xff] }
 0xa9d   :  { %5192 = vmatpush.bf16.msra.mxu0 %v5181_v2 }
 0xaa1   :  { %5193 = vmatpush.bf16.msra.mxu0 %v5180_v18 }
 0xaa5   :  { %5194 = vmatpush.bf16.msra.mxu0 %v5179_v41  ;;  %v6896_v41 = vld [vmem:[#allocation7] sm:$0xff] }
 0xaa8   :  { %6675 = vmatmul.msk.bf16.vlgmr.msra.gmra.mxu0 %vm6674_vm7, %v11148_v4 }
 0xaa9   :  { %5258 = vmatpush.bf16.msrb.mxu0 %v6903_v28 }
 0xaad   :  { %5259 = vmatpush.bf16.msrb.mxu0 %v6902_v6 }
 0xab1   :  { %5260 = vmatpush.bf16.msrb.mxu0 %v6901_v10 }
 0xab5   :  { %5261 = vmatpush.bf16.msrb.mxu0 %v6900_v56  ;;  %v11151_v56 = vld [vmem:[#allocation26_spill] sm:$0xff] }
 0xab8   :  { %6677 = vmatmul.msk.bf16.gmra.mxu0 %vm6676_vm12, %v11148_v4 }
 0xab9   :  { %5262 = vmatpush.bf16.msrb.mxu0 %v6899_v34  ;;  %v11152_v34 = vld [vmem:[#allocation27_spill] sm:$0xff] }
 0xabd   :  { %5263 = vmatpush.bf16.msrb.mxu0 %v6898_v12  ;;  %v7064_v12 = vld [vmem:[%s11153_s10] ss:$0 sm:$0xff] }
 0xabe   :  { %vm5346_vm4 = vcmp.eq.s32.totalorder %v7064_v12, %v11143_v11 }
 0xac1   :  { %5264 = vmatpush.bf16.msrb.mxu0 %v6897_v16  ;;  %v5347_v16 = vsel %vm5346_vm4, 1.0, %v11145_v46 }
 0xac5   :  { %5265 = vmatpush.bf16.msrb.mxu0 %v6896_v41  ;;  %v7031_v41 = vld [vmem:[#allocation10 + $0x38] sm:$0xff] }
 0xac8   :  { %5266 = vmatmul.bf16.vlgmr.msrb.gmra.mxu0 %v11149_v17  ;;  %v5351_v17 = vsel %vm5350_vm5, %v5347_v16, 0.0 }
 0xac9   :  { %5352 = vadd.xlane.f32.xlu0 %v5351_v17 }
 0xace   :  { %v5168_v15 = vpop.xlane.xlu1 %5167  ;;  %v5164_v36 = vpop.xlane.xlu2 %5163 }
 0xacf   :  { %v5171_v5 = vmax.f32 %v5164_v36, 1.0  ;;  %v5173_v48 = vmax.f32 %v5168_v15, 1.0  ;;  %v5170_v50 = vpop.xlane.xlu0 %5169 }
 0xad0   :  { %v5174_v54 = vmax.f32 %v5170_v50, 1.0  ;;  %v7024_v50 = vld [vmem:[#allocation10] sm:$0xff] }
 0xad6   :  { %v5166_v13 = vpop.xlane.xlu1 %5165 }
 0xad7   :  { %v5172_v31 = vmax.f32 %v5166_v13, 1.0 }
 0xad8   :  { %5271 = vmatmul.bf16.gmra.mxu0 %v11150_v14  ;;  %v7030_v14 = vld [vmem:[#allocation10 + $0x30] sm:$0xff] }
 0xad9   :  { %7099 = vrcp.f32 %v5172_v31 }
 0xada   :  { %7101 = vrcp.f32 %v5171_v5  ;;  %v7026_v5 = vld [vmem:[#allocation10 + $0x10] sm:$0xff] }
 0xadb   :  { %7103 = vrcp.f32 %v5173_v48  ;;  %v7025_v48 = vld [vmem:[#allocation10 + $0x8] sm:$0xff] }
 0xadc   :  { %7105 = vrcp.f32 %v5174_v54  ;;  %v7037_v54 = vld [vmem:[#allocation11 + $0x28] sm:$0xff] }
 0xadf   :  { %v7100_v63 = vpop.eup %7099 }
 0xae0   :  { %v7102_v24 = vpop.eup %7101 }
 0xae1   :  { %v7104_v7 = vpop.eup %7103 }
 0xae2   :  { %v7106_v37 = vpop.eup %7105 }
 0xb25   :  { %v5196_v18 = vpop.f32.mrf.mxu0 }
 0xb26   :  { %v5206_v47 = vmul.f32 %v7102_v24, %v5196_v18  ;;  %v7029_v18 = vld [vmem:[#allocation10 + $0x28] sm:$0xff] }
 0xb2d   :  { %v5198_v2 = vpop.f32.mrf.mxu0 }
 0xb2e   :  { %v5207_v62 = vmul.f32 %v7100_v63, %v5198_v2  ;;  %v7028_v2 = vld [vmem:[#allocation10 + $0x20] sm:$0xff]  ;;  %v7038_v63 = vld [vmem:[#allocation11 + $0x30] sm:$0xff] }
 0xb35   :  { %v5201_v35 = vpop.f32.mrf.mxu0 }
 0xb36   :  { %v5208_v45 = vmul.f32 %v7104_v7, %v5201_v35  ;;  %v7027_v35 = vld [vmem:[#allocation10 + $0x18] sm:$0xff] }
 0xb3c   :  { %v5353_v24 = vpop.xlane.xlu0 %5352 }
 0xb3d   :  { %v5203_v32 = vpop.f32.mrf.mxu0  ;;  %v5354_v7 = vmax.f32 %v5353_v24, 1.0 }
 0xb3e   :  { %v5209_v1 = vmul.f32 %v7106_v37, %v5203_v32  ;;  %v7065_v37 = vld [vmem:[%s10309_s22] ss:$0 sm:$0xff]  ;;  %s7316_s22 = smov [#allocation13]  }
 0xb3f   :  { %s5563_s19 = sshll.u32 %s7316_s22, 4  ;;  %s5564_s19 = int_to_ptr.vmem [resolvable:$true] %s5563_s19 }
 0xb45   :  { %v5267_v3 = vpop.f32.mrf.mxu0 }
 0xb46   :  { %v5268_v29 = vadd.f32 %v5267_v3, %v5206_v47  ;;  %v5348_v3 = vpack.c.bf16 %v5347_v16, %v5347_v16 }
 0xb48   :  { %v5280_v51 = vadd.f32 %v7063_v43, %v5268_v29 }
 0xb4a   :  { %v5288_v59 = vmin.f32 %v5280_v51, 0.0  ;;  %vm5284_vm3 = vcmp.gt.f32.partialorder %v5280_v51, 0.0 }
 0xb4c   :  { %v5292_v19 = vmul.f32 1.442695, %v5288_v59 }
 0xb4d   :  { %v5269_v40 = vpop.f32.mrf.mxu0 }
 0xb4e   :  { %v5270_v21 = vadd.f32 %v5269_v40, %v5207_v62  ;;  %v7039_v40 = vld [vmem:[#allocation11 + $0x38] sm:$0xff] }
 0xb50   :  { %v5281_v53 = vadd.f32 %v7063_v43, %v5270_v21 }
 0xb52   :  { %v5289_v23 = vmin.f32 %v5281_v53, 0.0  ;;  %vm5285_vm2 = vcmp.gt.f32.partialorder %v5281_v53, 0.0 }
 0xb54   :  { %v5294_v8 = vmul.f32 1.442695, %v5289_v23 }
 0xb55   :  { %v5272_v25 = vpop.f32.mrf.mxu0 }
 0xb56   :  { %v5273_v42 = vadd.f32 %v5272_v25, %v5208_v45  ;;  %v7035_v25 = vld [vmem:[#allocation11 + $0x18] sm:$0xff] }
 0xb58   :  { %v5282_v0 = vadd.f32 %v7063_v43, %v5273_v42  ;;  %v7034_v42 = vld [vmem:[#allocation11 + $0x10] sm:$0xff] }
 0xb5a   :  { %v5290_v57 = vmin.f32 %v5282_v0, 0.0  ;;  %vm5286_vm13 = vcmp.gt.f32.partialorder %v5282_v0, 0.0 }
 0xb5c   :  { %v5296_v33 = vmul.f32 1.442695, %v5290_v57 }
 0xb5d   :  { %v5274_v22 = vpop.f32.mrf.mxu0 }
 0xb5e   :  { %v5275_v9 = vadd.f32 %v5274_v22, %v5209_v1  ;;  %7107 = vpow2.f32 %v5296_v33 }
 0xb5f   :  { %7109 = vpow2.f32 %v5294_v8 }
 0xb60   :  { %v5283_v52 = vadd.f32 %v7063_v43, %v5275_v9  ;;  %7111 = vpow2.f32 %v5292_v19  ;;  %v7036_v43 = vld [vmem:[#allocation11 + $0x20] sm:$0xff] }
 0xb62   :  { %v5291_v60 = vmin.f32 %v5283_v52, 0.0  ;;  %vm5287_vm15 = vcmp.gt.f32.partialorder %v5283_v52, 0.0 }
 0xb64   :  { %v5298_v49 = vmul.f32 1.442695, %v5291_v60  ;;  %v7108_v44 = vpop.eup %7107 }
 0xb65   :  { %v7110_v30 = vpop.eup %7109  ;;  %v6712_v20 = vadd.f32 -1.0, %v7108_v44 }
 0xb66   :  { %7113 = vpow2.f32 %v5298_v49  ;;  %v7112_v61 = vpop.eup %7111  ;;  %v6711_v55 = vadd.f32 -1.0, %v7110_v30 }
 0xb67   :  { %v5306_v27 = vsel %vm5286_vm13, %v5282_v0, %v6712_v20  ;;  %v6710_v58 = vadd.f32 -1.0, %v7112_v61  ;;  %7115 = vrcp.f32 %v5354_v7  ;;  %v7032_v0 = vld [vmem:[#allocation11] sm:$0xff] }
 0xb68   :  { %v5305_v6 = vsel %vm5285_vm2, %v5281_v53, %v6711_v55  ;;  %v7033_v53 = vld [vmem:[#allocation11 + $0x8] sm:$0xff] }
 0xb69   :  { %v5304_v4 = vsel %vm5284_vm3, %v5280_v51, %v6710_v58 }
 0xb6a   :  { %v5308_v10 = vpack.c.bf16 %v5305_v6, %v5304_v4 }
 0xb6c   :  { %v7114_v39 = vpop.eup %7113 }
 0xb6d   :  { %v6713_v38 = vadd.f32 -1.0, %v7114_v39  ;;  %v7116_v62 = vpop.eup %7115 }
 0xb6f   :  { %v5307_v26 = vsel %vm5287_vm15, %v5283_v52, %v6713_v38  ;;  %v7066_v52 = vld [vmem:[%s10311_s24] ss:$0 sm:$0xff] }
 0xb70   :  { %v5309_v28 = vpack.c.bf16 %v5307_v26, %v5306_v27 }
 0xb72   :  { %5318 = vmatpush.bf16.msrb.mxu1 %v5309_v28  ;;  %5334 = vmatpush.bf16.msra.mxu0 %v5309_v28 }
 0xb76   :  { %5319 = vmatpush.bf16.msrb.mxu1 %v5308_v10  ;;  %5335 = vmatpush.bf16.msra.mxu0 %v5308_v10 }
 0xb79   :  { %6714 = vmatmul.msk.bf16.vlgmr.msrb.gmra.mxu1 %vm651_vm14, %v11151_v56  ;;  %6715 = vmatmul.msk.bf16.vlgmr.msra.gmra.mxu0 %vm651_vm14, %v11152_v34  ;;  %vm5357_vm14 = vcmask 130048  }
 0xb7a   :  { %5444 = vmatpush.bf16.msrb.mxu0 %v7031_v41 }
 0xb7e   :  { %5445 = vmatpush.bf16.msrb.mxu0 %v7030_v14 }
 0xb82   :  { %5446 = vmatpush.bf16.msrb.mxu0 %v7029_v18 }
 0xb86   :  { %5447 = vmatpush.bf16.msrb.mxu0 %v7028_v2 }
 0xb8a   :  { %5448 = vmatpush.bf16.msrb.mxu0 %v7027_v35 }
 0xb8e   :  { %5449 = vmatpush.bf16.msrb.mxu0 %v7026_v5 }
 0xb92   :  { %5450 = vmatpush.bf16.msrb.mxu0 %v7025_v48 }
 0xb96   :  { %5451 = vmatpush.bf16.msrb.mxu0 %v7024_v50 }
 0xbf6   :  { %v5321_v15 = vpop.f32.mrf.mxu1  ;;  %v5337_v32 = vpop.f32.mrf.mxu0 }
 0xbf7   :  { %v5342_v11 = vmax.f32 %v5321_v15, %v5337_v32 }
 0xbfe   :  { %v5323_v13 = vpop.f32.mrf.mxu1  ;;  %v5339_v36 = vpop.f32.mrf.mxu0 }
 0xbff   :  { %v5343_v31 = vmax.f32 %v5323_v13, %v5339_v36 }
 0xc01   :  { %v5356_v46 = vpack.c.bf16 %v5343_v31, %v5342_v11 }
 0xc03   :  { %5368 = vmatpush.bf16.msra.mxu1 %v5356_v46 }
 0xc06   :  { %6716 = vmatmul.msk.bf16.vlgmr.msra.gmra.mxu1 %vm5357_vm14, %v5348_v3 }
 0xc07   :  { %5532 = vmatpush.bf16.msrb.mxu1 %v7039_v40 }
 0xc0b   :  { %5533 = vmatpush.bf16.msrb.mxu1 %v7038_v63 }
 0xc0f   :  { %5534 = vmatpush.bf16.msrb.mxu1 %v7037_v54 }
 0xc13   :  { %5535 = vmatpush.bf16.msrb.mxu1 %v7036_v43 }
 0xc17   :  { %5536 = vmatpush.bf16.msrb.mxu1 %v7035_v25 }
 0xc1b   :  { %5537 = vmatpush.bf16.msrb.mxu1 %v7034_v42 }
 0xc1f   :  { %5538 = vmatpush.bf16.msrb.mxu1 %v7033_v53 }
 0xc23   :  { %5539 = vmatpush.bf16.msrb.mxu1 %v7032_v0 }
 0xc83   :  { %v5370_v47 = vpop.f32.mrf.mxu1 }
 0xc84   :  { %v5374_v45 = vmul.f32 %v7116_v62, %v5370_v47 }
 0xc86   :  { %v5375_v21 = vpack.c.bf16 %v5374_v45, %v5374_v45 }
 0xc88   :  { %5452 = vmatmul.bf16.vlgmr.msrb.gmra.mxu0 %v5375_v21 }
 0xc8b   :  { %v5372_v29 = vpop.f32.mrf.mxu1 }
 0xd05   :  { %v5453_v51 = vpop.f32.mrf.mxu0 }
 0xd06   :  { %v5454_v57 = vadd.f32 %v7065_v37, %v5453_v51 }
 0xd08   :  { %v5458_v1 = vmin.f32 %v5454_v57, 0.0  ;;  %vm5457_vm6 = vcmp.gt.f32.partialorder %v5454_v57, 0.0 }
 0xd0a   :  { %v5459_v23 = vmul.f32 1.442695, %v5458_v1 }
 0xd0c   :  { %7117 = vpow2.f32 %v5459_v23 }
 0xd0d   :  { %v5455_v59 = vpop.f32.mrf.mxu0 }
 0xd12   :  { %v7118_v22 = vpop.eup %7117 }
 0xd13   :  { %v6749_v33 = vadd.f32 -1.0, %v7118_v22 }
 0xd15   :  { %v5462_v9 = vsel %vm5457_vm6, %v5454_v57, %v6749_v33 }
 0xd16   :  { %v5463_v8 = vpack.c.bf16 %v5462_v9, %v5462_v9 }
 0xd18   :  { %5540 = vmatmul.bf16.vlgmr.msrb.gmra.mxu1 %v5463_v8 }
 0xd95   :  { %v5541_v19 = vpop.f32.mrf.mxu1 }
 0xd96   :  { %v5542_v60 = vadd.f32 %v7066_v52, %v5541_v19 }
 0xd98   :  { %v5545_v49 = vsel %vm578_vm9, %v5542_v60, -inf }
 0xd99   :  { %5546 = vmax.xlane.f32.xlu2 %v5545_v49 }
 0xd9d   :  { %v5543_v44 = vpop.f32.mrf.mxu1 }
 0xe0c   :  { %v5547_v30 = vpop.xlane.xlu2 %5546 }
 0xe0d   :  { %v5548_v61 = vsub.f32 %v5542_v60, %v5547_v30 }
 0xe0f   :  { %v5549_v20 = vmul.f32 1.442695, %v5548_v61 }
 0xe11   :  { %7119 = vpow2.f32 %v5549_v20 }
 0xe17   :  { %v7120_v39 = vpop.eup %7119 }
 0xe18   :  { %v5551_v38 = vsel %vm578_vm9, %v7120_v39, 0.0 }
 0xe19   :  { %5552 = vadd.xlane.f32.xlu1 %v5551_v38 }
 0xe8c   :  { %v5553_v55 = vpop.xlane.xlu1 %5552 }
 0xe8d   :  { %7121 = vlog2.f32 %v5553_v55 }
 0xe93   :  { %v7122_v27 = vpop.eup %7121 }
 0xe94   :  { %v5555_v26 = vmul.f32 0.6931472, %v7122_v27 }
 0xe96   :  { %v5556_v58 = vsub.f32 %v5548_v61, %v5555_v26 }
 0xe98   :  { %5557 = vst [vmem:[#allocation13] sm:$0x3] %v5556_v58 }
 0xe99   :  { %5568 = dma.vmem_to_hbm [thread:$0]  %s5564_s19, 32, %s5566_s2, [#allocation4]  }
 0xe9a   :  { %7301 = dma.done.wait [#allocation4], 32  }
 0xe9b   :  { %7302 = vsyncadd [#allocation4], 4294967264 }
 0xe9c   :  { %5573 = vsyncpa [#allocation3], 1 }
 0xe9d   :  { %5574 = vsyncpa [#allocation6], 1 }
 0xe9e   :  { %5575 = vsyncpa [#allocation9], 1 }
 0xe9f   :  { %5576 = vsyncpa [#allocation12], 1 }
 0xea0   :  { %5577 = vsyncpa [#allocation4], 1 }

</bundles_post_ra>
